<compile_context>
chip_gen: v7x
topology: tpu7x:2x2x1
jax: 0.10.0
libtpu: 0.0.40
codegen_flags: <defaults>
</compile_context>

<pallas_src>
import jax
import jax.numpy as jnp
from jax.experimental import pallas as pl
from jax.experimental.pallas import tpu as pltpu

_LANES = 128
_TM_MAX = 256          # output-row tile: feeds the 256-wide MXU on v6e/v7x
_FULL_K_MAX = 4096     # contraction depths below this run as a single full-K MXU dot
_IN_EPS = 1e-9         # matches the reference InstanceNormalization


def _round_up(v, m):
    return ((v + m - 1) // m) * m


def _pick_vmem_limit():
    # Generation-aware VMEM budget: ~75% of physical capacity, capped at 96 MiB.
    # v5e/v6e (128 MiB physical) -> 96 MiB; v7x (64 MiB physical) -> 48 MiB.
    cap = None
    try:
        cap = getattr(pltpu.get_tpu_info(), "vmem_capacity_bytes", None)
    except Exception:
        cap = None
    if not cap:
        cap = 64 * 1024 * 1024
    return int(min(int(cap) * 3 // 4, 96 * 1024 * 1024))


_VMEM_LIMIT = _pick_vmem_limit()

# Static architecture table: name -> (kernel_size, cin, cout, stride, upsample)
_CONV_GEOM = {
    "enconv1": (9, 3, 32, 1, 1),
    "enconv2": (3, 32, 64, 2, 1),
    "enconv3": (3, 64, 128, 2, 1),
    "deconv1": (3, 128, 64, 1, 2),
    "deconv2": (3, 64, 32, 1, 2),
    "deconv3": (9, 32, 3, 1, 1),
    "style":   (3, 128, 128, 1, 1),
}


# ----------------------------------------------------------------------------
# Pallas kernels
# ----------------------------------------------------------------------------
def _gemm_kernel(a_ref, b_ref, o_ref):
    # Full-K tile: one deep MXU dot, f32 accumulation inside the dot, cast on store.
    o_ref[...] = jnp.dot(a_ref[...], b_ref[...],
                         preferred_element_type=jnp.float32).astype(o_ref.dtype)


def _gemm_bias_kernel(a_ref, b_ref, bias_ref, o_ref):
    acc = jnp.dot(a_ref[...], b_ref[...], preferred_element_type=jnp.float32)
    o_ref[...] = (acc + bias_ref[...]).astype(o_ref.dtype)


def _gemm_kernel_ktiled(a_ref, b_ref, o_ref, acc_ref):
    # K-tiled fallback (K > _FULL_K_MAX): f32 accumulator resident across the K axis.
    @pl.when(pl.program_id(2) == 0)
    def _():
        acc_ref[...] = jnp.zeros_like(acc_ref)

    acc_ref[...] += jnp.dot(a_ref[...], b_ref[...], preferred_element_type=jnp.float32)

    @pl.when(pl.program_id(2) == pl.num_programs(2) - 1)
    def _():
        o_ref[...] = acc_ref[...].astype(o_ref.dtype)


def _gemm_bias_kernel_ktiled(a_ref, b_ref, bias_ref, o_ref, acc_ref):
    @pl.when(pl.program_id(2) == 0)
    def _():
        acc_ref[...] = jnp.zeros_like(acc_ref)

    acc_ref[...] += jnp.dot(a_ref[...], b_ref[...], preferred_element_type=jnp.float32)

    @pl.when(pl.program_id(2) == pl.num_programs(2) - 1)
    def _():
        o_ref[...] = (acc_ref[...] + bias_ref[...]).astype(o_ref.dtype)


def _style_gemm_kernel(sid_ref, a_ref, w_ref, b_ref, o_ref):
    # Per-sample filter/bias already selected by the scalar-prefetch index_maps; the
    # full-K weight block is resident across the m axis, so this is a plain GEMM + bias.
    del sid_ref  # consumed by the index_maps only
    acc = jnp.dot(a_ref[...], w_ref[...], preferred_element_type=jnp.float32)
    o_ref[...] = (acc + b_ref[...]).astype(o_ref.dtype)


# ----------------------------------------------------------------------------
# GEMM wrapper
# ----------------------------------------------------------------------------
def pallas_matmul(a, w, bias=None, *, out_dtype=jnp.bfloat16):
    """C = A @ W (+ bias).

    a:    (M, Kp) bf16 with Kp % 128 == 0 (K zero-padded at im2col time, no extra pad pass).
    w:    (Kp, Np) bf16, pre-padded/pre-cast once at init.
    bias: (1, Np) f32 or None.
    Returns (M, Np) in out_dtype (bf16 between layers, f32 only for the final conv)."""
    M, Kp = a.shape
    Kp2, Np = w.shape
    assert Kp == Kp2 and Kp % _LANES == 0 and Np % _LANES == 0

    # Adaptive row tile: as large as possible (<= 256), multiple of 8, no ragged-M pad
    # in the common case (keeps the parallel grid extent > 1 for v7x's 2 TensorCores
    # whenever M is large enough to matter).
    tm = min(_TM_MAX, _round_up(M, 8))
    Mp = _round_up(M, tm)
    if Mp != M:
        a = jnp.pad(a, ((0, Mp - M), (0, 0)))
    tn = 256 if Np % 256 == 0 else _LANES
    out_bytes = jnp.dtype(out_dtype).itemsize

    cost = pl.CostEstimate(
        flops=2 * Mp * Kp * Np,
        transcendentals=0,
        bytes_accessed=Mp * Kp * 2 + Kp * Np * 2 + Np * 4 + Mp * Np * out_bytes,
    )

    if Kp <= _FULL_K_MAX:
        grid = (Mp // tm, Np // tn)
        in_specs = [pl.BlockSpec((tm, Kp), lambda i, j: (i, 0)),
                    pl.BlockSpec((Kp, tn), lambda i, j: (0, j))]
        operands = [a, w]
        if bias is None:
            kernel = _gemm_kernel
        else:
            kernel = _gemm_bias_kernel
            in_specs.append(pl.BlockSpec((1, tn), lambda i, j: (0, j)))
            operands.append(bias)
        out = pl.pallas_call(
            kernel,
            out_shape=jax.ShapeDtypeStruct((Mp, Np), out_dtype),
            grid_spec=pltpu.PrefetchScalarGridSpec(
                num_scalar_prefetch=0,
                grid=grid,
                in_specs=in_specs,
                out_specs=pl.BlockSpec((tm, tn), lambda i, j: (i, j)),
            ),
            compiler_params=pltpu.CompilerParams(
                dimension_semantics=("parallel", "parallel"),
                vmem_limit_bytes=_VMEM_LIMIT,
            ),
            cost_estimate=cost,
        )(*operands)
    else:
        # K-tiled fallback (not hit by StyleBankNet shapes, kept for generality).
        tk = 512
        Kt = _round_up(Kp, tk)
        if Kt != Kp:
            a = jnp.pad(a, ((0, 0), (0, Kt - Kp)))
            w = jnp.pad(w, ((0, Kt - Kp), (0, 0)))
        grid = (Mp // tm, Np // tn, Kt // tk)
        in_specs = [pl.BlockSpec((tm, tk), lambda i, j, k: (i, k)),
                    pl.BlockSpec((tk, tn), lambda i, j, k: (k, j))]
        operands = [a, w]
        if bias is None:
            kernel = _gemm_kernel_ktiled
        else:
            kernel = _gemm_bias_kernel_ktiled
            in_specs.append(pl.BlockSpec((1, tn), lambda i, j, k: (0, j)))
            operands.append(bias)
        out = pl.pallas_call(
            kernel,
            out_shape=jax.ShapeDtypeStruct((Mp, Np), out_dtype),
            grid_spec=pltpu.PrefetchScalarGridSpec(
                num_scalar_prefetch=0,
                grid=grid,
                in_specs=in_specs,
                out_specs=pl.BlockSpec((tm, tn), lambda i, j, k: (i, j)),
                scratch_shapes=[pltpu.VMEM((tm, tn), jnp.float32)],
            ),
            compiler_params=pltpu.CompilerParams(
                dimension_semantics=("parallel", "parallel", "arbitrary"),
                vmem_limit_bytes=_VMEM_LIMIT,
            ),
            cost_estimate=cost,
        )(*operands)
    return out[:M]


# ----------------------------------------------------------------------------
# Fused InstanceNorm (eps=1e-9, biased variance) + ReLU, tiled over HW.
# ----------------------------------------------------------------------------
def _pick_hw_tile(hwp):
    for cand in (2048, 1024, 512, 256, 128, 64, 32, 16, 8):
        if hwp % cand == 0:
            return cand
    return hwp


def pallas_instnorm_relu(x_nhwc, scale, shift):
    """x: (N, H, W, Cp) bf16 with Cp % 128 == 0; scale/shift: (1, Cp) f32 (zero-padded).

    Pass 1 reduces HW tiles with a Chan/Welford-style merge (stable, bounded VMEM);
    pass 2 normalizes + ReLU and writes bf16.  Padded channels and padded HW rows stay
    exactly zero / are sliced off, preserving the zero-lane-padding invariant."""
    N, H, W, Cp = x_nhwc.shape
    HW = H * W
    HWp = _round_up(HW, 8)
    x = x_nhwc.reshape(N, HW, Cp)
    if HWp != HW:
        x = jnp.pad(x, ((0, 0), (0, HWp - HW), (0, 0)))
    cb = _LANES
    th = _pick_hw_tile(HWp)
    nt = HWp // th

    def stats_kernel(x_ref, mean_ref, rstd_ref, cnt_sc, mean_sc, m2_sc):
        t = pl.program_id(2)
        xt = x_ref[...].astype(jnp.float32)                       # (th, cb)
        n_t = jnp.minimum(th, HW - t * th).astype(jnp.float32)    # valid rows this tile
        s = jnp.sum(xt, axis=0, keepdims=True)                    # zero-padded rows are 0
        ss = jnp.sum(xt * xt, axis=0, keepdims=True)
        m_t = s / n_t
        m2_t = jnp.maximum(ss - n_t * m_t * m_t, 0.0)

        @pl.when(t == 0)
        def _():
            cnt_sc[...] = jnp.zeros_like(cnt_sc) + n_t
            mean_sc[...] = m_t
            m2_sc[...] = m2_t

        @pl.when(t > 0)
        def _():
            cnt = cnt_sc[...]
            delta = m_t - mean_sc[...]
            tot = cnt + n_t
            mean_sc[...] = mean_sc[...] + delta * (n_t / tot)
            m2_sc[...] = m2_sc[...] + m2_t + delta * delta * (cnt * n_t / tot)
            cnt_sc[...] = tot

        @pl.when(t == pl.num_programs(2) - 1)
        def _():
            var = m2_sc[...] / jnp.float32(HW)                    # biased variance
            mean_ref[...] = mean_sc[...]
            rstd_ref[...] = jax.lax.rsqrt(var + jnp.float32(_IN_EPS))

    mean, rstd = pl.pallas_call(
        stats_kernel,
        out_shape=(jax.ShapeDtypeStruct((N, 1, Cp), jnp.float32),
                   jax.ShapeDtypeStruct((N, 1, Cp), jnp.float32)),
        grid=(N, Cp // cb, nt),
        in_specs=[
            # None == squeezed leading dim: kernel sees (th, cb) directly.
            pl.BlockSpec((None, th, cb), lambda n, c, t: (n, t, c)),
        ],
        out_specs=(pl.BlockSpec((None, 1, cb), lambda n, c, t: (n, 0, c)),
                   pl.BlockSpec((None, 1, cb), lambda n, c, t: (n, 0, c))),
        scratch_shapes=[pltpu.VMEM((1, cb), jnp.float32)] * 3,
        compiler_params=pltpu.CompilerParams(
            dimension_semantics=("parallel", "parallel", "arbitrary"),
            vmem_limit_bytes=_VMEM_LIMIT,
        ),
        cost_estimate=pl.CostEstimate(
            flops=6 * N * HWp * Cp,
            transcendentals=N * Cp,
            bytes_accessed=N * HWp * Cp * 2 + 2 * N * Cp * 4,
        ),
    )(x)

    def norm_kernel(x_ref, mean_ref, rstd_ref, scale_ref, shift_ref, o_ref):
        xt = x_ref[...].astype(jnp.float32)
        y = (xt - mean_ref[...]) * (rstd_ref[...] * scale_ref[...]) + shift_ref[...]
        o_ref[...] = jnp.maximum(y, 0.0).astype(o_ref.dtype)

    out = pl.pallas_call(
        norm_kernel,
        out_shape=jax.ShapeDtypeStruct((N, HWp, Cp), jnp.bfloat16),
        grid=(N, Cp // cb, nt),
        in_specs=[
            pl.BlockSpec((None, th, cb), lambda n, c, t: (n, t, c)),
            pl.BlockSpec((None, 1, cb), lambda n, c, t: (n, 0, c)),
            pl.BlockSpec((None, 1, cb), lambda n, c, t: (n, 0, c)),
            pl.BlockSpec((1, cb), lambda n, c, t: (0, c)),
            pl.BlockSpec((1, cb), lambda n, c, t: (0, c)),
        ],
        out_specs=pl.BlockSpec((None, th, cb), lambda n, c, t: (n, t, c)),
        compiler_params=pltpu.CompilerParams(
            dimension_semantics=("parallel", "parallel", "parallel"),
            vmem_limit_bytes=_VMEM_LIMIT,
        ),
        cost_estimate=pl.CostEstimate(
            flops=5 * N * HWp * Cp,
            transcendentals=0,
            bytes_accessed=N * HWp * Cp * 4 + 2 * N * Cp * 4,
        ),
    )(x, mean, rstd, scale, shift)
    return out[:, :HW].reshape(N, H, W, Cp)


# ----------------------------------------------------------------------------
# Layers (data-movement glue in XLA, FLOPs in Pallas)
# ----------------------------------------------------------------------------
def _upsample_reflect_pad(x, pad, upsample):
    """Nearest `upsample`x upsample (broadcast+reshape, no gather) + ReflectionPad(pad)."""
    if upsample != 1:
        N, H, W, C = x.shape
        x = jnp.broadcast_to(x[:, :, None, :, None, :],
                             (N, H, upsample, W, upsample, C))
        x = x.reshape(N, H * upsample, W * upsample, C)
    if pad:
        x = jnp.pad(x, ((0, 0), (pad, pad), (pad, pad), (0, 0)), mode="reflect")
    return x


def _im2col(x_nhwc, ksize, cin, stride, upsample):
    """Returns (a, Ho, Wo) with a: (N, Ho*Wo, Kp) bf16, K = ksize*ksize*cin zero-padded to
    Kp (the zero chunk is appended inside the concatenate, so no extra pad pass over A)."""
    x = x_nhwc[..., :cin]           # drop lane-padding channels before expanding K
    pad = ksize // 2
    xp = _upsample_reflect_pad(x, pad, upsample)
    N, Hp, Wp, _ = xp.shape
    Ho = (Hp - ksize) // stride + 1
    Wo = (Wp - ksize) // stride + 1
    # TODO(synk): replace this HBM-materialized im2col with a streaming conv (manual DMA of
    # overlapping row tiles + in-kernel pl.ds tap loop) to avoid the ksize^2-expanded copy.
    cols = [
        xp[:, dh:dh + (Ho - 1) * stride + 1:stride,
               dw:dw + (Wo - 1) * stride + 1:stride, :]
        for dh in range(ksize) for dw in range(ksize)
    ]
    K = ksize * ksize * cin
    Kp = _round_up(K, _LANES)
    if Kp != K:
        cols.append(jnp.zeros((N, Ho, Wo, Kp - K), xp.dtype))
    a = jnp.concatenate(cols, axis=-1).reshape(N, Ho * Wo, Kp)
    return a, Ho, Wo


def conv_layer(x_nhwc, w2d, bias, name, *, out_dtype=jnp.bfloat16):
    """[optional nearest 2x upsample] + ReflectionPad(k//2) + Conv2d(stride) as im2col+GEMM.

    w2d: (Kp, 128) bf16 pre-padded; bias: (1, 128) f32 or None (dropped when a following
    InstanceNorm makes it a no-op).  Returns (N, Ho, Wo, 128); padded channels stay zero."""
    ksize, cin, cout, stride, upsample = _CONV_GEOM[name]
    del cout
    N = x_nhwc.shape[0]
    a, Ho, Wo = _im2col(x_nhwc, ksize, cin, stride, upsample)
    a = a.reshape(N * Ho * Wo, a.shape[-1])
    out = pallas_matmul(a, w2d, bias, out_dtype=out_dtype)
    return out.reshape(N, Ho, Wo, out.shape[-1])


def style_bank_conv(x_nhwc, style_w, style_b, sid):
    """Batched style-bank conv (3x3, stride 1, 128->128): one pallas_call; the per-sample
    filter/bias is selected through the scalar-prefetch style-id array, and the full-K
    weight block stays resident across the m axis (no redundant per-tile re-DMA)."""
    ksize, cin, cout, stride, upsample = _CONV_GEOM["style"]
    N = x_nhwc.shape[0]
    a, Ho, Wo = _im2col(x_nhwc, ksize, cin, stride, upsample)   # (N, Ho*Wo, Kp) bf16
    Kp = a.shape[-1]
    Mhw = Ho * Wo
    tm = min(_TM_MAX, _round_up(Mhw, 8))
    Mp = _round_up(Mhw, tm)
    if Mp != Mhw:
        a = jnp.pad(a, ((0, 0), (0, Mp - Mhw), (0, 0)))

    out = pl.pallas_call(
        _style_gemm_kernel,
        out_shape=jax.ShapeDtypeStruct((N, Mp, cout), jnp.bfloat16),
        grid_spec=pltpu.PrefetchScalarGridSpec(
            num_scalar_prefetch=1,
            grid=(N, Mp // tm),
            in_specs=[
                # None == squeezed leading dim; index_maps get the prefetch ref `s` last.
                pl.BlockSpec((None, tm, Kp), lambda n, m, s: (n, m, 0)),
                pl.BlockSpec((None, Kp, cout), lambda n, m, s: (s[n], 0, 0)),
                pl.BlockSpec((None, 1, cout), lambda n, m, s: (s[n], 0, 0)),
            ],
            out_specs=pl.BlockSpec((None, tm, cout), lambda n, m, s: (n, m, 0)),
        ),
        compiler_params=pltpu.CompilerParams(
            dimension_semantics=("parallel", "parallel"),
            vmem_limit_bytes=_VMEM_LIMIT,
        ),
        cost_estimate=pl.CostEstimate(
            flops=2 * N * Mp * Kp * cout,
            transcendentals=0,
            bytes_accessed=N * Mp * Kp * 2 + N * Kp * cout * 2 + N * Mp * cout * 2,
        ),
    )(sid, a, style_w, style_b)
    return out[:, :Mhw].reshape(N, Ho, Wo, cout)


# ----------------------------------------------------------------------------
# Parameter init (deterministic, synthetic — mirrors the PyTorch module layout).
# Weights are pre-cast to bf16 and pre-padded (K to 128-multiples, cout to 128 lanes) ONCE.
# ----------------------------------------------------------------------------
def _init_conv(key, ksize, cin, cout):
    kw_, kb = jax.random.split(key)
    fan_in = float(ksize * ksize * cin)
    w = jax.random.normal(kw_, (ksize, ksize, cin, cout), jnp.float32) / jnp.sqrt(fan_in)
    b = 0.01 * jax.random.normal(kb, (cout,), jnp.float32)
    return w, b


def _prep_conv(w, b, keep_bias):
    kh, kw, cin, cout = w.shape
    K = kh * kw * cin
    Kp = _round_up(K, _LANES)
    Np = _round_up(cout, _LANES)
    w2d = jnp.pad(w.reshape(K, cout).astype(jnp.bfloat16),
                  ((0, Kp - K), (0, Np - cout)))
    bias = None
    if keep_bias:
        bias = jnp.pad(b.astype(jnp.float32), (0, Np - cout)).reshape(1, Np)
    return w2d, bias


def _prep_in(key, c, cp=_LANES):
    scale = jax.random.uniform(key, (c,), jnp.float32)   # like torch .uniform_()
    shift = jnp.zeros((c,), jnp.float32)                 # like torch .zero_()
    # Zero-padded affine params keep the padded lanes exactly zero through IN+ReLU.
    scale_p = jnp.pad(scale, (0, cp - c)).reshape(1, cp)
    shift_p = jnp.pad(shift, (0, cp - c)).reshape(1, cp)
    return scale_p, shift_p


def init_stylebank_params(key, total_style):
    keys = jax.random.split(key, 12 + max(total_style, 1))
    params = {}

    def conv_in(name, kw_idx, kin_idx):
        ks, cin, cout, _, _ = _CONV_GEOM[name]
        w, b = _init_conv(keys[kw_idx], ks, cin, cout)
        # bias dropped: a per-channel constant is removed exactly by the IN mean subtraction
        w2d, _ = _prep_conv(w, b, keep_bias=False)
        sc, sh = _prep_in(keys[kin_idx], cout)
        params[name] = {"w": w2d, "in_scale": sc, "in_shift": sh}

    conv_in("enconv1", 0, 1)
    conv_in("enconv2", 2, 3)
    conv_in("enconv3", 4, 5)
    conv_in("deconv1", 6, 7)
    conv_in("deconv2", 8, 9)

    ks, cin, cout, _, _ = _CONV_GEOM["deconv3"]
    w, b = _init_conv(keys[10], ks, cin, cout)
    w2d, bias = _prep_conv(w, b, keep_bias=True)
    params["deconv3"] = {"w": w2d, "bias": bias}

    if total_style > 0:
        ks, cin, cout, _, _ = _CONV_GEOM["style"]
        ws, bs = [], []
        for i in range(total_style):
            w, b = _init_conv(keys[12 + i], ks, cin, cout)
            w2d, bias = _prep_conv(w, b, keep_bias=True)
            ws.append(w2d)
            bs.append(bias)
        params["style_w"] = jnp.stack(ws)   # (S, Kp, 128) bf16
        params["style_b"] = jnp.stack(bs)   # (S, 1, 128) f32
    return params


# ----------------------------------------------------------------------------
# StyleBankNet forward
# ----------------------------------------------------------------------------
@jax.jit
def _stylebank_core(params, x_nchw, sid):
    x = jnp.transpose(x_nchw, (0, 2, 3, 1)).astype(jnp.bfloat16)   # NCHW -> NHWC, bf16

    def conv_in_relu(h, name):
        layer = params[name]
        y = conv_layer(h, layer["w"], None, name)
        return pallas_instnorm_relu(y, layer["in_scale"], layer["in_shift"])

    out = conv_in_relu(x, "enconv1")
    out = conv_in_relu(out, "enconv2")
    out = conv_in_relu(out, "enconv3")

    if sid is not None:
        out = style_bank_conv(out, params["style_w"], params["style_b"], sid)

    out = conv_in_relu(out, "deconv1")   # nearest 2x upsample folded into the conv layer
    out = conv_in_relu(out, "deconv2")

    out = conv_layer(out, params["deconv3"]["w"], params["deconv3"]["bias"],
                     "deconv3", out_dtype=jnp.float32)
    out = out[..., :3]                                  # drop lane-padding channels
    return jnp.transpose(out, (0, 3, 1, 2))             # NHWC -> NCHW


def stylebank_forward(params, X_nchw, style_id=None):
    """X_nchw: (N, 3, H, W) float32 (or (3, H, W) with an int style_id, as in torch);
    style_id: None, int, or list of 1-indexed style ids."""
    in_X = X_nchw
    sid = None
    if style_id is not None:
        if isinstance(style_id, int):
            style_id = [style_id]
            if in_X.ndim == 3:          # mirror the torch unsqueeze(0) on a single image
                in_X = in_X[None]
        sid = jnp.asarray([int(s) - 1 for s in style_id], dtype=jnp.int32)
    return _stylebank_core(params, in_X, sid)


# ----------------------------------------------------------------------------
if __name__ == "__main__":
    key = jax.random.PRNGKey(0)
    k_par, k_x = jax.random.split(key)

    total_style = 2
    params = init_stylebank_params(k_par, total_style)

    # Small input: batch=2, 3 channels, 16x16 spatial (divisible by 4 so decoder matches).
    X = jax.random.normal(k_x, (2, 3, 16, 16), jnp.float32)

    y_styled = stylebank_forward(params, X, style_id=[1, 2])
    y_auto = stylebank_forward(params, X, style_id=None)   # plain encoder/decoder path

    jax.block_until_ready(y_styled)
    jax.block_until_ready(y_auto)

    assert y_styled.shape == (2, 3, 16, 16), y_styled.shape
    assert y_auto.shape == (2, 3, 16, 16), y_auto.shape
    assert bool(jnp.all(jnp.isfinite(y_styled))) and bool(jnp.all(jnp.isfinite(y_auto)))

    print("KERNEL_OK")
</pallas_src>

<mosaic_0001>
module attributes {stable_mosaic.version = 11 : i64} {
  func.func @_gemm_kernel(%arg0: i32, %arg1: i32, %arg2: memref<256x256xbf16, #tpu.memory_space<vmem>>, %arg3: memref<256x128xbf16, #tpu.memory_space<vmem>>, %arg4: memref<256x128xbf16, #tpu.memory_space<vmem>>) attributes {dimension_semantics = [#tpu.dimension_semantics<parallel>, #tpu.dimension_semantics<parallel>], iteration_bounds = array<i64: 2, 1>, scalar_prefetch = 0 : i64, scratch_operands = 0 : i64, tpu.core_type = #tpu.core_type<tc>, window_params = [{transform_indices = @transform_0, window_bounds = array<i64: 256, 256>}, {transform_indices = @transform_1, window_bounds = array<i64: 256, 128>}, {transform_indices = @transform_2, window_bounds = array<i64: 256, 128>}]} {
    %c0 = arith.constant 0 : index
    %c0_0 = arith.constant 0 : index
    %0 = vector.load %arg2[%c0, %c0_0] : memref<256x256xbf16, #tpu.memory_space<vmem>>, vector<256x256xbf16>
    %c0_1 = arith.constant 0 : index
    %c0_2 = arith.constant 0 : index
    %1 = vector.load %arg3[%c0_1, %c0_2] : memref<256x128xbf16, #tpu.memory_space<vmem>>, vector<256x128xbf16>
    %cst = arith.constant dense<0.000000e+00> : vector<256x128xf32>
    %2 = tpu.matmul %0, %1, %cst {dimension_numbers = #tpu.dot_dimension_numbers<[1], [0], [0], [1], [0, 0, 1, 1], [], []>} : vector<256x256xbf16>, vector<256x128xbf16>, vector<256x128xf32> -> vector<256x128xf32>
    %3 = arith.truncf %2 : vector<256x128xf32> to vector<256x128xbf16>
    %c0_3 = arith.constant 0 : index
    %c0_4 = arith.constant 0 : index
    %4 = vector.load %arg4[%c0_3, %c0_4] : memref<256x128xbf16, #tpu.memory_space<vmem>>, vector<256x128xbf16>
    tpu.vector_store %arg4[%c0_3, %c0_4], %3 {strides = array<i32>} : memref<256x128xbf16, #tpu.memory_space<vmem>>, vector<256x128xbf16>,
    return
  }
  func.func @transform_0(%arg0: i32, %arg1: i32) -> (i32, i32) {
    %c0_i32 = arith.constant 0 : i32
    %c0_i32_0 = arith.constant 0 : i32
    return %arg0, %c0_i32 : i32, i32
  }
  func.func @transform_1(%arg0: i32, %arg1: i32) -> (i32, i32) {
    %c0_i32 = arith.constant 0 : i32
    %c0_i32_0 = arith.constant 0 : i32
    return %c0_i32, %arg1 : i32, i32
  }
  func.func @transform_2(%arg0: i32, %arg1: i32) -> (i32, i32) {
    %c0_i32 = arith.constant 0 : i32
    return %arg0, %arg1 : i32, i32
  }
}

module attributes {stable_mosaic.version = 11 : i64} {
  func.func @stats_kernel(%arg0: i32, %arg1: i32, %arg2: i32, %arg3: memref<1x256x128xbf16, #tpu.memory_space<vmem>>, %arg4: memref<1x1x128xf32, #tpu.memory_space<vmem>>, %arg5: memref<1x1x128xf32, #tpu.memory_space<vmem>>, %arg6: memref<1x128xf32, #tpu.memory_space<vmem>>, %arg7: memref<1x128xf32, #tpu.memory_space<vmem>>, %arg8: memref<1x128xf32, #tpu.memory_space<vmem>>) attributes {dimension_semantics = [#tpu.dimension_semantics<parallel>, #tpu.dimension_semantics<parallel>, #tpu.dimension_semantics<arbitrary>], iteration_bounds = array<i64: 2, 1, 1>, scalar_prefetch = 0 : i64, scratch_operands = 3 : i64, tpu.core_type = #tpu.core_type<tc>, window_params = [{transform_indices = @transform_0, window_bounds = array<i64: 1, 256, 128>}, {transform_indices = @transform_1, window_bounds = array<i64: 1, 1, 128>}, {transform_indices = @transform_2, window_bounds = array<i64: 1, 1, 128>}]} {
    %c0 = arith.constant 0 : index
    %c0_0 = arith.constant 0 : index
    %c0_1 = arith.constant 0 : index
    %0 = vector.load %arg3[%c0, %c0_0, %c0_1] : memref<1x256x128xbf16, #tpu.memory_space<vmem>>, vector<1x256x128xbf16>
    %1 = vector.shape_cast %0 : vector<1x256x128xbf16> to vector<256x128xbf16>
    %2 = arith.extf %1 : vector<256x128xbf16> to vector<256x128xf32>
    %c256_i32 = arith.constant 256 : i32
    %3 = arith.muli %arg2, %c256_i32 : i32
    %c256_i32_2 = arith.constant 256 : i32
    %4 = arith.subi %c256_i32_2, %3 : i32
    %c256_i32_3 = arith.constant 256 : i32
    %5 = arith.minsi %c256_i32_3, %4 : i32
    %6 = arith.sitofp %5 : i32 to f32
    %cst = arith.constant dense<0.000000e+00> : vector<128xf32>
    %7 = vector.multi_reduction <add>, %2, %cst [0] : vector<256x128xf32> to vector<128xf32>
    %8 = vector.shape_cast %7 : vector<128xf32> to vector<1x128xf32>
    %9 = arith.mulf %2, %2 : vector<256x128xf32>
    %cst_4 = arith.constant dense<0.000000e+00> : vector<128xf32>
    %10 = vector.multi_reduction <add>, %9, %cst_4 [0] : vector<256x128xf32> to vector<128xf32>
    %11 = vector.shape_cast %10 : vector<128xf32> to vector<1x128xf32>
    %12 = vector.broadcast %6 : f32 to vector<1x128xf32>
    %13 = arith.divf %8, %12 : vector<1x128xf32>
    %14 = vector.broadcast %6 : f32 to vector<1x128xf32>
    %15 = arith.mulf %14, %13 : vector<1x128xf32>
    %16 = arith.mulf %15, %13 : vector<1x128xf32>
    %17 = arith.subf %11, %16 : vector<1x128xf32>
    %cst_5 = arith.constant 0.000000e+00 : f32
    %18 = vector.broadcast %cst_5 : f32 to vector<1x128xf32>
    %19 = arith.maximumf %17, %18 : vector<1x128xf32>
    %c0_i32 = arith.constant 0 : i32
    %20 = arith.cmpi eq, %arg2, %c0_i32 : i32
    %21 = arith.extui %20 : i1 to i32
    %c0_i32_6 = arith.constant 0 : i32
    %22 = arith.cmpi ne, %21, %c0_i32_6 : i32
    scf.if %22 {
      %cst_11 = arith.constant 0.000000e+00 : f32
      %29 = vector.broadcast %cst_11 : f32 to vector<1x128xf32>
      %30 = vector.broadcast %6 : f32 to vector<1x128xf32>
      %31 = arith.addf %29, %30 : vector<1x128xf32>
      %c0_12 = arith.constant 0 : index
      %c0_13 = arith.constant 0 : index
      %32 = vector.load %arg6[%c0_12, %c0_13] : memref<1x128xf32, #tpu.memory_space<vmem>>, vector<1x128xf32>
      tpu.vector_store %arg6[%c0_12, %c0_13], %31 {strides = array<i32>} : memref<1x128xf32, #tpu.memory_space<vmem>>, vector<1x128xf32>,
      %c0_14 = arith.constant 0 : index
      %c0_15 = arith.constant 0 : index
      %33 = vector.load %arg7[%c0_14, %c0_15] : memref<1x128xf32, #tpu.memory_space<vmem>>, vector<1x128xf32>
      tpu.vector_store %arg7[%c0_14, %c0_15], %13 {strides = array<i32>} : memref<1x128xf32, #tpu.memory_space<vmem>>, vector<1x128xf32>,
      %c0_16 = arith.constant 0 : index
      %c0_17 = arith.constant 0 : index
      %34 = vector.load %arg8[%c0_16, %c0_17] : memref<1x128xf32, #tpu.memory_space<vmem>>, vector<1x128xf32>
      tpu.vector_store %arg8[%c0_16, %c0_17], %19 {strides = array<i32>} : memref<1x128xf32, #tpu.memory_space<vmem>>, vector<1x128xf32>,
    } else {
    }
    %c0_i32_7 = arith.constant 0 : i32
    %23 = arith.cmpi sgt, %arg2, %c0_i32_7 : i32
    %24 = arith.extui %23 : i1 to i32
    %c0_i32_8 = arith.constant 0 : i32
    %25 = arith.cmpi ne, %24, %c0_i32_8 : i32
    scf.if %25 {
      %c0_11 = arith.constant 0 : index
      %c0_12 = arith.constant 0 : index
      %29 = vector.load %arg6[%c0_11, %c0_12] : memref<1x128xf32, #tpu.memory_space<vmem>>, vector<1x128xf32>
      %c0_13 = arith.constant 0 : index
      %c0_14 = arith.constant 0 : index
      %30 = vector.load %arg7[%c0_13, %c0_14] : memref<1x128xf32, #tpu.memory_space<vmem>>, vector<1x128xf32>
      %31 = arith.subf %13, %30 : vector<1x128xf32>
      %32 = vector.broadcast %6 : f32 to vector<1x128xf32>
      %33 = arith.addf %29, %32 : vector<1x128xf32>
      %c0_15 = arith.constant 0 : index
      %c0_16 = arith.constant 0 : index
      %34 = vector.load %arg7[%c0_15, %c0_16] : memref<1x128xf32, #tpu.memory_space<vmem>>, vector<1x128xf32>
      %35 = vector.broadcast %6 : f32 to vector<1x128xf32>
      %36 = arith.divf %35, %33 : vector<1x128xf32>
      %37 = arith.mulf %31, %36 : vector<1x128xf32>
      %38 = arith.addf %34, %37 : vector<1x128xf32>
      %c0_17 = arith.constant 0 : index
      %c0_18 = arith.constant 0 : index
      %39 = vector.load %arg7[%c0_17, %c0_18] : memref<1x128xf32, #tpu.memory_space<vmem>>, vector<1x128xf32>
      tpu.vector_store %arg7[%c0_17, %c0_18], %38 {strides = array<i32>} : memref<1x128xf32, #tpu.memory_space<vmem>>, vector<1x128xf32>,
      %c0_19 = arith.constant 0 : index
      %c0_20 = arith.constant 0 : index
      %40 = vector.load %arg8[%c0_19, %c0_20] : memref<1x128xf32, #tpu.memory_space<vmem>>, vector<1x128xf32>
      %41 = arith.addf %40, %19 : vector<1x128xf32>
      %42 = arith.mulf %31, %31 : vector<1x128xf32>
      %43 = vector.broadcast %6 : f32 to vector<1x128xf32>
      %44 = arith.mulf %29, %43 : vector<1x128xf32>
      %45 = arith.divf %44, %33 : vector<1x128xf32>
      %46 = arith.mulf %42, %45 : vector<1x128xf32>
      %47 = arith.addf %41, %46 : vector<1x128xf32>
      %c0_21 = arith.constant 0 : index
      %c0_22 = arith.constant 0 : index
      %48 = vector.load %arg8[%c0_21, %c0_22] : memref<1x128xf32, #tpu.memory_space<vmem>>, vector<1x128xf32>
      tpu.vector_store %arg8[%c0_21, %c0_22], %47 {strides = array<i32>} : memref<1x128xf32, #tpu.memory_space<vmem>>, vector<1x128xf32>,
      %c0_23 = arith.constant 0 : index
      %c0_24 = arith.constant 0 : index
      %49 = vector.load %arg6[%c0_23, %c0_24] : memref<1x128xf32, #tpu.memory_space<vmem>>, vector<1x128xf32>
      tpu.vector_store %arg6[%c0_23, %c0_24], %33 {strides = array<i32>} : memref<1x128xf32, #tpu.memory_space<vmem>>, vector<1x128xf32>,
    } else {
    }
    %c0_i32_9 = arith.constant 0 : i32
    %26 = arith.cmpi eq, %arg2, %c0_i32_9 : i32
    %27 = arith.extui %26 : i1 to i32
    %c0_i32_10 = arith.constant 0 : i32
    %28 = arith.cmpi ne, %27, %c0_i32_10 : i32
    scf.if %28 {
      %c0_11 = arith.constant 0 : index
      %c0_12 = arith.constant 0 : index
      %29 = vector.load %arg8[%c0_11, %c0_12] : memref<1x128xf32, #tpu.memory_space<vmem>>, vector<1x128xf32>
      %cst_13 = arith.constant 2.560000e+02 : f32
      %30 = vector.broadcast %cst_13 : f32 to vector<1x128xf32>
      %31 = arith.divf %29, %30 : vector<1x128xf32>
      %c0_14 = arith.constant 0 : index
      %c0_15 = arith.constant 0 : index
      %32 = vector.load %arg7[%c0_14, %c0_15] : memref<1x128xf32, #tpu.memory_space<vmem>>, vector<1x128xf32>
      %c0_16 = arith.constant 0 : index
      %c0_17 = arith.constant 0 : index
      %c0_18 = arith.constant 0 : index
      %33 = vector.load %arg4[%c0_16, %c0_17, %c0_18] : memref<1x1x128xf32, #tpu.memory_space<vmem>>, vector<1x1x128xf32>
      %34 = vector.shape_cast %33 : vector<1x1x128xf32> to vector<1x128xf32>
      %35 = vector.shape_cast %32 : vector<1x128xf32> to vector<1x1x128xf32>
      tpu.vector_store %arg4[%c0_16, %c0_17, %c0_18], %35 {strides = array<i32>} : memref<1x1x128xf32, #tpu.memory_space<vmem>>, vector<1x1x128xf32>,
      %cst_19 = arith.constant 9.99999971E-10 : f32
      %36 = vector.broadcast %cst_19 : f32 to vector<1x128xf32>
      %37 = arith.addf %31, %36 : vector<1x128xf32>
      %38 = math.rsqrt %37 : vector<1x128xf32>
      %c0_20 = arith.constant 0 : index
      %c0_21 = arith.constant 0 : index
      %c0_22 = arith.constant 0 : index
      %39 = vector.load %arg5[%c0_20, %c0_21, %c0_22] : memref<1x1x128xf32, #tpu.memory_space<vmem>>, vector<1x1x128xf32>
      %40 = vector.shape_cast %39 : vector<1x1x128xf32> to vector<1x128xf32>
      %41 = vector.shape_cast %38 : vector<1x128xf32> to vector<1x1x128xf32>
      tpu.vector_store %arg5[%c0_20, %c0_21, %c0_22], %41 {strides = array<i32>} : memref<1x1x128xf32, #tpu.memory_space<vmem>>, vector<1x1x128xf32>,
    } else {
    }
    return
  }
  func.func @transform_0(%arg0: i32, %arg1: i32, %arg2: i32) -> (i32, i32, i32) {
    %c0_i32 = arith.constant 0 : i32
    return %arg0, %arg2, %arg1 : i32, i32, i32
  }
  func.func @transform_1(%arg0: i32, %arg1: i32, %arg2: i32) -> (i32, i32, i32) {
    %c0_i32 = arith.constant 0 : i32
    %c0_i32_0 = arith.constant 0 : i32
    return %arg0, %c0_i32, %arg1 : i32, i32, i32
  }
  func.func @transform_2(%arg0: i32, %arg1: i32, %arg2: i32) -> (i32, i32, i32) {
    %c0_i32 = arith.constant 0 : i32
    %c0_i32_0 = arith.constant 0 : i32
    return %arg0, %c0_i32, %arg1 : i32, i32, i32
  }
}

module attributes {stable_mosaic.version = 11 : i64} {
  func.func @norm_kernel(%arg0: i32, %arg1: i32, %arg2: i32, %arg3: memref<1x256x128xbf16, #tpu.memory_space<vmem>>, %arg4: memref<1x1x128xf32, #tpu.memory_space<vmem>>, %arg5: memref<1x1x128xf32, #tpu.memory_space<vmem>>, %arg6: memref<1x128xf32, #tpu.memory_space<vmem>>, %arg7: memref<1x128xf32, #tpu.memory_space<vmem>>, %arg8: memref<1x256x128xbf16, #tpu.memory_space<vmem>>) attributes {dimension_semantics = [#tpu.dimension_semantics<parallel>, #tpu.dimension_semantics<parallel>, #tpu.dimension_semantics<parallel>], iteration_bounds = array<i64: 2, 1, 1>, scalar_prefetch = 0 : i64, scratch_operands = 0 : i64, tpu.core_type = #tpu.core_type<tc>, window_params = [{transform_indices = @transform_0, window_bounds = array<i64: 1, 256, 128>}, {transform_indices = @transform_1, window_bounds = array<i64: 1, 1, 128>}, {transform_indices = @transform_2, window_bounds = array<i64: 1, 1, 128>}, {transform_indices = @transform_3, window_bounds = array<i64: 1, 128>}, {transform_indices = @transform_4, window_bounds = array<i64: 1, 128>}, {transform_indices = @transform_5, window_bounds = array<i64: 1, 256, 128>}]} {
    %c0 = arith.constant 0 : index
    %c0_0 = arith.constant 0 : index
    %c0_1 = arith.constant 0 : index
    %0 = vector.load %arg3[%c0, %c0_0, %c0_1] : memref<1x256x128xbf16, #tpu.memory_space<vmem>>, vector<1x256x128xbf16>
    %1 = vector.shape_cast %0 : vector<1x256x128xbf16> to vector<256x128xbf16>
    %2 = arith.extf %1 : vector<256x128xbf16> to vector<256x128xf32>
    %c0_2 = arith.constant 0 : index
    %c0_3 = arith.constant 0 : index
    %c0_4 = arith.constant 0 : index
    %3 = vector.load %arg4[%c0_2, %c0_3, %c0_4] : memref<1x1x128xf32, #tpu.memory_space<vmem>>, vector<1x1x128xf32>
    %4 = vector.shape_cast %3 : vector<1x1x128xf32> to vector<1x128xf32>
    %5 = vector.broadcast %4 : vector<1x128xf32> to vector<256x128xf32>
    %6 = arith.subf %2, %5 : vector<256x128xf32>
    %c0_5 = arith.constant 0 : index
    %c0_6 = arith.constant 0 : index
    %c0_7 = arith.constant 0 : index
    %7 = vector.load %arg5[%c0_5, %c0_6, %c0_7] : memref<1x1x128xf32, #tpu.memory_space<vmem>>, vector<1x1x128xf32>
    %8 = vector.shape_cast %7 : vector<1x1x128xf32> to vector<1x128xf32>
    %c0_8 = arith.constant 0 : index
    %c0_9 = arith.constant 0 : index
    %9 = vector.load %arg6[%c0_8, %c0_9] : memref<1x128xf32, #tpu.memory_space<vmem>>, vector<1x128xf32>
    %10 = arith.mulf %8, %9 : vector<1x128xf32>
    %11 = vector.broadcast %10 : vector<1x128xf32> to vector<256x128xf32>
    %12 = arith.mulf %6, %11 : vector<256x128xf32>
    %c0_10 = arith.constant 0 : index
    %c0_11 = arith.constant 0 : index
    %13 = vector.load %arg7[%c0_10, %c0_11] : memref<1x128xf32, #tpu.memory_space<vmem>>, vector<1x128xf32>
    %14 = vector.broadcast %13 : vector<1x128xf32> to vector<256x128xf32>
    %15 = arith.addf %12, %14 : vector<256x128xf32>
    %cst = arith.constant 0.000000e+00 : f32
    %16 = vector.broadcast %cst : f32 to vector<256x128xf32>
    %17 = arith.maximumf %15, %16 : vector<256x128xf32>
    %18 = arith.truncf %17 : vector<256x128xf32> to vector<256x128xbf16>
    %c0_12 = arith.constant 0 : index
    %c0_13 = arith.constant 0 : index
    %c0_14 = arith.constant 0 : index
    %19 = vector.load %arg8[%c0_12, %c0_13, %c0_14] : memref<1x256x128xbf16, #tpu.memory_space<vmem>>, vector<1x256x128xbf16>
    %20 = vector.shape_cast %19 : vector<1x256x128xbf16> to vector<256x128xbf16>
    %21 = vector.shape_cast %18 : vector<256x128xbf16> to vector<1x256x128xbf16>
    tpu.vector_store %arg8[%c0_12, %c0_13, %c0_14], %21 {strides = array<i32>} : memref<1x256x128xbf16, #tpu.memory_space<vmem>>, vector<1x256x128xbf16>,
    return
  }
  func.func @transform_0(%arg0: i32, %arg1: i32, %arg2: i32) -> (i32, i32, i32) {
    %c0_i32 = arith.constant 0 : i32
    return %arg0, %arg2, %arg1 : i32, i32, i32
  }
  func.func @transform_1(%arg0: i32, %arg1: i32, %arg2: i32) -> (i32, i32, i32) {
    %c0_i32 = arith.constant 0 : i32
    %c0_i32_0 = arith.constant 0 : i32
    return %arg0, %c0_i32, %arg1 : i32, i32, i32
  }
  func.func @transform_2(%arg0: i32, %arg1: i32, %arg2: i32) -> (i32, i32, i32) {
    %c0_i32 = arith.constant 0 : i32
    %c0_i32_0 = arith.constant 0 : i32
    return %arg0, %c0_i32, %arg1 : i32, i32, i32
  }
  func.func @transform_3(%arg0: i32, %arg1: i32, %arg2: i32) -> (i32, i32) {
    %c0_i32 = arith.constant 0 : i32
    %c0_i32_0 = arith.constant 0 : i32
    return %c0_i32, %arg1 : i32, i32
  }
  func.func @transform_4(%arg0: i32, %arg1: i32, %arg2: i32) -> (i32, i32) {
    %c0_i32 = arith.constant 0 : i32
    %c0_i32_0 = arith.constant 0 : i32
    return %c0_i32, %arg1 : i32, i32
  }
  func.func @transform_5(%arg0: i32, %arg1: i32, %arg2: i32) -> (i32, i32, i32) {
    %c0_i32 = arith.constant 0 : i32
    return %arg0, %arg2, %arg1 : i32, i32, i32
  }
}

module attributes {stable_mosaic.version = 11 : i64} {
  func.func @_gemm_kernel(%arg0: i32, %arg1: i32, %arg2: memref<128x384xbf16, #tpu.memory_space<vmem>>, %arg3: memref<384x128xbf16, #tpu.memory_space<vmem>>, %arg4: memref<128x128xbf16, #tpu.memory_space<vmem>>) attributes {dimension_semantics = [#tpu.dimension_semantics<parallel>, #tpu.dimension_semantics<parallel>], iteration_bounds = array<i64: 1, 1>, scalar_prefetch = 0 : i64, scratch_operands = 0 : i64, tpu.core_type = #tpu.core_type<tc>, window_params = [{transform_indices = @transform_0, window_bounds = array<i64: 128, 384>}, {transform_indices = @transform_1, window_bounds = array<i64: 384, 128>}, {transform_indices = @transform_2, window_bounds = array<i64: 128, 128>}]} {
    %c0 = arith.constant 0 : index
    %c0_0 = arith.constant 0 : index
    %0 = vector.load %arg2[%c0, %c0_0] : memref<128x384xbf16, #tpu.memory_space<vmem>>, vector<128x384xbf16>
    %c0_1 = arith.constant 0 : index
    %c0_2 = arith.constant 0 : index
    %1 = vector.load %arg3[%c0_1, %c0_2] : memref<384x128xbf16, #tpu.memory_space<vmem>>, vector<384x128xbf16>
    %cst = arith.constant dense<0.000000e+00> : vector<128x128xf32>
    %2 = tpu.matmul %0, %1, %cst {dimension_numbers = #tpu.dot_dimension_numbers<[1], [0], [0], [1], [0, 0, 1, 1], [], []>} : vector<128x384xbf16>, vector<384x128xbf16>, vector<128x128xf32> -> vector<128x128xf32>
    %3 = arith.truncf %2 : vector<128x128xf32> to vector<128x128xbf16>
    %c0_3 = arith.constant 0 : index
    %c0_4 = arith.constant 0 : index
    %4 = vector.load %arg4[%c0_3, %c0_4] : memref<128x128xbf16, #tpu.memory_space<vmem>>, vector<128x128xbf16>
    tpu.vector_store %arg4[%c0_3, %c0_4], %3 {strides = array<i32>} : memref<128x128xbf16, #tpu.memory_space<vmem>>, vector<128x128xbf16>,
    return
  }
  func.func @transform_0(%arg0: i32, %arg1: i32) -> (i32, i32) {
    %c0_i32 = arith.constant 0 : i32
    %c0_i32_0 = arith.constant 0 : i32
    return %arg0, %c0_i32 : i32, i32
  }
  func.func @transform_1(%arg0: i32, %arg1: i32) -> (i32, i32) {
    %c0_i32 = arith.constant 0 : i32
    %c0_i32_0 = arith.constant 0 : i32
    return %c0_i32, %arg1 : i32, i32
  }
  func.func @transform_2(%arg0: i32, %arg1: i32) -> (i32, i32) {
    %c0_i32 = arith.constant 0 : i32
    return %arg0, %arg1 : i32, i32
  }
}

module attributes {stable_mosaic.version = 11 : i64} {
  func.func @stats_kernel(%arg0: i32, %arg1: i32, %arg2: i32, %arg3: memref<1x64x128xbf16, #tpu.memory_space<vmem>>, %arg4: memref<1x1x128xf32, #tpu.memory_space<vmem>>, %arg5: memref<1x1x128xf32, #tpu.memory_space<vmem>>, %arg6: memref<1x128xf32, #tpu.memory_space<vmem>>, %arg7: memref<1x128xf32, #tpu.memory_space<vmem>>, %arg8: memref<1x128xf32, #tpu.memory_space<vmem>>) attributes {dimension_semantics = [#tpu.dimension_semantics<parallel>, #tpu.dimension_semantics<parallel>, #tpu.dimension_semantics<arbitrary>], iteration_bounds = array<i64: 2, 1, 1>, scalar_prefetch = 0 : i64, scratch_operands = 3 : i64, tpu.core_type = #tpu.core_type<tc>, window_params = [{transform_indices = @transform_0, window_bounds = array<i64: 1, 64, 128>}, {transform_indices = @transform_1, window_bounds = array<i64: 1, 1, 128>}, {transform_indices = @transform_2, window_bounds = array<i64: 1, 1, 128>}]} {
    %c0 = arith.constant 0 : index
    %c0_0 = arith.constant 0 : index
    %c0_1 = arith.constant 0 : index
    %0 = vector.load %arg3[%c0, %c0_0, %c0_1] : memref<1x64x128xbf16, #tpu.memory_space<vmem>>, vector<1x64x128xbf16>
    %1 = vector.shape_cast %0 : vector<1x64x128xbf16> to vector<64x128xbf16>
    %2 = arith.extf %1 : vector<64x128xbf16> to vector<64x128xf32>
    %c64_i32 = arith.constant 64 : i32
    %3 = arith.muli %arg2, %c64_i32 : i32
    %c64_i32_2 = arith.constant 64 : i32
    %4 = arith.subi %c64_i32_2, %3 : i32
    %c64_i32_3 = arith.constant 64 : i32
    %5 = arith.minsi %c64_i32_3, %4 : i32
    %6 = arith.sitofp %5 : i32 to f32
    %cst = arith.constant dense<0.000000e+00> : vector<128xf32>
    %7 = vector.multi_reduction <add>, %2, %cst [0] : vector<64x128xf32> to vector<128xf32>
    %8 = vector.shape_cast %7 : vector<128xf32> to vector<1x128xf32>
    %9 = arith.mulf %2, %2 : vector<64x128xf32>
    %cst_4 = arith.constant dense<0.000000e+00> : vector<128xf32>
    %10 = vector.multi_reduction <add>, %9, %cst_4 [0] : vector<64x128xf32> to vector<128xf32>
    %11 = vector.shape_cast %10 : vector<128xf32> to vector<1x128xf32>
    %12 = vector.broadcast %6 : f32 to vector<1x128xf32>
    %13 = arith.divf %8, %12 : vector<1x128xf32>
    %14 = vector.broadcast %6 : f32 to vector<1x128xf32>
    %15 = arith.mulf %14, %13 : vector<1x128xf32>
    %16 = arith.mulf %15, %13 : vector<1x128xf32>
    %17 = arith.subf %11, %16 : vector<1x128xf32>
    %cst_5 = arith.constant 0.000000e+00 : f32
    %18 = vector.broadcast %cst_5 : f32 to vector<1x128xf32>
    %19 = arith.maximumf %17, %18 : vector<1x128xf32>
    %c0_i32 = arith.constant 0 : i32
    %20 = arith.cmpi eq, %arg2, %c0_i32 : i32
    %21 = arith.extui %20 : i1 to i32
    %c0_i32_6 = arith.constant 0 : i32
    %22 = arith.cmpi ne, %21, %c0_i32_6 : i32
    scf.if %22 {
      %cst_11 = arith.constant 0.000000e+00 : f32
      %29 = vector.broadcast %cst_11 : f32 to vector<1x128xf32>
      %30 = vector.broadcast %6 : f32 to vector<1x128xf32>
      %31 = arith.addf %29, %30 : vector<1x128xf32>
      %c0_12 = arith.constant 0 : index
      %c0_13 = arith.constant 0 : index
      %32 = vector.load %arg6[%c0_12, %c0_13] : memref<1x128xf32, #tpu.memory_space<vmem>>, vector<1x128xf32>
      tpu.vector_store %arg6[%c0_12, %c0_13], %31 {strides = array<i32>} : memref<1x128xf32, #tpu.memory_space<vmem>>, vector<1x128xf32>,
      %c0_14 = arith.constant 0 : index
      %c0_15 = arith.constant 0 : index
      %33 = vector.load %arg7[%c0_14, %c0_15] : memref<1x128xf32, #tpu.memory_space<vmem>>, vector<1x128xf32>
      tpu.vector_store %arg7[%c0_14, %c0_15], %13 {strides = array<i32>} : memref<1x128xf32, #tpu.memory_space<vmem>>, vector<1x128xf32>,
      %c0_16 = arith.constant 0 : index
      %c0_17 = arith.constant 0 : index
      %34 = vector.load %arg8[%c0_16, %c0_17] : memref<1x128xf32, #tpu.memory_space<vmem>>, vector<1x128xf32>
      tpu.vector_store %arg8[%c0_16, %c0_17], %19 {strides = array<i32>} : memref<1x128xf32, #tpu.memory_space<vmem>>, vector<1x128xf32>,
    } else {
    }
    %c0_i32_7 = arith.constant 0 : i32
    %23 = arith.cmpi sgt, %arg2, %c0_i32_7 : i32
    %24 = arith.extui %23 : i1 to i32
    %c0_i32_8 = arith.constant 0 : i32
    %25 = arith.cmpi ne, %24, %c0_i32_8 : i32
    scf.if %25 {
      %c0_11 = arith.constant 0 : index
      %c0_12 = arith.constant 0 : index
      %29 = vector.load %arg6[%c0_11, %c0_12] : memref<1x128xf32, #tpu.memory_space<vmem>>, vector<1x128xf32>
      %c0_13 = arith.constant 0 : index
      %c0_14 = arith.constant 0 : index
      %30 = vector.load %arg7[%c0_13, %c0_14] : memref<1x128xf32, #tpu.memory_space<vmem>>, vector<1x128xf32>
      %31 = arith.subf %13, %30 : vector<1x128xf32>
      %32 = vector.broadcast %6 : f32 to vector<1x128xf32>
      %33 = arith.addf %29, %32 : vector<1x128xf32>
      %c0_15 = arith.constant 0 : index
      %c0_16 = arith.constant 0 : index
      %34 = vector.load %arg7[%c0_15, %c0_16] : memref<1x128xf32, #tpu.memory_space<vmem>>, vector<1x128xf32>
      %35 = vector.broadcast %6 : f32 to vector<1x128xf32>
      %36 = arith.divf %35, %33 : vector<1x128xf32>
      %37 = arith.mulf %31, %36 : vector<1x128xf32>
      %38 = arith.addf %34, %37 : vector<1x128xf32>
      %c0_17 = arith.constant 0 : index
      %c0_18 = arith.constant 0 : index
      %39 = vector.load %arg7[%c0_17, %c0_18] : memref<1x128xf32, #tpu.memory_space<vmem>>, vector<1x128xf32>
      tpu.vector_store %arg7[%c0_17, %c0_18], %38 {strides = array<i32>} : memref<1x128xf32, #tpu.memory_space<vmem>>, vector<1x128xf32>,
      %c0_19 = arith.constant 0 : index
      %c0_20 = arith.constant 0 : index
      %40 = vector.load %arg8[%c0_19, %c0_20] : memref<1x128xf32, #tpu.memory_space<vmem>>, vector<1x128xf32>
      %41 = arith.addf %40, %19 : vector<1x128xf32>
      %42 = arith.mulf %31, %31 : vector<1x128xf32>
      %43 = vector.broadcast %6 : f32 to vector<1x128xf32>
      %44 = arith.mulf %29, %43 : vector<1x128xf32>
      %45 = arith.divf %44, %33 : vector<1x128xf32>
      %46 = arith.mulf %42, %45 : vector<1x128xf32>
      %47 = arith.addf %41, %46 : vector<1x128xf32>
      %c0_21 = arith.constant 0 : index
      %c0_22 = arith.constant 0 : index
      %48 = vector.load %arg8[%c0_21, %c0_22] : memref<1x128xf32, #tpu.memory_space<vmem>>, vector<1x128xf32>
      tpu.vector_store %arg8[%c0_21, %c0_22], %47 {strides = array<i32>} : memref<1x128xf32, #tpu.memory_space<vmem>>, vector<1x128xf32>,
      %c0_23 = arith.constant 0 : index
      %c0_24 = arith.constant 0 : index
      %49 = vector.load %arg6[%c0_23, %c0_24] : memref<1x128xf32, #tpu.memory_space<vmem>>, vector<1x128xf32>
      tpu.vector_store %arg6[%c0_23, %c0_24], %33 {strides = array<i32>} : memref<1x128xf32, #tpu.memory_space<vmem>>, vector<1x128xf32>,
    } else {
    }
    %c0_i32_9 = arith.constant 0 : i32
    %26 = arith.cmpi eq, %arg2, %c0_i32_9 : i32
    %27 = arith.extui %26 : i1 to i32
    %c0_i32_10 = arith.constant 0 : i32
    %28 = arith.cmpi ne, %27, %c0_i32_10 : i32
    scf.if %28 {
      %c0_11 = arith.constant 0 : index
      %c0_12 = arith.constant 0 : index
      %29 = vector.load %arg8[%c0_11, %c0_12] : memref<1x128xf32, #tpu.memory_space<vmem>>, vector<1x128xf32>
      %cst_13 = arith.constant 6.400000e+01 : f32
      %30 = vector.broadcast %cst_13 : f32 to vector<1x128xf32>
      %31 = arith.divf %29, %30 : vector<1x128xf32>
      %c0_14 = arith.constant 0 : index
      %c0_15 = arith.constant 0 : index
      %32 = vector.load %arg7[%c0_14, %c0_15] : memref<1x128xf32, #tpu.memory_space<vmem>>, vector<1x128xf32>
      %c0_16 = arith.constant 0 : index
      %c0_17 = arith.constant 0 : index
      %c0_18 = arith.constant 0 : index
      %33 = vector.load %arg4[%c0_16, %c0_17, %c0_18] : memref<1x1x128xf32, #tpu.memory_space<vmem>>, vector<1x1x128xf32>
      %34 = vector.shape_cast %33 : vector<1x1x128xf32> to vector<1x128xf32>
      %35 = vector.shape_cast %32 : vector<1x128xf32> to vector<1x1x128xf32>
      tpu.vector_store %arg4[%c0_16, %c0_17, %c0_18], %35 {strides = array<i32>} : memref<1x1x128xf32, #tpu.memory_space<vmem>>, vector<1x1x128xf32>,
      %cst_19 = arith.constant 9.99999971E-10 : f32
      %36 = vector.broadcast %cst_19 : f32 to vector<1x128xf32>
      %37 = arith.addf %31, %36 : vector<1x128xf32>
      %38 = math.rsqrt %37 : vector<1x128xf32>
      %c0_20 = arith.constant 0 : index
      %c0_21 = arith.constant 0 : index
      %c0_22 = arith.constant 0 : index
      %39 = vector.load %arg5[%c0_20, %c0_21, %c0_22] : memref<1x1x128xf32, #tpu.memory_space<vmem>>, vector<1x1x128xf32>
      %40 = vector.shape_cast %39 : vector<1x1x128xf32> to vector<1x128xf32>
      %41 = vector.shape_cast %38 : vector<1x128xf32> to vector<1x1x128xf32>
      tpu.vector_store %arg5[%c0_20, %c0_21, %c0_22], %41 {strides = array<i32>} : memref<1x1x128xf32, #tpu.memory_space<vmem>>, vector<1x1x128xf32>,
    } else {
    }
    return
  }
  func.func @transform_0(%arg0: i32, %arg1: i32, %arg2: i32) -> (i32, i32, i32) {
    %c0_i32 = arith.constant 0 : i32
    return %arg0, %arg2, %arg1 : i32, i32, i32
  }
  func.func @transform_1(%arg0: i32, %arg1: i32, %arg2: i32) -> (i32, i32, i32) {
    %c0_i32 = arith.constant 0 : i32
    %c0_i32_0 = arith.constant 0 : i32
    return %arg0, %c0_i32, %arg1 : i32, i32, i32
  }
  func.func @transform_2(%arg0: i32, %arg1: i32, %arg2: i32) -> (i32, i32, i32) {
    %c0_i32 = arith.constant 0 : i32
    %c0_i32_0 = arith.constant 0 : i32
    return %arg0, %c0_i32, %arg1 : i32, i32, i32
  }
}

module attributes {stable_mosaic.version = 11 : i64} {
  func.func @norm_kernel(%arg0: i32, %arg1: i32, %arg2: i32, %arg3: memref<1x64x128xbf16, #tpu.memory_space<vmem>>, %arg4: memref<1x1x128xf32, #tpu.memory_space<vmem>>, %arg5: memref<1x1x128xf32, #tpu.memory_space<vmem>>, %arg6: memref<1x128xf32, #tpu.memory_space<vmem>>, %arg7: memref<1x128xf32, #tpu.memory_space<vmem>>, %arg8: memref<1x64x128xbf16, #tpu.memory_space<vmem>>) attributes {dimension_semantics = [#tpu.dimension_semantics<parallel>, #tpu.dimension_semantics<parallel>, #tpu.dimension_semantics<parallel>], iteration_bounds = array<i64: 2, 1, 1>, scalar_prefetch = 0 : i64, scratch_operands = 0 : i64, tpu.core_type = #tpu.core_type<tc>, window_params = [{transform_indices = @transform_0, window_bounds = array<i64: 1, 64, 128>}, {transform_indices = @transform_1, window_bounds = array<i64: 1, 1, 128>}, {transform_indices = @transform_2, window_bounds = array<i64: 1, 1, 128>}, {transform_indices = @transform_3, window_bounds = array<i64: 1, 128>}, {transform_indices = @transform_4, window_bounds = array<i64: 1, 128>}, {transform_indices = @transform_5, window_bounds = array<i64: 1, 64, 128>}]} {
    %c0 = arith.constant 0 : index
    %c0_0 = arith.constant 0 : index
    %c0_1 = arith.constant 0 : index
    %0 = vector.load %arg3[%c0, %c0_0, %c0_1] : memref<1x64x128xbf16, #tpu.memory_space<vmem>>, vector<1x64x128xbf16>
    %1 = vector.shape_cast %0 : vector<1x64x128xbf16> to vector<64x128xbf16>
    %2 = arith.extf %1 : vector<64x128xbf16> to vector<64x128xf32>
    %c0_2 = arith.constant 0 : index
    %c0_3 = arith.constant 0 : index
    %c0_4 = arith.constant 0 : index
    %3 = vector.load %arg4[%c0_2, %c0_3, %c0_4] : memref<1x1x128xf32, #tpu.memory_space<vmem>>, vector<1x1x128xf32>
    %4 = vector.shape_cast %3 : vector<1x1x128xf32> to vector<1x128xf32>
    %5 = vector.broadcast %4 : vector<1x128xf32> to vector<64x128xf32>
    %6 = arith.subf %2, %5 : vector<64x128xf32>
    %c0_5 = arith.constant 0 : index
    %c0_6 = arith.constant 0 : index
    %c0_7 = arith.constant 0 : index
    %7 = vector.load %arg5[%c0_5, %c0_6, %c0_7] : memref<1x1x128xf32, #tpu.memory_space<vmem>>, vector<1x1x128xf32>
    %8 = vector.shape_cast %7 : vector<1x1x128xf32> to vector<1x128xf32>
    %c0_8 = arith.constant 0 : index
    %c0_9 = arith.constant 0 : index
    %9 = vector.load %arg6[%c0_8, %c0_9] : memref<1x128xf32, #tpu.memory_space<vmem>>, vector<1x128xf32>
    %10 = arith.mulf %8, %9 : vector<1x128xf32>
    %11 = vector.broadcast %10 : vector<1x128xf32> to vector<64x128xf32>
    %12 = arith.mulf %6, %11 : vector<64x128xf32>
    %c0_10 = arith.constant 0 : index
    %c0_11 = arith.constant 0 : index
    %13 = vector.load %arg7[%c0_10, %c0_11] : memref<1x128xf32, #tpu.memory_space<vmem>>, vector<1x128xf32>
    %14 = vector.broadcast %13 : vector<1x128xf32> to vector<64x128xf32>
    %15 = arith.addf %12, %14 : vector<64x128xf32>
    %cst = arith.constant 0.000000e+00 : f32
    %16 = vector.broadcast %cst : f32 to vector<64x128xf32>
    %17 = arith.maximumf %15, %16 : vector<64x128xf32>
    %18 = arith.truncf %17 : vector<64x128xf32> to vector<64x128xbf16>
    %c0_12 = arith.constant 0 : index
    %c0_13 = arith.constant 0 : index
    %c0_14 = arith.constant 0 : index
    %19 = vector.load %arg8[%c0_12, %c0_13, %c0_14] : memref<1x64x128xbf16, #tpu.memory_space<vmem>>, vector<1x64x128xbf16>
    %20 = vector.shape_cast %19 : vector<1x64x128xbf16> to vector<64x128xbf16>
    %21 = vector.shape_cast %18 : vector<64x128xbf16> to vector<1x64x128xbf16>
    tpu.vector_store %arg8[%c0_12, %c0_13, %c0_14], %21 {strides = array<i32>} : memref<1x64x128xbf16, #tpu.memory_space<vmem>>, vector<1x64x128xbf16>,
    return
  }
  func.func @transform_0(%arg0: i32, %arg1: i32, %arg2: i32) -> (i32, i32, i32) {
    %c0_i32 = arith.constant 0 : i32
    return %arg0, %arg2, %arg1 : i32, i32, i32
  }
  func.func @transform_1(%arg0: i32, %arg1: i32, %arg2: i32) -> (i32, i32, i32) {
    %c0_i32 = arith.constant 0 : i32
    %c0_i32_0 = arith.constant 0 : i32
    return %arg0, %c0_i32, %arg1 : i32, i32, i32
  }
  func.func @transform_2(%arg0: i32, %arg1: i32, %arg2: i32) -> (i32, i32, i32) {
    %c0_i32 = arith.constant 0 : i32
    %c0_i32_0 = arith.constant 0 : i32
    return %arg0, %c0_i32, %arg1 : i32, i32, i32
  }
  func.func @transform_3(%arg0: i32, %arg1: i32, %arg2: i32) -> (i32, i32) {
    %c0_i32 = arith.constant 0 : i32
    %c0_i32_0 = arith.constant 0 : i32
    return %c0_i32, %arg1 : i32, i32
  }
  func.func @transform_4(%arg0: i32, %arg1: i32, %arg2: i32) -> (i32, i32) {
    %c0_i32 = arith.constant 0 : i32
    %c0_i32_0 = arith.constant 0 : i32
    return %c0_i32, %arg1 : i32, i32
  }
  func.func @transform_5(%arg0: i32, %arg1: i32, %arg2: i32) -> (i32, i32, i32) {
    %c0_i32 = arith.constant 0 : i32
    return %arg0, %arg2, %arg1 : i32, i32, i32
  }
}

module attributes {stable_mosaic.version = 11 : i64} {
  func.func @_gemm_kernel(%arg0: i32, %arg1: i32, %arg2: memref<32x640xbf16, #tpu.memory_space<vmem>>, %arg3: memref<640x128xbf16, #tpu.memory_space<vmem>>, %arg4: memref<32x128xbf16, #tpu.memory_space<vmem>>) attributes {dimension_semantics = [#tpu.dimension_semantics<parallel>, #tpu.dimension_semantics<parallel>], iteration_bounds = array<i64: 1, 1>, scalar_prefetch = 0 : i64, scratch_operands = 0 : i64, tpu.core_type = #tpu.core_type<tc>, window_params = [{transform_indices = @transform_0, window_bounds = array<i64: 32, 640>}, {transform_indices = @transform_1, window_bounds = array<i64: 640, 128>}, {transform_indices = @transform_2, window_bounds = array<i64: 32, 128>}]} {
    %c0 = arith.constant 0 : index
    %c0_0 = arith.constant 0 : index
    %0 = vector.load %arg2[%c0, %c0_0] : memref<32x640xbf16, #tpu.memory_space<vmem>>, vector<32x640xbf16>
    %c0_1 = arith.constant 0 : index
    %c0_2 = arith.constant 0 : index
    %1 = vector.load %arg3[%c0_1, %c0_2] : memref<640x128xbf16, #tpu.memory_space<vmem>>, vector<640x128xbf16>
    %cst = arith.constant dense<0.000000e+00> : vector<32x128xf32>
    %2 = tpu.matmul %0, %1, %cst {dimension_numbers = #tpu.dot_dimension_numbers<[1], [0], [0], [1], [0, 0, 1, 1], [], []>} : vector<32x640xbf16>, vector<640x128xbf16>, vector<32x128xf32> -> vector<32x128xf32>
    %3 = arith.truncf %2 : vector<32x128xf32> to vector<32x128xbf16>
    %c0_3 = arith.constant 0 : index
    %c0_4 = arith.constant 0 : index
    %4 = vector.load %arg4[%c0_3, %c0_4] : memref<32x128xbf16, #tpu.memory_space<vmem>>, vector<32x128xbf16>
    tpu.vector_store %arg4[%c0_3, %c0_4], %3 {strides = array<i32>} : memref<32x128xbf16, #tpu.memory_space<vmem>>, vector<32x128xbf16>,
    return
  }
  func.func @transform_0(%arg0: i32, %arg1: i32) -> (i32, i32) {
    %c0_i32 = arith.constant 0 : i32
    %c0_i32_0 = arith.constant 0 : i32
    return %arg0, %c0_i32 : i32, i32
  }
  func.func @transform_1(%arg0: i32, %arg1: i32) -> (i32, i32) {
    %c0_i32 = arith.constant 0 : i32
    %c0_i32_0 = arith.constant 0 : i32
    return %c0_i32, %arg1 : i32, i32
  }
  func.func @transform_2(%arg0: i32, %arg1: i32) -> (i32, i32) {
    %c0_i32 = arith.constant 0 : i32
    return %arg0, %arg1 : i32, i32
  }
}

module attributes {stable_mosaic.version = 11 : i64} {
  func.func @stats_kernel(%arg0: i32, %arg1: i32, %arg2: i32, %arg3: memref<1x16x128xbf16, #tpu.memory_space<vmem>>, %arg4: memref<1x1x128xf32, #tpu.memory_space<vmem>>, %arg5: memref<1x1x128xf32, #tpu.memory_space<vmem>>, %arg6: memref<1x128xf32, #tpu.memory_space<vmem>>, %arg7: memref<1x128xf32, #tpu.memory_space<vmem>>, %arg8: memref<1x128xf32, #tpu.memory_space<vmem>>) attributes {dimension_semantics = [#tpu.dimension_semantics<parallel>, #tpu.dimension_semantics<parallel>, #tpu.dimension_semantics<arbitrary>], iteration_bounds = array<i64: 2, 1, 1>, scalar_prefetch = 0 : i64, scratch_operands = 3 : i64, tpu.core_type = #tpu.core_type<tc>, window_params = [{transform_indices = @transform_0, window_bounds = array<i64: 1, 16, 128>}, {transform_indices = @transform_1, window_bounds = array<i64: 1, 1, 128>}, {transform_indices = @transform_2, window_bounds = array<i64: 1, 1, 128>}]} {
    %c0 = arith.constant 0 : index
    %c0_0 = arith.constant 0 : index
    %c0_1 = arith.constant 0 : index
    %0 = vector.load %arg3[%c0, %c0_0, %c0_1] : memref<1x16x128xbf16, #tpu.memory_space<vmem>>, vector<1x16x128xbf16>
    %1 = vector.shape_cast %0 : vector<1x16x128xbf16> to vector<16x128xbf16>
    %2 = arith.extf %1 : vector<16x128xbf16> to vector<16x128xf32>
    %c16_i32 = arith.constant 16 : i32
    %3 = arith.muli %arg2, %c16_i32 : i32
    %c16_i32_2 = arith.constant 16 : i32
    %4 = arith.subi %c16_i32_2, %3 : i32
    %c16_i32_3 = arith.constant 16 : i32
    %5 = arith.minsi %c16_i32_3, %4 : i32
    %6 = arith.sitofp %5 : i32 to f32
    %cst = arith.constant dense<0.000000e+00> : vector<128xf32>
    %7 = vector.multi_reduction <add>, %2, %cst [0] : vector<16x128xf32> to vector<128xf32>
    %8 = vector.shape_cast %7 : vector<128xf32> to vector<1x128xf32>
    %9 = arith.mulf %2, %2 : vector<16x128xf32>
    %cst_4 = arith.constant dense<0.000000e+00> : vector<128xf32>
    %10 = vector.multi_reduction <add>, %9, %cst_4 [0] : vector<16x128xf32> to vector<128xf32>
    %11 = vector.shape_cast %10 : vector<128xf32> to vector<1x128xf32>
    %12 = vector.broadcast %6 : f32 to vector<1x128xf32>
    %13 = arith.divf %8, %12 : vector<1x128xf32>
    %14 = vector.broadcast %6 : f32 to vector<1x128xf32>
    %15 = arith.mulf %14, %13 : vector<1x128xf32>
    %16 = arith.mulf %15, %13 : vector<1x128xf32>
    %17 = arith.subf %11, %16 : vector<1x128xf32>
    %cst_5 = arith.constant 0.000000e+00 : f32
    %18 = vector.broadcast %cst_5 : f32 to vector<1x128xf32>
    %19 = arith.maximumf %17, %18 : vector<1x128xf32>
    %c0_i32 = arith.constant 0 : i32
    %20 = arith.cmpi eq, %arg2, %c0_i32 : i32
    %21 = arith.extui %20 : i1 to i32
    %c0_i32_6 = arith.constant 0 : i32
    %22 = arith.cmpi ne, %21, %c0_i32_6 : i32
    scf.if %22 {
      %cst_11 = arith.constant 0.000000e+00 : f32
      %29 = vector.broadcast %cst_11 : f32 to vector<1x128xf32>
      %30 = vector.broadcast %6 : f32 to vector<1x128xf32>
      %31 = arith.addf %29, %30 : vector<1x128xf32>
      %c0_12 = arith.constant 0 : index
      %c0_13 = arith.constant 0 : index
      %32 = vector.load %arg6[%c0_12, %c0_13] : memref<1x128xf32, #tpu.memory_space<vmem>>, vector<1x128xf32>
      tpu.vector_store %arg6[%c0_12, %c0_13], %31 {strides = array<i32>} : memref<1x128xf32, #tpu.memory_space<vmem>>, vector<1x128xf32>,
      %c0_14 = arith.constant 0 : index
      %c0_15 = arith.constant 0 : index
      %33 = vector.load %arg7[%c0_14, %c0_15] : memref<1x128xf32, #tpu.memory_space<vmem>>, vector<1x128xf32>
      tpu.vector_store %arg7[%c0_14, %c0_15], %13 {strides = array<i32>} : memref<1x128xf32, #tpu.memory_space<vmem>>, vector<1x128xf32>,
      %c0_16 = arith.constant 0 : index
      %c0_17 = arith.constant 0 : index
      %34 = vector.load %arg8[%c0_16, %c0_17] : memref<1x128xf32, #tpu.memory_space<vmem>>, vector<1x128xf32>
      tpu.vector_store %arg8[%c0_16, %c0_17], %19 {strides = array<i32>} : memref<1x128xf32, #tpu.memory_space<vmem>>, vector<1x128xf32>,
    } else {
    }
    %c0_i32_7 = arith.constant 0 : i32
    %23 = arith.cmpi sgt, %arg2, %c0_i32_7 : i32
    %24 = arith.extui %23 : i1 to i32
    %c0_i32_8 = arith.constant 0 : i32
    %25 = arith.cmpi ne, %24, %c0_i32_8 : i32
    scf.if %25 {
      %c0_11 = arith.constant 0 : index
      %c0_12 = arith.constant 0 : index
      %29 = vector.load %arg6[%c0_11, %c0_12] : memref<1x128xf32, #tpu.memory_space<vmem>>, vector<1x128xf32>
      %c0_13 = arith.constant 0 : index
      %c0_14 = arith.constant 0 : index
      %30 = vector.load %arg7[%c0_13, %c0_14] : memref<1x128xf32, #tpu.memory_space<vmem>>, vector<1x128xf32>
      %31 = arith.subf %13, %30 : vector<1x128xf32>
      %32 = vector.broadcast %6 : f32 to vector<1x128xf32>
      %33 = arith.addf %29, %32 : vector<1x128xf32>
      %c0_15 = arith.constant 0 : index
      %c0_16 = arith.constant 0 : index
      %34 = vector.load %arg7[%c0_15, %c0_16] : memref<1x128xf32, #tpu.memory_space<vmem>>, vector<1x128xf32>
      %35 = vector.broadcast %6 : f32 to vector<1x128xf32>
      %36 = arith.divf %35, %33 : vector<1x128xf32>
      %37 = arith.mulf %31, %36 : vector<1x128xf32>
      %38 = arith.addf %34, %37 : vector<1x128xf32>
      %c0_17 = arith.constant 0 : index
      %c0_18 = arith.constant 0 : index
      %39 = vector.load %arg7[%c0_17, %c0_18] : memref<1x128xf32, #tpu.memory_space<vmem>>, vector<1x128xf32>
      tpu.vector_store %arg7[%c0_17, %c0_18], %38 {strides = array<i32>} : memref<1x128xf32, #tpu.memory_space<vmem>>, vector<1x128xf32>,
      %c0_19 = arith.constant 0 : index
      %c0_20 = arith.constant 0 : index
      %40 = vector.load %arg8[%c0_19, %c0_20] : memref<1x128xf32, #tpu.memory_space<vmem>>, vector<1x128xf32>
      %41 = arith.addf %40, %19 : vector<1x128xf32>
      %42 = arith.mulf %31, %31 : vector<1x128xf32>
      %43 = vector.broadcast %6 : f32 to vector<1x128xf32>
      %44 = arith.mulf %29, %43 : vector<1x128xf32>
      %45 = arith.divf %44, %33 : vector<1x128xf32>
      %46 = arith.mulf %42, %45 : vector<1x128xf32>
      %47 = arith.addf %41, %46 : vector<1x128xf32>
      %c0_21 = arith.constant 0 : index
      %c0_22 = arith.constant 0 : index
      %48 = vector.load %arg8[%c0_21, %c0_22] : memref<1x128xf32, #tpu.memory_space<vmem>>, vector<1x128xf32>
      tpu.vector_store %arg8[%c0_21, %c0_22], %47 {strides = array<i32>} : memref<1x128xf32, #tpu.memory_space<vmem>>, vector<1x128xf32>,
      %c0_23 = arith.constant 0 : index
      %c0_24 = arith.constant 0 : index
      %49 = vector.load %arg6[%c0_23, %c0_24] : memref<1x128xf32, #tpu.memory_space<vmem>>, vector<1x128xf32>
      tpu.vector_store %arg6[%c0_23, %c0_24], %33 {strides = array<i32>} : memref<1x128xf32, #tpu.memory_space<vmem>>, vector<1x128xf32>,
    } else {
    }
    %c0_i32_9 = arith.constant 0 : i32
    %26 = arith.cmpi eq, %arg2, %c0_i32_9 : i32
    %27 = arith.extui %26 : i1 to i32
    %c0_i32_10 = arith.constant 0 : i32
    %28 = arith.cmpi ne, %27, %c0_i32_10 : i32
    scf.if %28 {
      %c0_11 = arith.constant 0 : index
      %c0_12 = arith.constant 0 : index
      %29 = vector.load %arg8[%c0_11, %c0_12] : memref<1x128xf32, #tpu.memory_space<vmem>>, vector<1x128xf32>
      %cst_13 = arith.constant 1.600000e+01 : f32
      %30 = vector.broadcast %cst_13 : f32 to vector<1x128xf32>
      %31 = arith.divf %29, %30 : vector<1x128xf32>
      %c0_14 = arith.constant 0 : index
      %c0_15 = arith.constant 0 : index
      %32 = vector.load %arg7[%c0_14, %c0_15] : memref<1x128xf32, #tpu.memory_space<vmem>>, vector<1x128xf32>
      %c0_16 = arith.constant 0 : index
      %c0_17 = arith.constant 0 : index
      %c0_18 = arith.constant 0 : index
      %33 = vector.load %arg4[%c0_16, %c0_17, %c0_18] : memref<1x1x128xf32, #tpu.memory_space<vmem>>, vector<1x1x128xf32>
      %34 = vector.shape_cast %33 : vector<1x1x128xf32> to vector<1x128xf32>
      %35 = vector.shape_cast %32 : vector<1x128xf32> to vector<1x1x128xf32>
      tpu.vector_store %arg4[%c0_16, %c0_17, %c0_18], %35 {strides = array<i32>} : memref<1x1x128xf32, #tpu.memory_space<vmem>>, vector<1x1x128xf32>,
      %cst_19 = arith.constant 9.99999971E-10 : f32
      %36 = vector.broadcast %cst_19 : f32 to vector<1x128xf32>
      %37 = arith.addf %31, %36 : vector<1x128xf32>
      %38 = math.rsqrt %37 : vector<1x128xf32>
      %c0_20 = arith.constant 0 : index
      %c0_21 = arith.constant 0 : index
      %c0_22 = arith.constant 0 : index
      %39 = vector.load %arg5[%c0_20, %c0_21, %c0_22] : memref<1x1x128xf32, #tpu.memory_space<vmem>>, vector<1x1x128xf32>
      %40 = vector.shape_cast %39 : vector<1x1x128xf32> to vector<1x128xf32>
      %41 = vector.shape_cast %38 : vector<1x128xf32> to vector<1x1x128xf32>
      tpu.vector_store %arg5[%c0_20, %c0_21, %c0_22], %41 {strides = array<i32>} : memref<1x1x128xf32, #tpu.memory_space<vmem>>, vector<1x1x128xf32>,
    } else {
    }
    return
  }
  func.func @transform_0(%arg0: i32, %arg1: i32, %arg2: i32) -> (i32, i32, i32) {
    %c0_i32 = arith.constant 0 : i32
    return %arg0, %arg2, %arg1 : i32, i32, i32
  }
  func.func @transform_1(%arg0: i32, %arg1: i32, %arg2: i32) -> (i32, i32, i32) {
    %c0_i32 = arith.constant 0 : i32
    %c0_i32_0 = arith.constant 0 : i32
    return %arg0, %c0_i32, %arg1 : i32, i32, i32
  }
  func.func @transform_2(%arg0: i32, %arg1: i32, %arg2: i32) -> (i32, i32, i32) {
    %c0_i32 = arith.constant 0 : i32
    %c0_i32_0 = arith.constant 0 : i32
    return %arg0, %c0_i32, %arg1 : i32, i32, i32
  }
}

module attributes {stable_mosaic.version = 11 : i64} {
  func.func @norm_kernel(%arg0: i32, %arg1: i32, %arg2: i32, %arg3: memref<1x16x128xbf16, #tpu.memory_space<vmem>>, %arg4: memref<1x1x128xf32, #tpu.memory_space<vmem>>, %arg5: memref<1x1x128xf32, #tpu.memory_space<vmem>>, %arg6: memref<1x128xf32, #tpu.memory_space<vmem>>, %arg7: memref<1x128xf32, #tpu.memory_space<vmem>>, %arg8: memref<1x16x128xbf16, #tpu.memory_space<vmem>>) attributes {dimension_semantics = [#tpu.dimension_semantics<parallel>, #tpu.dimension_semantics<parallel>, #tpu.dimension_semantics<parallel>], iteration_bounds = array<i64: 2, 1, 1>, scalar_prefetch = 0 : i64, scratch_operands = 0 : i64, tpu.core_type = #tpu.core_type<tc>, window_params = [{transform_indices = @transform_0, window_bounds = array<i64: 1, 16, 128>}, {transform_indices = @transform_1, window_bounds = array<i64: 1, 1, 128>}, {transform_indices = @transform_2, window_bounds = array<i64: 1, 1, 128>}, {transform_indices = @transform_3, window_bounds = array<i64: 1, 128>}, {transform_indices = @transform_4, window_bounds = array<i64: 1, 128>}, {transform_indices = @transform_5, window_bounds = array<i64: 1, 16, 128>}]} {
    %c0 = arith.constant 0 : index
    %c0_0 = arith.constant 0 : index
    %c0_1 = arith.constant 0 : index
    %0 = vector.load %arg3[%c0, %c0_0, %c0_1] : memref<1x16x128xbf16, #tpu.memory_space<vmem>>, vector<1x16x128xbf16>
    %1 = vector.shape_cast %0 : vector<1x16x128xbf16> to vector<16x128xbf16>
    %2 = arith.extf %1 : vector<16x128xbf16> to vector<16x128xf32>
    %c0_2 = arith.constant 0 : index
    %c0_3 = arith.constant 0 : index
    %c0_4 = arith.constant 0 : index
    %3 = vector.load %arg4[%c0_2, %c0_3, %c0_4] : memref<1x1x128xf32, #tpu.memory_space<vmem>>, vector<1x1x128xf32>
    %4 = vector.shape_cast %3 : vector<1x1x128xf32> to vector<1x128xf32>
    %5 = vector.broadcast %4 : vector<1x128xf32> to vector<16x128xf32>
    %6 = arith.subf %2, %5 : vector<16x128xf32>
    %c0_5 = arith.constant 0 : index
    %c0_6 = arith.constant 0 : index
    %c0_7 = arith.constant 0 : index
    %7 = vector.load %arg5[%c0_5, %c0_6, %c0_7] : memref<1x1x128xf32, #tpu.memory_space<vmem>>, vector<1x1x128xf32>
    %8 = vector.shape_cast %7 : vector<1x1x128xf32> to vector<1x128xf32>
    %c0_8 = arith.constant 0 : index
    %c0_9 = arith.constant 0 : index
    %9 = vector.load %arg6[%c0_8, %c0_9] : memref<1x128xf32, #tpu.memory_space<vmem>>, vector<1x128xf32>
    %10 = arith.mulf %8, %9 : vector<1x128xf32>
    %11 = vector.broadcast %10 : vector<1x128xf32> to vector<16x128xf32>
    %12 = arith.mulf %6, %11 : vector<16x128xf32>
    %c0_10 = arith.constant 0 : index
    %c0_11 = arith.constant 0 : index
    %13 = vector.load %arg7[%c0_10, %c0_11] : memref<1x128xf32, #tpu.memory_space<vmem>>, vector<1x128xf32>
    %14 = vector.broadcast %13 : vector<1x128xf32> to vector<16x128xf32>
    %15 = arith.addf %12, %14 : vector<16x128xf32>
    %cst = arith.constant 0.000000e+00 : f32
    %16 = vector.broadcast %cst : f32 to vector<16x128xf32>
    %17 = arith.maximumf %15, %16 : vector<16x128xf32>
    %18 = arith.truncf %17 : vector<16x128xf32> to vector<16x128xbf16>
    %c0_12 = arith.constant 0 : index
    %c0_13 = arith.constant 0 : index
    %c0_14 = arith.constant 0 : index
    %19 = vector.load %arg8[%c0_12, %c0_13, %c0_14] : memref<1x16x128xbf16, #tpu.memory_space<vmem>>, vector<1x16x128xbf16>
    %20 = vector.shape_cast %19 : vector<1x16x128xbf16> to vector<16x128xbf16>
    %21 = vector.shape_cast %18 : vector<16x128xbf16> to vector<1x16x128xbf16>
    tpu.vector_store %arg8[%c0_12, %c0_13, %c0_14], %21 {strides = array<i32>} : memref<1x16x128xbf16, #tpu.memory_space<vmem>>, vector<1x16x128xbf16>,
    return
  }
  func.func @transform_0(%arg0: i32, %arg1: i32, %arg2: i32) -> (i32, i32, i32) {
    %c0_i32 = arith.constant 0 : i32
    return %arg0, %arg2, %arg1 : i32, i32, i32
  }
  func.func @transform_1(%arg0: i32, %arg1: i32, %arg2: i32) -> (i32, i32, i32) {
    %c0_i32 = arith.constant 0 : i32
    %c0_i32_0 = arith.constant 0 : i32
    return %arg0, %c0_i32, %arg1 : i32, i32, i32
  }
  func.func @transform_2(%arg0: i32, %arg1: i32, %arg2: i32) -> (i32, i32, i32) {
    %c0_i32 = arith.constant 0 : i32
    %c0_i32_0 = arith.constant 0 : i32
    return %arg0, %c0_i32, %arg1 : i32, i32, i32
  }
  func.func @transform_3(%arg0: i32, %arg1: i32, %arg2: i32) -> (i32, i32) {
    %c0_i32 = arith.constant 0 : i32
    %c0_i32_0 = arith.constant 0 : i32
    return %c0_i32, %arg1 : i32, i32
  }
  func.func @transform_4(%arg0: i32, %arg1: i32, %arg2: i32) -> (i32, i32) {
    %c0_i32 = arith.constant 0 : i32
    %c0_i32_0 = arith.constant 0 : i32
    return %c0_i32, %arg1 : i32, i32
  }
  func.func @transform_5(%arg0: i32, %arg1: i32, %arg2: i32) -> (i32, i32, i32) {
    %c0_i32 = arith.constant 0 : i32
    return %arg0, %arg2, %arg1 : i32, i32, i32
  }
}

module attributes {stable_mosaic.version = 11 : i64} {
  func.func @_style_gemm_kernel(%arg0: i32, %arg1: i32, %arg2: memref<2xi32, #tpu.memory_space<smem>>, %arg3: memref<1x16x1152xbf16, #tpu.memory_space<vmem>>, %arg4: memref<1x1152x128xbf16, #tpu.memory_space<vmem>>, %arg5: memref<1x1x128xf32, #tpu.memory_space<vmem>>, %arg6: memref<1x16x128xbf16, #tpu.memory_space<vmem>>) attributes {dimension_semantics = [#tpu.dimension_semantics<parallel>, #tpu.dimension_semantics<parallel>], iteration_bounds = array<i64: 2, 1>, scalar_prefetch = 1 : i64, scratch_operands = 0 : i64, tpu.core_type = #tpu.core_type<tc>, window_params = [{transform_indices = @transform_0, window_bounds = array<i64: 1, 16, 1152>}, {transform_indices = @transform_1, window_bounds = array<i64: 1, 1152, 128>}, {transform_indices = @transform_2, window_bounds = array<i64: 1, 1, 128>}, {transform_indices = @transform_3, window_bounds = array<i64: 1, 16, 128>}]} {
    %c0 = arith.constant 0 : index
    %c0_0 = arith.constant 0 : index
    %c0_1 = arith.constant 0 : index
    %0 = vector.load %arg3[%c0, %c0_0, %c0_1] : memref<1x16x1152xbf16, #tpu.memory_space<vmem>>, vector<1x16x1152xbf16>
    %1 = vector.shape_cast %0 : vector<1x16x1152xbf16> to vector<16x1152xbf16>
    %c0_2 = arith.constant 0 : index
    %c0_3 = arith.constant 0 : index
    %c0_4 = arith.constant 0 : index
    %2 = vector.load %arg4[%c0_2, %c0_3, %c0_4] : memref<1x1152x128xbf16, #tpu.memory_space<vmem>>, vector<1x1152x128xbf16>
    %3 = vector.shape_cast %2 : vector<1x1152x128xbf16> to vector<1152x128xbf16>
    %cst = arith.constant dense<0.000000e+00> : vector<16x128xf32>
    %4 = tpu.matmul %1, %3, %cst {dimension_numbers = #tpu.dot_dimension_numbers<[1], [0], [0], [1], [0, 0, 1, 1], [], []>} : vector<16x1152xbf16>, vector<1152x128xbf16>, vector<16x128xf32> -> vector<16x128xf32>
    %c0_5 = arith.constant 0 : index
    %c0_6 = arith.constant 0 : index
    %c0_7 = arith.constant 0 : index
    %5 = vector.load %arg5[%c0_5, %c0_6, %c0_7] : memref<1x1x128xf32, #tpu.memory_space<vmem>>, vector<1x1x128xf32>
    %6 = vector.shape_cast %5 : vector<1x1x128xf32> to vector<1x128xf32>
    %7 = vector.broadcast %6 : vector<1x128xf32> to vector<16x128xf32>
    %8 = arith.addf %4, %7 : vector<16x128xf32>
    %9 = arith.truncf %8 : vector<16x128xf32> to vector<16x128xbf16>
    %c0_8 = arith.constant 0 : index
    %c0_9 = arith.constant 0 : index
    %c0_10 = arith.constant 0 : index
    %10 = vector.load %arg6[%c0_8, %c0_9, %c0_10] : memref<1x16x128xbf16, #tpu.memory_space<vmem>>, vector<1x16x128xbf16>
    %11 = vector.shape_cast %10 : vector<1x16x128xbf16> to vector<16x128xbf16>
    %12 = vector.shape_cast %9 : vector<16x128xbf16> to vector<1x16x128xbf16>
    tpu.vector_store %arg6[%c0_8, %c0_9, %c0_10], %12 {strides = array<i32>} : memref<1x16x128xbf16, #tpu.memory_space<vmem>>, vector<1x16x128xbf16>,
    return
  }
  func.func @transform_0(%arg0: i32, %arg1: i32, %arg2: memref<2xi32, #tpu.memory_space<smem>>) -> (i32, i32, i32) {
    %c0_i32 = arith.constant 0 : i32
    %c0_i32_0 = arith.constant 0 : i32
    return %arg0, %arg1, %c0_i32 : i32, i32, i32
  }
  func.func @transform_1(%arg0: i32, %arg1: i32, %arg2: memref<2xi32, #tpu.memory_space<smem>>) -> (i32, i32, i32) {
    %0 = arith.index_cast %arg0 : i32 to index
    %1 = memref.load %arg2[%0] : memref<2xi32, #tpu.memory_space<smem>>
    %c0_i32 = arith.constant 0 : i32
    %c0_i32_0 = arith.constant 0 : i32
    %c0_i32_1 = arith.constant 0 : i32
    return %1, %c0_i32, %c0_i32_0 : i32, i32, i32
  }
  func.func @transform_2(%arg0: i32, %arg1: i32, %arg2: memref<2xi32, #tpu.memory_space<smem>>) -> (i32, i32, i32) {
    %0 = arith.index_cast %arg0 : i32 to index
    %1 = memref.load %arg2[%0] : memref<2xi32, #tpu.memory_space<smem>>
    %c0_i32 = arith.constant 0 : i32
    %c0_i32_0 = arith.constant 0 : i32
    %c0_i32_1 = arith.constant 0 : i32
    return %1, %c0_i32, %c0_i32_0 : i32, i32, i32
  }
  func.func @transform_3(%arg0: i32, %arg1: i32, %arg2: memref<2xi32, #tpu.memory_space<smem>>) -> (i32, i32, i32) {
    %c0_i32 = arith.constant 0 : i32
    %c0_i32_0 = arith.constant 0 : i32
    return %arg0, %arg1, %c0_i32 : i32, i32, i32
  }
}

module attributes {stable_mosaic.version = 11 : i64} {
  func.func @_gemm_kernel(%arg0: i32, %arg1: i32, %arg2: memref<128x1152xbf16, #tpu.memory_space<vmem>>, %arg3: memref<1152x128xbf16, #tpu.memory_space<vmem>>, %arg4: memref<128x128xbf16, #tpu.memory_space<vmem>>) attributes {dimension_semantics = [#tpu.dimension_semantics<parallel>, #tpu.dimension_semantics<parallel>], iteration_bounds = array<i64: 1, 1>, scalar_prefetch = 0 : i64, scratch_operands = 0 : i64, tpu.core_type = #tpu.core_type<tc>, window_params = [{transform_indices = @transform_0, window_bounds = array<i64: 128, 1152>}, {transform_indices = @transform_1, window_bounds = array<i64: 1152, 128>}, {transform_indices = @transform_2, window_bounds = array<i64: 128, 128>}]} {
    %c0 = arith.constant 0 : index
    %c0_0 = arith.constant 0 : index
    %0 = vector.load %arg2[%c0, %c0_0] : memref<128x1152xbf16, #tpu.memory_space<vmem>>, vector<128x1152xbf16>
    %c0_1 = arith.constant 0 : index
    %c0_2 = arith.constant 0 : index
    %1 = vector.load %arg3[%c0_1, %c0_2] : memref<1152x128xbf16, #tpu.memory_space<vmem>>, vector<1152x128xbf16>
    %cst = arith.constant dense<0.000000e+00> : vector<128x128xf32>
    %2 = tpu.matmul %0, %1, %cst {dimension_numbers = #tpu.dot_dimension_numbers<[1], [0], [0], [1], [0, 0, 1, 1], [], []>} : vector<128x1152xbf16>, vector<1152x128xbf16>, vector<128x128xf32> -> vector<128x128xf32>
    %3 = arith.truncf %2 : vector<128x128xf32> to vector<128x128xbf16>
    %c0_3 = arith.constant 0 : index
    %c0_4 = arith.constant 0 : index
    %4 = vector.load %arg4[%c0_3, %c0_4] : memref<128x128xbf16, #tpu.memory_space<vmem>>, vector<128x128xbf16>
    tpu.vector_store %arg4[%c0_3, %c0_4], %3 {strides = array<i32>} : memref<128x128xbf16, #tpu.memory_space<vmem>>, vector<128x128xbf16>,
    return
  }
  func.func @transform_0(%arg0: i32, %arg1: i32) -> (i32, i32) {
    %c0_i32 = arith.constant 0 : i32
    %c0_i32_0 = arith.constant 0 : i32
    return %arg0, %c0_i32 : i32, i32
  }
  func.func @transform_1(%arg0: i32, %arg1: i32) -> (i32, i32) {
    %c0_i32 = arith.constant 0 : i32
    %c0_i32_0 = arith.constant 0 : i32
    return %c0_i32, %arg1 : i32, i32
  }
  func.func @transform_2(%arg0: i32, %arg1: i32) -> (i32, i32) {
    %c0_i32 = arith.constant 0 : i32
    return %arg0, %arg1 : i32, i32
  }
}

module attributes {stable_mosaic.version = 11 : i64} {
  func.func @_gemm_kernel(%arg0: i32, %arg1: i32, %arg2: memref<256x640xbf16, #tpu.memory_space<vmem>>, %arg3: memref<640x128xbf16, #tpu.memory_space<vmem>>, %arg4: memref<256x128xbf16, #tpu.memory_space<vmem>>) attributes {dimension_semantics = [#tpu.dimension_semantics<parallel>, #tpu.dimension_semantics<parallel>], iteration_bounds = array<i64: 2, 1>, scalar_prefetch = 0 : i64, scratch_operands = 0 : i64, tpu.core_type = #tpu.core_type<tc>, window_params = [{transform_indices = @transform_0, window_bounds = array<i64: 256, 640>}, {transform_indices = @transform_1, window_bounds = array<i64: 640, 128>}, {transform_indices = @transform_2, window_bounds = array<i64: 256, 128>}]} {
    %c0 = arith.constant 0 : index
    %c0_0 = arith.constant 0 : index
    %0 = vector.load %arg2[%c0, %c0_0] : memref<256x640xbf16, #tpu.memory_space<vmem>>, vector<256x640xbf16>
    %c0_1 = arith.constant 0 : index
    %c0_2 = arith.constant 0 : index
    %1 = vector.load %arg3[%c0_1, %c0_2] : memref<640x128xbf16, #tpu.memory_space<vmem>>, vector<640x128xbf16>
    %cst = arith.constant dense<0.000000e+00> : vector<256x128xf32>
    %2 = tpu.matmul %0, %1, %cst {dimension_numbers = #tpu.dot_dimension_numbers<[1], [0], [0], [1], [0, 0, 1, 1], [], []>} : vector<256x640xbf16>, vector<640x128xbf16>, vector<256x128xf32> -> vector<256x128xf32>
    %3 = arith.truncf %2 : vector<256x128xf32> to vector<256x128xbf16>
    %c0_3 = arith.constant 0 : index
    %c0_4 = arith.constant 0 : index
    %4 = vector.load %arg4[%c0_3, %c0_4] : memref<256x128xbf16, #tpu.memory_space<vmem>>, vector<256x128xbf16>
    tpu.vector_store %arg4[%c0_3, %c0_4], %3 {strides = array<i32>} : memref<256x128xbf16, #tpu.memory_space<vmem>>, vector<256x128xbf16>,
    return
  }
  func.func @transform_0(%arg0: i32, %arg1: i32) -> (i32, i32) {
    %c0_i32 = arith.constant 0 : i32
    %c0_i32_0 = arith.constant 0 : i32
    return %arg0, %c0_i32 : i32, i32
  }
  func.func @transform_1(%arg0: i32, %arg1: i32) -> (i32, i32) {
    %c0_i32 = arith.constant 0 : i32
    %c0_i32_0 = arith.constant 0 : i32
    return %c0_i32, %arg1 : i32, i32
  }
  func.func @transform_2(%arg0: i32, %arg1: i32) -> (i32, i32) {
    %c0_i32 = arith.constant 0 : i32
    return %arg0, %arg1 : i32, i32
  }
}

module attributes {stable_mosaic.version = 11 : i64} {
  func.func @_gemm_bias_kernel(%arg0: i32, %arg1: i32, %arg2: memref<256x2688xbf16, #tpu.memory_space<vmem>>, %arg3: memref<2688x128xbf16, #tpu.memory_space<vmem>>, %arg4: memref<1x128xf32, #tpu.memory_space<vmem>>, %arg5: memref<256x128xf32, #tpu.memory_space<vmem>>) attributes {dimension_semantics = [#tpu.dimension_semantics<parallel>, #tpu.dimension_semantics<parallel>], iteration_bounds = array<i64: 2, 1>, scalar_prefetch = 0 : i64, scratch_operands = 0 : i64, tpu.core_type = #tpu.core_type<tc>, window_params = [{transform_indices = @transform_0, window_bounds = array<i64: 256, 2688>}, {transform_indices = @transform_1, window_bounds = array<i64: 2688, 128>}, {transform_indices = @transform_2, window_bounds = array<i64: 1, 128>}, {transform_indices = @transform_3, window_bounds = array<i64: 256, 128>}]} {
    %c0 = arith.constant 0 : index
    %c0_0 = arith.constant 0 : index
    %0 = vector.load %arg2[%c0, %c0_0] : memref<256x2688xbf16, #tpu.memory_space<vmem>>, vector<256x2688xbf16>
    %c0_1 = arith.constant 0 : index
    %c0_2 = arith.constant 0 : index
    %1 = vector.load %arg3[%c0_1, %c0_2] : memref<2688x128xbf16, #tpu.memory_space<vmem>>, vector<2688x128xbf16>
    %cst = arith.constant dense<0.000000e+00> : vector<256x128xf32>
    %2 = tpu.matmul %0, %1, %cst {dimension_numbers = #tpu.dot_dimension_numbers<[1], [0], [0], [1], [0, 0, 1, 1], [], []>} : vector<256x2688xbf16>, vector<2688x128xbf16>, vector<256x128xf32> -> vector<256x128xf32>
    %c0_3 = arith.constant 0 : index
    %c0_4 = arith.constant 0 : index
    %3 = vector.load %arg4[%c0_3, %c0_4] : memref<1x128xf32, #tpu.memory_space<vmem>>, vector<1x128xf32>
    %4 = vector.broadcast %3 : vector<1x128xf32> to vector<256x128xf32>
    %5 = arith.addf %2, %4 : vector<256x128xf32>
    %c0_5 = arith.constant 0 : index
    %c0_6 = arith.constant 0 : index
    %6 = vector.load %arg5[%c0_5, %c0_6] : memref<256x128xf32, #tpu.memory_space<vmem>>, vector<256x128xf32>
    tpu.vector_store %arg5[%c0_5, %c0_6], %5 {strides = array<i32>} : memref<256x128xf32, #tpu.memory_space<vmem>>, vector<256x128xf32>,
    return
  }
  func.func @transform_0(%arg0: i32, %arg1: i32) -> (i32, i32) {
    %c0_i32 = arith.constant 0 : i32
    %c0_i32_0 = arith.constant 0 : i32
    return %arg0, %c0_i32 : i32, i32
  }
  func.func @transform_1(%arg0: i32, %arg1: i32) -> (i32, i32) {
    %c0_i32 = arith.constant 0 : i32
    %c0_i32_0 = arith.constant 0 : i32
    return %c0_i32, %arg1 : i32, i32
  }
  func.func @transform_2(%arg0: i32, %arg1: i32) -> (i32, i32) {
    %c0_i32 = arith.constant 0 : i32
    %c0_i32_0 = arith.constant 0 : i32
    return %c0_i32, %arg1 : i32, i32
  }
  func.func @transform_3(%arg0: i32, %arg1: i32) -> (i32, i32) {
    %c0_i32 = arith.constant 0 : i32
    return %arg0, %arg1 : i32, i32
  }
}

</mosaic_0001>

<bundles_post_ra>
// kernel: _stylebank_core.19
= control target key start
LH: loop header
LB: loop body
LE: loop exit
PB: predicated region body
PF: predicated region fallthrough
CT: control target
= control target key end

     0   :  { %s1227_s18 = smov 0   ;;  %s1229_s19 = smov 0   ;;  %s1419_s0 = inlined_call_operand.vmem [shape: bf16[2,256,128], index: 0, kind: input, shape index: {}]   ;;  %s1420_s1 = inlined_call_operand.vmem [shape: f32[2,1,128], index: 1, kind: input, shape index: {}]   ;;  %s1421_s2 = inlined_call_operand.vmem [shape: f32[2,1,128], index: 2, kind: input, shape index: {}]   ;;  %s1422_s3 = inlined_call_operand.vmem [shape: f32[1,128], index: 3, kind: input, shape index: {}]   ;;  %s1423_s4 = inlined_call_operand.vmem [shape: f32[1,128], index: 4, kind: input, shape index: {}]   ;;  %s1424_s5 = inlined_call_operand.vmem [shape: bf16[2,256,128], index: 5, kind: output, shape index: {}]  }
   0x1   :  { %s1231_s20 = smov 0  }
   0x2 LB: > { %s34_s21 = sadd.s32 1, %s1191_s19  ;;  %p900_p0 = scmp.ge.s32.totalorder %s1195_s20, 1  ;;  %s1195_s20 = sphi %s1231_s20, %s15_s20   ;;  %s1191_s19 = sphi %s1229_s19, %s1426_s19   ;;  %s1187_s18 = sphi %s1227_s18, %s1425_s18  }
   0x3   : > { %p36_p1 = scmp.ge.s32.totalorder %s34_s21, 2  ;;  %p264_p2 = scmp.lt.s32.totalorder %s1195_s20, 3 }
   0x5   : > { %s1428_s21 = smov (%p36_p1, %s34_s21), 0  ;;  %p265_p3 = pnand %p900_p0, %p264_p2 }
   0x6   : > { %p325_p4 = scmp.lt.s32.totalorder (!%p265_p3), %s1187_s18, 1  ;;  %v475_v0 = vlaneseq (!%p265_p3)  ;;  %v472_v2 = vld [vmem:[%s1422_s3] sm:$0x1] (!%p265_p3) }
   0x7   : > { %268 = sbr.rel (%p265_p3) target bundleno = 69 (0x45), region = 40  ;;  %v1280_v22 = vld [vmem:[%s1423_s4] ss:$0 sm:$0xff] (!%p265_p3) }
   0x8   : > { %v476_v1 = vshrl.u32 (!%p265_p3), %v475_v0, 7 }
   0xa   : > { %v477_v4 = vsub.s32 (!%p265_p3), 0, %v476_v1 }
   0xe   : > { %s1430_s18 = smov (!%p325_p4, %s1187_s18), 1 }
   0xf   : > { %s941_s22 = sshll.u32 %s1430_s18, 7  ;;  %s342_s25 = scalar_lea.vmem %s1420_s1, %s1430_s18 }
  0x10   : > { %s1260_s30 = scalar_lea.vmem %s1419_s0, %s941_s22  ;;  %s348_s8 = scalar_lea.vmem %s1421_s2, %s1430_s18  ;;  %v1266_v3 = vld [vmem:[%s342_s25] ss:$0 sm:$0xff] }
  0x11   : > { %v976_v5 = vld [vmem:[%s1260_s30] sm:$0xff]   ;;  %v1119_v7 = vld [vmem:[%s1260_s30 + $0x8] sm:$0xff]   ;;  %v1120_v12 = vld [vmem:[%s1260_s30 + $0x10] sm:$0xff]   ;;  %s1309_s13 = scalar_lea.vmem %s1424_s5, %s941_s22 }
  0x12   : > { %v471_v6 = vld [vmem:[%s348_s8] sm:$0x1]  ;;  %v977_v8 = vunpack.c.l.bf16 %v976_v5  ;;  %v978_v9 = vunpack.c.h.bf16 %v976_v5  ;;  %v981_v11 = vunpack.c.l.bf16 %v1119_v7  ;;  %v1121_v13 = vld [vmem:[%s1260_s30 + $0x18] sm:$0xff]   ;;  %v982_v14 = vunpack.c.h.bf16 %v1119_v7  ;;  %v1123_v48 = vld [vmem:[%s1260_s30 + $0x28] sm:$0xff]  }
  0x13   : > { %v473_v10 = vmul.f32 %v472_v2, %v471_v6  ;;  %v985_v15 = vunpack.c.l.bf16 %v1120_v12  ;;  %v986_v16 = vunpack.c.h.bf16 %v1120_v12  ;;  %v989_v17 = vunpack.c.l.bf16 %v1121_v13  ;;  %v1122_v43 = vld [vmem:[%s1260_s30 + $0x20] sm:$0xff]   ;;  %v1124_v53 = vld [vmem:[%s1260_s30 + $0x30] sm:$0xff]   ;;  %v1125_v58 = vld [vmem:[%s1260_s30 + $0x38] sm:$0xff]  }
  0x14   : > { %v439_v18 = vsub.f32 %v977_v8, %v1266_v3  ;;  %v440_v19 = vsub.f32 %v978_v9, %v1266_v3  ;;  %v441_v21 = vsub.f32 %v981_v11, %v1266_v3  ;;  %v442_v23 = vsub.f32 %v982_v14, %v1266_v3 }
  0x15   : > { %v1274_v20 = vrot.slane %v473_v10, %v477_v4  ;;  %v443_v24 = vsub.f32 %v985_v15, %v1266_v3  ;;  %v444_v25 = vsub.f32 %v986_v16, %v1266_v3  ;;  %v990_v26 = vunpack.c.h.bf16 %v1121_v13 }
  0x16   : > { %v445_v30 = vsub.f32 %v989_v17, %v1266_v3  ;;  %v993_v56 = vunpack.c.l.bf16 %v1122_v43  ;;  %v994_v57 = vunpack.c.h.bf16 %v1122_v43  ;;  %v997_v62 = vunpack.c.l.bf16 %v1123_v48 }
  0x17   : > { %v480_v27 = vmul.f32 %v1274_v20, %v439_v18  ;;  %v481_v28 = vmul.f32 %v1274_v20, %v440_v19  ;;  %v482_v29 = vmul.f32 %v1274_v20, %v441_v21  ;;  %v483_v31 = vmul.f32 %v1274_v20, %v442_v23 }
  0x18   : > { %v484_v32 = vmul.f32 %v1274_v20, %v443_v24  ;;  %v485_v33 = vmul.f32 %v1274_v20, %v444_v25  ;;  %v446_v34 = vsub.f32 %v990_v26, %v1266_v3  ;;  %v486_v38 = vmul.f32 %v1274_v20, %v445_v30  ;;  %v1126_v26 = vld [vmem:[%s1260_s30 + $0x40] sm:$0xff]  }
  0x19   : > { %v519_v35 = vadd.f32 %v1280_v22, %v480_v27  ;;  %v520_v36 = vadd.f32 %v1280_v22, %v481_v28  ;;  %v521_v37 = vadd.f32 %v1280_v22, %v482_v29  ;;  %v522_v39 = vadd.f32 %v1280_v22, %v483_v31 }
  0x1a   : > { %v523_v40 = vadd.f32 %v1280_v22, %v484_v32  ;;  %v524_v41 = vadd.f32 %v1280_v22, %v485_v33  ;;  %v487_v42 = vmul.f32 %v1274_v20, %v446_v34  ;;  %v525_v47 = vadd.f32 %v1280_v22, %v486_v38 }
  0x1b   : > { %v551_v44 = vmax.f32 %v519_v35, 0.0  ;;  %v552_v45 = vmax.f32 %v520_v36, 0.0  ;;  %v553_v46 = vmax.f32 %v521_v37, 0.0  ;;  %v554_v49 = vmax.f32 %v522_v39, 0.0  ;;  %v1127_v35 = vld [vmem:[%s1260_s30 + $0x48] sm:$0xff]  }
  0x1c   : > { %v555_v50 = vmax.f32 %v523_v40, 0.0  ;;  %v556_v51 = vmax.f32 %v524_v41, 0.0  ;;  %v526_v52 = vadd.f32 %v1280_v22, %v487_v42  ;;  %v557_v55 = vmax.f32 %v525_v47, 0.0  ;;  %v1128_v40 = vld [vmem:[%s1260_s30 + $0x50] sm:$0xff]  }
  0x1d   : > { %v1042_v54 = vpack.c.bf16 %v552_v45, %v551_v44  ;;  %v1047_v59 = vpack.c.bf16 %v554_v49, %v553_v46  ;;  %v447_v63 = vsub.f32 %v993_v56, %v1266_v3  ;;  %v448_v0 = vsub.f32 %v994_v57, %v1266_v3  ;;  %v1129_v49 = vld [vmem:[%s1260_s30 + $0x58] sm:$0xff]  }
  0x1e   : > { %v1052_v60 = vpack.c.bf16 %v556_v51, %v555_v50  ;;  %v558_v61 = vmax.f32 %v526_v52, 0.0  ;;  %v998_v1 = vunpack.c.h.bf16 %v1123_v48  ;;  %v1001_v2 = vunpack.c.l.bf16 %v1124_v53 }
  0x1f   : > { %1043 = vst [vmem:[%s1309_s13] sm:$0xff] %v1042_v54   ;;  %1134 = vst [vmem:[%s1309_s13 + $0x8] sm:$0xff] %v1047_v59   ;;  %v449_v5 = vsub.f32 %v997_v62, %v1266_v3  ;;  %v1002_v6 = vunpack.c.h.bf16 %v1124_v53  ;;  %v1005_v7 = vunpack.c.l.bf16 %v1125_v58  ;;  %v488_v8 = vmul.f32 %v1274_v20, %v447_v63 }
  0x20   : > { %1135 = vst [vmem:[%s1309_s13 + $0x10] sm:$0xff] %v1052_v60   ;;  %v1057_v4 = vpack.c.bf16 %v558_v61, %v557_v55  ;;  %v489_v9 = vmul.f32 %v1274_v20, %v448_v0  ;;  %v450_v10 = vsub.f32 %v998_v1, %v1266_v3  ;;  %v451_v11 = vsub.f32 %v1001_v2, %v1266_v3 }
  0x21   : > { %v490_v12 = vmul.f32 %v1274_v20, %v449_v5  ;;  %v452_v13 = vsub.f32 %v1002_v6, %v1266_v3  ;;  %v1006_v14 = vunpack.c.h.bf16 %v1125_v58  ;;  %v453_v15 = vsub.f32 %v1005_v7, %v1266_v3  ;;  %v1130_v7 = vld [vmem:[%s1260_s30 + $0x60] sm:$0xff]  }
  0x22   : > { %1136 = vst [vmem:[%s1309_s13 + $0x18] sm:$0xff] %v1057_v4   ;;  %v527_v16 = vadd.f32 %v1280_v22, %v488_v8  ;;  %v528_v17 = vadd.f32 %v1280_v22, %v489_v9  ;;  %v491_v18 = vmul.f32 %v1274_v20, %v450_v10  ;;  %v492_v19 = vmul.f32 %v1274_v20, %v451_v11 }
  0x23   : > { %v529_v21 = vadd.f32 %v1280_v22, %v490_v12  ;;  %v493_v23 = vmul.f32 %v1274_v20, %v452_v13  ;;  %v454_v24 = vsub.f32 %v1006_v14, %v1266_v3  ;;  %v494_v25 = vmul.f32 %v1274_v20, %v453_v15 }
  0x24   : > { %v559_v27 = vmax.f32 %v527_v16, 0.0  ;;  %v560_v28 = vmax.f32 %v528_v17, 0.0  ;;  %v530_v29 = vadd.f32 %v1280_v22, %v491_v18  ;;  %v531_v30 = vadd.f32 %v1280_v22, %v492_v19 }
  0x25   : > { %v561_v31 = vmax.f32 %v529_v21, 0.0  ;;  %v532_v32 = vadd.f32 %v1280_v22, %v493_v23  ;;  %v495_v33 = vmul.f32 %v1274_v20, %v454_v24  ;;  %v533_v34 = vadd.f32 %v1280_v22, %v494_v25  ;;  %v1131_v21 = vld [vmem:[%s1260_s30 + $0x68] sm:$0xff]  }
  0x26   : > { %v1062_v36 = vpack.c.bf16 %v560_v28, %v559_v27  ;;  %v562_v37 = vmax.f32 %v530_v29, 0.0  ;;  %v563_v38 = vmax.f32 %v531_v30, 0.0  ;;  %v1009_v39 = vunpack.c.l.bf16 %v1126_v26  ;;  %v1132_v27 = vld [vmem:[%s1260_s30 + $0x70] sm:$0xff]  }
  0x27   : > { %v564_v41 = vmax.f32 %v532_v32, 0.0  ;;  %v534_v42 = vadd.f32 %v1280_v22, %v495_v33  ;;  %v565_v43 = vmax.f32 %v533_v34, 0.0  ;;  %v1010_v44 = vunpack.c.h.bf16 %v1126_v26 }
  0x28   : > { %1137 = vst [vmem:[%s1309_s13 + $0x20] sm:$0xff] %v1062_v36   ;;  %v1067_v45 = vpack.c.bf16 %v562_v37, %v561_v31  ;;  %v455_v46 = vsub.f32 %v1009_v39, %v1266_v3  ;;  %v1013_v47 = vunpack.c.l.bf16 %v1127_v35  ;;  %v1014_v48 = vunpack.c.h.bf16 %v1127_v35  ;;  %v1133_v36 = vld [vmem:[%s1260_s30 + $0x78] sm:$0xff]  }
  0x29   : > { %v1072_v50 = vpack.c.bf16 %v564_v41, %v563_v38  ;;  %v566_v51 = vmax.f32 %v534_v42, 0.0  ;;  %v456_v52 = vsub.f32 %v1010_v44, %v1266_v3  ;;  %v1017_v53 = vunpack.c.l.bf16 %v1128_v40 }
  0x2a   : > { %1138 = vst [vmem:[%s1309_s13 + $0x28] sm:$0xff] %v1067_v45   ;;  %v496_v54 = vmul.f32 %v1274_v20, %v455_v46  ;;  %v457_v55 = vsub.f32 %v1013_v47, %v1266_v3  ;;  %v458_v56 = vsub.f32 %v1014_v48, %v1266_v3  ;;  %v1018_v57 = vunpack.c.h.bf16 %v1128_v40 }
  0x2b   : > { %1139 = vst [vmem:[%s1309_s13 + $0x30] sm:$0xff] %v1072_v50   ;;  %v1077_v58 = vpack.c.bf16 %v566_v51, %v565_v43  ;;  %v497_v59 = vmul.f32 %v1274_v20, %v456_v52  ;;  %v459_v60 = vsub.f32 %v1017_v53, %v1266_v3  ;;  %v1021_v61 = vunpack.c.l.bf16 %v1129_v49 }
  0x2c   : > { %v535_v62 = vadd.f32 %v1280_v22, %v496_v54  ;;  %v498_v63 = vmul.f32 %v1274_v20, %v457_v55  ;;  %v499_v0 = vmul.f32 %v1274_v20, %v458_v56  ;;  %v460_v1 = vsub.f32 %v1018_v57, %v1266_v3 }
  0x2d   : > { %1140 = vst [vmem:[%s1309_s13 + $0x38] sm:$0xff] %v1077_v58   ;;  %v536_v2 = vadd.f32 %v1280_v22, %v497_v59  ;;  %v500_v4 = vmul.f32 %v1274_v20, %v459_v60  ;;  %v1022_v5 = vunpack.c.h.bf16 %v1129_v49  ;;  %v461_v6 = vsub.f32 %v1021_v61, %v1266_v3 }
  0x2e   : > { %v567_v8 = vmax.f32 %v535_v62, 0.0  ;;  %v537_v9 = vadd.f32 %v1280_v22, %v498_v63  ;;  %v538_v10 = vadd.f32 %v1280_v22, %v499_v0  ;;  %v501_v11 = vmul.f32 %v1274_v20, %v460_v1 }
  0x2f   : > { %v568_v12 = vmax.f32 %v536_v2, 0.0  ;;  %v539_v13 = vadd.f32 %v1280_v22, %v500_v4  ;;  %v462_v14 = vsub.f32 %v1022_v5, %v1266_v3  ;;  %v502_v15 = vmul.f32 %v1274_v20, %v461_v6 }
  0x30   : > { %v569_v16 = vmax.f32 %v537_v9, 0.0  ;;  %v570_v17 = vmax.f32 %v538_v10, 0.0  ;;  %v540_v18 = vadd.f32 %v1280_v22, %v501_v11  ;;  %v1025_v19 = vunpack.c.l.bf16 %v1130_v7 }
  0x31   : > { %v1082_v23 = vpack.c.bf16 %v568_v12, %v567_v8  ;;  %v571_v24 = vmax.f32 %v539_v13, 0.0  ;;  %v503_v25 = vmul.f32 %v1274_v20, %v462_v14  ;;  %v541_v26 = vadd.f32 %v1280_v22, %v502_v15 }
  0x32   : > { %v1087_v28 = vpack.c.bf16 %v570_v17, %v569_v16  ;;  %v572_v29 = vmax.f32 %v540_v18, 0.0  ;;  %v1026_v30 = vunpack.c.h.bf16 %v1130_v7  ;;  %v463_v31 = vsub.f32 %v1025_v19, %v1266_v3 }
  0x33   : > { %1141 = vst [vmem:[%s1309_s13 + $0x40] sm:$0xff] %v1082_v23   ;;  %v542_v32 = vadd.f32 %v1280_v22, %v503_v25  ;;  %v573_v33 = vmax.f32 %v541_v26, 0.0  ;;  %v1029_v34 = vunpack.c.l.bf16 %v1131_v21  ;;  %v1030_v35 = vunpack.c.h.bf16 %v1131_v21 }
  0x34   : > { %1142 = vst [vmem:[%s1309_s13 + $0x48] sm:$0xff] %v1087_v28   ;;  %v1092_v37 = vpack.c.bf16 %v572_v29, %v571_v24  ;;  %v464_v38 = vsub.f32 %v1026_v30, %v1266_v3  ;;  %v504_v39 = vmul.f32 %v1274_v20, %v463_v31  ;;  %v1033_v40 = vunpack.c.l.bf16 %v1132_v27 }
  0x35   : > { %v574_v41 = vmax.f32 %v542_v32, 0.0  ;;  %v465_v42 = vsub.f32 %v1029_v34, %v1266_v3  ;;  %v466_v43 = vsub.f32 %v1030_v35, %v1266_v3  ;;  %v1034_v44 = vunpack.c.h.bf16 %v1132_v27 }
  0x36   : > { %1143 = vst [vmem:[%s1309_s13 + $0x50] sm:$0xff] %v1092_v37   ;;  %v505_v45 = vmul.f32 %v1274_v20, %v464_v38  ;;  %v543_v46 = vadd.f32 %v1280_v22, %v504_v39  ;;  %v467_v47 = vsub.f32 %v1033_v40, %v1266_v3  ;;  %v1037_v48 = vunpack.c.l.bf16 %v1133_v36 }
  0x37   : > { %v1097_v49 = vpack.c.bf16 %v574_v41, %v573_v33  ;;  %v506_v50 = vmul.f32 %v1274_v20, %v465_v42  ;;  %v507_v51 = vmul.f32 %v1274_v20, %v466_v43  ;;  %v468_v52 = vsub.f32 %v1034_v44, %v1266_v3 }
  0x38   : > { %v544_v53 = vadd.f32 %v1280_v22, %v505_v45  ;;  %v575_v54 = vmax.f32 %v543_v46, 0.0  ;;  %v508_v55 = vmul.f32 %v1274_v20, %v467_v47  ;;  %v1038_v56 = vunpack.c.h.bf16 %v1133_v36 }
  0x39   : > { %1144 = vst [vmem:[%s1309_s13 + $0x58] sm:$0xff] %v1097_v49   ;;  %v545_v57 = vadd.f32 %v1280_v22, %v506_v50  ;;  %v546_v58 = vadd.f32 %v1280_v22, %v507_v51  ;;  %v509_v59 = vmul.f32 %v1274_v20, %v468_v52  ;;  %v469_v60 = vsub.f32 %v1037_v48, %v1266_v3 }
  0x3a   : > { %v576_v61 = vmax.f32 %v544_v53, 0.0  ;;  %v547_v62 = vadd.f32 %v1280_v22, %v508_v55  ;;  %v470_v63 = vsub.f32 %v1038_v56, %v1266_v3 }
  0x3b   : > { %v577_v0 = vmax.f32 %v545_v57, 0.0  ;;  %v578_v1 = vmax.f32 %v546_v58, 0.0  ;;  %v548_v2 = vadd.f32 %v1280_v22, %v509_v59  ;;  %v510_v4 = vmul.f32 %v1274_v20, %v469_v60 }
  0x3c   : > { %v1102_v5 = vpack.c.bf16 %v576_v61, %v575_v54  ;;  %v579_v6 = vmax.f32 %v547_v62, 0.0  ;;  %v511_v7 = vmul.f32 %v1274_v20, %v470_v63 }
  0x3d   : > { %v1107_v8 = vpack.c.bf16 %v578_v1, %v577_v0  ;;  %v580_v9 = vmax.f32 %v548_v2, 0.0  ;;  %v549_v10 = vadd.f32 %v1280_v22, %v510_v4 }
  0x3e   : > { %1145 = vst [vmem:[%s1309_s13 + $0x60] sm:$0xff] %v1102_v5   ;;  %v550_v11 = vadd.f32 %v1280_v22, %v511_v7 }
  0x3f   : > { %1146 = vst [vmem:[%s1309_s13 + $0x68] sm:$0xff] %v1107_v8   ;;  %v1112_v3 = vpack.c.bf16 %v580_v9, %v579_v6  ;;  %v581_v12 = vmax.f32 %v549_v10, 0.0 }
  0x40   : > { %v582_v13 = vmax.f32 %v550_v11, 0.0 }
  0x41   : > { %1147 = vst [vmem:[%s1309_s13 + $0x70] sm:$0xff] %v1112_v3  }
  0x42   : > { %v1117_v14 = vpack.c.bf16 %v582_v13, %v581_v12 }
  0x44   : > { %1148 = vst [vmem:[%s1309_s13 + $0x78] sm:$0xff] %v1117_v14  }
  0x45 PF: > { %s15_s20 = sadd.s32 1, %s1195_s20   ;;  %s1425_s18 = smov %s1191_s19 }
  0x46   : > { %p12_p5 = scmp.ge.s32.totalorder %s15_s20, 4   ;;  %s1426_s19 = smov %s1428_s21 }
  0x48   :  { %14 = sbr.rel (!%p12_p5) target bundleno = 2 (0x2), region = 82 }

// kernel: _stylebank_core.18
= control target key start
LH: loop header
LB: loop body
LE: loop exit
PB: predicated region body
PF: predicated region fallthrough
CT: control target
= control target key end

     0   :  { %s701_s9 = smov 0   ;;  %s703_s10 = smov 0   ;;  %s760_s0 = inlined_call_operand.vmem [shape: bf16[2,256,128], index: 0, kind: input, shape index: {}]   ;;  %s761_s1 = inlined_call_operand.vmem [shape: f32[2,1,128], index: 1, kind: output, shape index: {0}]   ;;  %s762_s2 = inlined_call_operand.vmem [shape: f32[2,1,128], index: 2, kind: output, shape index: {1}]  }
   0x1   :  { %s705_s11 = smov 0  }
   0x2 LB: > { %s32_s12 = sadd.s32 1, %s680_s10  ;;  %p550_p0 = scmp.ge.s32.totalorder %s684_s11, 1  ;;  %s684_s11 = sphi %s705_s11, %s13_s11   ;;  %s680_s10 = sphi %s703_s10, %s764_s10   ;;  %s676_s9 = sphi %s701_s9, %s763_s9  }
   0x3   : > { %p34_p1 = scmp.ge.s32.totalorder %s32_s12, 2  ;;  %p150_p2 = scmp.lt.s32.totalorder %s684_s11, 3 }
   0x5   : > { %s766_s12 = smov (%p34_p1, %s32_s12), 0  ;;  %p151_p3 = pnand %p550_p0, %p150_p2 }
   0x6   : > { %p187_p4 = scmp.lt.s32.totalorder (!%p151_p3), %s676_s9, 1 }
   0x7   : > { %154 = sbr.rel (%p151_p3) target bundleno = 128 (0x80), region = 24 }
   0xe   : > { %s768_s9 = smov (!%p187_p4, %s676_s9), 1 }
   0xf   : > { %s555_s13 = sshll.u32 %s768_s9, 7  ;;  %s204_s19 = scalar_lea.vmem %s761_s1, %s768_s9 }
  0x10   : > { %s725_s16 = scalar_lea.vmem %s760_s0, %s555_s13  ;;  %s210_s22 = scalar_lea.vmem %s762_s2, %s768_s9 }
  0x11   : > { %v557_v0 = vld [vmem:[%s725_s16] sm:$0xff]   ;;  %v620_v1 = vld [vmem:[%s725_s16 + $0x8] sm:$0xff]   ;;  %v621_v5 = vld [vmem:[%s725_s16 + $0x10] sm:$0xff]  }
  0x12   : > { %v558_v2 = vunpack.c.l.bf16 %v557_v0  ;;  %v559_v3 = vunpack.c.h.bf16 %v557_v0  ;;  %v562_v4 = vunpack.c.l.bf16 %v620_v1  ;;  %v563_v6 = vunpack.c.h.bf16 %v620_v1  ;;  %v622_v10 = vld [vmem:[%s725_s16 + $0x18] sm:$0xff]   ;;  %v623_v17 = vld [vmem:[%s725_s16 + $0x20] sm:$0xff]   ;;  %v624_v25 = vld [vmem:[%s725_s16 + $0x28] sm:$0xff]  }
  0x13   : > { %v566_v8 = vunpack.c.l.bf16 %v621_v5  ;;  %v567_v11 = vunpack.c.h.bf16 %v621_v5  ;;  %v570_v15 = vunpack.c.l.bf16 %v622_v10  ;;  %v571_v19 = vunpack.c.h.bf16 %v622_v10  ;;  %v625_v34 = vld [vmem:[%s725_s16 + $0x30] sm:$0xff]   ;;  %v626_v43 = vld [vmem:[%s725_s16 + $0x38] sm:$0xff]   ;;  %v627_v52 = vld [vmem:[%s725_s16 + $0x40] sm:$0xff]  }
  0x14   : > { %v280_v7 = vadd.f32 %v559_v3, %v558_v2  ;;  %v317_v13 = vmul.f32 %v558_v2, %v558_v2  ;;  %v318_v14 = vmul.f32 %v559_v3, %v559_v3  ;;  %v319_v18 = vmul.f32 %v562_v4, %v562_v4  ;;  %v628_v61 = vld [vmem:[%s725_s16 + $0x48] sm:$0xff]  }
  0x15   : > { %v320_v21 = vmul.f32 %v563_v6, %v563_v6  ;;  %v574_v23 = vunpack.c.l.bf16 %v623_v17  ;;  %v321_v26 = vmul.f32 %v566_v8, %v566_v8  ;;  %v575_v28 = vunpack.c.h.bf16 %v623_v17 }
  0x16   : > { %v281_v9 = vadd.f32 %v562_v4, %v280_v7  ;;  %v349_v22 = vadd.f32 %v318_v14, %v317_v13  ;;  %v322_v30 = vmul.f32 %v567_v11, %v567_v11  ;;  %v578_v32 = vunpack.c.l.bf16 %v624_v25 }
  0x17   : > { %v323_v35 = vmul.f32 %v570_v15, %v570_v15  ;;  %v579_v37 = vunpack.c.h.bf16 %v624_v25  ;;  %v324_v39 = vmul.f32 %v571_v19, %v571_v19  ;;  %v582_v41 = vunpack.c.l.bf16 %v625_v34 }
  0x18   : > { %v282_v12 = vadd.f32 %v563_v6, %v281_v9  ;;  %v350_v27 = vadd.f32 %v349_v22, %v319_v18  ;;  %v325_v44 = vmul.f32 %v574_v23, %v574_v23  ;;  %v583_v46 = vunpack.c.h.bf16 %v625_v34  ;;  %v629_v6 = vld [vmem:[%s725_s16 + $0x50] sm:$0xff]  }
  0x19   : > { %v326_v48 = vmul.f32 %v575_v28, %v575_v28  ;;  %v586_v50 = vunpack.c.l.bf16 %v626_v43  ;;  %v327_v53 = vmul.f32 %v578_v32, %v578_v32  ;;  %v587_v55 = vunpack.c.h.bf16 %v626_v43 }
  0x1a   : > { %v283_v16 = vadd.f32 %v566_v8, %v282_v12  ;;  %v351_v31 = vadd.f32 %v350_v27, %v320_v21  ;;  %v328_v57 = vmul.f32 %v579_v37, %v579_v37  ;;  %v590_v59 = vunpack.c.l.bf16 %v627_v52 }
  0x1b   : > { %v329_v62 = vmul.f32 %v582_v41, %v582_v41  ;;  %v591_v0 = vunpack.c.h.bf16 %v627_v52  ;;  %v330_v2 = vmul.f32 %v583_v46, %v583_v46  ;;  %v594_v4 = vunpack.c.l.bf16 %v628_v61 }
  0x1c   : > { %v284_v20 = vadd.f32 %v567_v11, %v283_v16  ;;  %v352_v36 = vadd.f32 %v351_v31, %v321_v26  ;;  %v331_v7 = vmul.f32 %v586_v50, %v586_v50  ;;  %v595_v9 = vunpack.c.h.bf16 %v628_v61 }
  0x1d   : > { %v332_v11 = vmul.f32 %v587_v55, %v587_v55  ;;  %v598_v13 = vunpack.c.l.bf16 %v629_v6  ;;  %v333_v16 = vmul.f32 %v590_v59, %v590_v59  ;;  %v599_v18 = vunpack.c.h.bf16 %v629_v6 }
  0x1e   : > { %v285_v24 = vadd.f32 %v570_v15, %v284_v20  ;;  %v353_v40 = vadd.f32 %v352_v36, %v322_v30  ;;  %v630_v15 = vld [vmem:[%s725_s16 + $0x58] sm:$0xff]   ;;  %v334_v20 = vmul.f32 %v591_v0, %v591_v0  ;;  %v335_v25 = vmul.f32 %v594_v4, %v594_v4 }
  0x1f   : > { %v602_v22 = vunpack.c.l.bf16 %v630_v15  ;;  %v603_v27 = vunpack.c.h.bf16 %v630_v15  ;;  %v337_v34 = vmul.f32 %v598_v13, %v598_v13 }
  0x20   : > { %v286_v29 = vadd.f32 %v571_v19, %v285_v24  ;;  %v354_v45 = vadd.f32 %v353_v40, %v323_v35  ;;  %v631_v24 = vld [vmem:[%s725_s16 + $0x60] sm:$0xff]  }
  0x21   : > { %v606_v31 = vunpack.c.l.bf16 %v631_v24  ;;  %v607_v36 = vunpack.c.h.bf16 %v631_v24  ;;  %v339_v43 = vmul.f32 %v602_v22, %v602_v22 }
  0x22   : > { %v287_v33 = vadd.f32 %v574_v23, %v286_v29  ;;  %v355_v49 = vadd.f32 %v354_v45, %v324_v39  ;;  %v336_v29 = vmul.f32 %v595_v9, %v595_v9 }
  0x23   : > { %v341_v52 = vmul.f32 %v606_v31, %v606_v31 }
  0x24   : > { %v288_v38 = vadd.f32 %v575_v28, %v287_v33  ;;  %v356_v54 = vadd.f32 %v355_v49, %v325_v44  ;;  %v632_v33 = vld [vmem:[%s725_s16 + $0x68] sm:$0xff]  }
  0x25   : > { %v610_v40 = vunpack.c.l.bf16 %v632_v33  ;;  %v611_v45 = vunpack.c.h.bf16 %v632_v33 }
  0x26   : > { %v289_v42 = vadd.f32 %v578_v32, %v288_v38  ;;  %v357_v58 = vadd.f32 %v356_v54, %v326_v48  ;;  %v338_v38 = vmul.f32 %v599_v18, %v599_v18 }
  0x28   : > { %v290_v47 = vadd.f32 %v579_v37, %v289_v42  ;;  %v358_v63 = vadd.f32 %v357_v58, %v327_v53  ;;  %v633_v42 = vld [vmem:[%s725_s16 + $0x70] sm:$0xff]  }
  0x29   : > { %v614_v49 = vunpack.c.l.bf16 %v633_v42  ;;  %v615_v54 = vunpack.c.h.bf16 %v633_v42 }
  0x2a   : > { %v291_v51 = vadd.f32 %v582_v41, %v290_v47  ;;  %v359_v3 = vadd.f32 %v358_v63, %v328_v57  ;;  %v340_v47 = vmul.f32 %v603_v27, %v603_v27 }
  0x2b   : > { %v346_v6 = vmul.f32 %v615_v54, %v615_v54 }
  0x2c   : > { %v292_v56 = vadd.f32 %v583_v46, %v291_v51  ;;  %v360_v8 = vadd.f32 %v359_v3, %v329_v62  ;;  %v634_v51 = vld [vmem:[%s725_s16 + $0x78] sm:$0xff]   ;;  %v345_v3 = vmul.f32 %v614_v49, %v614_v49 }
  0x2d   : > { %v618_v58 = vunpack.c.l.bf16 %v634_v51  ;;  %v619_v62 = vunpack.c.h.bf16 %v634_v51 }
  0x2e   : > { %v293_v60 = vadd.f32 %v586_v50, %v292_v56  ;;  %v361_v12 = vadd.f32 %v360_v8, %v330_v2  ;;  %v342_v56 = vmul.f32 %v607_v36, %v607_v36 }
  0x30   : > { %v294_v1 = vadd.f32 %v587_v55, %v293_v60  ;;  %v362_v17 = vadd.f32 %v361_v12, %v331_v7  ;;  %v343_v60 = vmul.f32 %v610_v40, %v610_v40  ;;  %v348_v12 = vmul.f32 %v619_v62, %v619_v62 }
  0x32   : > { %v295_v5 = vadd.f32 %v590_v59, %v294_v1  ;;  %v363_v21 = vadd.f32 %v362_v17, %v332_v11 }
  0x34   : > { %v296_v10 = vadd.f32 %v591_v0, %v295_v5  ;;  %v364_v26 = vadd.f32 %v363_v21, %v333_v16  ;;  %v344_v0 = vmul.f32 %v611_v45, %v611_v45 }
  0x36   : > { %v297_v14 = vadd.f32 %v594_v4, %v296_v10  ;;  %v365_v30 = vadd.f32 %v364_v26, %v334_v20 }
  0x38   : > { %v298_v19 = vadd.f32 %v595_v9, %v297_v14  ;;  %v366_v35 = vadd.f32 %v365_v30, %v335_v25  ;;  %v347_v9 = vmul.f32 %v618_v58, %v618_v58 }
  0x3a   : > { %v299_v23 = vadd.f32 %v598_v13, %v298_v19  ;;  %v367_v39 = vadd.f32 %v366_v35, %v336_v29 }
  0x3c   : > { %v300_v28 = vadd.f32 %v599_v18, %v299_v23  ;;  %v368_v44 = vadd.f32 %v367_v39, %v337_v34 }
  0x3e   : > { %v301_v32 = vadd.f32 %v602_v22, %v300_v28  ;;  %v369_v48 = vadd.f32 %v368_v44, %v338_v38 }
  0x40   : > { %v302_v37 = vadd.f32 %v603_v27, %v301_v32  ;;  %v370_v53 = vadd.f32 %v369_v48, %v339_v43 }
  0x42   : > { %v303_v41 = vadd.f32 %v606_v31, %v302_v37  ;;  %v371_v57 = vadd.f32 %v370_v53, %v340_v47 }
  0x44   : > { %v304_v46 = vadd.f32 %v607_v36, %v303_v41  ;;  %v372_v61 = vadd.f32 %v371_v57, %v341_v52 }
  0x46   : > { %v305_v50 = vadd.f32 %v610_v40, %v304_v46  ;;  %v373_v1 = vadd.f32 %v372_v61, %v342_v56 }
  0x48   : > { %v306_v55 = vadd.f32 %v611_v45, %v305_v50  ;;  %v374_v4 = vadd.f32 %v373_v1, %v343_v60 }
  0x4a   : > { %v307_v59 = vadd.f32 %v614_v49, %v306_v55  ;;  %v375_v7 = vadd.f32 %v374_v4, %v344_v0 }
  0x4c   : > { %v308_v63 = vadd.f32 %v615_v54, %v307_v59  ;;  %v376_v10 = vadd.f32 %v375_v7, %v345_v3 }
  0x4e   : > { %v309_v2 = vadd.f32 %v618_v58, %v308_v63  ;;  %v377_v13 = vadd.f32 %v376_v10, %v346_v6 }
  0x50   : > { %v310_v5 = vadd.f32 %v619_v62, %v309_v2  ;;  %v378_v15 = vadd.f32 %v377_v13, %v347_v9 }
  0x52   : > { %v311_v8 = vrot.slane %v310_v5, 4  ;;  %v379_v17 = vadd.f32 %v378_v15, %v348_v12 }
  0x54   : > { %v312_v11 = vadd.f32 %v311_v8, %v310_v5  ;;  %v380_v19 = vrot.slane %v379_v17, 4 }
  0x56   : > { %v313_v14 = vrot.slane %v312_v11, 2  ;;  %v381_v21 = vadd.f32 %v380_v19, %v379_v17 }
  0x58   : > { %v314_v16 = vadd.f32 %v313_v14, %v312_v11  ;;  %v382_v23 = vrot.slane %v381_v21, 2 }
  0x5a   : > { %v315_v18 = vrot.slane %v314_v16, 1  ;;  %v383_v25 = vadd.f32 %v382_v23, %v381_v21 }
  0x5c   : > { %v316_v20 = vadd.f32 %v315_v18, %v314_v16  ;;  %v384_v26 = vrot.slane %v383_v25, 1 }
  0x5e   : > { %v388_v22 = vmul.f32 0.00390625, %v316_v20  ;;  %v385_v28 = vadd.f32 %v384_v26, %v383_v25 }
  0x60   : > { %v389_v24 = vmul.f32 256.0, %v388_v22  ;;  %399 = vst [vmem:[#allocation3] sm:$0x1] %v388_v22 }
  0x62   : > { %v390_v27 = vmul.f32 %v389_v24, %v388_v22 }
  0x64   : > { %v391_v29 = vsub.f32 %v385_v28, %v390_v27 }
  0x66   : > { %v392_v31 = vmax.f32 %v391_v29, 0.0 }
  0x67   : > { %v429_v30 = vld [vmem:[#allocation3] sm:$0x1] }
  0x68   : > { %430 = vst [vmem:[%s204_s19] sm:$0x1] %v429_v30  ;;  %400 = vst [vmem:[#allocation4] sm:$0x1] %v392_v31 }
  0x6f   : > { %v426_v32 = vld [vmem:[#allocation4] sm:$0x1] }
  0x70   : > { %v428_v33 = vmul.f32 0.00390625, %v426_v32 }
  0x72   : > { %v431_v34 = vadd.f32 1e-09, %v428_v33 }
  0x74   : > { %660 = vrsqrt.f32 %v431_v34 }
  0x7e   : > { %v661_v35 = vpop.eup %660 }
  0x7f   : > { %433 = vst [vmem:[%s210_s22] sm:$0x1] %v661_v35 }
  0x80 PF: > { %s13_s11 = sadd.s32 1, %s684_s11   ;;  %s763_s9 = smov %s680_s10 }
  0x81   : > { %p10_p5 = scmp.ge.s32.totalorder %s13_s11, 4   ;;  %s764_s10 = smov %s766_s12 }
  0x83   :  { %12 = sbr.rel (!%p10_p5) target bundleno = 2 (0x2), region = 78 }

// kernel: _stylebank_core.17
= control target key start
LH: loop header
LB: loop body
LE: loop exit
PB: predicated region body
PF: predicated region fallthrough
CT: control target
= control target key end

     0   :  { %s1395_s9 = smov 0   ;;  %s1397_s10 = smov 0   ;;  %s1532_s0 = inlined_call_operand.vmem [shape: bf16[512,256], index: 0, kind: input, shape index: {}]   ;;  %s1533_s1 = inlined_call_operand.vmem [shape: bf16[256,128], index: 1, kind: input, shape index: {}]   ;;  %s1534_s2 = inlined_call_operand.vmem [shape: bf16[512,128], index: 2, kind: output, shape index: {}]  }
   0x1   :  { %s1399_s11 = smov 0  }
   0x2 LB: > { %s24_s12 = sadd.s32 1, %s1374_s10  ;;  %p924_p0 = scmp.ge.s32.totalorder %s1378_s11, 1  ;;  %s1378_s11 = sphi %s1399_s11, %s12_s11   ;;  %s1374_s10 = sphi %s1397_s10, %s1536_s10   ;;  %s1370_s9 = sphi %s1395_s9, %s1535_s9  }
   0x3   : > { %p26_p1 = scmp.ge.s32.totalorder %s24_s12, 2  ;;  %p137_p2 = scmp.lt.s32.totalorder %s1378_s11, 3 }
   0x5   : > { %s1538_s12 = smov (%p26_p1, %s24_s12), 0  ;;  %p138_p3 = pnand %p924_p0, %p137_p2 }
   0x6   : > { %v1292_v0 = vld [vmem:[%s1533_s1 + $0x40] sm:$0xff] (!%p138_p3)   ;;  %s925_s15 = sshll.u32 (!%p138_p3), %s1370_s9, 5  ;;  %v1294_v2 = vld [vmem:[%s1533_s1 + $0x48] sm:$0xff] (!%p138_p3)   ;;  %v1296_v4 = vld [vmem:[%s1533_s1 + $0x50] sm:$0xff] (!%p138_p3)  }
   0x7   : > { %141 = sbr.rel (%p138_p3) target bundleno = 315 (0x13b), region = 28  ;;  %v1293_v1 = vld [vmem:[%s1533_s1] sm:$0xff] (!%p138_p3)   ;;  %1140 = vmatprep.subr.bf16.mxu0 (!%p138_p3), %v1292_v0  ;;  %1252 = vmatprep.subr.bf16.mxu1 (!%p138_p3), %v1292_v0  ;;  %v1295_v3 = vld [vmem:[%s1533_s1 + $0x8] sm:$0xff] (!%p138_p3)   ;;  %p168_p4 = scmp.lt.s32.totalorder (!%p138_p3), %s925_s15, 63  ;;  %v1297_v5 = vld [vmem:[%s1533_s1 + $0x10] sm:$0xff] (!%p138_p3)  }
   0x8   : > { %1141 = vmatpush3.bf16.msra.mxu0 (!%p138_p3), %v1293_v1  ;;  %1260 = vmatpush3.bf16.msra.mxu1 (!%p138_p3), %v1293_v1  ;;  %v1298_v6 = vld [vmem:[%s1533_s1 + $0x58] sm:$0xff] (!%p138_p3)   ;;  %v1300_v8 = vld [vmem:[%s1533_s1 + $0x60] sm:$0xff] (!%p138_p3)   ;;  %v1302_v10 = vld [vmem:[%s1533_s1 + $0x68] sm:$0xff] (!%p138_p3)  }
   0x9   : > { %1142 = vmatprep.subr.bf16.mxu0 (!%p138_p3), %v1294_v2  ;;  %1253 = vmatprep.subr.bf16.mxu1 (!%p138_p3), %v1294_v2  ;;  %v1299_v7 = vld [vmem:[%s1533_s1 + $0x18] sm:$0xff] (!%p138_p3)   ;;  %v1301_v9 = vld [vmem:[%s1533_s1 + $0x20] sm:$0xff] (!%p138_p3)   ;;  %v1303_v13 = vld [vmem:[%s1533_s1 + $0x28] sm:$0xff] (!%p138_p3)  }
   0xa   : > { %v1304_v14 = vld [vmem:[%s1533_s1 + $0x70] sm:$0xff] (!%p138_p3)   ;;  %v1306_v16 = vld [vmem:[%s1533_s1 + $0x78] sm:$0xff] (!%p138_p3)  }
   0xb   : > { %v1305_v15 = vld [vmem:[%s1533_s1 + $0x30] sm:$0xff] (!%p138_p3)   ;;  %v1307_v17 = vld [vmem:[%s1533_s1 + $0x38] sm:$0xff] (!%p138_p3)  }
   0xc   : > { %1143 = vmatpush3.bf16.msra.mxu0 (!%p138_p3), %v1295_v3  ;;  %1261 = vmatpush3.bf16.msra.mxu1 (!%p138_p3), %v1295_v3 }
   0xd   : > { %1144 = vmatprep.subr.bf16.mxu0 (!%p138_p3), %v1296_v4  ;;  %1254 = vmatprep.subr.bf16.mxu1 (!%p138_p3), %v1296_v4 }
   0xe   : > { %s1540_s15 = smov (!%p168_p4, %s925_s15), 63 }
   0xf   : > { %s1012_s30 = sshll.u32 %s1540_s15, 3  ;;  %s929_s26 = sshll.u32 %s1540_s15, 2 }
  0x10   : > { %1145 = vmatpush3.bf16.msra.mxu0 %v1297_v5  ;;  %1262 = vmatpush3.bf16.msra.mxu1 %v1297_v5  ;;  %s1446_s7 = scalar_lea.vmem %s1532_s0, %s1012_s30  ;;  %s1505_s29 = scalar_lea.vmem %s1534_s2, %s929_s26 }
  0x11   : > { %1146 = vmatprep.subr.bf16.mxu0 %v1298_v6  ;;  %1255 = vmatprep.subr.bf16.mxu1 %v1298_v6  ;;  %v1310_v11 = vld [vmem:[%s1446_s7 + $0x4] ss:$8 sps:$4 sm:$0xff]   ;;  %v1308_v18 = vld [vmem:[%s1446_s7] ss:$8 sps:$4 sm:$0xff]   ;;  %v1314_v20 = vld [vmem:[%s1446_s7 + $0x14] ss:$8 sps:$4 sm:$0xff]  }
  0x12   : > { %v1313_v12 = vld [vmem:[%s1446_s7 + $0x84] ss:$8 sps:$4 sm:$0xff]   ;;  %540 = vmatprep.mubr.bf16.mxu0 %v1310_v11  ;;  %v1311_v19 = vld [vmem:[%s1446_s7 + $0x80] ss:$8 sps:$4 sm:$0xff]   ;;  %v1316_v21 = vld [vmem:[%s1446_s7 + $0x94] ss:$8 sps:$4 sm:$0xff]  }
  0x13   : > { %604 = vmatprep.mubr.bf16.mxu1 %v1313_v12  ;;  %v1318_v22 = vld [vmem:[%s1446_s7 + $0x10] ss:$8 sps:$4 sm:$0xff]   ;;  %v1320_v24 = vld [vmem:[%s1446_s7 + $0x24] ss:$8 sps:$4 sm:$0xff]   ;;  %v1324_v26 = vld [vmem:[%s1446_s7 + $0x20] ss:$8 sps:$4 sm:$0xff]  }
  0x14   : > { %1147 = vmatpush3.bf16.msra.mxu0 %v1299_v7  ;;  %1263 = vmatpush3.bf16.msra.mxu1 %v1299_v7  ;;  %v1319_v23 = vld [vmem:[%s1446_s7 + $0x90] ss:$8 sps:$4 sm:$0xff]   ;;  %v1322_v25 = vld [vmem:[%s1446_s7 + $0xa4] ss:$8 sps:$4 sm:$0xff]   ;;  %v1325_v27 = vld [vmem:[%s1446_s7 + $0xa0] ss:$8 sps:$4 sm:$0xff]  }
  0x15   : > { %1148 = vmatprep.subr.bf16.mxu0 %v1300_v8  ;;  %1256 = vmatprep.subr.bf16.mxu1 %v1300_v8  ;;  %v1326_v28 = vld [vmem:[%s1446_s7 + $0x34] ss:$8 sps:$4 sm:$0xff]   ;;  %v1330_v30 = vld [vmem:[%s1446_s7 + $0x30] ss:$8 sps:$4 sm:$0xff]   ;;  %v1332_v32 = vld [vmem:[%s1446_s7 + $0x44] ss:$8 sps:$4 sm:$0xff]  }
  0x16   : > { %v1328_v29 = vld [vmem:[%s1446_s7 + $0xb4] ss:$8 sps:$4 sm:$0xff]   ;;  %v1331_v31 = vld [vmem:[%s1446_s7 + $0xb0] ss:$8 sps:$4 sm:$0xff]   ;;  %v1334_v33 = vld [vmem:[%s1446_s7 + $0xc4] ss:$8 sps:$4 sm:$0xff]  }
  0x17   : > { %v1336_v34 = vld [vmem:[%s1446_s7 + $0x40] ss:$8 sps:$4 sm:$0xff]   ;;  %v1338_v36 = vld [vmem:[%s1446_s7 + $0x54] ss:$8 sps:$4 sm:$0xff]   ;;  %v1342_v38 = vld [vmem:[%s1446_s7 + $0x50] ss:$8 sps:$4 sm:$0xff]  }
  0x18   : > { %1149 = vmatpush3.bf16.msra.mxu0 %v1301_v9  ;;  %1264 = vmatpush3.bf16.msra.mxu1 %v1301_v9  ;;  %v1337_v35 = vld [vmem:[%s1446_s7 + $0xc0] ss:$8 sps:$4 sm:$0xff]   ;;  %v1340_v37 = vld [vmem:[%s1446_s7 + $0xd4] ss:$8 sps:$4 sm:$0xff]   ;;  %v1343_v39 = vld [vmem:[%s1446_s7 + $0xd0] ss:$8 sps:$4 sm:$0xff]  }
  0x19   : > { %1150 = vmatprep.subr.bf16.mxu0 %v1302_v10  ;;  %1257 = vmatprep.subr.bf16.mxu1 %v1302_v10  ;;  %v1344_v40 = vld [vmem:[%s1446_s7 + $0x64] ss:$8 sps:$4 sm:$0xff]   ;;  %v1348_v42 = vld [vmem:[%s1446_s7 + $0x60] ss:$8 sps:$4 sm:$0xff]   ;;  %v1350_v44 = vld [vmem:[%s1446_s7 + $0x74] ss:$8 sps:$4 sm:$0xff]  }
  0x1a   : > { %v1346_v41 = vld [vmem:[%s1446_s7 + $0xe4] ss:$8 sps:$4 sm:$0xff]   ;;  %v1349_v43 = vld [vmem:[%s1446_s7 + $0xe0] ss:$8 sps:$4 sm:$0xff]   ;;  %v1352_v45 = vld [vmem:[%s1446_s7 + $0xf4] ss:$8 sps:$4 sm:$0xff]  }
  0x1b   : > { %v1354_v46 = vld [vmem:[%s1446_s7 + $0x70] ss:$8 sps:$4 sm:$0xff]  }
  0x1c   : > { %1151 = vmatpush3.bf16.msra.mxu0 %v1303_v13  ;;  %1265 = vmatpush3.bf16.msra.mxu1 %v1303_v13  ;;  %v1355_v47 = vld [vmem:[%s1446_s7 + $0xf0] ss:$8 sps:$4 sm:$0xff]  }
  0x1d   : > { %1152 = vmatprep.subr.bf16.mxu0 %v1304_v14  ;;  %1258 = vmatprep.subr.bf16.mxu1 %v1304_v14 }
  0x20   : > { %1153 = vmatpush3.bf16.msra.mxu0 %v1305_v15  ;;  %1266 = vmatpush3.bf16.msra.mxu1 %v1305_v15 }
  0x21   : > { %1154 = vmatprep.subr.bf16.mxu0 %v1306_v16  ;;  %1259 = vmatprep.subr.bf16.mxu1 %v1306_v16 }
  0x24   : > { %1155 = vmatpush3.bf16.msra.mxu0 %v1307_v17  ;;  %1267 = vmatpush3.bf16.msra.mxu1 %v1307_v17 }
  0x27   : > { %541 = vmatmul.mubr.bf16.vlgmr.msra.gmra.mrb[0].mxu0 %v1308_v18  ;;  %605 = vmatmul.mubr.bf16.vlgmr.msra.gmra.mrb[0].mxu1 %v1311_v19 }
  0x28   : > { %548 = vmatprep.mubr.bf16.mxu0 %v1314_v20  ;;  %612 = vmatprep.mubr.bf16.mxu1 %v1316_v21 }
  0x2f   : > { %549 = vmatmul.mubr.bf16.gmra.mrb[4].mxu0 %v1318_v22  ;;  %613 = vmatmul.mubr.bf16.gmra.mrb[4].mxu1 %v1319_v23 }
  0x30   : > { %556 = vmatprep.mubr.bf16.mxu0 %v1320_v24  ;;  %620 = vmatprep.mubr.bf16.mxu1 %v1322_v25 }
  0x37   : > { %557 = vmatmul.mubr.bf16.gmra.mrb[8].mxu0 %v1324_v26  ;;  %621 = vmatmul.mubr.bf16.gmra.mrb[8].mxu1 %v1325_v27 }
  0x38   : > { %564 = vmatprep.mubr.bf16.mxu0 %v1326_v28  ;;  %628 = vmatprep.mubr.bf16.mxu1 %v1328_v29 }
  0x3f   : > { %565 = vmatmul.mubr.bf16.gmra.mrb[12].mxu0 %v1330_v30  ;;  %629 = vmatmul.mubr.bf16.gmra.mrb[12].mxu1 %v1331_v31 }
  0x40   : > { %572 = vmatprep.mubr.bf16.mxu0 %v1332_v32  ;;  %636 = vmatprep.mubr.bf16.mxu1 %v1334_v33 }
  0x47   : > { %573 = vmatmul.mubr.bf16.gmra.mrb[16].mxu0 %v1336_v34  ;;  %637 = vmatmul.mubr.bf16.gmra.mrb[16].mxu1 %v1337_v35 }
  0x48   : > { %580 = vmatprep.mubr.bf16.mxu0 %v1338_v36  ;;  %644 = vmatprep.mubr.bf16.mxu1 %v1340_v37 }
  0x4f   : > { %581 = vmatmul.mubr.bf16.gmra.mrb[20].mxu0 %v1342_v38  ;;  %645 = vmatmul.mubr.bf16.gmra.mrb[20].mxu1 %v1343_v39 }
  0x50   : > { %588 = vmatprep.mubr.bf16.mxu0 %v1344_v40  ;;  %652 = vmatprep.mubr.bf16.mxu1 %v1346_v41 }
  0x57   : > { %589 = vmatmul.mubr.bf16.gmra.mrb[24].mxu0 %v1348_v42  ;;  %653 = vmatmul.mubr.bf16.gmra.mrb[24].mxu1 %v1349_v43 }
  0x58   : > { %596 = vmatprep.mubr.bf16.mxu0 %v1350_v44  ;;  %660 = vmatprep.mubr.bf16.mxu1 %v1352_v45 }
  0x5f   : > { %597 = vmatmul.mubr.bf16.gmra.mrb[28].mxu0 %v1354_v46  ;;  %661 = vmatmul.mubr.bf16.gmra.mrb[28].mxu1 %v1355_v47 }
  0xfa   : > { %v1156_v48 = vpop.f32.mrb[0].mxu0  ;;  %v1204_v49 = vpop.f32.mrb[0].mxu1 }
  0xfb   : > { %v1157_v50 = vpop.f32.mrb[1].mxu0  ;;  %v1205_v51 = vpop.f32.mrb[1].mxu1 }
  0xfc   : > { %v1158_v52 = vadd.f32 %v1157_v50, %v1156_v48  ;;  %v1206_v53 = vadd.f32 %v1205_v51, %v1204_v49  ;;  %v1159_v54 = vpop.f32.mrb[2].mxu0  ;;  %v1207_v55 = vpop.f32.mrb[2].mxu1 }
  0xfd   : > { %v1160_v56 = vpop.f32.mrb[3].mxu0  ;;  %v1208_v57 = vpop.f32.mrb[3].mxu1 }
  0xfe   : > { %v1161_v58 = vadd.f32 %v1160_v56, %v1159_v54  ;;  %v1209_v59 = vadd.f32 %v1208_v57, %v1207_v55 }
 0x100   : > { %v1048_v60 = vpack.c.bf16 %v1161_v58, %v1158_v52  ;;  %v1088_v61 = vpack.c.bf16 %v1209_v59, %v1206_v53 }
 0x102   : > { %1049 = vst [vmem:[%s1505_s29] sm:$0xff] %v1048_v60   ;;  %1132 = vst [vmem:[%s1505_s29 + $0x40] sm:$0xff] %v1088_v61   ;;  %v1162_v62 = vpop.f32.mrb[4].mxu0  ;;  %v1210_v63 = vpop.f32.mrb[4].mxu1 }
 0x103   : > { %v1163_v0 = vpop.f32.mrb[5].mxu0  ;;  %v1211_v1 = vpop.f32.mrb[5].mxu1 }
 0x104   : > { %v1164_v2 = vadd.f32 %v1163_v0, %v1162_v62  ;;  %v1212_v3 = vadd.f32 %v1211_v1, %v1210_v63  ;;  %v1165_v4 = vpop.f32.mrb[6].mxu0  ;;  %v1213_v5 = vpop.f32.mrb[6].mxu1 }
 0x105   : > { %v1166_v6 = vpop.f32.mrb[7].mxu0  ;;  %v1214_v7 = vpop.f32.mrb[7].mxu1 }
 0x106   : > { %v1167_v8 = vadd.f32 %v1166_v6, %v1165_v4  ;;  %v1215_v9 = vadd.f32 %v1214_v7, %v1213_v5 }
 0x108   : > { %v1053_v10 = vpack.c.bf16 %v1167_v8, %v1164_v2  ;;  %v1093_v11 = vpack.c.bf16 %v1215_v9, %v1212_v3 }
 0x10a   : > { %1125 = vst [vmem:[%s1505_s29 + $0x8] sm:$0xff] %v1053_v10   ;;  %1133 = vst [vmem:[%s1505_s29 + $0x48] sm:$0xff] %v1093_v11   ;;  %v1168_v12 = vpop.f32.mrb[8].mxu0  ;;  %v1216_v13 = vpop.f32.mrb[8].mxu1 }
 0x10b   : > { %v1169_v14 = vpop.f32.mrb[9].mxu0  ;;  %v1217_v15 = vpop.f32.mrb[9].mxu1 }
 0x10c   : > { %v1170_v16 = vadd.f32 %v1169_v14, %v1168_v12  ;;  %v1218_v17 = vadd.f32 %v1217_v15, %v1216_v13  ;;  %v1171_v18 = vpop.f32.mrb[10].mxu0  ;;  %v1219_v19 = vpop.f32.mrb[10].mxu1 }
 0x10d   : > { %v1172_v20 = vpop.f32.mrb[11].mxu0  ;;  %v1220_v21 = vpop.f32.mrb[11].mxu1 }
 0x10e   : > { %v1173_v22 = vadd.f32 %v1172_v20, %v1171_v18  ;;  %v1221_v23 = vadd.f32 %v1220_v21, %v1219_v19 }
 0x110   : > { %v1058_v24 = vpack.c.bf16 %v1173_v22, %v1170_v16  ;;  %v1098_v25 = vpack.c.bf16 %v1221_v23, %v1218_v17 }
 0x112   : > { %1126 = vst [vmem:[%s1505_s29 + $0x10] sm:$0xff] %v1058_v24   ;;  %1134 = vst [vmem:[%s1505_s29 + $0x50] sm:$0xff] %v1098_v25   ;;  %v1174_v26 = vpop.f32.mrb[12].mxu0  ;;  %v1222_v27 = vpop.f32.mrb[12].mxu1 }
 0x113   : > { %v1175_v28 = vpop.f32.mrb[13].mxu0  ;;  %v1223_v29 = vpop.f32.mrb[13].mxu1 }
 0x114   : > { %v1176_v30 = vadd.f32 %v1175_v28, %v1174_v26  ;;  %v1224_v31 = vadd.f32 %v1223_v29, %v1222_v27  ;;  %v1177_v32 = vpop.f32.mrb[14].mxu0  ;;  %v1225_v33 = vpop.f32.mrb[14].mxu1 }
 0x115   : > { %v1178_v34 = vpop.f32.mrb[15].mxu0  ;;  %v1226_v35 = vpop.f32.mrb[15].mxu1 }
 0x116   : > { %v1179_v36 = vadd.f32 %v1178_v34, %v1177_v32  ;;  %v1227_v37 = vadd.f32 %v1226_v35, %v1225_v33 }
 0x118   : > { %v1063_v38 = vpack.c.bf16 %v1179_v36, %v1176_v30  ;;  %v1103_v39 = vpack.c.bf16 %v1227_v37, %v1224_v31 }
 0x11a   : > { %1127 = vst [vmem:[%s1505_s29 + $0x18] sm:$0xff] %v1063_v38   ;;  %1135 = vst [vmem:[%s1505_s29 + $0x58] sm:$0xff] %v1103_v39   ;;  %v1180_v40 = vpop.f32.mrb[16].mxu0  ;;  %v1228_v41 = vpop.f32.mrb[16].mxu1 }
 0x11b   : > { %v1181_v42 = vpop.f32.mrb[17].mxu0  ;;  %v1229_v43 = vpop.f32.mrb[17].mxu1 }
 0x11c   : > { %v1182_v44 = vadd.f32 %v1181_v42, %v1180_v40  ;;  %v1230_v45 = vadd.f32 %v1229_v43, %v1228_v41  ;;  %v1183_v46 = vpop.f32.mrb[18].mxu0  ;;  %v1231_v47 = vpop.f32.mrb[18].mxu1 }
 0x11d   : > { %v1184_v48 = vpop.f32.mrb[19].mxu0  ;;  %v1232_v49 = vpop.f32.mrb[19].mxu1 }
 0x11e   : > { %v1185_v50 = vadd.f32 %v1184_v48, %v1183_v46  ;;  %v1233_v51 = vadd.f32 %v1232_v49, %v1231_v47 }
 0x120   : > { %v1068_v52 = vpack.c.bf16 %v1185_v50, %v1182_v44  ;;  %v1108_v53 = vpack.c.bf16 %v1233_v51, %v1230_v45 }
 0x122   : > { %1128 = vst [vmem:[%s1505_s29 + $0x20] sm:$0xff] %v1068_v52   ;;  %1136 = vst [vmem:[%s1505_s29 + $0x60] sm:$0xff] %v1108_v53   ;;  %v1186_v54 = vpop.f32.mrb[20].mxu0  ;;  %v1234_v55 = vpop.f32.mrb[20].mxu1 }
 0x123   : > { %v1187_v56 = vpop.f32.mrb[21].mxu0  ;;  %v1235_v57 = vpop.f32.mrb[21].mxu1 }
 0x124   : > { %v1188_v58 = vadd.f32 %v1187_v56, %v1186_v54  ;;  %v1236_v59 = vadd.f32 %v1235_v57, %v1234_v55  ;;  %v1189_v60 = vpop.f32.mrb[22].mxu0  ;;  %v1237_v61 = vpop.f32.mrb[22].mxu1 }
 0x125   : > { %v1190_v62 = vpop.f32.mrb[23].mxu0  ;;  %v1238_v63 = vpop.f32.mrb[23].mxu1 }
 0x126   : > { %v1191_v0 = vadd.f32 %v1190_v62, %v1189_v60  ;;  %v1239_v1 = vadd.f32 %v1238_v63, %v1237_v61 }
 0x128   : > { %v1073_v2 = vpack.c.bf16 %v1191_v0, %v1188_v58  ;;  %v1113_v3 = vpack.c.bf16 %v1239_v1, %v1236_v59 }
 0x12a   : > { %1129 = vst [vmem:[%s1505_s29 + $0x28] sm:$0xff] %v1073_v2   ;;  %1137 = vst [vmem:[%s1505_s29 + $0x68] sm:$0xff] %v1113_v3   ;;  %v1192_v4 = vpop.f32.mrb[24].mxu0  ;;  %v1240_v5 = vpop.f32.mrb[24].mxu1 }
 0x12b   : > { %v1193_v6 = vpop.f32.mrb[25].mxu0  ;;  %v1241_v7 = vpop.f32.mrb[25].mxu1 }
 0x12c   : > { %v1194_v8 = vadd.f32 %v1193_v6, %v1192_v4  ;;  %v1242_v9 = vadd.f32 %v1241_v7, %v1240_v5  ;;  %v1195_v10 = vpop.f32.mrb[26].mxu0  ;;  %v1243_v11 = vpop.f32.mrb[26].mxu1 }
 0x12d   : > { %v1196_v12 = vpop.f32.mrb[27].mxu0  ;;  %v1244_v13 = vpop.f32.mrb[27].mxu1 }
 0x12e   : > { %v1197_v14 = vadd.f32 %v1196_v12, %v1195_v10  ;;  %v1245_v15 = vadd.f32 %v1244_v13, %v1243_v11 }
 0x130   : > { %v1078_v16 = vpack.c.bf16 %v1197_v14, %v1194_v8  ;;  %v1118_v17 = vpack.c.bf16 %v1245_v15, %v1242_v9 }
 0x132   : > { %1130 = vst [vmem:[%s1505_s29 + $0x30] sm:$0xff] %v1078_v16   ;;  %1138 = vst [vmem:[%s1505_s29 + $0x70] sm:$0xff] %v1118_v17   ;;  %v1198_v18 = vpop.f32.mrb[28].mxu0  ;;  %v1246_v19 = vpop.f32.mrb[28].mxu1 }
 0x133   : > { %v1199_v20 = vpop.f32.mrb[29].mxu0  ;;  %v1247_v21 = vpop.f32.mrb[29].mxu1 }
 0x134   : > { %v1200_v22 = vadd.f32 %v1199_v20, %v1198_v18  ;;  %v1248_v23 = vadd.f32 %v1247_v21, %v1246_v19  ;;  %v1201_v24 = vpop.f32.mrb[30].mxu0  ;;  %v1249_v25 = vpop.f32.mrb[30].mxu1 }
 0x135   : > { %v1202_v26 = vpop.f32.mrb[31].mxu0  ;;  %v1250_v27 = vpop.f32.mrb[31].mxu1 }
 0x136   : > { %v1203_v28 = vadd.f32 %v1202_v26, %v1201_v24  ;;  %v1251_v29 = vadd.f32 %v1250_v27, %v1249_v25 }
 0x138   : > { %v1083_v30 = vpack.c.bf16 %v1203_v28, %v1200_v22  ;;  %v1123_v31 = vpack.c.bf16 %v1251_v29, %v1248_v23 }
 0x13a   : > { %1131 = vst [vmem:[%s1505_s29 + $0x38] sm:$0xff] %v1083_v30   ;;  %1139 = vst [vmem:[%s1505_s29 + $0x78] sm:$0xff] %v1123_v31  }
 0x13b PF: > { %s12_s11 = sadd.s32 1, %s1378_s11   ;;  %s1535_s9 = smov %s1374_s10 }
 0x13c   : > { %p9_p5 = scmp.ge.s32.totalorder %s12_s11, 4   ;;  %s1536_s10 = smov %s1538_s12 }
 0x13e   :  { %11 = sbr.rel (!%p9_p5) target bundleno = 2 (0x2), region = 61 }

// kernel: _stylebank_core.21
= control target key start
LH: loop header
LB: loop body
LE: loop exit
PB: predicated region body
PF: predicated region fallthrough
CT: control target
= control target key end

     0   :  { %s521_s9 = smov 0   ;;  %s523_s10 = smov 0   ;;  %s562_s0 = inlined_call_operand.vmem [shape: bf16[2,64,128], index: 0, kind: input, shape index: {}]   ;;  %s563_s1 = inlined_call_operand.vmem [shape: f32[2,1,128], index: 1, kind: output, shape index: {0}]   ;;  %s564_s2 = inlined_call_operand.vmem [shape: f32[2,1,128], index: 2, kind: output, shape index: {1}]  }
   0x1   :  { %s525_s11 = smov 0  }
   0x2 LB: > { %s32_s12 = sadd.s32 1, %s500_s10  ;;  %p430_p0 = scmp.ge.s32.totalorder %s504_s11, 1  ;;  %s504_s11 = sphi %s525_s11, %s13_s11   ;;  %s500_s10 = sphi %s523_s10, %s566_s10   ;;  %s496_s9 = sphi %s521_s9, %s565_s9  }
   0x3   : > { %p34_p1 = scmp.ge.s32.totalorder %s32_s12, 2  ;;  %p150_p2 = scmp.lt.s32.totalorder %s504_s11, 3 }
   0x5   : > { %s568_s12 = smov (%p34_p1, %s32_s12), 0  ;;  %p151_p3 = pnand %p430_p0, %p150_p2 }
   0x6   : > { %p187_p4 = scmp.lt.s32.totalorder (!%p151_p3), %s496_s9, 1 }
   0x7   : > { %154 = sbr.rel (%p151_p3) target bundleno = 80 (0x50), region = 24 }
   0xe   : > { %s570_s9 = smov (!%p187_p4, %s496_s9), 1 }
   0xf   : > { %s435_s13 = sshll.u32 %s570_s9, 5  ;;  %s204_s19 = scalar_lea.vmem %s563_s1, %s570_s9 }
  0x10   : > { %s197_s16 = scalar_lea.vmem %s562_s0, %s435_s13  ;;  %s210_s22 = scalar_lea.vmem %s564_s2, %s570_s9 }
  0x11   : > { %v437_v0 = vld [vmem:[%s197_s16] sm:$0xff]   ;;  %v452_v1 = vld [vmem:[%s197_s16 + $0x8] sm:$0xff]   ;;  %v453_v6 = vld [vmem:[%s197_s16 + $0x10] sm:$0xff]  }
  0x12   : > { %v438_v2 = vunpack.c.l.bf16 %v437_v0  ;;  %v439_v3 = vunpack.c.h.bf16 %v437_v0  ;;  %v442_v4 = vunpack.c.l.bf16 %v452_v1  ;;  %v443_v5 = vunpack.c.h.bf16 %v452_v1  ;;  %v454_v15 = vld [vmem:[%s197_s16 + $0x18] sm:$0xff]  }
  0x13   : > { %v446_v11 = vunpack.c.l.bf16 %v453_v6  ;;  %v447_v16 = vunpack.c.h.bf16 %v453_v6  ;;  %v450_v20 = vunpack.c.l.bf16 %v454_v15  ;;  %v451_v24 = vunpack.c.h.bf16 %v454_v15 }
  0x14   : > { %v232_v7 = vadd.f32 %v439_v3, %v438_v2  ;;  %v245_v8 = vmul.f32 %v438_v2, %v438_v2  ;;  %v246_v9 = vmul.f32 %v439_v3, %v439_v3  ;;  %v247_v10 = vmul.f32 %v442_v4, %v442_v4 }
  0x15   : > { %v248_v13 = vmul.f32 %v443_v5, %v443_v5  ;;  %v249_v18 = vmul.f32 %v446_v11, %v446_v11  ;;  %v250_v22 = vmul.f32 %v447_v16, %v447_v16  ;;  %v251_v26 = vmul.f32 %v450_v20, %v450_v20 }
  0x16   : > { %v233_v12 = vadd.f32 %v442_v4, %v232_v7  ;;  %v253_v14 = vadd.f32 %v246_v9, %v245_v8  ;;  %v252_v29 = vmul.f32 %v451_v24, %v451_v24 }
  0x18   : > { %v234_v17 = vadd.f32 %v443_v5, %v233_v12  ;;  %v254_v19 = vadd.f32 %v253_v14, %v247_v10 }
  0x1a   : > { %v235_v21 = vadd.f32 %v446_v11, %v234_v17  ;;  %v255_v23 = vadd.f32 %v254_v19, %v248_v13 }
  0x1c   : > { %v236_v25 = vadd.f32 %v447_v16, %v235_v21  ;;  %v256_v27 = vadd.f32 %v255_v23, %v249_v18 }
  0x1e   : > { %v237_v28 = vadd.f32 %v450_v20, %v236_v25  ;;  %v257_v30 = vadd.f32 %v256_v27, %v250_v22 }
  0x20   : > { %v238_v31 = vadd.f32 %v451_v24, %v237_v28  ;;  %v258_v32 = vadd.f32 %v257_v30, %v251_v26 }
  0x22   : > { %v239_v33 = vrot.slane %v238_v31, 4  ;;  %v259_v34 = vadd.f32 %v258_v32, %v252_v29 }
  0x24   : > { %v240_v35 = vadd.f32 %v239_v33, %v238_v31  ;;  %v260_v36 = vrot.slane %v259_v34, 4 }
  0x26   : > { %v241_v37 = vrot.slane %v240_v35, 2  ;;  %v261_v38 = vadd.f32 %v260_v36, %v259_v34 }
  0x28   : > { %v242_v39 = vadd.f32 %v241_v37, %v240_v35  ;;  %v262_v40 = vrot.slane %v261_v38, 2 }
  0x2a   : > { %v243_v41 = vrot.slane %v242_v39, 1  ;;  %v263_v42 = vadd.f32 %v262_v40, %v261_v38 }
  0x2c   : > { %v244_v43 = vadd.f32 %v243_v41, %v242_v39  ;;  %v264_v44 = vrot.slane %v263_v42, 1 }
  0x2e   : > { %v268_v45 = vmul.f32 0.015625, %v244_v43  ;;  %v265_v46 = vadd.f32 %v264_v44, %v263_v42 }
  0x30   : > { %v269_v47 = vmul.f32 64.0, %v268_v45  ;;  %279 = vst [vmem:[#allocation3] sm:$0x1] %v268_v45 }
  0x32   : > { %v270_v48 = vmul.f32 %v269_v47, %v268_v45 }
  0x34   : > { %v271_v49 = vsub.f32 %v265_v46, %v270_v48 }
  0x36   : > { %v272_v50 = vmax.f32 %v271_v49, 0.0 }
  0x37   : > { %v309_v51 = vld [vmem:[#allocation3] sm:$0x1] }
  0x38   : > { %280 = vst [vmem:[#allocation4] sm:$0x1] %v272_v50  ;;  %310 = vst [vmem:[%s204_s19] sm:$0x1] %v309_v51 }
  0x3f   : > { %v306_v52 = vld [vmem:[#allocation4] sm:$0x1] }
  0x40   : > { %v308_v53 = vmul.f32 0.015625, %v306_v52 }
  0x42   : > { %v311_v54 = vadd.f32 1e-09, %v308_v53 }
  0x44   : > { %480 = vrsqrt.f32 %v311_v54 }
  0x4e   : > { %v481_v55 = vpop.eup %480 }
  0x4f   : > { %313 = vst [vmem:[%s210_s22] sm:$0x1] %v481_v55 }
  0x50 PF: > { %s13_s11 = sadd.s32 1, %s504_s11   ;;  %s565_s9 = smov %s500_s10 }
  0x51   : > { %p10_p5 = scmp.ge.s32.totalorder %s13_s11, 4   ;;  %s566_s10 = smov %s568_s12 }
  0x53   :  { %12 = sbr.rel (!%p10_p5) target bundleno = 2 (0x2), region = 78 }

// kernel: _stylebank_core.20
= control target key start
LH: loop header
LB: loop body
LE: loop exit
PB: predicated region body
PF: predicated region fallthrough
CT: control target
= control target key end

     0   :  { %s1120_s1 = inlined_call_operand.vmem [shape: bf16[384,128], index: 1, kind: input, shape index: {}]   ;;  %s1121_s0 = inlined_call_operand.vmem [shape: bf16[128,384], index: 0, kind: input, shape index: {}]   ;;  %s1122_s2 = inlined_call_operand.vmem [shape: bf16[128,128], index: 2, kind: output, shape index: {}]  }
   0x1   :  { %v881_v0 = vld [vmem:[%s1120_s1 + $0x40] sm:$0xff]   ;;  %v884_v3 = vld [vmem:[%s1120_s1 + $0x48] sm:$0xff]   ;;  %v887_v6 = vld [vmem:[%s1120_s1 + $0x50] sm:$0xff]  }
   0x2   :  { %v882_v1 = vld [vmem:[%s1120_s1] sm:$0xff]   ;;  %769 = vmatprep.subr.bf16.mxu0 %v881_v0  ;;  %v885_v4 = vld [vmem:[%s1120_s1 + $0x8] sm:$0xff]   ;;  %v888_v7 = vld [vmem:[%s1120_s1 + $0x10] sm:$0xff]  }
   0x3   :  { %v883_v2 = vld [vmem:[%s1120_s1 + $0x80] sm:$0xff]   ;;  %770 = vmatpush3.bf16.msra.mxu0 %v882_v1  ;;  %v886_v5 = vld [vmem:[%s1120_s1 + $0x88] sm:$0xff]   ;;  %v889_v8 = vld [vmem:[%s1120_s1 + $0x90] sm:$0xff]  }
   0x4   :  { %849 = vmatprep.subr.bf16.mxu1 %v883_v2  ;;  %771 = vmatprep.subr.bf16.mxu0 %v884_v3  ;;  %v890_v9 = vld [vmem:[%s1120_s1 + $0x58] sm:$0xff]   ;;  %v893_v12 = vld [vmem:[%s1120_s1 + $0x60] sm:$0xff]   ;;  %v896_v15 = vld [vmem:[%s1120_s1 + $0x68] sm:$0xff]  }
   0x5   :  { %850 = vmatpush3.bf16.msra.mxu1 %v883_v2  ;;  %v891_v10 = vld [vmem:[%s1120_s1 + $0x18] sm:$0xff]   ;;  %v895_v13 = vld [vmem:[%s1120_s1 + $0xa0] sm:$0xff]   ;;  %v898_v16 = vld [vmem:[%s1120_s1 + $0xa8] sm:$0xff]  }
   0x6   :  { %851 = vmatprep.subr.bf16.mxu1 %v886_v5  ;;  %v892_v11 = vld [vmem:[%s1120_s1 + $0x98] sm:$0xff]   ;;  %v894_v14 = vld [vmem:[%s1120_s1 + $0x20] sm:$0xff]   ;;  %v897_v17 = vld [vmem:[%s1120_s1 + $0x28] sm:$0xff]  }
   0x7   :  { %772 = vmatpush3.bf16.msra.mxu0 %v885_v4  ;;  %v899_v18 = vld [vmem:[%s1120_s1 + $0x70] sm:$0xff]   ;;  %v902_v21 = vld [vmem:[%s1120_s1 + $0x78] sm:$0xff]   ;;  %v905_v26 = vld [vmem:[%s1121_s0] ss:$12 sps:$4 sm:$0xff]  }
   0x8   :  { %773 = vmatprep.subr.bf16.mxu0 %v887_v6  ;;  %v900_v19 = vld [vmem:[%s1120_s1 + $0x30] sm:$0xff]   ;;  %v904_v22 = vld [vmem:[%s1120_s1 + $0xb8] sm:$0xff]   ;;  %v909_v28 = vld [vmem:[%s1121_s0 + $0x20] ss:$12 sps:$4 sm:$0xff]  }
   0x9   :  { %852 = vmatpush3.bf16.msra.mxu1 %v886_v5  ;;  %v901_v20 = vld [vmem:[%s1120_s1 + $0xb0] sm:$0xff]   ;;  %v903_v25 = vld [vmem:[%s1120_s1 + $0x38] sm:$0xff]   ;;  %v925_v36 = vld [vmem:[%s1121_s0 + $0x80] ss:$12 sps:$4 sm:$0xff]  }
   0xa   :  { %853 = vmatprep.subr.bf16.mxu1 %v889_v8  ;;  %v907_v23 = vld [vmem:[%s1121_s0 + $0x4] ss:$12 sps:$4 sm:$0xff]   ;;  %v908_v24 = vld [vmem:[%s1121_s0 + $0x8] ss:$12 sps:$4 sm:$0xff]   ;;  %v918_v35 = vld [vmem:[%s1121_s0 + $0x4c] ss:$12 sps:$4 sm:$0xff]  }
   0xb   :  { %774 = vmatpush3.bf16.msra.mxu0 %v888_v7  ;;  %396 = vmatprep.mubr.bf16.mxu0 %v907_v23  ;;  %v910_v27 = vld [vmem:[%s1121_s0 + $0x1c] ss:$12 sps:$4 sm:$0xff]   ;;  %v916_v29 = vld [vmem:[%s1121_s0 + $0x38] ss:$12 sps:$4 sm:$0xff]   ;;  %v913_v31 = vld [vmem:[%s1121_s0 + $0x34] ss:$12 sps:$4 sm:$0xff]  }
   0xc   :  { %775 = vmatprep.subr.bf16.mxu0 %v890_v9  ;;  %865 = vmatprep.mubr.bf16.mxu1 %v908_v24  ;;  %v912_v30 = vld [vmem:[%s1121_s0 + $0x18] ss:$12 sps:$4 sm:$0xff]   ;;  %v917_v32 = vld [vmem:[%s1121_s0 + $0x50] ss:$12 sps:$4 sm:$0xff]   ;;  %v924_v33 = vld [vmem:[%s1121_s0 + $0x68] ss:$12 sps:$4 sm:$0xff]  }
   0xd   :  { %854 = vmatpush3.bf16.msra.mxu1 %v889_v8  ;;  %v915_v34 = vld [vmem:[%s1121_s0 + $0x30] ss:$12 sps:$4 sm:$0xff]   ;;  %v932_v37 = vld [vmem:[%s1121_s0 + $0x98] ss:$12 sps:$4 sm:$0xff]   ;;  %v920_v38 = vld [vmem:[%s1121_s0 + $0x48] ss:$12 sps:$4 sm:$0xff]  }
   0xe   :  { %855 = vmatprep.subr.bf16.mxu1 %v892_v11  ;;  %v921_v39 = vld [vmem:[%s1121_s0 + $0x64] ss:$12 sps:$4 sm:$0xff]   ;;  %v923_v41 = vld [vmem:[%s1121_s0 + $0x60] ss:$12 sps:$4 sm:$0xff]   ;;  %v926_v42 = vld [vmem:[%s1121_s0 + $0x7c] ss:$12 sps:$4 sm:$0xff]  }
   0xf   :  { %776 = vmatpush3.bf16.msra.mxu0 %v891_v10  ;;  %v933_v40 = vld [vmem:[%s1121_s0 + $0xb0] ss:$12 sps:$4 sm:$0xff]   ;;  %v928_v43 = vld [vmem:[%s1121_s0 + $0x78] ss:$12 sps:$4 sm:$0xff]   ;;  %v929_v44 = vld [vmem:[%s1121_s0 + $0x94] ss:$12 sps:$4 sm:$0xff]  }
  0x10   :  { %777 = vmatprep.subr.bf16.mxu0 %v893_v12  ;;  %v931_v45 = vld [vmem:[%s1121_s0 + $0x90] ss:$12 sps:$4 sm:$0xff]   ;;  %v934_v46 = vld [vmem:[%s1121_s0 + $0xac] ss:$12 sps:$4 sm:$0xff]   ;;  %v936_v47 = vld [vmem:[%s1121_s0 + $0xa8] ss:$12 sps:$4 sm:$0xff]  }
  0x11   :  { %856 = vmatpush3.bf16.msra.mxu1 %v892_v11 }
  0x12   :  { %857 = vmatprep.subr.bf16.mxu1 %v895_v13 }
  0x13   :  { %778 = vmatpush3.bf16.msra.mxu0 %v894_v14 }
  0x14   :  { %779 = vmatprep.subr.bf16.mxu0 %v896_v15 }
  0x15   :  { %858 = vmatpush3.bf16.msra.mxu1 %v895_v13 }
  0x16   :  { %859 = vmatprep.subr.bf16.mxu1 %v898_v16 }
  0x17   :  { %780 = vmatpush3.bf16.msra.mxu0 %v897_v17 }
  0x18   :  { %781 = vmatprep.subr.bf16.mxu0 %v899_v18 }
  0x19   :  { %860 = vmatpush3.bf16.msra.mxu1 %v898_v16 }
  0x1a   :  { %861 = vmatprep.subr.bf16.mxu1 %v901_v20 }
  0x1b   :  { %782 = vmatpush3.bf16.msra.mxu0 %v900_v19 }
  0x1c   :  { %783 = vmatprep.subr.bf16.mxu0 %v902_v21 }
  0x1d   :  { %862 = vmatpush3.bf16.msra.mxu1 %v901_v20 }
  0x1e   :  { %863 = vmatprep.subr.bf16.mxu1 %v904_v22 }
  0x1f   :  { %784 = vmatpush3.bf16.msra.mxu0 %v903_v25 }
  0x21   :  { %864 = vmatpush3.bf16.msra.mxu1 %v904_v22 }
  0x22   :  { %397 = vmatmul.mubr.bf16.vlgmr.msra.gmra.mrb[0].mxu0 %v905_v26 }
  0x23   :  { %404 = vmatprep.mubr.bf16.mxu0 %v910_v27 }
  0x24   :  { %866 = vmatmul.mubr.bf16.vlgmr.msra.gmra.mrb[0].mxu1 %v909_v28 }
  0x25   :  { %869 = vmatprep.mubr.bf16.mxu1 %v916_v29 }
  0x2a   :  { %405 = vmatmul.mubr.bf16.gmra.mrb[4].mxu0 %v912_v30 }
  0x2b   :  { %412 = vmatprep.mubr.bf16.mxu0 %v913_v31 }
  0x2c   :  { %870 = vmatmul.mubr.bf16.gmra.mrb[4].mxu1 %v917_v32 }
  0x2d   :  { %873 = vmatprep.mubr.bf16.mxu1 %v924_v33 }
  0x32   :  { %413 = vmatmul.mubr.bf16.gmra.mrb[8].mxu0 %v915_v34 }
  0x33   :  { %420 = vmatprep.mubr.bf16.mxu0 %v918_v35 }
  0x34   :  { %874 = vmatmul.mubr.bf16.gmra.mrb[8].mxu1 %v925_v36 }
  0x35   :  { %877 = vmatprep.mubr.bf16.mxu1 %v932_v37 }
  0x3a   :  { %421 = vmatmul.mubr.bf16.gmra.mrb[12].mxu0 %v920_v38 }
  0x3b   :  { %428 = vmatprep.mubr.bf16.mxu0 %v921_v39 }
  0x3c   :  { %878 = vmatmul.mubr.bf16.gmra.mrb[12].mxu1 %v933_v40 }
  0x42   :  { %429 = vmatmul.mubr.bf16.gmra.mrb[16].mxu0 %v923_v41 }
  0x43   :  { %436 = vmatprep.mubr.bf16.mxu0 %v926_v42 }
  0x4a   :  { %437 = vmatmul.mubr.bf16.gmra.mrb[20].mxu0 %v928_v43 }
  0x4b   :  { %444 = vmatprep.mubr.bf16.mxu0 %v929_v44 }
  0x52   :  { %445 = vmatmul.mubr.bf16.gmra.mrb[24].mxu0 %v931_v45 }
  0x53   :  { %452 = vmatprep.mubr.bf16.mxu0 %v934_v46 }
  0x5a   :  { %453 = vmatmul.mubr.bf16.gmra.mrb[28].mxu0 %v936_v47 }
  0xf5   :  { %v785_v48 = vpop.f32.mrb[0].mxu0 }
  0xf6   :  { %v786_v49 = vpop.f32.mrb[1].mxu0 }
  0xf7   :  { %v787_v50 = vadd.f32 %v786_v49, %v785_v48  ;;  %v788_v51 = vpop.f32.mrb[2].mxu0  ;;  %v867_v52 = vpop.f32.mrb[0].mxu1 }
  0xf8   :  { %v789_v53 = vpop.f32.mrb[3].mxu0  ;;  %v495_v54 = vpop.f32.mrb[1].mxu1 }
  0xf9   :  { %v790_v55 = vadd.f32 %v789_v53, %v788_v51  ;;  %v496_v56 = vadd.f32 %v787_v50, %v495_v54  ;;  %v868_v57 = vpop.f32.mrb[2].mxu1 }
  0xfa   :  { %v498_v58 = vpop.f32.mrb[3].mxu1 }
  0xfb   :  { %v499_v59 = vadd.f32 %v790_v55, %v498_v58 }
  0xfd   :  { %v725_v60 = vpack.c.bf16 %v499_v59, %v496_v56  ;;  %v791_v61 = vpop.f32.mrb[4].mxu0 }
  0xfe   :  { %v792_v62 = vpop.f32.mrb[5].mxu0 }
  0xff   :  { %726 = vst [vmem:[%s1122_s2] sm:$0xff] %v725_v60   ;;  %v793_v63 = vadd.f32 %v792_v62, %v791_v61  ;;  %v794_v0 = vpop.f32.mrb[6].mxu0  ;;  %v871_v1 = vpop.f32.mrb[4].mxu1 }
 0x100   :  { %v795_v2 = vpop.f32.mrb[7].mxu0  ;;  %v511_v3 = vpop.f32.mrb[5].mxu1 }
 0x101   :  { %v504_v4 = vadd.f32 %v867_v52, %v793_v63  ;;  %v796_v5 = vadd.f32 %v795_v2, %v794_v0  ;;  %v872_v6 = vpop.f32.mrb[6].mxu1 }
 0x102   :  { %v514_v7 = vpop.f32.mrb[7].mxu1 }
 0x103   :  { %v507_v8 = vadd.f32 %v868_v57, %v796_v5 }
 0x105   :  { %v730_v9 = vpack.c.bf16 %v507_v8, %v504_v4  ;;  %v797_v10 = vpop.f32.mrb[8].mxu0 }
 0x106   :  { %v798_v11 = vpop.f32.mrb[9].mxu0 }
 0x107   :  { %762 = vst [vmem:[%s1122_s2 + $0x8] sm:$0xff] %v730_v9   ;;  %v799_v12 = vadd.f32 %v798_v11, %v797_v10  ;;  %v800_v13 = vpop.f32.mrb[10].mxu0  ;;  %v875_v14 = vpop.f32.mrb[8].mxu1 }
 0x108   :  { %v801_v15 = vpop.f32.mrb[11].mxu0  ;;  %v527_v16 = vpop.f32.mrb[9].mxu1 }
 0x109   :  { %v802_v17 = vadd.f32 %v801_v15, %v800_v13  ;;  %v512_v18 = vadd.f32 %v799_v12, %v511_v3  ;;  %v876_v19 = vpop.f32.mrb[10].mxu1 }
 0x10a   :  { %v530_v20 = vpop.f32.mrb[11].mxu1 }
 0x10b   :  { %v515_v21 = vadd.f32 %v802_v17, %v514_v7 }
 0x10d   :  { %v735_v22 = vpack.c.bf16 %v515_v21, %v512_v18  ;;  %v803_v23 = vpop.f32.mrb[12].mxu0 }
 0x10e   :  { %v804_v24 = vpop.f32.mrb[13].mxu0 }
 0x10f   :  { %763 = vst [vmem:[%s1122_s2 + $0x10] sm:$0xff] %v735_v22   ;;  %v805_v25 = vadd.f32 %v804_v24, %v803_v23  ;;  %v806_v26 = vpop.f32.mrb[14].mxu0  ;;  %v879_v27 = vpop.f32.mrb[12].mxu1 }
 0x110   :  { %v807_v28 = vpop.f32.mrb[15].mxu0  ;;  %v543_v29 = vpop.f32.mrb[13].mxu1 }
 0x111   :  { %v520_v30 = vadd.f32 %v871_v1, %v805_v25  ;;  %v808_v31 = vadd.f32 %v807_v28, %v806_v26  ;;  %v880_v32 = vpop.f32.mrb[14].mxu1 }
 0x112   :  { %v546_v33 = vpop.f32.mrb[15].mxu1 }
 0x113   :  { %v523_v34 = vadd.f32 %v872_v6, %v808_v31 }
 0x115   :  { %v740_v35 = vpack.c.bf16 %v523_v34, %v520_v30  ;;  %v809_v36 = vpop.f32.mrb[16].mxu0 }
 0x116   :  { %v810_v37 = vpop.f32.mrb[17].mxu0 }
 0x117   :  { %764 = vst [vmem:[%s1122_s2 + $0x18] sm:$0xff] %v740_v35   ;;  %v811_v38 = vadd.f32 %v810_v37, %v809_v36  ;;  %v812_v39 = vpop.f32.mrb[18].mxu0 }
 0x118   :  { %v813_v40 = vpop.f32.mrb[19].mxu0 }
 0x119   :  { %v814_v41 = vadd.f32 %v813_v40, %v812_v39  ;;  %v528_v42 = vadd.f32 %v811_v38, %v527_v16 }
 0x11b   :  { %v531_v43 = vadd.f32 %v814_v41, %v530_v20 }
 0x11d   :  { %v745_v44 = vpack.c.bf16 %v531_v43, %v528_v42  ;;  %v815_v45 = vpop.f32.mrb[20].mxu0 }
 0x11e   :  { %v816_v46 = vpop.f32.mrb[21].mxu0 }
 0x11f   :  { %765 = vst [vmem:[%s1122_s2 + $0x20] sm:$0xff] %v745_v44   ;;  %v817_v47 = vadd.f32 %v816_v46, %v815_v45  ;;  %v818_v48 = vpop.f32.mrb[22].mxu0 }
 0x120   :  { %v819_v49 = vpop.f32.mrb[23].mxu0 }
 0x121   :  { %v536_v50 = vadd.f32 %v875_v14, %v817_v47  ;;  %v820_v51 = vadd.f32 %v819_v49, %v818_v48 }
 0x123   :  { %v539_v52 = vadd.f32 %v876_v19, %v820_v51 }
 0x125   :  { %v750_v53 = vpack.c.bf16 %v539_v52, %v536_v50  ;;  %v821_v54 = vpop.f32.mrb[24].mxu0 }
 0x126   :  { %v822_v55 = vpop.f32.mrb[25].mxu0 }
 0x127   :  { %766 = vst [vmem:[%s1122_s2 + $0x28] sm:$0xff] %v750_v53   ;;  %v823_v56 = vadd.f32 %v822_v55, %v821_v54  ;;  %v824_v57 = vpop.f32.mrb[26].mxu0 }
 0x128   :  { %v825_v58 = vpop.f32.mrb[27].mxu0 }
 0x129   :  { %v826_v59 = vadd.f32 %v825_v58, %v824_v57  ;;  %v544_v60 = vadd.f32 %v823_v56, %v543_v29 }
 0x12b   :  { %v547_v61 = vadd.f32 %v826_v59, %v546_v33 }
 0x12d   :  { %v755_v62 = vpack.c.bf16 %v547_v61, %v544_v60  ;;  %v827_v63 = vpop.f32.mrb[28].mxu0 }
 0x12e   :  { %v828_v0 = vpop.f32.mrb[29].mxu0 }
 0x12f   :  { %767 = vst [vmem:[%s1122_s2 + $0x30] sm:$0xff] %v755_v62   ;;  %v829_v1 = vadd.f32 %v828_v0, %v827_v63  ;;  %v830_v2 = vpop.f32.mrb[30].mxu0 }
 0x130   :  { %v831_v3 = vpop.f32.mrb[31].mxu0 }
 0x131   :  { %v552_v4 = vadd.f32 %v879_v27, %v829_v1  ;;  %v832_v5 = vadd.f32 %v831_v3, %v830_v2 }
 0x133   :  { %v555_v6 = vadd.f32 %v880_v32, %v832_v5 }
 0x135   :  { %v760_v7 = vpack.c.bf16 %v555_v6, %v552_v4 }
 0x137   :  { %768 = vst [vmem:[%s1122_s2 + $0x38] sm:$0xff] %v760_v7  }

// kernel: _stylebank_core.22
= control target key start
LH: loop header
LB: loop body
LE: loop exit
PB: predicated region body
PF: predicated region fallthrough
CT: control target
= control target key end

     0   :  { %s783_s18 = smov 0   ;;  %s785_s19 = smov 0   ;;  %s837_s0 = inlined_call_operand.vmem [shape: bf16[2,64,128], index: 0, kind: input, shape index: {}]   ;;  %s838_s1 = inlined_call_operand.vmem [shape: f32[2,1,128], index: 1, kind: input, shape index: {}]   ;;  %s839_s2 = inlined_call_operand.vmem [shape: f32[2,1,128], index: 2, kind: input, shape index: {}]   ;;  %s840_s3 = inlined_call_operand.vmem [shape: f32[1,128], index: 3, kind: input, shape index: {}]   ;;  %s841_s4 = inlined_call_operand.vmem [shape: f32[1,128], index: 4, kind: input, shape index: {}]   ;;  %s842_s5 = inlined_call_operand.vmem [shape: bf16[2,64,128], index: 5, kind: output, shape index: {}]  }
   0x1   :  { %s787_s20 = smov 0  }
   0x2 LB: > { %s34_s21 = sadd.s32 1, %s747_s19  ;;  %p636_p0 = scmp.ge.s32.totalorder %s751_s20, 1  ;;  %s751_s20 = sphi %s787_s20, %s15_s20   ;;  %s747_s19 = sphi %s785_s19, %s844_s19   ;;  %s743_s18 = sphi %s783_s18, %s843_s18  }
   0x3   : > { %p36_p1 = scmp.ge.s32.totalorder %s34_s21, 2  ;;  %p264_p2 = scmp.lt.s32.totalorder %s751_s20, 3 }
   0x5   : > { %s846_s21 = smov (%p36_p1, %s34_s21), 0  ;;  %p265_p3 = pnand %p636_p0, %p264_p2 }
   0x6   : > { %p325_p4 = scmp.lt.s32.totalorder (!%p265_p3), %s743_s18, 1  ;;  %v403_v0 = vlaneseq (!%p265_p3)  ;;  %v400_v3 = vld [vmem:[%s840_s3] sm:$0x1] (!%p265_p3) }
   0x7   : > { %268 = sbr.rel (%p265_p3) target bundleno = 35 (0x23), region = 40  ;;  %v642_v26 = vld [vmem:[%s841_s4] ss:$0 sm:$0xff] (!%p265_p3) }
   0x8   : > { %v404_v1 = vshrl.u32 (!%p265_p3), %v403_v0, 7 }
   0xa   : > { %v405_v7 = vsub.s32 (!%p265_p3), 0, %v404_v1 }
   0xe   : > { %s848_s18 = smov (!%p325_p4, %s743_s18), 1 }
   0xf   : > { %s653_s22 = sshll.u32 %s848_s18, 5  ;;  %s342_s25 = scalar_lea.vmem %s838_s1, %s848_s18 }
  0x10   : > { %s335_s28 = scalar_lea.vmem %s837_s0, %s653_s22  ;;  %s348_s6 = scalar_lea.vmem %s839_s2, %s848_s18  ;;  %v641_v2 = vld [vmem:[%s342_s25] ss:$0 sm:$0xff] }
  0x11   : > { %v664_v4 = vld [vmem:[%s335_s28] sm:$0xff]   ;;  %v699_v5 = vld [vmem:[%s335_s28 + $0x8] sm:$0xff]   ;;  %v700_v6 = vld [vmem:[%s335_s28 + $0x10] sm:$0xff]   ;;  %s366_s13 = scalar_lea.vmem %s842_s5, %s653_s22 }
  0x12   : > { %v665_v8 = vunpack.c.l.bf16 %v664_v4  ;;  %v666_v9 = vunpack.c.h.bf16 %v664_v4  ;;  %v701_v10 = vld [vmem:[%s335_s28 + $0x18] sm:$0xff]   ;;  %v399_v11 = vld [vmem:[%s348_s6] sm:$0x1]  ;;  %v669_v12 = vunpack.c.l.bf16 %v699_v5  ;;  %v670_v13 = vunpack.c.h.bf16 %v699_v5 }
  0x13   : > { %v401_v14 = vmul.f32 %v400_v3, %v399_v11  ;;  %v673_v15 = vunpack.c.l.bf16 %v700_v6  ;;  %v674_v16 = vunpack.c.h.bf16 %v700_v6  ;;  %v677_v17 = vunpack.c.l.bf16 %v701_v10 }
  0x14   : > { %v391_v18 = vsub.f32 %v665_v8, %v641_v2  ;;  %v392_v19 = vsub.f32 %v666_v9, %v641_v2  ;;  %v393_v20 = vsub.f32 %v669_v12, %v641_v2  ;;  %v394_v21 = vsub.f32 %v670_v13, %v641_v2 }
  0x15   : > { %v406_v22 = vrot.slane %v401_v14, %v405_v7  ;;  %v395_v23 = vsub.f32 %v673_v15, %v641_v2  ;;  %v396_v24 = vsub.f32 %v674_v16, %v641_v2  ;;  %v678_v25 = vunpack.c.h.bf16 %v701_v10 }
  0x16   : > { %v397_v27 = vsub.f32 %v677_v17, %v641_v2 }
  0x17   : > { %v408_v28 = vmul.f32 %v406_v22, %v391_v18  ;;  %v409_v29 = vmul.f32 %v406_v22, %v392_v19  ;;  %v410_v30 = vmul.f32 %v406_v22, %v393_v20  ;;  %v411_v31 = vmul.f32 %v406_v22, %v394_v21 }
  0x18   : > { %v412_v32 = vmul.f32 %v406_v22, %v395_v23  ;;  %v413_v33 = vmul.f32 %v406_v22, %v396_v24  ;;  %v398_v34 = vsub.f32 %v678_v25, %v641_v2  ;;  %v414_v35 = vmul.f32 %v406_v22, %v397_v27 }
  0x19   : > { %v423_v36 = vadd.f32 %v642_v26, %v408_v28  ;;  %v424_v37 = vadd.f32 %v642_v26, %v409_v29  ;;  %v425_v38 = vadd.f32 %v642_v26, %v410_v30  ;;  %v426_v39 = vadd.f32 %v642_v26, %v411_v31 }
  0x1a   : > { %v427_v40 = vadd.f32 %v642_v26, %v412_v32  ;;  %v428_v41 = vadd.f32 %v642_v26, %v413_v33  ;;  %v415_v42 = vmul.f32 %v406_v22, %v398_v34  ;;  %v429_v43 = vadd.f32 %v642_v26, %v414_v35 }
  0x1b   : > { %v431_v44 = vmax.f32 %v423_v36, 0.0  ;;  %v432_v45 = vmax.f32 %v424_v37, 0.0  ;;  %v433_v46 = vmax.f32 %v425_v38, 0.0  ;;  %v434_v47 = vmax.f32 %v426_v39, 0.0 }
  0x1c   : > { %v435_v48 = vmax.f32 %v427_v40, 0.0  ;;  %v436_v49 = vmax.f32 %v428_v41, 0.0  ;;  %v430_v50 = vadd.f32 %v642_v26, %v415_v42  ;;  %v437_v51 = vmax.f32 %v429_v43, 0.0 }
  0x1d   : > { %v682_v52 = vpack.c.bf16 %v432_v45, %v431_v44  ;;  %v687_v53 = vpack.c.bf16 %v434_v47, %v433_v46 }
  0x1e   : > { %v692_v54 = vpack.c.bf16 %v436_v49, %v435_v48  ;;  %v438_v55 = vmax.f32 %v430_v50, 0.0 }
  0x1f   : > { %683 = vst [vmem:[%s366_s13] sm:$0xff] %v682_v52   ;;  %702 = vst [vmem:[%s366_s13 + $0x8] sm:$0xff] %v687_v53  }
  0x20   : > { %703 = vst [vmem:[%s366_s13 + $0x10] sm:$0xff] %v692_v54   ;;  %v697_v56 = vpack.c.bf16 %v438_v55, %v437_v51 }
  0x22   : > { %704 = vst [vmem:[%s366_s13 + $0x18] sm:$0xff] %v697_v56  }
  0x23 PF: > { %s15_s20 = sadd.s32 1, %s751_s20   ;;  %s843_s18 = smov %s747_s19 }
  0x24   : > { %p12_p5 = scmp.ge.s32.totalorder %s15_s20, 4   ;;  %s844_s19 = smov %s846_s21 }
  0x26   :  { %14 = sbr.rel (!%p12_p5) target bundleno = 2 (0x2), region = 82 }

// kernel: _stylebank_core.24
= control target key start
LH: loop header
LB: loop body
LE: loop exit
PB: predicated region body
PF: predicated region fallthrough
CT: control target
= control target key end

     0   :  { %s476_s9 = smov 0   ;;  %s478_s10 = smov 0   ;;  %s517_s0 = inlined_call_operand.vmem [shape: bf16[2,16,128], index: 0, kind: input, shape index: {}]   ;;  %s518_s1 = inlined_call_operand.vmem [shape: f32[2,1,128], index: 1, kind: output, shape index: {0}]   ;;  %s519_s2 = inlined_call_operand.vmem [shape: f32[2,1,128], index: 2, kind: output, shape index: {1}]  }
   0x1   :  { %s480_s11 = smov 0  }
   0x2 LB: > { %s32_s12 = sadd.s32 1, %s455_s10  ;;  %p400_p0 = scmp.ge.s32.totalorder %s459_s11, 1  ;;  %s459_s11 = sphi %s480_s11, %s13_s11   ;;  %s455_s10 = sphi %s478_s10, %s521_s10   ;;  %s451_s9 = sphi %s476_s9, %s520_s9  }
   0x3   : > { %p34_p1 = scmp.ge.s32.totalorder %s32_s12, 2  ;;  %p150_p2 = scmp.lt.s32.totalorder %s459_s11, 3 }
   0x5   : > { %s523_s12 = smov (%p34_p1, %s32_s12), 0  ;;  %p151_p3 = pnand %p400_p0, %p150_p2 }
   0x6   : > { %p187_p4 = scmp.lt.s32.totalorder (!%p151_p3), %s451_s9, 1 }
   0x7   : > { %154 = sbr.rel (%p151_p3) target bundleno = 68 (0x44), region = 24 }
   0xe   : > { %s525_s9 = smov (!%p187_p4, %s451_s9), 1 }
   0xf   : > { %s405_s13 = sshll.u32 %s525_s9, 3  ;;  %s204_s19 = scalar_lea.vmem %s518_s1, %s525_s9 }
  0x10   : > { %s197_s16 = scalar_lea.vmem %s517_s0, %s405_s13  ;;  %s210_s22 = scalar_lea.vmem %s519_s2, %s525_s9 }
  0x11   : > { %v407_v0 = vld [vmem:[%s197_s16] sm:$0xff]  }
  0x12   : > { %v408_v1 = vunpack.c.l.bf16 %v407_v0  ;;  %v409_v2 = vunpack.c.h.bf16 %v407_v0 }
  0x14   : > { %v220_v3 = vadd.f32 %v409_v2, %v408_v1  ;;  %v227_v4 = vmul.f32 %v408_v1, %v408_v1  ;;  %v228_v5 = vmul.f32 %v409_v2, %v409_v2 }
  0x16   : > { %v221_v6 = vrot.slane %v220_v3, 4  ;;  %v229_v7 = vadd.f32 %v228_v5, %v227_v4 }
  0x18   : > { %v222_v8 = vadd.f32 %v221_v6, %v220_v3  ;;  %v230_v9 = vrot.slane %v229_v7, 4 }
  0x1a   : > { %v223_v10 = vrot.slane %v222_v8, 2  ;;  %v231_v11 = vadd.f32 %v230_v9, %v229_v7 }
  0x1c   : > { %v224_v12 = vadd.f32 %v223_v10, %v222_v8  ;;  %v232_v13 = vrot.slane %v231_v11, 2 }
  0x1e   : > { %v225_v14 = vrot.slane %v224_v12, 1  ;;  %v233_v15 = vadd.f32 %v232_v13, %v231_v11 }
  0x20   : > { %v226_v16 = vadd.f32 %v225_v14, %v224_v12  ;;  %v234_v17 = vrot.slane %v233_v15, 1 }
  0x22   : > { %v238_v18 = vmul.f32 0.0625, %v226_v16  ;;  %v235_v19 = vadd.f32 %v234_v17, %v233_v15 }
  0x24   : > { %v239_v20 = vmul.f32 16.0, %v238_v18  ;;  %249 = vst [vmem:[#allocation3] sm:$0x1] %v238_v18 }
  0x26   : > { %v240_v21 = vmul.f32 %v239_v20, %v238_v18 }
  0x28   : > { %v241_v22 = vsub.f32 %v235_v19, %v240_v21 }
  0x2a   : > { %v242_v23 = vmax.f32 %v241_v22, 0.0 }
  0x2b   : > { %v279_v24 = vld [vmem:[#allocation3] sm:$0x1] }
  0x2c   : > { %250 = vst [vmem:[#allocation4] sm:$0x1] %v242_v23  ;;  %280 = vst [vmem:[%s204_s19] sm:$0x1] %v279_v24 }
  0x33   : > { %v276_v25 = vld [vmem:[#allocation4] sm:$0x1] }
  0x34   : > { %v278_v26 = vmul.f32 0.0625, %v276_v25 }
  0x36   : > { %v281_v27 = vadd.f32 1e-09, %v278_v26 }
  0x38   : > { %435 = vrsqrt.f32 %v281_v27 }
  0x42   : > { %v436_v28 = vpop.eup %435 }
  0x43   : > { %283 = vst [vmem:[%s210_s22] sm:$0x1] %v436_v28 }
  0x44 PF: > { %s13_s11 = sadd.s32 1, %s459_s11   ;;  %s520_s9 = smov %s455_s10 }
  0x45   : > { %p10_p5 = scmp.ge.s32.totalorder %s13_s11, 4   ;;  %s521_s10 = smov %s523_s12 }
  0x47   :  { %12 = sbr.rel (!%p10_p5) target bundleno = 2 (0x2), region = 78 }

// kernel: _stylebank_core.25
= control target key start
LH: loop header
LB: loop body
LE: loop exit
PB: predicated region body
PF: predicated region fallthrough
CT: control target
= control target key end

     0   :  { %s672_s18 = smov 0   ;;  %s674_s19 = smov 0   ;;  %s717_s0 = inlined_call_operand.vmem [shape: bf16[2,16,128], index: 0, kind: input, shape index: {}]   ;;  %s718_s1 = inlined_call_operand.vmem [shape: f32[2,1,128], index: 1, kind: input, shape index: {}]   ;;  %s719_s2 = inlined_call_operand.vmem [shape: f32[2,1,128], index: 2, kind: input, shape index: {}]   ;;  %s720_s3 = inlined_call_operand.vmem [shape: f32[1,128], index: 3, kind: input, shape index: {}]   ;;  %s721_s4 = inlined_call_operand.vmem [shape: f32[1,128], index: 4, kind: input, shape index: {}]   ;;  %s722_s5 = inlined_call_operand.vmem [shape: bf16[2,16,128], index: 5, kind: output, shape index: {}]  }
   0x1   :  { %s676_s20 = smov 0  }
   0x2 LB: > { %s34_s21 = sadd.s32 1, %s636_s19  ;;  %p570_p0 = scmp.ge.s32.totalorder %s640_s20, 1  ;;  %s640_s20 = sphi %s676_s20, %s15_s20   ;;  %s636_s19 = sphi %s674_s19, %s724_s19   ;;  %s632_s18 = sphi %s672_s18, %s723_s18  }
   0x3   : > { %p36_p1 = scmp.ge.s32.totalorder %s34_s21, 2  ;;  %p264_p2 = scmp.lt.s32.totalorder %s640_s20, 3 }
   0x5   : > { %s726_s21 = smov (%p36_p1, %s34_s21), 0  ;;  %p265_p3 = pnand %p570_p0, %p264_p2 }
   0x6   : > { %p325_p4 = scmp.lt.s32.totalorder (!%p265_p3), %s632_s18, 1  ;;  %v385_v0 = vlaneseq (!%p265_p3)  ;;  %v382_v2 = vld [vmem:[%s720_s3] sm:$0x1] (!%p265_p3) }
   0x7   : > { %268 = sbr.rel (%p265_p3) target bundleno = 32 (0x20), region = 40  ;;  %v576_v13 = vld [vmem:[%s721_s4] ss:$0 sm:$0xff] (!%p265_p3) }
   0x8   : > { %v386_v1 = vshrl.u32 (!%p265_p3), %v385_v0, 7 }
   0xa   : > { %v387_v3 = vsub.s32 (!%p265_p3), 0, %v386_v1 }
   0xe   : > { %s728_s18 = smov (!%p325_p4, %s632_s18), 1 }
   0xf   : > { %s581_s22 = sshll.u32 %s728_s18, 3  ;;  %s342_s25 = scalar_lea.vmem %s718_s1, %s728_s18 }
  0x10   : > { %s335_s30 = scalar_lea.vmem %s717_s0, %s581_s22  ;;  %s348_s8 = scalar_lea.vmem %s719_s2, %s728_s18  ;;  %v575_v5 = vld [vmem:[%s342_s25] ss:$0 sm:$0xff] }
  0x11   : > { %v586_v4 = vld [vmem:[%s335_s30] sm:$0xff]   ;;  %s366_s13 = scalar_lea.vmem %s722_s5, %s581_s22 }
  0x12   : > { %v381_v6 = vld [vmem:[%s348_s8] sm:$0x1]  ;;  %v587_v7 = vunpack.c.l.bf16 %v586_v4  ;;  %v588_v8 = vunpack.c.h.bf16 %v586_v4 }
  0x13   : > { %v383_v9 = vmul.f32 %v382_v2, %v381_v6 }
  0x14   : > { %v379_v10 = vsub.f32 %v587_v7, %v575_v5  ;;  %v380_v11 = vsub.f32 %v588_v8, %v575_v5 }
  0x15   : > { %v388_v12 = vrot.slane %v383_v9, %v387_v3 }
  0x17   : > { %v390_v14 = vmul.f32 %v388_v12, %v379_v10  ;;  %v391_v15 = vmul.f32 %v388_v12, %v380_v11 }
  0x19   : > { %v399_v16 = vadd.f32 %v576_v13, %v390_v14  ;;  %v400_v17 = vadd.f32 %v576_v13, %v391_v15 }
  0x1b   : > { %v401_v18 = vmax.f32 %v399_v16, 0.0  ;;  %v402_v19 = vmax.f32 %v400_v17, 0.0 }
  0x1d   : > { %v592_v20 = vpack.c.bf16 %v402_v19, %v401_v18 }
  0x1f   : > { %593 = vst [vmem:[%s366_s13] sm:$0xff] %v592_v20  }
  0x20 PF: > { %s15_s20 = sadd.s32 1, %s640_s20   ;;  %s723_s18 = smov %s636_s19 }
  0x21   : > { %p12_p5 = scmp.ge.s32.totalorder %s15_s20, 4   ;;  %s724_s19 = smov %s726_s21 }
  0x23   :  { %14 = sbr.rel (!%p12_p5) target bundleno = 2 (0x2), region = 82 }

// kernel: _stylebank_core.23
= control target key start
LH: loop header
LB: loop body
LE: loop exit
PB: predicated region body
PF: predicated region fallthrough
CT: control target
= control target key end

     0   :  { %s947_s1 = inlined_call_operand.vmem [shape: bf16[640,128], index: 1, kind: input, shape index: {}]   ;;  %s948_s0 = inlined_call_operand.vmem [shape: bf16[32,640], index: 0, kind: input, shape index: {}]   ;;  %s949_s2 = inlined_call_operand.vmem [shape: bf16[32,128], index: 2, kind: output, shape index: {}]  }
   0x1   :  { %v722_v0 = vld [vmem:[%s947_s1 + $0x40] sm:$0xff]   ;;  %v726_v4 = vld [vmem:[%s947_s1 + $0x48] sm:$0xff]   ;;  %v730_v8 = vld [vmem:[%s947_s1 + $0x50] sm:$0xff]  }
   0x2   :  { %v723_v1 = vld [vmem:[%s947_s1 + $0xc0] sm:$0xff]   ;;  %636 = vmatprep.subr.bf16.mxu0 %v722_v0  ;;  %v727_v5 = vld [vmem:[%s947_s1 + $0xc8] sm:$0xff]   ;;  %v731_v9 = vld [vmem:[%s947_s1 + $0xd0] sm:$0xff]  }
   0x3   :  { %v724_v2 = vld [vmem:[%s947_s1] sm:$0xff]   ;;  %664 = vmatprep.subr.bf16.mxu1 %v723_v1  ;;  %v728_v6 = vld [vmem:[%s947_s1 + $0x8] sm:$0xff]   ;;  %v732_v10 = vld [vmem:[%s947_s1 + $0x10] sm:$0xff]  }
   0x4   :  { %v725_v3 = vld [vmem:[%s947_s1 + $0x80] sm:$0xff]   ;;  %637 = vmatpush3.bf16.msra.mxu0 %v724_v2  ;;  %v729_v7 = vld [vmem:[%s947_s1 + $0x88] sm:$0xff]   ;;  %v733_v11 = vld [vmem:[%s947_s1 + $0x90] sm:$0xff]  }
   0x5   :  { %665 = vmatpush3.bf16.msra.mxu1 %v725_v3  ;;  %638 = vmatprep.subr.bf16.mxu0 %v726_v4  ;;  %v734_v12 = vld [vmem:[%s947_s1 + $0x58] sm:$0xff]   ;;  %v738_v16 = vld [vmem:[%s947_s1 + $0x60] sm:$0xff]   ;;  %v742_v20 = vld [vmem:[%s947_s1 + $0x68] sm:$0xff]  }
   0x6   :  { %666 = vmatprep.subr.bf16.mxu1 %v727_v5  ;;  %v735_v13 = vld [vmem:[%s947_s1 + $0xd8] sm:$0xff]   ;;  %v739_v17 = vld [vmem:[%s947_s1 + $0xe0] sm:$0xff]   ;;  %v743_v21 = vld [vmem:[%s947_s1 + $0xe8] sm:$0xff]  }
   0x7   :  { %v736_v14 = vld [vmem:[%s947_s1 + $0x18] sm:$0xff]   ;;  %v740_v18 = vld [vmem:[%s947_s1 + $0x20] sm:$0xff]   ;;  %v744_v22 = vld [vmem:[%s947_s1 + $0x28] sm:$0xff]  }
   0x8   :  { %639 = vmatpush3.bf16.msra.mxu0 %v728_v6  ;;  %v737_v15 = vld [vmem:[%s947_s1 + $0x98] sm:$0xff]   ;;  %v741_v19 = vld [vmem:[%s947_s1 + $0xa0] sm:$0xff]   ;;  %v745_v23 = vld [vmem:[%s947_s1 + $0xa8] sm:$0xff]  }
   0x9   :  { %667 = vmatpush3.bf16.msra.mxu1 %v729_v7  ;;  %640 = vmatprep.subr.bf16.mxu0 %v730_v8  ;;  %v746_v24 = vld [vmem:[%s947_s1 + $0x70] sm:$0xff]   ;;  %v750_v28 = vld [vmem:[%s947_s1 + $0x78] sm:$0xff]   ;;  %v759_v35 = vld [vmem:[%s948_s0 + $0xc] ss:$20 sps:$4 sm:$0xff]  }
   0xa   :  { %668 = vmatprep.subr.bf16.mxu1 %v731_v9  ;;  %v747_v25 = vld [vmem:[%s947_s1 + $0xf0] sm:$0xff]   ;;  %v751_v29 = vld [vmem:[%s947_s1 + $0xf8] sm:$0xff]   ;;  %v760_v36 = vld [vmem:[%s947_s1 + $0x100] sm:$0xff]   ;;  %477 = vmatprep.mubr.bf16.mxu1 %v759_v35 }
   0xb   :  { %v748_v26 = vld [vmem:[%s947_s1 + $0x30] sm:$0xff]   ;;  %v752_v30 = vld [vmem:[%s947_s1 + $0x38] sm:$0xff]   ;;  %v761_v37 = vld [vmem:[%s947_s1 + $0x108] sm:$0xff]  }
   0xc   :  { %641 = vmatpush3.bf16.msra.mxu0 %v732_v10  ;;  %v749_v27 = vld [vmem:[%s947_s1 + $0xb0] sm:$0xff]   ;;  %v753_v31 = vld [vmem:[%s947_s1 + $0xb8] sm:$0xff]   ;;  %v765_v39 = vld [vmem:[%s948_s0 + $0x2c] ss:$20 sps:$4 sm:$0xff]  }
   0xd   :  { %669 = vmatpush3.bf16.msra.mxu1 %v733_v11  ;;  %642 = vmatprep.subr.bf16.mxu0 %v734_v12  ;;  %v754_v32 = vld [vmem:[%s948_s0] ss:$20 sps:$4 sm:$0xff]   ;;  %v756_v33 = vld [vmem:[%s948_s0 + $0x4] ss:$20 sps:$4 sm:$0xff]   ;;  %v757_v34 = vld [vmem:[%s948_s0 + $0x8] ss:$20 sps:$4 sm:$0xff]  }
   0xe   :  { %670 = vmatprep.subr.bf16.mxu1 %v735_v13  ;;  %428 = vmatprep.mubr.bf16.mxu0 %v756_v33  ;;  %v762_v38 = vld [vmem:[%s947_s1 + $0x110] sm:$0xff]   ;;  %v763_v41 = vld [vmem:[%s947_s1 + $0x118] sm:$0xff]   ;;  %v764_v45 = vld [vmem:[%s947_s1 + $0x120] sm:$0xff]  }
   0xf   :  { %v767_v40 = vld [vmem:[%s948_s0 + $0x34] ss:$20 sps:$4 sm:$0xff]   ;;  %v771_v43 = vld [vmem:[%s948_s0 + $0x30] ss:$20 sps:$4 sm:$0xff]   ;;  %v773_v48 = vld [vmem:[%s947_s1 + $0x138] sm:$0xff]  }
  0x10   :  { %643 = vmatpush3.bf16.msra.mxu0 %v736_v14  ;;  %v770_v42 = vld [vmem:[%s948_s0 + $0x28] ss:$20 sps:$4 sm:$0xff]   ;;  %v774_v44 = vld [vmem:[%s948_s0 + $0x10] ss:$20 sps:$4 sm:$0xff]   ;;  %v775_v49 = vld [vmem:[%s948_s0 + $0x38] ss:$20 sps:$4 sm:$0xff]  }
  0x11   :  { %671 = vmatpush3.bf16.msra.mxu1 %v737_v15  ;;  %644 = vmatprep.subr.bf16.mxu0 %v738_v16  ;;  %v769_v46 = vld [vmem:[%s947_s1 + $0x128] sm:$0xff]   ;;  %v772_v47 = vld [vmem:[%s947_s1 + $0x130] sm:$0xff]  }
  0x12   :  { %672 = vmatprep.subr.bf16.mxu1 %v739_v17 }
  0x14   :  { %645 = vmatpush3.bf16.msra.mxu0 %v740_v18 }
  0x15   :  { %673 = vmatpush3.bf16.msra.mxu1 %v741_v19  ;;  %646 = vmatprep.subr.bf16.mxu0 %v742_v20 }
  0x16   :  { %674 = vmatprep.subr.bf16.mxu1 %v743_v21 }
  0x18   :  { %647 = vmatpush3.bf16.msra.mxu0 %v744_v22 }
  0x19   :  { %675 = vmatpush3.bf16.msra.mxu1 %v745_v23  ;;  %648 = vmatprep.subr.bf16.mxu0 %v746_v24 }
  0x1a   :  { %676 = vmatprep.subr.bf16.mxu1 %v747_v25 }
  0x1c   :  { %649 = vmatpush3.bf16.msra.mxu0 %v748_v26 }
  0x1d   :  { %677 = vmatpush3.bf16.msra.mxu1 %v749_v27  ;;  %650 = vmatprep.subr.bf16.mxu0 %v750_v28 }
  0x1e   :  { %678 = vmatprep.subr.bf16.mxu1 %v751_v29 }
  0x20   :  { %651 = vmatpush3.bf16.msra.mxu0 %v752_v30 }
  0x21   :  { %679 = vmatpush3.bf16.msra.mxu1 %v753_v31  ;;  %702 = vmatprep.subr.bf16.mxu0 %v760_v36 }
  0x23   :  { %429 = vmatmul.mubr.bf16.vlgmr.msra.gmra.mrb[0].mxu0 %v754_v32 }
  0x24   :  { %478 = vmatmul.mubr.bf16.vlgmr.msra.gmra.mrb[0].mxu1 %v757_v34  ;;  %703 = vmatpush3.bf16.msra.mxu0 %v760_v36 }
  0x25   :  { %704 = vmatprep.subr.bf16.mxu0 %v761_v37  ;;  %436 = vmatprep.mubr.bf16.mxu0 %v765_v39 }
  0x26   :  { %485 = vmatprep.mubr.bf16.mxu1 %v767_v40 }
  0x28   :  { %705 = vmatpush3.bf16.msra.mxu0 %v761_v37 }
  0x29   :  { %706 = vmatprep.subr.bf16.mxu0 %v762_v38 }
  0x2b   :  { %437 = vmatmul.mubr.bf16.gmra.mrb[4].mxu0 %v770_v42 }
  0x2c   :  { %486 = vmatmul.mubr.bf16.gmra.mrb[4].mxu1 %v771_v43  ;;  %707 = vmatpush3.bf16.msra.mxu0 %v762_v38 }
  0x2d   :  { %708 = vmatprep.subr.bf16.mxu0 %v763_v41  ;;  %718 = vmatprep.mubr.bf16.mxu0 %v774_v44 }
  0x30   :  { %709 = vmatpush3.bf16.msra.mxu0 %v763_v41 }
  0x31   :  { %710 = vmatprep.subr.bf16.mxu0 %v764_v45 }
  0x34   :  { %711 = vmatpush3.bf16.msra.mxu0 %v764_v45 }
  0x35   :  { %712 = vmatprep.subr.bf16.mxu0 %v769_v46 }
  0x38   :  { %713 = vmatpush3.bf16.msra.mxu0 %v769_v46 }
  0x39   :  { %714 = vmatprep.subr.bf16.mxu0 %v772_v47 }
  0x3c   :  { %715 = vmatpush3.bf16.msra.mxu0 %v772_v47 }
  0x3d   :  { %716 = vmatprep.subr.bf16.mxu0 %v773_v48 }
  0x40   :  { %717 = vmatpush3.bf16.msra.mxu0 %v773_v48 }
  0x43   :  { %719 = vmatmul.mubr.bf16.vlgmr.msra.gmra.mrb[8].mxu0 %v775_v49 }
  0xf6   :  { %v652_v50 = vpop.f32.mrb[0].mxu0 }
  0xf7   :  { %v680_v51 = vpop.f32.mrb[0].mxu1  ;;  %v653_v52 = vpop.f32.mrb[1].mxu0 }
  0xf8   :  { %v654_v53 = vadd.f32 %v653_v52, %v652_v50  ;;  %v681_v54 = vpop.f32.mrb[1].mxu1  ;;  %v655_v55 = vpop.f32.mrb[2].mxu0 }
  0xf9   :  { %v682_v56 = vadd.f32 %v681_v54, %v680_v51  ;;  %v683_v57 = vpop.f32.mrb[2].mxu1  ;;  %v656_v58 = vpop.f32.mrb[3].mxu0 }
  0xfa   :  { %v657_v59 = vadd.f32 %v656_v58, %v655_v55  ;;  %v684_v60 = vpop.f32.mrb[3].mxu1 }
  0xfb   :  { %v685_v61 = vadd.f32 %v684_v60, %v683_v57  ;;  %v480_v62 = vadd.f32 %v682_v56, %v654_v53 }
  0xfd   :  { %v483_v63 = vadd.f32 %v685_v61, %v657_v59 }
  0xfe   :  { %v658_v0 = vpop.f32.mrb[4].mxu0 }
  0xff   :  { %v686_v1 = vpop.f32.mrb[4].mxu1  ;;  %v659_v2 = vpop.f32.mrb[5].mxu0 }
 0x100   :  { %v660_v3 = vadd.f32 %v659_v2, %v658_v0  ;;  %v687_v4 = vpop.f32.mrb[5].mxu1  ;;  %v661_v5 = vpop.f32.mrb[6].mxu0 }
 0x101   :  { %v688_v6 = vadd.f32 %v687_v4, %v686_v1  ;;  %v689_v7 = vpop.f32.mrb[6].mxu1  ;;  %v662_v8 = vpop.f32.mrb[7].mxu0 }
 0x102   :  { %v663_v9 = vadd.f32 %v662_v8, %v661_v5  ;;  %v690_v10 = vpop.f32.mrb[7].mxu1 }
 0x103   :  { %v691_v11 = vadd.f32 %v690_v10, %v689_v7  ;;  %v488_v12 = vadd.f32 %v688_v6, %v660_v3 }
 0x105   :  { %v491_v13 = vadd.f32 %v691_v11, %v663_v9 }
 0x116   :  { %v720_v14 = vpop.f32.mrb[8].mxu0 }
 0x117   :  { %v537_v15 = vadd.f32 %v720_v14, %v488_v12  ;;  %v528_v16 = vpop.f32.mrb[9].mxu0 }
 0x118   :  { %v529_v17 = vadd.f32 %v528_v16, %v480_v62  ;;  %v721_v18 = vpop.f32.mrb[10].mxu0 }
 0x119   :  { %v540_v19 = vadd.f32 %v721_v18, %v491_v13  ;;  %v531_v20 = vpop.f32.mrb[11].mxu0 }
 0x11a   :  { %v532_v21 = vadd.f32 %v531_v20, %v483_v63 }
 0x11b   :  { %v633_v22 = vpack.c.bf16 %v540_v19, %v537_v15 }
 0x11c   :  { %v628_v23 = vpack.c.bf16 %v532_v21, %v529_v17 }
 0x11d   :  { %635 = vst [vmem:[%s949_s2 + $0x8] sm:$0xff] %v633_v22  }
 0x11e   :  { %629 = vst [vmem:[%s949_s2] sm:$0xff] %v628_v23  }

// kernel: _stylebank_core.26
= control target key start
LH: loop header
LB: loop body
LE: loop exit
PB: predicated region body
PF: predicated region fallthrough
CT: control target
= control target key end

     0   :  { %s1771_s0 = inlined_call_operand.vmem [shape: s32[2], index: 0, kind: input, shape index: {}]   ;;  %s1772_s1 = inlined_call_operand.vmem [shape: bf16[2,16,1152], index: 1, kind: input, shape index: {}]   ;;  %s1773_s2 = inlined_call_operand.vmem [shape: bf16[2,1152,128], index: 2, kind: input, shape index: {}]   ;;  %s1774_s3 = inlined_call_operand.vmem [shape: f32[2,1,128], index: 3, kind: input, shape index: {}]   ;;  %s1775_s4 = inlined_call_operand.vmem [shape: bf16[2,16,128], index: 4, kind: output, shape index: {}]  }
   0x1   :  { %s9_s17 = sshll.u32 %s1771_s0, 4  ;;  %s10_s17 = int_to_ptr.vmem [resolvable:$true] %s9_s17 }
   0x2   :  { %s1568_s18 = scalar_lea.vmem %s10_s17, 16  ;;  %p1573_p1 = scmp.lt.s32.totalorder %s10_s17, %s10_s17 }
   0x3   :  { %p1569_p0 = scmp.ne.s32.totalorder %s10_s17, %s1568_s18  ;;  %p1574_p2 = scmp.lt.s32.totalorder %s1568_s18, %s1568_s18 }
   0x5   :  { %p1575_p3 = por %p1574_p2, %p1573_p1 }
   0x7   :  { %p1576_p4 = pnand %p1575_p3, %p1569_p0 }
   0x9   :  { %1579 = shalt.err (!%p1576_p4)  }
   0xa   :  { %s1606_s19 = smov [#allocation3]  }
   0xb   :  { %12 = dma.vmem_to_smem %s10_s17, 16, %s1606_s19, [#allocation2] }
   0xc   :  { %1592 = dma.done.wait [#allocation2], 16 }
   0xd   :  { %1593 = vsyncadd [#allocation2], 4294967280 }
   0xe   :  { %14 = sfence }
   0xf   :  { %s1637_s20 = smov 0   ;;  %s1639_s21 = smov 0  }
  0x10   :  { %s1641_s22 = smov 0  }
  0x11 LB: > { %s32_s0 = sadd.s32 1, %s1600_s21  ;;  %p1238_p5 = scmp.ge.s32.totalorder %s1604_s22, 1  ;;  %s1604_s22 = sphi %s1641_s22, %s20_s22   ;;  %s1600_s21 = sphi %s1639_s21, %s1777_s21   ;;  %s1596_s20 = sphi %s1637_s20, %s1776_s20  }
  0x12   : > { %p34_p6 = scmp.ge.s32.totalorder %s32_s0, 2  ;;  %p192_p7 = scmp.lt.s32.totalorder %s1604_s22, 3 }
  0x14   : > { %s1779_s0 = smov (%p34_p6, %s32_s0), 0  ;;  %p193_p8 = pnand %p1238_p5, %p192_p7 }
  0x15   : > { %s246_s23 = sld [smem:[#allocation3 + %s1596_s20]] (!%p193_p8)  ;;  %p236_p9 = scmp.lt.s32.totalorder (!%p193_p8), %s1596_s20, 1  ;;  %vm1608_vm0 = vmmov (!%p193_p8), 0  }
  0x16   : > { %196 = sbr.rel (%p193_p8) target bundleno = 351 (0x15f), region = 32  ;;  %s253_s7 = sld [smem:[#allocation3 + %s1596_s20]] (!%p193_p8) }
  0x1b   : > { %p247_p10 = scmp.lt.s32.totalorder (!%p193_p8), %s246_s23, 1 }
  0x1c   : > { %p254_p11 = scmp.lt.s32.totalorder (!%p193_p8), %s253_s7, 1 }
  0x1d   : > { %s1660_s24 = scalar_select %p236_p9, %s1596_s20, 1 }
  0x1e   : > { %s1781_s23 = smov (!%p247_p10, %s246_s23), 1  ;;  %s1783_s7 = smov (!%p254_p11, %s253_s7), 1 }
  0x1f   : > { %s1454_s25 = smul.u32 72, %s1660_s24  ;;  %s256_s10 = scalar_lea.vmem %s1774_s3, %s1783_s7 }
  0x20   : > { %s1455_s29 = smul.u32 576, %s1781_s23  ;;  %s1329_s11 = sshll.u32 %s1660_s24, 3 }
  0x21   : > { %s1666_s28 = scalar_lea.vmem %s1772_s1, %s1454_s25  ;;  %s266_s14 = scalar_lea.vmem %s1775_s4, %s1329_s11 }
  0x22   : > { %v1516_v0 = vld [vmem:[%s1666_s28 + $0x4] ss:$36 sps:$4 sm:$0xff]   ;;  %v1521_v1 = vld [vmem:[%s1666_s28 + $0xc] ss:$36 sps:$4 sm:$0xff]   ;;  %s1673_s6 = scalar_lea.vmem %s1773_s2, %s1455_s29  ;;  %v1554_v33 = vld [vmem:[%s1666_s28 + $0x14] ss:$36 sps:$4 sm:$0xff]  }
  0x23   : > { %940 = vmatprep.mubr.bf16.mxu0 %v1516_v0  ;;  %981 = vmatprep.mubr.bf16.mxu1 %v1521_v1  ;;  %v1483_v2 = vld [vmem:[%s1673_s6 + $0x40] sm:$0xff]   ;;  %v1487_v6 = vld [vmem:[%s1673_s6 + $0x48] sm:$0xff]   ;;  %v1491_v10 = vld [vmem:[%s1673_s6 + $0x50] sm:$0xff]  }
  0x24   : > { %v1484_v3 = vld [vmem:[%s1673_s6] sm:$0xff]   ;;  %1337 = vmatprep.subr.bf16.mxu0 %v1483_v2  ;;  %v1488_v7 = vld [vmem:[%s1673_s6 + $0x8] sm:$0xff]   ;;  %v1492_v11 = vld [vmem:[%s1673_s6 + $0x10] sm:$0xff]  }
  0x25   : > { %v1485_v4 = vld [vmem:[%s1673_s6 + $0xc0] sm:$0xff]   ;;  %1338 = vmatpush3.bf16.msra.mxu0 %v1484_v3  ;;  %v1489_v8 = vld [vmem:[%s1673_s6 + $0xc8] sm:$0xff]   ;;  %v1493_v12 = vld [vmem:[%s1673_s6 + $0xd0] sm:$0xff]  }
  0x26   : > { %v1486_v5 = vld [vmem:[%s1673_s6 + $0x80] sm:$0xff]   ;;  %1359 = vmatprep.subr.bf16.mxu1 %v1485_v4  ;;  %1339 = vmatprep.subr.bf16.mxu0 %v1487_v6  ;;  %v1490_v9 = vld [vmem:[%s1673_s6 + $0x88] sm:$0xff]   ;;  %v1494_v13 = vld [vmem:[%s1673_s6 + $0x90] sm:$0xff]  }
  0x27   : > { %1360 = vmatpush3.bf16.msra.mxu1 %v1486_v5  ;;  %v1495_v14 = vld [vmem:[%s1673_s6 + $0x58] sm:$0xff]   ;;  %v1499_v18 = vld [vmem:[%s1673_s6 + $0x60] sm:$0xff]   ;;  %v1503_v22 = vld [vmem:[%s1673_s6 + $0x68] sm:$0xff]  }
  0x28   : > { %1361 = vmatprep.subr.bf16.mxu1 %v1489_v8  ;;  %v1496_v15 = vld [vmem:[%s1673_s6 + $0x18] sm:$0xff]   ;;  %v1500_v19 = vld [vmem:[%s1673_s6 + $0x20] sm:$0xff]   ;;  %v1504_v23 = vld [vmem:[%s1673_s6 + $0x28] sm:$0xff]   ;;  %v1607_v8 = vmov 0.0  }
  0x29   : > { %1340 = vmatpush3.bf16.msra.mxu0 %v1488_v7  ;;  %v1497_v16 = vld [vmem:[%s1673_s6 + $0xd8] sm:$0xff]   ;;  %v1501_v20 = vld [vmem:[%s1673_s6 + $0xe0] sm:$0xff]   ;;  %v1505_v24 = vld [vmem:[%s1673_s6 + $0xe8] sm:$0xff]  }
  0x2a   : > { %1341 = vmatprep.subr.bf16.mxu0 %v1491_v10  ;;  %v1498_v17 = vld [vmem:[%s1673_s6 + $0x98] sm:$0xff]   ;;  %v1502_v21 = vld [vmem:[%s1673_s6 + $0xa0] sm:$0xff]   ;;  %v1506_v25 = vld [vmem:[%s1673_s6 + $0xa8] sm:$0xff]  }
  0x2b   : > { %1362 = vmatpush3.bf16.msra.mxu1 %v1490_v9  ;;  %v1507_v26 = vld [vmem:[%s1673_s6 + $0x70] sm:$0xff]   ;;  %v1511_v30 = vld [vmem:[%s1673_s6 + $0x78] sm:$0xff]   ;;  %v1514_v31 = vld [vmem:[%s1666_s28] ss:$36 sps:$4 sm:$0xff]  }
  0x2c   : > { %1363 = vmatprep.subr.bf16.mxu1 %v1493_v12  ;;  %v1508_v27 = vld [vmem:[%s1673_s6 + $0x30] sm:$0xff]   ;;  %v1512_v32 = vld [vmem:[%s1673_s6 + $0x38] sm:$0xff]   ;;  %v1519_v35 = vld [vmem:[%s1666_s28 + $0x8] ss:$36 sps:$4 sm:$0xff]  }
  0x2d   : > { %1342 = vmatpush3.bf16.msra.mxu0 %v1492_v11  ;;  %v1509_v28 = vld [vmem:[%s1673_s6 + $0xf0] sm:$0xff]   ;;  %v1513_v34 = vld [vmem:[%s1673_s6 + $0xf8] sm:$0xff]   ;;  %v1518_v38 = vld [vmem:[%s1673_s6 + $0x140] sm:$0xff]  }
  0x2e   : > { %1343 = vmatprep.subr.bf16.mxu0 %v1495_v14  ;;  %v1510_v29 = vld [vmem:[%s1673_s6 + $0xb0] sm:$0xff]   ;;  %v1517_v36 = vld [vmem:[%s1673_s6 + $0xb8] sm:$0xff]   ;;  %v1522_v39 = vld [vmem:[%s1673_s6 + $0x100] sm:$0xff]  }
  0x2f   : > { %1364 = vmatpush3.bf16.msra.mxu1 %v1494_v13  ;;  %v1558_v37 = vld [vmem:[%s1666_s28 + $0x1c] ss:$36 sps:$4 sm:$0xff]   ;;  %v1525_v42 = vld [vmem:[%s1673_s6 + $0x148] sm:$0xff]   ;;  %v1529_v46 = vld [vmem:[%s1673_s6 + $0x150] sm:$0xff]  }
  0x30   : > { %1365 = vmatprep.subr.bf16.mxu1 %v1497_v16  ;;  %v1523_v40 = vld [vmem:[%s1673_s6 + $0x1c0] sm:$0xff]   ;;  %v1526_v43 = vld [vmem:[%s1673_s6 + $0x108] sm:$0xff]   ;;  %v1530_v47 = vld [vmem:[%s1673_s6 + $0x110] sm:$0xff]  }
  0x31   : > { %1344 = vmatpush3.bf16.msra.mxu0 %v1496_v15  ;;  %v1524_v41 = vld [vmem:[%s1673_s6 + $0x180] sm:$0xff]   ;;  %v1527_v44 = vld [vmem:[%s1673_s6 + $0x1c8] sm:$0xff]   ;;  %v1531_v48 = vld [vmem:[%s1673_s6 + $0x1d0] sm:$0xff]  }
  0x32   : > { %1345 = vmatprep.subr.bf16.mxu0 %v1499_v18  ;;  %v1528_v45 = vld [vmem:[%s1673_s6 + $0x188] sm:$0xff]   ;;  %v1532_v49 = vld [vmem:[%s1673_s6 + $0x190] sm:$0xff]   ;;  %v1533_v50 = vld [vmem:[%s1673_s6 + $0x158] sm:$0xff]  }
  0x33   : > { %1366 = vmatpush3.bf16.msra.mxu1 %v1498_v17  ;;  %v1534_v51 = vld [vmem:[%s1673_s6 + $0x118] sm:$0xff]   ;;  %v1537_v54 = vld [vmem:[%s1673_s6 + $0x160] sm:$0xff]   ;;  %v1541_v58 = vld [vmem:[%s1673_s6 + $0x168] sm:$0xff]  }
  0x34   : > { %1367 = vmatprep.subr.bf16.mxu1 %v1501_v20  ;;  %v1535_v52 = vld [vmem:[%s1673_s6 + $0x1d8] sm:$0xff]   ;;  %v1538_v55 = vld [vmem:[%s1673_s6 + $0x120] sm:$0xff]   ;;  %v1542_v59 = vld [vmem:[%s1673_s6 + $0x128] sm:$0xff]  }
  0x35   : > { %1346 = vmatpush3.bf16.msra.mxu0 %v1500_v19  ;;  %v1536_v53 = vld [vmem:[%s1673_s6 + $0x198] sm:$0xff]   ;;  %v1539_v56 = vld [vmem:[%s1673_s6 + $0x1e0] sm:$0xff]   ;;  %v1543_v60 = vld [vmem:[%s1673_s6 + $0x1e8] sm:$0xff]  }
  0x36   : > { %1347 = vmatprep.subr.bf16.mxu0 %v1503_v22  ;;  %v1540_v57 = vld [vmem:[%s1673_s6 + $0x1a0] sm:$0xff]   ;;  %v1544_v61 = vld [vmem:[%s1673_s6 + $0x1a8] sm:$0xff]   ;;  %v1545_v62 = vld [vmem:[%s1673_s6 + $0x170] sm:$0xff]  }
  0x37   : > { %1368 = vmatpush3.bf16.msra.mxu1 %v1502_v21  ;;  %v1546_v63 = vld [vmem:[%s1673_s6 + $0x130] sm:$0xff]   ;;  %v1549_v2 = vld [vmem:[%s1673_s6 + $0x178] sm:$0xff]   ;;  %v1559_v9 = vld [vmem:[%s1673_s6 + $0x200] sm:$0xff]  }
  0x38   : > { %1369 = vmatprep.subr.bf16.mxu1 %v1505_v24  ;;  %v1547_v0 = vld [vmem:[%s1673_s6 + $0x1f0] sm:$0xff]   ;;  %v1550_v4 = vld [vmem:[%s1673_s6 + $0x138] sm:$0xff]   ;;  %v1560_v10 = vld [vmem:[%s1673_s6 + $0x208] sm:$0xff]  }
  0x39   : > { %1348 = vmatpush3.bf16.msra.mxu0 %v1504_v23  ;;  %v1548_v1 = vld [vmem:[%s1673_s6 + $0x1b0] sm:$0xff]   ;;  %v1551_v5 = vld [vmem:[%s1673_s6 + $0x1f8] sm:$0xff]   ;;  %v1563_v13 = vld [vmem:[%s1673_s6 + $0x220] sm:$0xff]  }
  0x3a   : > { %1349 = vmatprep.subr.bf16.mxu0 %v1507_v26  ;;  %v1552_v3 = vld [vmem:[%s1666_s28 + $0x10] ss:$36 sps:$4 sm:$0xff]   ;;  %v1556_v6 = vld [vmem:[%s1666_s28 + $0x18] ss:$36 sps:$4 sm:$0xff]   ;;  %v1564_v14 = vld [vmem:[%s1673_s6 + $0x228] sm:$0xff]  }
  0x3b   : > { %1370 = vmatpush3.bf16.msra.mxu1 %v1506_v25  ;;  %v1555_v7 = vld [vmem:[%s1673_s6 + $0x1b8] sm:$0xff]   ;;  %v1561_v11 = vld [vmem:[%s1673_s6 + $0x210] sm:$0xff]   ;;  %v1567_v17 = vld [vmem:[%s1666_s28 + $0x20] ss:$36 sps:$4 sm:$0xff]  }
  0x3c   : > { %1371 = vmatprep.subr.bf16.mxu1 %v1509_v28  ;;  %v1562_v12 = vld [vmem:[%s1673_s6 + $0x218] sm:$0xff]   ;;  %v1565_v15 = vld [vmem:[%s1673_s6 + $0x230] sm:$0xff]   ;;  %v1243_v19 = vld [vmem:[%s256_s10] ss:$0 sm:$0xff] }
  0x3d   : > { %1350 = vmatpush3.bf16.msra.mxu0 %v1508_v27  ;;  %v1566_v16 = vld [vmem:[%s1673_s6 + $0x238] sm:$0xff]  }
  0x3e   : > { %1351 = vmatprep.subr.bf16.mxu0 %v1511_v30 }
  0x3f   : > { %1372 = vmatpush3.bf16.msra.mxu1 %v1510_v29 }
  0x40   : > { %1373 = vmatprep.subr.bf16.mxu1 %v1513_v34 }
  0x41   : > { %1352 = vmatpush3.bf16.msra.mxu0 %v1512_v32 }
  0x42   : > { %1381 = vmatprep.subr.bf16.mxu0 %v1518_v38 }
  0x43   : > { %1374 = vmatpush3.bf16.msra.mxu1 %v1517_v36 }
  0x44   : > { %941 = vmatmul.mubr.bf16.vlgmr.msra.gmra.mrb[0].mxu0 %v1514_v31  ;;  %1403 = vmatprep.subr.bf16.mxu1 %v1523_v40 }
  0x45   : > { %1382 = vmatpush3.bf16.msra.mxu0 %v1522_v39  ;;  %1022 = vmatprep.mubr.bf16.mxu0 %v1554_v33 }
  0x46   : > { %982 = vmatmul.mubr.bf16.vlgmr.msra.gmra.mrb[0].mxu1 %v1519_v35  ;;  %1383 = vmatprep.subr.bf16.mxu0 %v1525_v42 }
  0x47   : > { %1404 = vmatpush3.bf16.msra.mxu1 %v1524_v41  ;;  %1063 = vmatprep.mubr.bf16.mxu1 %v1558_v37 }
  0x48   : > { %1405 = vmatprep.subr.bf16.mxu1 %v1527_v44 }
  0x49   : > { %1384 = vmatpush3.bf16.msra.mxu0 %v1526_v43 }
  0x4a   : > { %1385 = vmatprep.subr.bf16.mxu0 %v1529_v46 }
  0x4b   : > { %1406 = vmatpush3.bf16.msra.mxu1 %v1528_v45 }
  0x4c   : > { %1407 = vmatprep.subr.bf16.mxu1 %v1531_v48 }
  0x4d   : > { %1386 = vmatpush3.bf16.msra.mxu0 %v1530_v47 }
  0x4e   : > { %1387 = vmatprep.subr.bf16.mxu0 %v1533_v50 }
  0x4f   : > { %1408 = vmatpush3.bf16.msra.mxu1 %v1532_v49 }
  0x50   : > { %1409 = vmatprep.subr.bf16.mxu1 %v1535_v52 }
  0x51   : > { %1388 = vmatpush3.bf16.msra.mxu0 %v1534_v51 }
  0x52   : > { %1389 = vmatprep.subr.bf16.mxu0 %v1537_v54 }
  0x53   : > { %1410 = vmatpush3.bf16.msra.mxu1 %v1536_v53 }
  0x54   : > { %1411 = vmatprep.subr.bf16.mxu1 %v1539_v56 }
  0x55   : > { %1390 = vmatpush3.bf16.msra.mxu0 %v1538_v55 }
  0x56   : > { %1391 = vmatprep.subr.bf16.mxu0 %v1541_v58 }
  0x57   : > { %1412 = vmatpush3.bf16.msra.mxu1 %v1540_v57 }
  0x58   : > { %1413 = vmatprep.subr.bf16.mxu1 %v1543_v60 }
  0x59   : > { %1392 = vmatpush3.bf16.msra.mxu0 %v1542_v59 }
  0x5a   : > { %1393 = vmatprep.subr.bf16.mxu0 %v1545_v62 }
  0x5b   : > { %1414 = vmatpush3.bf16.msra.mxu1 %v1544_v61 }
  0x5c   : > { %1415 = vmatprep.subr.bf16.mxu1 %v1547_v0 }
  0x5d   : > { %1394 = vmatpush3.bf16.msra.mxu0 %v1546_v63 }
  0x5e   : > { %1395 = vmatprep.subr.bf16.mxu0 %v1549_v2 }
  0x5f   : > { %1416 = vmatpush3.bf16.msra.mxu1 %v1548_v1 }
  0x60   : > { %1417 = vmatprep.subr.bf16.mxu1 %v1551_v5 }
  0x61   : > { %1396 = vmatpush3.bf16.msra.mxu0 %v1550_v4 }
  0x62   : > { %1434 = vmatprep.subr.bf16.mxu0 %v1607_v8 }
  0x63   : > { %1418 = vmatpush3.bf16.msra.mxu1 %v1555_v7 }
  0x64   : > { %1023 = vmatmul.mubr.bf16.vlgmr.msra.gmra.mrb[4].mxu0 %v1552_v3 }
  0x65   : > { %1435 = vmatpush3.bf16.msra.mxu0 %v1559_v9  ;;  %1450 = vmatprep.mubr.msk.bf16.mxu0 %vm1608_vm0, %v1607_v8 }
  0x66   : > { %1064 = vmatmul.mubr.bf16.vlgmr.msra.gmra.mrb[4].mxu1 %v1556_v6  ;;  %1436 = vmatprep.subr.bf16.mxu0 %v1607_v8 }
  0x69   : > { %1437 = vmatpush3.bf16.msra.mxu0 %v1560_v10 }
  0x6a   : > { %1438 = vmatprep.subr.bf16.mxu0 %v1607_v8 }
  0x6d   : > { %1439 = vmatpush3.bf16.msra.mxu0 %v1561_v11 }
  0x6e   : > { %1440 = vmatprep.subr.bf16.mxu0 %v1607_v8 }
  0x71   : > { %1441 = vmatpush3.bf16.msra.mxu0 %v1562_v12 }
  0x72   : > { %1442 = vmatprep.subr.bf16.mxu0 %v1607_v8 }
  0x75   : > { %1443 = vmatpush3.bf16.msra.mxu0 %v1563_v13 }
  0x76   : > { %1444 = vmatprep.subr.bf16.mxu0 %v1607_v8 }
  0x79   : > { %1445 = vmatpush3.bf16.msra.mxu0 %v1564_v14 }
  0x7a   : > { %1446 = vmatprep.subr.bf16.mxu0 %v1607_v8 }
  0x7d   : > { %1447 = vmatpush3.bf16.msra.mxu0 %v1565_v15 }
  0x7e   : > { %1448 = vmatprep.subr.bf16.mxu0 %v1607_v8 }
  0x81   : > { %1449 = vmatpush3.bf16.msra.mxu0 %v1566_v16 }
  0x84   : > { %1451 = vmatmul.mubr.bf16.vlgmr.msra.gmra.mrb[8].mxu0 %v1567_v17 }
 0x117   : > { %v1353_v18 = vpop.f32.mrb[0].mxu0 }
 0x118   : > { %v1354_v20 = vpop.f32.mrb[1].mxu0 }
 0x119   : > { %v1355_v21 = vadd.f32 %v1354_v20, %v1353_v18  ;;  %v1356_v22 = vpop.f32.mrb[2].mxu0  ;;  %v1375_v23 = vpop.f32.mrb[0].mxu1 }
 0x11a   : > { %v1357_v24 = vpop.f32.mrb[3].mxu0  ;;  %v1376_v25 = vpop.f32.mrb[1].mxu1 }
 0x11b   : > { %v943_v26 = vadd.f32 %v1355_v21, %v1243_v19  ;;  %v1358_v27 = vadd.f32 %v1357_v24, %v1356_v22  ;;  %v1377_v28 = vadd.f32 %v1376_v25, %v1375_v23  ;;  %v1378_v29 = vpop.f32.mrb[2].mxu1 }
 0x11c   : > { %v1379_v30 = vpop.f32.mrb[3].mxu1 }
 0x11d   : > { %v946_v31 = vadd.f32 %v1358_v27, %v1243_v19  ;;  %v984_v32 = vadd.f32 %v1377_v28, %v943_v26  ;;  %v1380_v33 = vadd.f32 %v1379_v30, %v1378_v29 }
 0x11f   : > { %v987_v34 = vadd.f32 %v1380_v33, %v946_v31 }
 0x137   : > { %v1397_v35 = vpop.f32.mrb[4].mxu0 }
 0x138   : > { %v1398_v36 = vpop.f32.mrb[5].mxu0 }
 0x139   : > { %v1399_v37 = vadd.f32 %v1398_v36, %v1397_v35  ;;  %v1400_v38 = vpop.f32.mrb[6].mxu0  ;;  %v1419_v39 = vpop.f32.mrb[4].mxu1 }
 0x13a   : > { %v1401_v40 = vpop.f32.mrb[7].mxu0  ;;  %v1420_v41 = vpop.f32.mrb[5].mxu1 }
 0x13b   : > { %v1025_v42 = vadd.f32 %v1399_v37, %v984_v32  ;;  %v1402_v43 = vadd.f32 %v1401_v40, %v1400_v38  ;;  %v1421_v44 = vadd.f32 %v1420_v41, %v1419_v39  ;;  %v1422_v45 = vpop.f32.mrb[6].mxu1 }
 0x13c   : > { %v1423_v46 = vpop.f32.mrb[7].mxu1 }
 0x13d   : > { %v1028_v47 = vadd.f32 %v1402_v43, %v987_v34  ;;  %v1424_v48 = vadd.f32 %v1423_v46, %v1422_v45  ;;  %v1066_v49 = vadd.f32 %v1421_v44, %v1025_v42 }
 0x13f   : > { %v1069_v50 = vadd.f32 %v1424_v48, %v1028_v47 }
 0x157   : > { %v1106_v51 = vpop.f32.mrb[8].mxu0 }
 0x158   : > { %v1107_v52 = vadd.f32 %v1106_v51, %v1066_v49  ;;  %v1452_v53 = vpop.f32.mrb[9].mxu0 }
 0x159   : > { %v1109_v54 = vpop.f32.mrb[10].mxu0 }
 0x15a   : > { %v1110_v55 = vadd.f32 %v1109_v54, %v1069_v50  ;;  %v1453_v56 = vpop.f32.mrb[11].mxu0 }
 0x15c   : > { %v1335_v57 = vpack.c.bf16 %v1110_v55, %v1107_v52 }
 0x15e   : > { %1336 = vst [vmem:[%s266_s14] sm:$0xff] %v1335_v57  }
 0x15f PF: > { %s20_s22 = sadd.s32 1, %s1604_s22   ;;  %s1776_s20 = smov %s1600_s21 }
 0x160   : > { %p17_p12 = scmp.ge.s32.totalorder %s20_s22, 4   ;;  %s1777_s21 = smov %s1779_s0 }
 0x162   :  { %19 = sbr.rel (!%p17_p12) target bundleno = 17 (0x11), region = 68 }

// kernel: _stylebank_core.27
= control target key start
LH: loop header
LB: loop body
LE: loop exit
PB: predicated region body
PF: predicated region fallthrough
CT: control target
= control target key end

     0   :  { %s2870_s1 = inlined_call_operand.vmem [shape: bf16[1152,128], index: 1, kind: input, shape index: {}]   ;;  %s2871_s0 = inlined_call_operand.vmem [shape: bf16[128,1152], index: 0, kind: input, shape index: {}]   ;;  %s2872_s2 = inlined_call_operand.vmem [shape: bf16[128,128], index: 2, kind: output, shape index: {}]  }
   0x1   :  { %v2148_v0 = vld [vmem:[%s2870_s1 + $0x40] sm:$0xff]   ;;  %v2152_v4 = vld [vmem:[%s2870_s1 + $0x48] sm:$0xff]   ;;  %v2156_v8 = vld [vmem:[%s2870_s1 + $0x50] sm:$0xff]  }
   0x2   :  { %v2149_v1 = vld [vmem:[%s2870_s1 + $0xc0] sm:$0xff]   ;;  %1828 = vmatprep.subr.bf16.mxu0 %v2148_v0  ;;  %v2153_v5 = vld [vmem:[%s2870_s1 + $0xc8] sm:$0xff]   ;;  %v2157_v9 = vld [vmem:[%s2870_s1 + $0xd0] sm:$0xff]  }
   0x3   :  { %v2150_v2 = vld [vmem:[%s2870_s1] sm:$0xff]   ;;  %1892 = vmatprep.subr.bf16.mxu1 %v2149_v1  ;;  %v2154_v6 = vld [vmem:[%s2870_s1 + $0x8] sm:$0xff]   ;;  %v2158_v10 = vld [vmem:[%s2870_s1 + $0x10] sm:$0xff]  }
   0x4   :  { %v2151_v3 = vld [vmem:[%s2870_s1 + $0x80] sm:$0xff]   ;;  %1829 = vmatpush3.bf16.msra.mxu0 %v2150_v2  ;;  %v2155_v7 = vld [vmem:[%s2870_s1 + $0x88] sm:$0xff]   ;;  %v2159_v11 = vld [vmem:[%s2870_s1 + $0x90] sm:$0xff]  }
   0x5   :  { %1893 = vmatpush3.bf16.msra.mxu1 %v2151_v3  ;;  %1830 = vmatprep.subr.bf16.mxu0 %v2152_v4  ;;  %v2160_v12 = vld [vmem:[%s2870_s1 + $0x58] sm:$0xff]   ;;  %v2164_v16 = vld [vmem:[%s2870_s1 + $0x60] sm:$0xff]   ;;  %v2168_v20 = vld [vmem:[%s2870_s1 + $0x68] sm:$0xff]  }
   0x6   :  { %1894 = vmatprep.subr.bf16.mxu1 %v2153_v5  ;;  %v2161_v13 = vld [vmem:[%s2870_s1 + $0xd8] sm:$0xff]   ;;  %v2165_v17 = vld [vmem:[%s2870_s1 + $0xe0] sm:$0xff]   ;;  %v2169_v21 = vld [vmem:[%s2870_s1 + $0xe8] sm:$0xff]  }
   0x7   :  { %v2162_v14 = vld [vmem:[%s2870_s1 + $0x18] sm:$0xff]   ;;  %v2166_v18 = vld [vmem:[%s2870_s1 + $0x20] sm:$0xff]   ;;  %v2170_v22 = vld [vmem:[%s2870_s1 + $0x28] sm:$0xff]  }
   0x8   :  { %1831 = vmatpush3.bf16.msra.mxu0 %v2154_v6  ;;  %v2163_v15 = vld [vmem:[%s2870_s1 + $0x98] sm:$0xff]   ;;  %v2167_v19 = vld [vmem:[%s2870_s1 + $0xa0] sm:$0xff]   ;;  %v2171_v23 = vld [vmem:[%s2870_s1 + $0xa8] sm:$0xff]  }
   0x9   :  { %1895 = vmatpush3.bf16.msra.mxu1 %v2155_v7  ;;  %1832 = vmatprep.subr.bf16.mxu0 %v2156_v8  ;;  %v2172_v24 = vld [vmem:[%s2870_s1 + $0x70] sm:$0xff]   ;;  %v2176_v28 = vld [vmem:[%s2870_s1 + $0x78] sm:$0xff]   ;;  %v2180_v32 = vld [vmem:[%s2871_s0] ss:$36 sps:$4 sm:$0xff]  }
   0xa   :  { %1896 = vmatprep.subr.bf16.mxu1 %v2157_v9  ;;  %v2173_v25 = vld [vmem:[%s2870_s1 + $0xf0] sm:$0xff]   ;;  %v2177_v29 = vld [vmem:[%s2870_s1 + $0xf8] sm:$0xff]   ;;  %v2182_v33 = vld [vmem:[%s2871_s0 + $0x4] ss:$36 sps:$4 sm:$0xff]  }
   0xb   :  { %v2174_v26 = vld [vmem:[%s2870_s1 + $0x30] sm:$0xff]   ;;  %v2178_v30 = vld [vmem:[%s2870_s1 + $0x38] sm:$0xff]   ;;  %v2183_v34 = vld [vmem:[%s2871_s0 + $0x8] ss:$36 sps:$4 sm:$0xff]   ;;  %1068 = vmatprep.mubr.bf16.mxu0 %v2182_v33 }
   0xc   :  { %1833 = vmatpush3.bf16.msra.mxu0 %v2158_v10  ;;  %v2175_v27 = vld [vmem:[%s2870_s1 + $0xb0] sm:$0xff]   ;;  %v2179_v31 = vld [vmem:[%s2870_s1 + $0xb8] sm:$0xff]   ;;  %v2186_v36 = vld [vmem:[%s2870_s1 + $0x140] sm:$0xff]  }
   0xd   :  { %1897 = vmatpush3.bf16.msra.mxu1 %v2159_v11  ;;  %1834 = vmatprep.subr.bf16.mxu0 %v2160_v12  ;;  %v2185_v35 = vld [vmem:[%s2871_s0 + $0xc] ss:$36 sps:$4 sm:$0xff]   ;;  %v2187_v37 = vld [vmem:[%s2870_s1 + $0x1c0] sm:$0xff]   ;;  %v2192_v41 = vld [vmem:[%s2871_s0 + $0x54] ss:$36 sps:$4 sm:$0xff]  }
   0xe   :  { %1898 = vmatprep.subr.bf16.mxu1 %v2161_v13  ;;  %1165 = vmatprep.mubr.bf16.mxu1 %v2185_v35  ;;  %v2188_v38 = vld [vmem:[%s2870_s1 + $0x100] sm:$0xff]   ;;  %v2190_v40 = vld [vmem:[%s2871_s0 + $0x4c] ss:$36 sps:$4 sm:$0xff]   ;;  %v2200_v48 = vld [vmem:[%s2871_s0 + $0x94] ss:$36 sps:$4 sm:$0xff]  }
   0xf   :  { %v2189_v39 = vld [vmem:[%s2870_s1 + $0x180] sm:$0xff]   ;;  %v2194_v42 = vld [vmem:[%s2871_s0 + $0x48] ss:$36 sps:$4 sm:$0xff]   ;;  %v2195_v43 = vld [vmem:[%s2871_s0 + $0x50] ss:$36 sps:$4 sm:$0xff]  }
  0x10   :  { %1835 = vmatpush3.bf16.msra.mxu0 %v2162_v14  ;;  %v2196_v44 = vld [vmem:[%s2870_s1 + $0x148] sm:$0xff]   ;;  %v2202_v49 = vld [vmem:[%s2871_s0 + $0x9c] ss:$36 sps:$4 sm:$0xff]   ;;  %v2204_v50 = vld [vmem:[%s2871_s0 + $0x90] ss:$36 sps:$4 sm:$0xff]  }
  0x11   :  { %1899 = vmatpush3.bf16.msra.mxu1 %v2163_v15  ;;  %1836 = vmatprep.subr.bf16.mxu0 %v2164_v16  ;;  %v2197_v45 = vld [vmem:[%s2870_s1 + $0x1c8] sm:$0xff]   ;;  %v2205_v51 = vld [vmem:[%s2871_s0 + $0x98] ss:$36 sps:$4 sm:$0xff]   ;;  %v2206_v52 = vld [vmem:[%s2870_s1 + $0x150] sm:$0xff]  }
  0x12   :  { %1900 = vmatprep.subr.bf16.mxu1 %v2165_v17  ;;  %v2198_v46 = vld [vmem:[%s2870_s1 + $0x108] sm:$0xff]   ;;  %v2207_v53 = vld [vmem:[%s2870_s1 + $0x1d0] sm:$0xff]   ;;  %v2210_v56 = vld [vmem:[%s2871_s0 + $0xdc] ss:$36 sps:$4 sm:$0xff]  }
  0x13   :  { %v2199_v47 = vld [vmem:[%s2870_s1 + $0x188] sm:$0xff]   ;;  %v2208_v54 = vld [vmem:[%s2870_s1 + $0x110] sm:$0xff]   ;;  %v2214_v58 = vld [vmem:[%s2871_s0 + $0xd8] ss:$36 sps:$4 sm:$0xff]  }
  0x14   :  { %1837 = vmatpush3.bf16.msra.mxu0 %v2166_v18  ;;  %v2209_v55 = vld [vmem:[%s2870_s1 + $0x190] sm:$0xff]   ;;  %v2212_v57 = vld [vmem:[%s2871_s0 + $0xe4] ss:$36 sps:$4 sm:$0xff]   ;;  %v2216_v60 = vld [vmem:[%s2870_s1 + $0x158] sm:$0xff]  }
  0x15   :  { %1901 = vmatpush3.bf16.msra.mxu1 %v2167_v19  ;;  %1838 = vmatprep.subr.bf16.mxu0 %v2168_v20  ;;  %v2215_v59 = vld [vmem:[%s2871_s0 + $0xe0] ss:$36 sps:$4 sm:$0xff]   ;;  %v2217_v61 = vld [vmem:[%s2870_s1 + $0x1d8] sm:$0xff]   ;;  %v2222_v1 = vld [vmem:[%s2871_s0 + $0x12c] ss:$36 sps:$4 sm:$0xff]  }
  0x16   :  { %1902 = vmatprep.subr.bf16.mxu1 %v2169_v21  ;;  %v2218_v62 = vld [vmem:[%s2870_s1 + $0x118] sm:$0xff]   ;;  %v2220_v0 = vld [vmem:[%s2871_s0 + $0x124] ss:$36 sps:$4 sm:$0xff]   ;;  %v2230_v8 = vld [vmem:[%s2871_s0 + $0x16c] ss:$36 sps:$4 sm:$0xff]  }
  0x17   :  { %v2219_v63 = vld [vmem:[%s2870_s1 + $0x198] sm:$0xff]   ;;  %v2224_v2 = vld [vmem:[%s2871_s0 + $0x120] ss:$36 sps:$4 sm:$0xff]   ;;  %v2225_v4 = vld [vmem:[%s2871_s0 + $0x128] ss:$36 sps:$4 sm:$0xff]  }
  0x18   :  { %1839 = vmatpush3.bf16.msra.mxu0 %v2170_v22  ;;  %v2226_v3 = vld [vmem:[%s2870_s1 + $0x160] sm:$0xff]   ;;  %v2232_v9 = vld [vmem:[%s2871_s0 + $0x174] ss:$36 sps:$4 sm:$0xff]   ;;  %v2236_v10 = vld [vmem:[%s2870_s1 + $0x168] sm:$0xff]  }
  0x19   :  { %1903 = vmatpush3.bf16.msra.mxu1 %v2171_v23  ;;  %1840 = vmatprep.subr.bf16.mxu0 %v2172_v24  ;;  %v2227_v5 = vld [vmem:[%s2870_s1 + $0x1e0] sm:$0xff]   ;;  %v2237_v11 = vld [vmem:[%s2870_s1 + $0x1e8] sm:$0xff]   ;;  %v2235_v15 = vld [vmem:[%s2871_s0 + $0x170] ss:$36 sps:$4 sm:$0xff]  }
  0x1a   :  { %1904 = vmatprep.subr.bf16.mxu1 %v2173_v25  ;;  %v2228_v6 = vld [vmem:[%s2870_s1 + $0x120] sm:$0xff]   ;;  %v2234_v12 = vld [vmem:[%s2871_s0 + $0x168] ss:$36 sps:$4 sm:$0xff]   ;;  %v2240_v16 = vld [vmem:[%s2871_s0 + $0x1b4] ss:$36 sps:$4 sm:$0xff]  }
  0x1b   :  { %v2229_v7 = vld [vmem:[%s2870_s1 + $0x1a0] sm:$0xff]   ;;  %v2238_v13 = vld [vmem:[%s2870_s1 + $0x128] sm:$0xff]   ;;  %v2246_v18 = vld [vmem:[%s2870_s1 + $0x170] sm:$0xff]  }
  0x1c   :  { %1841 = vmatpush3.bf16.msra.mxu0 %v2174_v26  ;;  %v2239_v14 = vld [vmem:[%s2870_s1 + $0x1a8] sm:$0xff]   ;;  %v2242_v17 = vld [vmem:[%s2871_s0 + $0x1bc] ss:$36 sps:$4 sm:$0xff]   ;;  %v2247_v19 = vld [vmem:[%s2870_s1 + $0x1f0] sm:$0xff]  }
  0x1d   :  { %1905 = vmatpush3.bf16.msra.mxu1 %v2175_v27  ;;  %1842 = vmatprep.subr.bf16.mxu0 %v2176_v28  ;;  %v2248_v20 = vld [vmem:[%s2870_s1 + $0x130] sm:$0xff]   ;;  %v2245_v23 = vld [vmem:[%s2871_s0 + $0x1b8] ss:$36 sps:$4 sm:$0xff]   ;;  %v2252_v25 = vld [vmem:[%s2871_s0 + $0x204] ss:$36 sps:$4 sm:$0xff]  }
  0x1e   :  { %1906 = vmatprep.subr.bf16.mxu1 %v2177_v29  ;;  %v2249_v21 = vld [vmem:[%s2870_s1 + $0x1b0] sm:$0xff]   ;;  %v2250_v24 = vld [vmem:[%s2871_s0 + $0x1fc] ss:$36 sps:$4 sm:$0xff]  }
  0x1f   :  { %v2244_v22 = vld [vmem:[%s2871_s0 + $0x1b0] ss:$36 sps:$4 sm:$0xff]   ;;  %v2256_v26 = vld [vmem:[%s2870_s1 + $0x178] sm:$0xff]  }
  0x20   :  { %1843 = vmatpush3.bf16.msra.mxu0 %v2178_v30  ;;  %v2257_v27 = vld [vmem:[%s2870_s1 + $0x1f8] sm:$0xff]   ;;  %v2260_v35 = vld [vmem:[%s2871_s0 + $0x10] ss:$36 sps:$4 sm:$0xff]  }
  0x21   :  { %1907 = vmatpush3.bf16.msra.mxu1 %v2179_v31  ;;  %1956 = vmatprep.subr.bf16.mxu0 %v2186_v36  ;;  %v2258_v28 = vld [vmem:[%s2870_s1 + $0x138] sm:$0xff]   ;;  %v2255_v31 = vld [vmem:[%s2871_s0 + $0x200] ss:$36 sps:$4 sm:$0xff]  }
  0x22   :  { %2020 = vmatprep.subr.bf16.mxu1 %v2187_v37  ;;  %v2259_v29 = vld [vmem:[%s2870_s1 + $0x1b8] sm:$0xff]  }
  0x23   :  { %1069 = vmatmul.mubr.bf16.vlgmr.msra.gmra.mrb[0].mxu0 %v2180_v32  ;;  %v2254_v30 = vld [vmem:[%s2871_s0 + $0x1f8] ss:$36 sps:$4 sm:$0xff]   ;;  %v2266_v32 = vld [vmem:[%s2870_s1 + $0x200] sm:$0xff]  }
  0x24   :  { %1166 = vmatmul.mubr.bf16.vlgmr.msra.gmra.mrb[0].mxu1 %v2183_v34  ;;  %1957 = vmatpush3.bf16.msra.mxu0 %v2188_v38  ;;  %v2262_v33 = vld [vmem:[%s2871_s0 + $0x14] ss:$36 sps:$4 sm:$0xff]   ;;  %v2265_v34 = vld [vmem:[%s2871_s0 + $0x1c] ss:$36 sps:$4 sm:$0xff]   ;;  %v2269_v38 = vld [vmem:[%s2871_s0 + $0x64] ss:$36 sps:$4 sm:$0xff]  }
  0x25   :  { %2021 = vmatpush3.bf16.msra.mxu1 %v2189_v39  ;;  %1076 = vmatprep.mubr.bf16.mxu0 %v2190_v40  ;;  %v2263_v36 = vld [vmem:[%s2871_s0 + $0x18] ss:$36 sps:$4 sm:$0xff]   ;;  %v2273_v39 = vld [vmem:[%s2870_s1 + $0x208] sm:$0xff]   ;;  %v2280_v40 = vld [vmem:[%s2870_s1 + $0x210] sm:$0xff]  }
  0x26   :  { %1173 = vmatprep.mubr.bf16.mxu1 %v2192_v41  ;;  %1958 = vmatprep.subr.bf16.mxu0 %v2196_v44  ;;  %v2267_v37 = vld [vmem:[%s2871_s0 + $0x5c] ss:$36 sps:$4 sm:$0xff]   ;;  %v2276_v44 = vld [vmem:[%s2871_s0 + $0xac] ss:$36 sps:$4 sm:$0xff]  }
  0x27   :  { %2022 = vmatprep.subr.bf16.mxu1 %v2197_v45  ;;  %v2271_v41 = vld [vmem:[%s2871_s0 + $0x58] ss:$36 sps:$4 sm:$0xff]  }
  0x28   :  { %1959 = vmatpush3.bf16.msra.mxu0 %v2198_v46  ;;  %v2287_v45 = vld [vmem:[%s2870_s1 + $0x218] sm:$0xff]   ;;  %v2294_v46 = vld [vmem:[%s2870_s1 + $0x220] sm:$0xff]  }
  0x29   :  { %2023 = vmatpush3.bf16.msra.mxu1 %v2199_v47  ;;  %1960 = vmatprep.subr.bf16.mxu0 %v2206_v52  ;;  %v2278_v47 = vld [vmem:[%s2871_s0 + $0xa0] ss:$36 sps:$4 sm:$0xff]   ;;  %v2285_v52 = vld [vmem:[%s2871_s0 + $0xe8] ss:$36 sps:$4 sm:$0xff]  }
  0x2a   :  { %2024 = vmatprep.subr.bf16.mxu1 %v2207_v53  ;;  %v2308_v53 = vld [vmem:[%s2870_s1 + $0x230] sm:$0xff]  }
  0x2b   :  { %1077 = vmatmul.mubr.bf16.gmra.mrb[4].mxu0 %v2194_v42  ;;  %v2272_v42 = vld [vmem:[%s2871_s0 + $0x60] ss:$36 sps:$4 sm:$0xff]  }
  0x2c   :  { %1174 = vmatmul.mubr.bf16.gmra.mrb[4].mxu1 %v2195_v43  ;;  %1084 = vmatprep.mubr.bf16.mxu0 %v2200_v48  ;;  %v2274_v43 = vld [vmem:[%s2871_s0 + $0xa4] ss:$36 sps:$4 sm:$0xff]  }
  0x2d   :  { %1181 = vmatprep.mubr.bf16.mxu1 %v2202_v49  ;;  %1961 = vmatpush3.bf16.msra.mxu0 %v2208_v54  ;;  %v2279_v48 = vld [vmem:[%s2871_s0 + $0xa8] ss:$36 sps:$4 sm:$0xff]   ;;  %v2286_v54 = vld [vmem:[%s2871_s0 + $0xf0] ss:$36 sps:$4 sm:$0xff]  }
  0x2e   :  { %2025 = vmatpush3.bf16.msra.mxu1 %v2209_v55  ;;  %1962 = vmatprep.subr.bf16.mxu0 %v2216_v60  ;;  %v2281_v49 = vld [vmem:[%s2871_s0 + $0xec] ss:$36 sps:$4 sm:$0xff]   ;;  %v2288_v55 = vld [vmem:[%s2871_s0 + $0x134] ss:$36 sps:$4 sm:$0xff]   ;;  %v2295_v60 = vld [vmem:[%s2871_s0 + $0x17c] ss:$36 sps:$4 sm:$0xff]  }
  0x2f   :  { %2026 = vmatprep.subr.bf16.mxu1 %v2217_v61  ;;  %v2297_v61 = vld [vmem:[%s2871_s0 + $0x184] ss:$36 sps:$4 sm:$0xff]  }
  0x31   :  { %1963 = vmatpush3.bf16.msra.mxu0 %v2218_v62  ;;  %v2299_v62 = vld [vmem:[%s2871_s0 + $0x178] ss:$36 sps:$4 sm:$0xff]  }
  0x32   :  { %2027 = vmatpush3.bf16.msra.mxu1 %v2219_v63  ;;  %1964 = vmatprep.subr.bf16.mxu0 %v2226_v3  ;;  %v2300_v63 = vld [vmem:[%s2871_s0 + $0x180] ss:$36 sps:$4 sm:$0xff]   ;;  %v2307_v3 = vld [vmem:[%s2871_s0 + $0x1c8] ss:$36 sps:$4 sm:$0xff]  }
  0x33   :  { %1085 = vmatmul.mubr.bf16.gmra.mrb[8].mxu0 %v2204_v50  ;;  %2028 = vmatprep.subr.bf16.mxu1 %v2227_v5  ;;  %v2283_v50 = vld [vmem:[%s2871_s0 + $0xf4] ss:$36 sps:$4 sm:$0xff]  }
  0x34   :  { %1182 = vmatmul.mubr.bf16.gmra.mrb[8].mxu1 %v2205_v51  ;;  %1092 = vmatprep.mubr.bf16.mxu0 %v2210_v56  ;;  %v2301_v51 = vld [vmem:[%s2870_s1 + $0x228] sm:$0xff]   ;;  %v2290_v56 = vld [vmem:[%s2871_s0 + $0x13c] ss:$36 sps:$4 sm:$0xff]   ;;  %v2311_v5 = vld [vmem:[%s2871_s0 + $0x214] ss:$36 sps:$4 sm:$0xff]  }
  0x35   :  { %1189 = vmatprep.mubr.bf16.mxu1 %v2212_v57  ;;  %1965 = vmatpush3.bf16.msra.mxu0 %v2228_v6  ;;  %v2315_v57 = vld [vmem:[%s2870_s1 + $0x238] sm:$0xff]   ;;  %v2313_v6 = vld [vmem:[%s2871_s0 + $0x208] ss:$36 sps:$4 sm:$0xff]  }
  0x36   :  { %2029 = vmatpush3.bf16.msra.mxu1 %v2229_v7  ;;  %1966 = vmatprep.subr.bf16.mxu0 %v2236_v10  ;;  %v2314_v7 = vld [vmem:[%s2871_s0 + $0x210] ss:$36 sps:$4 sm:$0xff]   ;;  %v2318_v10 = vld [vmem:[%s2871_s0 + $0x68] ss:$36 sps:$4 sm:$0xff]  }
  0x37   :  { %2030 = vmatprep.subr.bf16.mxu1 %v2237_v11  ;;  %v2319_v11 = vld [vmem:[%s2871_s0 + $0x188] ss:$36 sps:$4 sm:$0xff]  }
  0x39   :  { %1967 = vmatpush3.bf16.msra.mxu0 %v2238_v13  ;;  %v2321_v13 = vld [vmem:[%s2871_s0 + $0x1d0] ss:$36 sps:$4 sm:$0xff]  }
  0x3a   :  { %2031 = vmatpush3.bf16.msra.mxu1 %v2239_v14  ;;  %1968 = vmatprep.subr.bf16.mxu0 %v2246_v18  ;;  %v2322_v14 = vld [vmem:[%s2871_s0 + $0xf8] ss:$36 sps:$4 sm:$0xff]  }
  0x3b   :  { %1093 = vmatmul.mubr.bf16.gmra.mrb[12].mxu0 %v2214_v58  ;;  %2032 = vmatprep.subr.bf16.mxu1 %v2247_v19  ;;  %v2292_v58 = vld [vmem:[%s2871_s0 + $0x130] ss:$36 sps:$4 sm:$0xff]  }
  0x3c   :  { %1190 = vmatmul.mubr.bf16.gmra.mrb[12].mxu1 %v2215_v59  ;;  %1100 = vmatprep.mubr.bf16.mxu0 %v2220_v0  ;;  %v2293_v59 = vld [vmem:[%s2871_s0 + $0x138] ss:$36 sps:$4 sm:$0xff]   ;;  %v2302_v0 = vld [vmem:[%s2871_s0 + $0x1c4] ss:$36 sps:$4 sm:$0xff]  }
  0x3d   :  { %1197 = vmatprep.mubr.bf16.mxu1 %v2222_v1  ;;  %1969 = vmatpush3.bf16.msra.mxu0 %v2248_v20  ;;  %v2304_v1 = vld [vmem:[%s2871_s0 + $0x1cc] ss:$36 sps:$4 sm:$0xff]  }
  0x3e   :  { %2033 = vmatpush3.bf16.msra.mxu1 %v2249_v21  ;;  %1970 = vmatprep.subr.bf16.mxu0 %v2256_v26 }
  0x3f   :  { %2034 = vmatprep.subr.bf16.mxu1 %v2257_v27 }
  0x41   :  { %1971 = vmatpush3.bf16.msra.mxu0 %v2258_v28 }
  0x42   :  { %2035 = vmatpush3.bf16.msra.mxu1 %v2259_v29  ;;  %2100 = vmatprep.subr.bf16.mxu0 %v2266_v32 }
  0x43   :  { %1101 = vmatmul.mubr.bf16.gmra.mrb[16].mxu0 %v2224_v2  ;;  %2132 = vmatprep.subr.bf16.mxu1 %v2266_v32  ;;  %v2306_v2 = vld [vmem:[%s2871_s0 + $0x1c0] ss:$36 sps:$4 sm:$0xff]  }
  0x44   :  { %1198 = vmatmul.mubr.bf16.gmra.mrb[16].mxu1 %v2225_v4  ;;  %1108 = vmatprep.mubr.bf16.mxu0 %v2230_v8  ;;  %v2309_v4 = vld [vmem:[%s2871_s0 + $0x20c] ss:$36 sps:$4 sm:$0xff]   ;;  %v2316_v8 = vld [vmem:[%s2871_s0 + $0x20] ss:$36 sps:$4 sm:$0xff]  }
  0x45   :  { %1205 = vmatprep.mubr.bf16.mxu1 %v2232_v9  ;;  %v2317_v9 = vld [vmem:[%s2871_s0 + $0x140] ss:$36 sps:$4 sm:$0xff]  }
  0x4b   :  { %1109 = vmatmul.mubr.bf16.gmra.mrb[20].mxu0 %v2234_v12  ;;  %v2320_v12 = vld [vmem:[%s2871_s0 + $0xb0] ss:$36 sps:$4 sm:$0xff]  }
  0x4c   :  { %1206 = vmatmul.mubr.bf16.gmra.mrb[20].mxu1 %v2235_v15  ;;  %1116 = vmatprep.mubr.bf16.mxu0 %v2240_v16  ;;  %v2323_v15 = vld [vmem:[%s2871_s0 + $0x218] ss:$36 sps:$4 sm:$0xff]  }
  0x4d   :  { %1213 = vmatprep.mubr.bf16.mxu1 %v2242_v17 }
  0x53   :  { %1117 = vmatmul.mubr.bf16.gmra.mrb[24].mxu0 %v2244_v22 }
  0x54   :  { %1214 = vmatmul.mubr.bf16.gmra.mrb[24].mxu1 %v2245_v23  ;;  %1124 = vmatprep.mubr.bf16.mxu0 %v2250_v24 }
  0x55   :  { %1221 = vmatprep.mubr.bf16.mxu1 %v2252_v25 }
  0x5b   :  { %1125 = vmatmul.mubr.bf16.gmra.mrb[28].mxu0 %v2254_v30 }
  0x5c   :  { %1222 = vmatmul.mubr.bf16.gmra.mrb[28].mxu1 %v2255_v31  ;;  %1262 = vmatprep.mubr.bf16.mxu0 %v2262_v33 }
  0x5d   :  { %1359 = vmatprep.mubr.bf16.mxu1 %v2265_v34 }
  0x63   :  { %1263 = vmatmul.mubr.bf16.vlgmr.msra.gmra.mrb[32].mxu0 %v2260_v35 }
  0x64   :  { %1360 = vmatmul.mubr.bf16.vlgmr.msra.gmra.mrb[32].mxu1 %v2263_v36  ;;  %2101 = vmatpush3.bf16.msra.mxu0 %v2266_v32 }
  0x65   :  { %2140 = vmatpush3.bf16.msra.mxu1 %v2266_v32  ;;  %1270 = vmatprep.mubr.bf16.mxu0 %v2267_v37 }
  0x66   :  { %1367 = vmatprep.mubr.bf16.mxu1 %v2269_v38  ;;  %2102 = vmatprep.subr.bf16.mxu0 %v2273_v39 }
  0x67   :  { %2133 = vmatprep.subr.bf16.mxu1 %v2273_v39 }
  0x68   :  { %2103 = vmatpush3.bf16.msra.mxu0 %v2273_v39 }
  0x69   :  { %2141 = vmatpush3.bf16.msra.mxu1 %v2273_v39  ;;  %2104 = vmatprep.subr.bf16.mxu0 %v2280_v40 }
  0x6a   :  { %2134 = vmatprep.subr.bf16.mxu1 %v2280_v40 }
  0x6b   :  { %1271 = vmatmul.mubr.bf16.gmra.mrb[36].mxu0 %v2271_v41 }
  0x6c   :  { %1368 = vmatmul.mubr.bf16.gmra.mrb[36].mxu1 %v2272_v42  ;;  %1278 = vmatprep.mubr.bf16.mxu0 %v2274_v43 }
  0x6d   :  { %1375 = vmatprep.mubr.bf16.mxu1 %v2276_v44  ;;  %2105 = vmatpush3.bf16.msra.mxu0 %v2280_v40 }
  0x6e   :  { %2142 = vmatpush3.bf16.msra.mxu1 %v2280_v40  ;;  %2106 = vmatprep.subr.bf16.mxu0 %v2287_v45 }
  0x6f   :  { %2135 = vmatprep.subr.bf16.mxu1 %v2287_v45 }
  0x71   :  { %2107 = vmatpush3.bf16.msra.mxu0 %v2287_v45 }
  0x72   :  { %2143 = vmatpush3.bf16.msra.mxu1 %v2287_v45  ;;  %2108 = vmatprep.subr.bf16.mxu0 %v2294_v46 }
  0x73   :  { %1279 = vmatmul.mubr.bf16.gmra.mrb[40].mxu0 %v2278_v47  ;;  %2136 = vmatprep.subr.bf16.mxu1 %v2294_v46 }
  0x74   :  { %1376 = vmatmul.mubr.bf16.gmra.mrb[40].mxu1 %v2279_v48  ;;  %1286 = vmatprep.mubr.bf16.mxu0 %v2281_v49 }
  0x75   :  { %1383 = vmatprep.mubr.bf16.mxu1 %v2283_v50  ;;  %2109 = vmatpush3.bf16.msra.mxu0 %v2294_v46 }
  0x76   :  { %2144 = vmatpush3.bf16.msra.mxu1 %v2294_v46  ;;  %2110 = vmatprep.subr.bf16.mxu0 %v2301_v51 }
  0x77   :  { %2137 = vmatprep.subr.bf16.mxu1 %v2301_v51 }
  0x79   :  { %2111 = vmatpush3.bf16.msra.mxu0 %v2301_v51 }
  0x7a   :  { %2145 = vmatpush3.bf16.msra.mxu1 %v2301_v51  ;;  %2112 = vmatprep.subr.bf16.mxu0 %v2308_v53 }
  0x7b   :  { %1287 = vmatmul.mubr.bf16.gmra.mrb[44].mxu0 %v2285_v52  ;;  %2138 = vmatprep.subr.bf16.mxu1 %v2308_v53 }
  0x7c   :  { %1384 = vmatmul.mubr.bf16.gmra.mrb[44].mxu1 %v2286_v54  ;;  %1294 = vmatprep.mubr.bf16.mxu0 %v2288_v55 }
  0x7d   :  { %1391 = vmatprep.mubr.bf16.mxu1 %v2290_v56  ;;  %2113 = vmatpush3.bf16.msra.mxu0 %v2308_v53 }
  0x7e   :  { %2146 = vmatpush3.bf16.msra.mxu1 %v2308_v53  ;;  %2114 = vmatprep.subr.bf16.mxu0 %v2315_v57 }
  0x7f   :  { %2139 = vmatprep.subr.bf16.mxu1 %v2315_v57 }
  0x81   :  { %2115 = vmatpush3.bf16.msra.mxu0 %v2315_v57 }
  0x82   :  { %2147 = vmatpush3.bf16.msra.mxu1 %v2315_v57 }
  0x83   :  { %1295 = vmatmul.mubr.bf16.gmra.mrb[48].mxu0 %v2292_v58 }
  0x84   :  { %1392 = vmatmul.mubr.bf16.gmra.mrb[48].mxu1 %v2293_v59  ;;  %1302 = vmatprep.mubr.bf16.mxu0 %v2295_v60 }
  0x85   :  { %1399 = vmatprep.mubr.bf16.mxu1 %v2297_v61 }
  0x8b   :  { %1303 = vmatmul.mubr.bf16.gmra.mrb[52].mxu0 %v2299_v62 }
  0x8c   :  { %1400 = vmatmul.mubr.bf16.gmra.mrb[52].mxu1 %v2300_v63  ;;  %1310 = vmatprep.mubr.bf16.mxu0 %v2302_v0 }
  0x8d   :  { %1407 = vmatprep.mubr.bf16.mxu1 %v2304_v1 }
  0x93   :  { %1311 = vmatmul.mubr.bf16.gmra.mrb[56].mxu0 %v2306_v2 }
  0x94   :  { %1408 = vmatmul.mubr.bf16.gmra.mrb[56].mxu1 %v2307_v3  ;;  %1318 = vmatprep.mubr.bf16.mxu0 %v2309_v4 }
  0x95   :  { %1415 = vmatprep.mubr.bf16.mxu1 %v2311_v5 }
  0x9b   :  { %1319 = vmatmul.mubr.bf16.gmra.mrb[60].mxu0 %v2313_v6 }
  0x9c   :  { %1416 = vmatmul.mubr.bf16.gmra.mrb[60].mxu1 %v2314_v7  ;;  %2116 = vmatprep.mubr.bf16.mxu0 %v2316_v8 }
  0x9d   :  { %2124 = vmatprep.mubr.bf16.mxu1 %v2317_v9 }
  0xa3   :  { %2117 = vmatmul.mubr.bf16.vlgmr.msra.gmra.mrb[64].mxu0 %v2318_v10 }
  0xa4   :  { %2125 = vmatmul.mubr.bf16.vlgmr.msra.gmra.mrb[64].mxu1 %v2319_v11  ;;  %2120 = vmatprep.mubr.bf16.mxu0 %v2320_v12 }
  0xa5   :  { %2128 = vmatprep.mubr.bf16.mxu1 %v2321_v13 }
  0xab   :  { %2121 = vmatmul.mubr.bf16.gmra.mrb[68].mxu0 %v2322_v14 }
  0xac   :  { %2129 = vmatmul.mubr.bf16.gmra.mrb[68].mxu1 %v2323_v15 }
  0xf6   :  { %v1844_v16 = vpop.f32.mrb[0].mxu0 }
  0xf7   :  { %v1908_v17 = vpop.f32.mrb[0].mxu1  ;;  %v1845_v18 = vpop.f32.mrb[1].mxu0 }
  0xf8   :  { %v1846_v19 = vadd.f32 %v1845_v18, %v1844_v16  ;;  %v1909_v20 = vpop.f32.mrb[1].mxu1  ;;  %v1847_v21 = vpop.f32.mrb[2].mxu0 }
  0xf9   :  { %v1910_v22 = vadd.f32 %v1909_v20, %v1908_v17  ;;  %v1911_v23 = vpop.f32.mrb[2].mxu1  ;;  %v1848_v24 = vpop.f32.mrb[3].mxu0 }
  0xfa   :  { %v1849_v25 = vadd.f32 %v1848_v24, %v1847_v21  ;;  %v1912_v26 = vpop.f32.mrb[3].mxu1 }
  0xfb   :  { %v2771_v27 = vadd.f32 %v1910_v22, %v1846_v19  ;;  %v1913_v28 = vadd.f32 %v1912_v26, %v1911_v23 }
  0xfd   :  { %v2773_v29 = vadd.f32 %v1913_v28, %v1849_v25 }
  0xfe   :  { %v1850_v30 = vpop.f32.mrb[4].mxu0 }
  0xff   :  { %v1914_v31 = vpop.f32.mrb[4].mxu1  ;;  %v1851_v32 = vpop.f32.mrb[5].mxu0 }
 0x100   :  { %v1852_v33 = vadd.f32 %v1851_v32, %v1850_v30  ;;  %v1915_v34 = vpop.f32.mrb[5].mxu1  ;;  %v1853_v35 = vpop.f32.mrb[6].mxu0 }
 0x101   :  { %v1916_v36 = vadd.f32 %v1915_v34, %v1914_v31  ;;  %v1917_v37 = vpop.f32.mrb[6].mxu1  ;;  %v1854_v38 = vpop.f32.mrb[7].mxu0 }
 0x102   :  { %v1855_v39 = vadd.f32 %v1854_v38, %v1853_v35  ;;  %v1918_v40 = vpop.f32.mrb[7].mxu1 }
 0x103   :  { %v2775_v41 = vadd.f32 %v1916_v36, %v1852_v33  ;;  %v1919_v42 = vadd.f32 %v1918_v40, %v1917_v37 }
 0x105   :  { %v2777_v43 = vadd.f32 %v1919_v42, %v1855_v39 }
 0x106   :  { %v1856_v44 = vpop.f32.mrb[8].mxu0 }
 0x107   :  { %v1920_v45 = vpop.f32.mrb[8].mxu1  ;;  %v1857_v46 = vpop.f32.mrb[9].mxu0 }
 0x108   :  { %v1858_v47 = vadd.f32 %v1857_v46, %v1856_v44  ;;  %v1921_v48 = vpop.f32.mrb[9].mxu1  ;;  %v1859_v49 = vpop.f32.mrb[10].mxu0 }
 0x109   :  { %v1922_v50 = vadd.f32 %v1921_v48, %v1920_v45  ;;  %v1923_v51 = vpop.f32.mrb[10].mxu1  ;;  %v1860_v52 = vpop.f32.mrb[11].mxu0 }
 0x10a   :  { %v1861_v53 = vadd.f32 %v1860_v52, %v1859_v49  ;;  %v1924_v54 = vpop.f32.mrb[11].mxu1 }
 0x10b   :  { %v2779_v55 = vadd.f32 %v1922_v50, %v1858_v47  ;;  %v1925_v56 = vadd.f32 %v1924_v54, %v1923_v51 }
 0x10d   :  { %v2781_v57 = vadd.f32 %v1925_v56, %v1861_v53 }
 0x10e   :  { %v1862_v58 = vpop.f32.mrb[12].mxu0 }
 0x10f   :  { %v1926_v59 = vpop.f32.mrb[12].mxu1  ;;  %v1863_v60 = vpop.f32.mrb[13].mxu0 }
 0x110   :  { %v1864_v61 = vadd.f32 %v1863_v60, %v1862_v58  ;;  %v1927_v62 = vpop.f32.mrb[13].mxu1  ;;  %v1865_v63 = vpop.f32.mrb[14].mxu0 }
 0x111   :  { %v1928_v0 = vadd.f32 %v1927_v62, %v1926_v59  ;;  %v1929_v1 = vpop.f32.mrb[14].mxu1  ;;  %v1866_v2 = vpop.f32.mrb[15].mxu0 }
 0x112   :  { %v1867_v3 = vadd.f32 %v1866_v2, %v1865_v63  ;;  %v1930_v4 = vpop.f32.mrb[15].mxu1 }
 0x113   :  { %v2783_v5 = vadd.f32 %v1928_v0, %v1864_v61  ;;  %v1931_v6 = vadd.f32 %v1930_v4, %v1929_v1 }
 0x115   :  { %v2785_v7 = vadd.f32 %v1931_v6, %v1867_v3 }
 0x116   :  { %v1868_v8 = vpop.f32.mrb[16].mxu0 }
 0x117   :  { %v1932_v9 = vpop.f32.mrb[16].mxu1  ;;  %v1869_v10 = vpop.f32.mrb[17].mxu0 }
 0x118   :  { %v1870_v11 = vadd.f32 %v1869_v10, %v1868_v8  ;;  %v1933_v12 = vpop.f32.mrb[17].mxu1  ;;  %v1871_v13 = vpop.f32.mrb[18].mxu0 }
 0x119   :  { %v1934_v14 = vadd.f32 %v1933_v12, %v1932_v9  ;;  %v1935_v15 = vpop.f32.mrb[18].mxu1  ;;  %v1872_v16 = vpop.f32.mrb[19].mxu0 }
 0x11a   :  { %v1873_v17 = vadd.f32 %v1872_v16, %v1871_v13  ;;  %v1936_v18 = vpop.f32.mrb[19].mxu1 }
 0x11b   :  { %v2787_v19 = vadd.f32 %v1934_v14, %v1870_v11  ;;  %v1937_v20 = vadd.f32 %v1936_v18, %v1935_v15 }
 0x11d   :  { %v2789_v21 = vadd.f32 %v1937_v20, %v1873_v17 }
 0x11e   :  { %v1874_v22 = vpop.f32.mrb[20].mxu0 }
 0x11f   :  { %v1938_v23 = vpop.f32.mrb[20].mxu1  ;;  %v1875_v24 = vpop.f32.mrb[21].mxu0 }
 0x120   :  { %v1876_v25 = vadd.f32 %v1875_v24, %v1874_v22  ;;  %v1939_v26 = vpop.f32.mrb[21].mxu1  ;;  %v1877_v28 = vpop.f32.mrb[22].mxu0 }
 0x121   :  { %v1940_v30 = vadd.f32 %v1939_v26, %v1938_v23  ;;  %v1941_v31 = vpop.f32.mrb[22].mxu1  ;;  %v1878_v32 = vpop.f32.mrb[23].mxu0 }
 0x122   :  { %v1879_v33 = vadd.f32 %v1878_v32, %v1877_v28  ;;  %v1942_v34 = vpop.f32.mrb[23].mxu1 }
 0x123   :  { %v2791_v35 = vadd.f32 %v1940_v30, %v1876_v25  ;;  %v1943_v36 = vadd.f32 %v1942_v34, %v1941_v31 }
 0x125   :  { %v2793_v37 = vadd.f32 %v1943_v36, %v1879_v33 }
 0x126   :  { %v1880_v38 = vpop.f32.mrb[24].mxu0 }
 0x127   :  { %v1944_v39 = vpop.f32.mrb[24].mxu1  ;;  %v1881_v40 = vpop.f32.mrb[25].mxu0 }
 0x128   :  { %v1882_v42 = vadd.f32 %v1881_v40, %v1880_v38  ;;  %v1945_v44 = vpop.f32.mrb[25].mxu1  ;;  %v1883_v45 = vpop.f32.mrb[26].mxu0 }
 0x129   :  { %v1946_v46 = vadd.f32 %v1945_v44, %v1944_v39  ;;  %v1947_v47 = vpop.f32.mrb[26].mxu1  ;;  %v1884_v48 = vpop.f32.mrb[27].mxu0 }
 0x12a   :  { %v1885_v49 = vadd.f32 %v1884_v48, %v1883_v45  ;;  %v1948_v50 = vpop.f32.mrb[27].mxu1 }
 0x12b   :  { %v2795_v51 = vadd.f32 %v1946_v46, %v1882_v42  ;;  %v1949_v52 = vadd.f32 %v1948_v50, %v1947_v47 }
 0x12d   :  { %v2797_v53 = vadd.f32 %v1949_v52, %v1885_v49 }
 0x12e   :  { %v1886_v54 = vpop.f32.mrb[28].mxu0 }
 0x12f   :  { %v1950_v56 = vpop.f32.mrb[28].mxu1  ;;  %v1887_v58 = vpop.f32.mrb[29].mxu0 }
 0x130   :  { %v1888_v59 = vadd.f32 %v1887_v58, %v1886_v54  ;;  %v1951_v60 = vpop.f32.mrb[29].mxu1  ;;  %v1889_v61 = vpop.f32.mrb[30].mxu0 }
 0x131   :  { %v1952_v62 = vadd.f32 %v1951_v60, %v1950_v56  ;;  %v1953_v63 = vpop.f32.mrb[30].mxu1  ;;  %v1890_v0 = vpop.f32.mrb[31].mxu0 }
 0x132   :  { %v1891_v1 = vadd.f32 %v1890_v0, %v1889_v61  ;;  %v1954_v2 = vpop.f32.mrb[31].mxu1 }
 0x133   :  { %v2799_v3 = vadd.f32 %v1952_v62, %v1888_v59  ;;  %v1955_v4 = vadd.f32 %v1954_v2, %v1953_v63 }
 0x135   :  { %v2801_v6 = vadd.f32 %v1955_v4, %v1891_v1 }
 0x136   :  { %v1972_v8 = vpop.f32.mrb[32].mxu0 }
 0x137   :  { %v2036_v9 = vpop.f32.mrb[32].mxu1  ;;  %v1973_v10 = vpop.f32.mrb[33].mxu0 }
 0x138   :  { %v1974_v11 = vadd.f32 %v1973_v10, %v1972_v8  ;;  %v2037_v12 = vpop.f32.mrb[33].mxu1  ;;  %v1975_v13 = vpop.f32.mrb[34].mxu0 }
 0x139   :  { %v2038_v14 = vadd.f32 %v2037_v12, %v2036_v9  ;;  %v2039_v15 = vpop.f32.mrb[34].mxu1  ;;  %v1976_v16 = vpop.f32.mrb[35].mxu0 }
 0x13a   :  { %v1265_v17 = vadd.f32 %v1974_v11, %v2771_v27  ;;  %v1977_v18 = vadd.f32 %v1976_v16, %v1975_v13  ;;  %v2040_v20 = vpop.f32.mrb[35].mxu1 }
 0x13b   :  { %v2041_v22 = vadd.f32 %v2040_v20, %v2039_v15 }
 0x13c   :  { %v1268_v23 = vadd.f32 %v1977_v18, %v2773_v29  ;;  %v2805_v24 = vadd.f32 %v2038_v14, %v1265_v17 }
 0x13e   :  { %v1978_v25 = vpop.f32.mrb[36].mxu0  ;;  %v2807_v26 = vadd.f32 %v2041_v22, %v1268_v23 }
 0x13f   :  { %v2042_v28 = vpop.f32.mrb[36].mxu1  ;;  %v1979_v30 = vpop.f32.mrb[37].mxu0 }
 0x140   :  { %v1980_v31 = vadd.f32 %v1979_v30, %v1978_v25  ;;  %v2043_v32 = vpop.f32.mrb[37].mxu1  ;;  %v1981_v33 = vpop.f32.mrb[38].mxu0 }
 0x141   :  { %v2044_v34 = vadd.f32 %v2043_v32, %v2042_v28  ;;  %v2045_v36 = vpop.f32.mrb[38].mxu1  ;;  %v1982_v38 = vpop.f32.mrb[39].mxu0 }
 0x142   :  { %v1273_v27 = vadd.f32 %v1980_v31, %v2775_v41  ;;  %v1983_v39 = vadd.f32 %v1982_v38, %v1981_v33  ;;  %v2046_v40 = vpop.f32.mrb[39].mxu1 }
 0x143   :  { %v2047_v42 = vadd.f32 %v2046_v40, %v2045_v36 }
 0x144   :  { %v1276_v29 = vadd.f32 %v1983_v39, %v2777_v43  ;;  %v2811_v44 = vadd.f32 %v2044_v34, %v1273_v27 }
 0x146   :  { %v1984_v45 = vpop.f32.mrb[40].mxu0  ;;  %v2813_v46 = vadd.f32 %v2047_v42, %v1276_v29 }
 0x147   :  { %v2048_v47 = vpop.f32.mrb[40].mxu1  ;;  %v1985_v48 = vpop.f32.mrb[41].mxu0 }
 0x148   :  { %v1986_v49 = vadd.f32 %v1985_v48, %v1984_v45  ;;  %v2049_v50 = vpop.f32.mrb[41].mxu1  ;;  %v1987_v52 = vpop.f32.mrb[42].mxu0 }
 0x149   :  { %v2050_v54 = vadd.f32 %v2049_v50, %v2048_v47  ;;  %v2051_v56 = vpop.f32.mrb[42].mxu1  ;;  %v1988_v58 = vpop.f32.mrb[43].mxu0 }
 0x14a   :  { %v1281_v41 = vadd.f32 %v1986_v49, %v2779_v55  ;;  %v1989_v59 = vadd.f32 %v1988_v58, %v1987_v52  ;;  %v2052_v60 = vpop.f32.mrb[43].mxu1 }
 0x14b   :  { %v2053_v61 = vadd.f32 %v2052_v60, %v2051_v56 }
 0x14c   :  { %v1284_v43 = vadd.f32 %v1989_v59, %v2781_v57  ;;  %v2817_v62 = vadd.f32 %v2050_v54, %v1281_v41 }
 0x14e   :  { %v1990_v63 = vpop.f32.mrb[44].mxu0  ;;  %v2819_v0 = vadd.f32 %v2053_v61, %v1284_v43 }
 0x14f   :  { %v2054_v1 = vpop.f32.mrb[44].mxu1  ;;  %v1991_v2 = vpop.f32.mrb[45].mxu0 }
 0x150   :  { %v1992_v4 = vadd.f32 %v1991_v2, %v1990_v63  ;;  %v2055_v8 = vpop.f32.mrb[45].mxu1  ;;  %v1993_v9 = vpop.f32.mrb[46].mxu0 }
 0x151   :  { %v2056_v10 = vadd.f32 %v2055_v8, %v2054_v1  ;;  %v2057_v11 = vpop.f32.mrb[46].mxu1  ;;  %v1994_v12 = vpop.f32.mrb[47].mxu0 }
 0x152   :  { %v1289_v55 = vadd.f32 %v1992_v4, %v2783_v5  ;;  %v1995_v13 = vadd.f32 %v1994_v12, %v1993_v9  ;;  %v2058_v14 = vpop.f32.mrb[47].mxu1 }
 0x153   :  { %v2059_v15 = vadd.f32 %v2058_v14, %v2057_v11 }
 0x154   :  { %v1292_v57 = vadd.f32 %v1995_v13, %v2785_v7  ;;  %v2823_v16 = vadd.f32 %v2056_v10, %v1289_v55 }
 0x156   :  { %v1996_v17 = vpop.f32.mrb[48].mxu0  ;;  %v2825_v18 = vadd.f32 %v2059_v15, %v1292_v57 }
 0x157   :  { %v2060_v20 = vpop.f32.mrb[48].mxu1  ;;  %v1997_v22 = vpop.f32.mrb[49].mxu0 }
 0x158   :  { %v1998_v23 = vadd.f32 %v1997_v22, %v1996_v17  ;;  %v2061_v25 = vpop.f32.mrb[49].mxu1  ;;  %v1999_v28 = vpop.f32.mrb[50].mxu0 }
 0x159   :  { %v2062_v30 = vadd.f32 %v2061_v25, %v2060_v20  ;;  %v2063_v31 = vpop.f32.mrb[50].mxu1  ;;  %v2000_v32 = vpop.f32.mrb[51].mxu0 }
 0x15a   :  { %v1297_v5 = vadd.f32 %v1998_v23, %v2787_v19  ;;  %v2001_v33 = vadd.f32 %v2000_v32, %v1999_v28  ;;  %v2064_v34 = vpop.f32.mrb[51].mxu1 }
 0x15b   :  { %v2065_v36 = vadd.f32 %v2064_v34, %v2063_v31 }
 0x15c   :  { %v1300_v7 = vadd.f32 %v2001_v33, %v2789_v21  ;;  %v1394_v38 = vadd.f32 %v2062_v30, %v1297_v5 }
 0x15e   :  { %v2002_v27 = vpop.f32.mrb[52].mxu0  ;;  %v2829_v39 = vadd.f32 %v2065_v36, %v1300_v7 }
 0x15f   :  { %v2066_v40 = vpop.f32.mrb[52].mxu1  ;;  %v2003_v42 = vpop.f32.mrb[53].mxu0 }
 0x160   :  { %v2004_v29 = vadd.f32 %v2003_v42, %v2002_v27  ;;  %v2067_v45 = vpop.f32.mrb[53].mxu1  ;;  %v2005_v47 = vpop.f32.mrb[54].mxu0 }
 0x161   :  { %v2068_v48 = vadd.f32 %v2067_v45, %v2066_v40  ;;  %v2069_v49 = vpop.f32.mrb[54].mxu1  ;;  %v2006_v50 = vpop.f32.mrb[55].mxu0 }
 0x162   :  { %v1305_v52 = vadd.f32 %v2004_v29, %v2791_v35  ;;  %v2007_v19 = vadd.f32 %v2006_v50, %v2005_v47  ;;  %v2070_v54 = vpop.f32.mrb[55].mxu1 }
 0x163   :  { %v2071_v56 = vadd.f32 %v2070_v54, %v2069_v49 }
 0x164   :  { %v1308_v58 = vadd.f32 %v2007_v19, %v2793_v37  ;;  %v1402_v21 = vadd.f32 %v2068_v48, %v1305_v52 }
 0x166   :  { %v2008_v41 = vpop.f32.mrb[56].mxu0  ;;  %v1405_v59 = vadd.f32 %v2071_v56, %v1308_v58 }
 0x167   :  { %v2072_v60 = vpop.f32.mrb[56].mxu1  ;;  %v2009_v61 = vpop.f32.mrb[57].mxu0 }
 0x168   :  { %v2010_v43 = vadd.f32 %v2009_v61, %v2008_v41  ;;  %v2073_v63 = vpop.f32.mrb[57].mxu1  ;;  %v2011_v1 = vpop.f32.mrb[58].mxu0 }
 0x169   :  { %v2074_v2 = vadd.f32 %v2073_v63, %v2072_v60  ;;  %v2075_v4 = vpop.f32.mrb[58].mxu1  ;;  %v2012_v8 = vpop.f32.mrb[59].mxu0 }
 0x16a   :  { %v1313_v9 = vadd.f32 %v2010_v43, %v2795_v51  ;;  %v2013_v10 = vadd.f32 %v2012_v8, %v2011_v1  ;;  %v2076_v35 = vpop.f32.mrb[59].mxu1 }
 0x16b   :  { %v2077_v11 = vadd.f32 %v2076_v35, %v2075_v4 }
 0x16c   :  { %v1316_v12 = vadd.f32 %v2013_v10, %v2797_v53  ;;  %v1410_v55 = vadd.f32 %v2074_v2, %v1313_v9 }
 0x16e   :  { %v2014_v37 = vpop.f32.mrb[60].mxu0  ;;  %v1413_v13 = vadd.f32 %v2077_v11, %v1316_v12 }
 0x16f   :  { %v2078_v14 = vpop.f32.mrb[60].mxu1  ;;  %v2015_v15 = vpop.f32.mrb[61].mxu0 }
 0x170   :  { %v2016_v57 = vadd.f32 %v2015_v15, %v2014_v37  ;;  %v2079_v17 = vpop.f32.mrb[61].mxu1  ;;  %v2017_v20 = vpop.f32.mrb[62].mxu0 }
 0x171   :  { %v2080_v22 = vadd.f32 %v2079_v17, %v2078_v14  ;;  %v2081_v23 = vpop.f32.mrb[62].mxu1  ;;  %v2018_v25 = vpop.f32.mrb[63].mxu0 }
 0x172   :  { %v1321_v28 = vadd.f32 %v2016_v57, %v2799_v3  ;;  %v2019_v30 = vadd.f32 %v2018_v25, %v2017_v20  ;;  %v2082_v51 = vpop.f32.mrb[63].mxu1 }
 0x173   :  { %v2083_v31 = vadd.f32 %v2082_v51, %v2081_v23 }
 0x174   :  { %v1324_v32 = vadd.f32 %v2019_v30, %v2801_v6  ;;  %v1418_v5 = vadd.f32 %v2080_v22, %v1321_v28 }
 0x176   :  { %v2118_v53 = vpop.f32.mrb[64].mxu0  ;;  %v1421_v33 = vadd.f32 %v2083_v31, %v1324_v32 }
 0x177   :  { %v1467_v34 = vadd.f32 %v2118_v53, %v2811_v44  ;;  %v2126_v36 = vpop.f32.mrb[64].mxu1  ;;  %v1458_v7 = vpop.f32.mrb[65].mxu0 }
 0x178   :  { %v1499_v27 = vadd.f32 %v2126_v36, %v1402_v21  ;;  %v1459_v40 = vadd.f32 %v1458_v7, %v2805_v24  ;;  %v1490_v42 = vpop.f32.mrb[65].mxu1  ;;  %v2119_v29 = vpop.f32.mrb[66].mxu0 }
 0x179   :  { %v1491_v45 = vadd.f32 %v1490_v42, %v1394_v38  ;;  %v1470_v3 = vadd.f32 %v2119_v29, %v2813_v46  ;;  %v2127_v47 = vpop.f32.mrb[66].mxu1  ;;  %v1461_v48 = vpop.f32.mrb[67].mxu0 }
 0x17a   :  { %v1502_v49 = vadd.f32 %v2127_v47, %v1405_v59  ;;  %v1462_v6 = vadd.f32 %v1461_v48, %v2807_v26  ;;  %v1493_v50 = vpop.f32.mrb[67].mxu1 }
 0x17b   :  { %v1789_v52 = vpack.c.bf16 %v1470_v3, %v1467_v34  ;;  %v1494_v19 = vadd.f32 %v1493_v50, %v2829_v39 }
 0x17c   :  { %v1809_v44 = vpack.c.bf16 %v1502_v49, %v1499_v27  ;;  %v1784_v54 = vpack.c.bf16 %v1462_v6, %v1459_v40 }
 0x17d   :  { %1821 = vst [vmem:[%s2872_s2 + $0x8] sm:$0xff] %v1789_v52   ;;  %v1804_v24 = vpack.c.bf16 %v1494_v19, %v1491_v45 }
 0x17e   :  { %1825 = vst [vmem:[%s2872_s2 + $0x28] sm:$0xff] %v1809_v44   ;;  %1785 = vst [vmem:[%s2872_s2] sm:$0xff] %v1784_v54   ;;  %v2122_v26 = vpop.f32.mrb[68].mxu0 }
 0x17f   :  { %1824 = vst [vmem:[%s2872_s2 + $0x20] sm:$0xff] %v1804_v24   ;;  %v1483_v46 = vadd.f32 %v2122_v26, %v2823_v16  ;;  %v2130_v38 = vpop.f32.mrb[68].mxu1  ;;  %v1474_v39 = vpop.f32.mrb[69].mxu0 }
 0x180   :  { %v1515_v56 = vadd.f32 %v2130_v38, %v1418_v5  ;;  %v1475_v58 = vadd.f32 %v1474_v39, %v2817_v62  ;;  %v1506_v21 = vpop.f32.mrb[69].mxu1  ;;  %v2123_v41 = vpop.f32.mrb[70].mxu0 }
 0x181   :  { %v1507_v59 = vadd.f32 %v1506_v21, %v1410_v55  ;;  %v1486_v60 = vadd.f32 %v2123_v41, %v2825_v18  ;;  %v2131_v61 = vpop.f32.mrb[70].mxu1  ;;  %v1477_v43 = vpop.f32.mrb[71].mxu0 }
 0x182   :  { %v1518_v63 = vadd.f32 %v2131_v61, %v1421_v33  ;;  %v1478_v1 = vadd.f32 %v1477_v43, %v2819_v0  ;;  %v1509_v2 = vpop.f32.mrb[71].mxu1 }
 0x183   :  { %v1799_v4 = vpack.c.bf16 %v1486_v60, %v1483_v46  ;;  %v1510_v8 = vadd.f32 %v1509_v2, %v1413_v13 }
 0x184   :  { %v1819_v9 = vpack.c.bf16 %v1518_v63, %v1515_v56  ;;  %v1794_v16 = vpack.c.bf16 %v1478_v1, %v1475_v58 }
 0x185   :  { %1823 = vst [vmem:[%s2872_s2 + $0x18] sm:$0xff] %v1799_v4   ;;  %v1814_v62 = vpack.c.bf16 %v1510_v8, %v1507_v59 }
 0x186   :  { %1827 = vst [vmem:[%s2872_s2 + $0x38] sm:$0xff] %v1819_v9   ;;  %1822 = vst [vmem:[%s2872_s2 + $0x10] sm:$0xff] %v1794_v16  }
 0x187   :  { %1826 = vst [vmem:[%s2872_s2 + $0x30] sm:$0xff] %v1814_v62  }

// kernel: _stylebank_core.30
= control target key start
LH: loop header
LB: loop body
LE: loop exit
PB: predicated region body
PF: predicated region fallthrough
CT: control target
= control target key end

     0   :  { %s2572_s9 = smov 0   ;;  %s2574_s10 = smov 0   ;;  %s2931_s0 = inlined_call_operand.vmem [shape: bf16[512,640], index: 0, kind: input, shape index: {}]   ;;  %s2932_s1 = inlined_call_operand.vmem [shape: bf16[640,128], index: 1, kind: input, shape index: {}]   ;;  %s2933_s2 = inlined_call_operand.vmem [shape: bf16[512,128], index: 2, kind: output, shape index: {}]  }
   0x1   :  { %s2576_s11 = smov 0  }
   0x2 LB: > { %s24_s12 = sadd.s32 1, %s2551_s10  ;;  %p1758_p0 = scmp.ge.s32.totalorder %s2555_s11, 1  ;;  %s2555_s11 = sphi %s2576_s11, %s12_s11   ;;  %s2551_s10 = sphi %s2574_s10, %s2935_s10   ;;  %s2547_s9 = sphi %s2572_s9, %s2934_s9  }
   0x3   : > { %p26_p1 = scmp.ge.s32.totalorder %s24_s12, 2  ;;  %p137_p2 = scmp.lt.s32.totalorder %s2555_s11, 3 }
   0x5   : > { %s2937_s12 = smov (%p26_p1, %s24_s12), 0  ;;  %p138_p3 = pnand %p1758_p0, %p137_p2 }
   0x6   : > { %v2381_v0 = vld [vmem:[%s2932_s1 + $0x40] sm:$0xff] (!%p138_p3)   ;;  %s1759_s15 = sshll.u32 (!%p138_p3), %s2547_s9, 5  ;;  %v2383_v2 = vld [vmem:[%s2932_s1 + $0x48] sm:$0xff] (!%p138_p3)   ;;  %v2385_v4 = vld [vmem:[%s2932_s1 + $0x50] sm:$0xff] (!%p138_p3)  }
   0x7   : > { %141 = sbr.rel (%p138_p3) target bundleno = 415 (0x19f), region = 28  ;;  %v2382_v1 = vld [vmem:[%s2932_s1] sm:$0xff] (!%p138_p3)   ;;  %2044 = vmatprep.subr.bf16.mxu0 (!%p138_p3), %v2381_v0  ;;  %2340 = vmatprep.subr.bf16.mxu1 (!%p138_p3), %v2381_v0  ;;  %p168_p4 = scmp.lt.s32.totalorder (!%p138_p3), %s1759_s15, 63  ;;  %v2384_v3 = vld [vmem:[%s2932_s1 + $0x8] sm:$0xff] (!%p138_p3)   ;;  %v2386_v5 = vld [vmem:[%s2932_s1 + $0x10] sm:$0xff] (!%p138_p3)  }
   0x8   : > { %2045 = vmatpush3.bf16.msra.mxu0 (!%p138_p3), %v2382_v1  ;;  %2348 = vmatpush3.bf16.msra.mxu1 (!%p138_p3), %v2382_v1  ;;  %v2387_v6 = vld [vmem:[%s2932_s1 + $0x58] sm:$0xff] (!%p138_p3)   ;;  %v2389_v8 = vld [vmem:[%s2932_s1 + $0x60] sm:$0xff] (!%p138_p3)   ;;  %v2391_v10 = vld [vmem:[%s2932_s1 + $0x68] sm:$0xff] (!%p138_p3)  }
   0x9   : > { %2046 = vmatprep.subr.bf16.mxu0 (!%p138_p3), %v2383_v2  ;;  %2341 = vmatprep.subr.bf16.mxu1 (!%p138_p3), %v2383_v2  ;;  %v2388_v7 = vld [vmem:[%s2932_s1 + $0x18] sm:$0xff] (!%p138_p3)   ;;  %v2390_v9 = vld [vmem:[%s2932_s1 + $0x20] sm:$0xff] (!%p138_p3)   ;;  %v2392_v13 = vld [vmem:[%s2932_s1 + $0x28] sm:$0xff] (!%p138_p3)  }
   0xa   : > { %v2393_v14 = vld [vmem:[%s2932_s1 + $0x70] sm:$0xff] (!%p138_p3)   ;;  %v2395_v16 = vld [vmem:[%s2932_s1 + $0x78] sm:$0xff] (!%p138_p3)   ;;  %v2403_v18 = vld [vmem:[%s2932_s1 + $0xc0] sm:$0xff] (!%p138_p3)  }
   0xb   : > { %v2394_v15 = vld [vmem:[%s2932_s1 + $0x30] sm:$0xff] (!%p138_p3)   ;;  %v2396_v17 = vld [vmem:[%s2932_s1 + $0x38] sm:$0xff] (!%p138_p3)   ;;  %v2406_v19 = vld [vmem:[%s2932_s1 + $0x100] sm:$0xff] (!%p138_p3)  }
   0xc   : > { %2047 = vmatpush3.bf16.msra.mxu0 (!%p138_p3), %v2384_v3  ;;  %2349 = vmatpush3.bf16.msra.mxu1 (!%p138_p3), %v2384_v3  ;;  %v2404_v22 = vld [vmem:[%s2932_s1 + $0x80] sm:$0xff] (!%p138_p3)   ;;  %v2405_v23 = vld [vmem:[%s2932_s1 + $0xc8] sm:$0xff] (!%p138_p3)   ;;  %v2414_v29 = vld [vmem:[%s2932_s1 + $0xd0] sm:$0xff] (!%p138_p3)  }
   0xd   : > { %2048 = vmatprep.subr.bf16.mxu0 (!%p138_p3), %v2385_v4  ;;  %2342 = vmatprep.subr.bf16.mxu1 (!%p138_p3), %v2385_v4  ;;  %v2425_v26 = vld [vmem:[%s2932_s1 + $0x108] sm:$0xff] (!%p138_p3)   ;;  %v2415_v31 = vld [vmem:[%s2932_s1 + $0x90] sm:$0xff] (!%p138_p3)   ;;  %v2416_v33 = vld [vmem:[%s2932_s1 + $0xd8] sm:$0xff] (!%p138_p3)  }
   0xe   : > { %s2939_s15 = smov (!%p168_p4, %s1759_s15), 63  ;;  %v2407_v27 = vld [vmem:[%s2932_s1 + $0x88] sm:$0xff]   ;;  %v2417_v35 = vld [vmem:[%s2932_s1 + $0x98] sm:$0xff]   ;;  %v2424_v36 = vld [vmem:[%s2932_s1 + $0xe0] sm:$0xff]  }
   0xf   : > { %s2356_s28 = smul.u32 20, %s2939_s15  ;;  %v2438_v38 = vld [vmem:[%s2932_s1 + $0x110] sm:$0xff]   ;;  %v2426_v40 = vld [vmem:[%s2932_s1 + $0xa0] sm:$0xff]   ;;  %v2427_v41 = vld [vmem:[%s2932_s1 + $0xe8] sm:$0xff]  }
  0x10   : > { %2049 = vmatpush3.bf16.msra.mxu0 %v2386_v5  ;;  %2350 = vmatpush3.bf16.msra.mxu1 %v2386_v5  ;;  %v2428_v44 = vld [vmem:[%s2932_s1 + $0xa8] sm:$0xff]   ;;  %v2452_v45 = vld [vmem:[%s2932_s1 + $0x118] sm:$0xff]   ;;  %v2435_v48 = vld [vmem:[%s2932_s1 + $0xf0] sm:$0xff]  }
  0x11   : > { %2050 = vmatprep.subr.bf16.mxu0 %v2387_v6  ;;  %2343 = vmatprep.subr.bf16.mxu1 %v2387_v6  ;;  %s2623_s7 = scalar_lea.vmem %s2931_s0, %s2356_s28  ;;  %v2436_v49 = vld [vmem:[%s2932_s1 + $0xb0] sm:$0xff]   ;;  %v2437_v50 = vld [vmem:[%s2932_s1 + $0xf8] sm:$0xff]   ;;  %v2459_v52 = vld [vmem:[%s2932_s1 + $0x120] sm:$0xff]  }
  0x12   : > { %v2399_v11 = vld [vmem:[%s2623_s7 + $0x4] ss:$20 sps:$4 sm:$0xff]   ;;  %v2397_v20 = vld [vmem:[%s2623_s7] ss:$20 sps:$4 sm:$0xff]   ;;  %v2412_v28 = vld [vmem:[%s2623_s7 + $0x28] ss:$20 sps:$4 sm:$0xff]  }
  0x13   : > { %v2402_v12 = vld [vmem:[%s2623_s7 + $0x1e4] ss:$20 sps:$4 sm:$0xff]   ;;  %1052 = vmatprep.mubr.bf16.mxu0 %v2399_v11  ;;  %v2400_v21 = vld [vmem:[%s2623_s7 + $0x1e0] ss:$20 sps:$4 sm:$0xff]   ;;  %v2413_v30 = vld [vmem:[%s2623_s7 + $0x208] ss:$20 sps:$4 sm:$0xff]  }
  0x14   : > { %2051 = vmatpush3.bf16.msra.mxu0 %v2388_v7  ;;  %2351 = vmatpush3.bf16.msra.mxu1 %v2388_v7  ;;  %v2408_v24 = vld [vmem:[%s2623_s7 + $0x2c] ss:$20 sps:$4 sm:$0xff]   ;;  %v2418_v32 = vld [vmem:[%s2623_s7 + $0x54] ss:$20 sps:$4 sm:$0xff]   ;;  %v2422_v37 = vld [vmem:[%s2623_s7 + $0x50] ss:$20 sps:$4 sm:$0xff]  }
  0x15   : > { %2052 = vmatprep.subr.bf16.mxu0 %v2389_v8  ;;  %2344 = vmatprep.subr.bf16.mxu1 %v2389_v8  ;;  %v2410_v25 = vld [vmem:[%s2623_s7 + $0x20c] ss:$20 sps:$4 sm:$0xff]   ;;  %v2420_v34 = vld [vmem:[%s2623_s7 + $0x234] ss:$20 sps:$4 sm:$0xff]   ;;  %v2423_v39 = vld [vmem:[%s2623_s7 + $0x230] ss:$20 sps:$4 sm:$0xff]  }
  0x16   : > { %1148 = vmatprep.mubr.bf16.mxu1 %v2402_v12  ;;  %v2429_v42 = vld [vmem:[%s2623_s7 + $0x7c] ss:$20 sps:$4 sm:$0xff]   ;;  %v2433_v46 = vld [vmem:[%s2623_s7 + $0x78] ss:$20 sps:$4 sm:$0xff]   ;;  %v2445_v56 = vld [vmem:[%s2623_s7 + $0xa0] ss:$20 sps:$4 sm:$0xff]  }
  0x17   : > { %v2431_v43 = vld [vmem:[%s2623_s7 + $0x25c] ss:$20 sps:$4 sm:$0xff]   ;;  %v2434_v47 = vld [vmem:[%s2623_s7 + $0x258] ss:$20 sps:$4 sm:$0xff]   ;;  %v2448_v59 = vld [vmem:[%s2623_s7 + $0x34] ss:$20 sps:$4 sm:$0xff]  }
  0x18   : > { %2053 = vmatpush3.bf16.msra.mxu0 %v2390_v9  ;;  %2352 = vmatpush3.bf16.msra.mxu1 %v2390_v9  ;;  %v2440_v51 = vld [vmem:[%s2623_s7 + $0xa4] ss:$20 sps:$4 sm:$0xff]   ;;  %v2444_v53 = vld [vmem:[%s2623_s7 + $0xc] ss:$20 sps:$4 sm:$0xff]   ;;  %v2442_v55 = vld [vmem:[%s2623_s7 + $0x8] ss:$20 sps:$4 sm:$0xff]  }
  0x19   : > { %2054 = vmatprep.subr.bf16.mxu0 %v2391_v10  ;;  %2345 = vmatprep.subr.bf16.mxu1 %v2391_v10  ;;  %v2439_v54 = vld [vmem:[%s2932_s1 + $0xb8] sm:$0xff]   ;;  %v2472_v57 = vld [vmem:[%s2932_s1 + $0x128] sm:$0xff]   ;;  %v2479_v60 = vld [vmem:[%s2932_s1 + $0x130] sm:$0xff]  }
  0x1a   : > { %v2446_v58 = vld [vmem:[%s2623_s7 + $0xcc] ss:$20 sps:$4 sm:$0xff]   ;;  %v2450_v61 = vld [vmem:[%s2623_s7 + $0xc8] ss:$20 sps:$4 sm:$0xff]   ;;  %v2451_v62 = vld [vmem:[%s2623_s7 + $0x30] ss:$20 sps:$4 sm:$0xff]  }
  0x1b   : > { %v2453_v63 = vld [vmem:[%s2623_s7 + $0xf4] ss:$20 sps:$4 sm:$0xff]   ;;  %v2455_v0 = vld [vmem:[%s2623_s7 + $0x5c] ss:$20 sps:$4 sm:$0xff]   ;;  %v2458_v3 = vld [vmem:[%s2623_s7 + $0x58] ss:$20 sps:$4 sm:$0xff]  }
  0x1c   : > { %2055 = vmatpush3.bf16.msra.mxu0 %v2392_v13  ;;  %2353 = vmatpush3.bf16.msra.mxu1 %v2392_v13  ;;  %v2492_v1 = vld [vmem:[%s2932_s1 + $0x138] sm:$0xff]   ;;  %v2457_v2 = vld [vmem:[%s2623_s7 + $0xf0] ss:$20 sps:$4 sm:$0xff]   ;;  %v2465_v7 = vld [vmem:[%s2623_s7 + $0x80] ss:$20 sps:$4 sm:$0xff]  }
  0x1d   : > { %2056 = vmatprep.subr.bf16.mxu0 %v2393_v14  ;;  %2346 = vmatprep.subr.bf16.mxu1 %v2393_v14  ;;  %v2460_v4 = vld [vmem:[%s2623_s7 + $0x11c] ss:$20 sps:$4 sm:$0xff]   ;;  %v2462_v5 = vld [vmem:[%s2623_s7 + $0x84] ss:$20 sps:$4 sm:$0xff]   ;;  %v2468_v9 = vld [vmem:[%s2623_s7 + $0xac] ss:$20 sps:$4 sm:$0xff]  }
  0x1e   : > { %v2464_v6 = vld [vmem:[%s2623_s7 + $0x118] ss:$20 sps:$4 sm:$0xff]   ;;  %v2470_v10 = vld [vmem:[%s2623_s7 + $0x140] ss:$20 sps:$4 sm:$0xff]   ;;  %v2471_v11 = vld [vmem:[%s2623_s7 + $0xa8] ss:$20 sps:$4 sm:$0xff]  }
  0x1f   : > { %v2466_v8 = vld [vmem:[%s2623_s7 + $0x144] ss:$20 sps:$4 sm:$0xff]   ;;  %v2473_v12 = vld [vmem:[%s2623_s7 + $0x16c] ss:$20 sps:$4 sm:$0xff]   ;;  %v2475_v13 = vld [vmem:[%s2623_s7 + $0xd4] ss:$20 sps:$4 sm:$0xff]  }
  0x20   : > { %2057 = vmatpush3.bf16.msra.mxu0 %v2394_v15  ;;  %2354 = vmatpush3.bf16.msra.mxu1 %v2394_v15  ;;  %v2477_v14 = vld [vmem:[%s2623_s7 + $0x168] ss:$20 sps:$4 sm:$0xff]   ;;  %v2478_v15 = vld [vmem:[%s2623_s7 + $0xd0] ss:$20 sps:$4 sm:$0xff]  }
  0x21   : > { %2058 = vmatprep.subr.bf16.mxu0 %v2395_v16  ;;  %2347 = vmatprep.subr.bf16.mxu1 %v2395_v16  ;;  %v2480_v16 = vld [vmem:[%s2623_s7 + $0x194] ss:$20 sps:$4 sm:$0xff]  }
  0x24   : > { %2059 = vmatpush3.bf16.msra.mxu0 %v2396_v17  ;;  %2355 = vmatpush3.bf16.msra.mxu1 %v2396_v17  ;;  %v2482_v17 = vld [vmem:[%s2623_s7 + $0xfc] ss:$20 sps:$4 sm:$0xff]  }
  0x25   : > { %2156 = vmatprep.subr.bf16.mxu1 %v2403_v18  ;;  %2292 = vmatprep.subr.bf16.mxu0 %v2406_v19  ;;  %v2484_v18 = vld [vmem:[%s2623_s7 + $0x190] ss:$20 sps:$4 sm:$0xff]  }
  0x27   : > { %1053 = vmatmul.mubr.bf16.vlgmr.msra.gmra.mrb[0].mxu0 %v2397_v20  ;;  %1149 = vmatmul.mubr.bf16.vlgmr.msra.gmra.mrb[0].mxu1 %v2400_v21  ;;  %v2486_v20 = vld [vmem:[%s2623_s7 + $0x1bc] ss:$20 sps:$4 sm:$0xff]   ;;  %v2488_v21 = vld [vmem:[%s2623_s7 + $0x124] ss:$20 sps:$4 sm:$0xff]  }
  0x28   : > { %2157 = vmatpush3.bf16.msra.mxu1 %v2404_v22  ;;  %2293 = vmatpush3.bf16.msra.mxu0 %v2406_v19  ;;  %v2485_v19 = vld [vmem:[%s2623_s7 + $0xf8] ss:$20 sps:$4 sm:$0xff]  }
  0x29   : > { %2158 = vmatprep.subr.bf16.mxu1 %v2405_v23  ;;  %1060 = vmatprep.mubr.bf16.mxu0 %v2408_v24  ;;  %v2490_v22 = vld [vmem:[%s2623_s7 + $0x1b8] ss:$20 sps:$4 sm:$0xff]   ;;  %v2491_v23 = vld [vmem:[%s2623_s7 + $0x120] ss:$20 sps:$4 sm:$0xff]  }
  0x2a   : > { %1156 = vmatprep.mubr.bf16.mxu1 %v2410_v25  ;;  %2294 = vmatprep.subr.bf16.mxu0 %v2425_v26  ;;  %v2493_v24 = vld [vmem:[%s2623_s7 + $0x14c] ss:$20 sps:$4 sm:$0xff]   ;;  %v2495_v25 = vld [vmem:[%s2623_s7 + $0x10] ss:$20 sps:$4 sm:$0xff]  }
  0x2c   : > { %2159 = vmatpush3.bf16.msra.mxu1 %v2407_v27  ;;  %2295 = vmatpush3.bf16.msra.mxu0 %v2425_v26  ;;  %v2496_v26 = vld [vmem:[%s2623_s7 + $0x148] ss:$20 sps:$4 sm:$0xff]   ;;  %v2497_v27 = vld [vmem:[%s2623_s7 + $0x38] ss:$20 sps:$4 sm:$0xff]  }
  0x2d   : > { %2160 = vmatprep.subr.bf16.mxu1 %v2414_v29  ;;  %2296 = vmatprep.subr.bf16.mxu0 %v2438_v38  ;;  %v2500_v29 = vld [vmem:[%s2623_s7 + $0x60] ss:$20 sps:$4 sm:$0xff]  }
  0x2f   : > { %1061 = vmatmul.mubr.bf16.gmra.mrb[4].mxu0 %v2412_v28  ;;  %1157 = vmatmul.mubr.bf16.gmra.mrb[4].mxu1 %v2413_v30  ;;  %v2498_v28 = vld [vmem:[%s2623_s7 + $0x174] ss:$20 sps:$4 sm:$0xff]   ;;  %v2501_v30 = vld [vmem:[%s2623_s7 + $0x170] ss:$20 sps:$4 sm:$0xff]  }
  0x30   : > { %2161 = vmatpush3.bf16.msra.mxu1 %v2415_v31  ;;  %1068 = vmatprep.mubr.bf16.mxu0 %v2418_v32  ;;  %v2502_v31 = vld [vmem:[%s2623_s7 + $0x88] ss:$20 sps:$4 sm:$0xff]  }
  0x31   : > { %2162 = vmatprep.subr.bf16.mxu1 %v2416_v33  ;;  %1164 = vmatprep.mubr.bf16.mxu1 %v2420_v34  ;;  %v2503_v32 = vld [vmem:[%s2623_s7 + $0x19c] ss:$20 sps:$4 sm:$0xff]   ;;  %v2506_v34 = vld [vmem:[%s2623_s7 + $0x198] ss:$20 sps:$4 sm:$0xff]  }
  0x32   : > { %2297 = vmatpush3.bf16.msra.mxu0 %v2438_v38  ;;  %v2505_v33 = vld [vmem:[%s2623_s7 + $0xb0] ss:$20 sps:$4 sm:$0xff]   ;;  %v2511_v38 = vld [vmem:[%s2623_s7 + $0x1c0] ss:$20 sps:$4 sm:$0xff]  }
  0x33   : > { %2298 = vmatprep.subr.bf16.mxu0 %v2452_v45 }
  0x34   : > { %2163 = vmatpush3.bf16.msra.mxu1 %v2417_v35  ;;  %v2507_v35 = vld [vmem:[%s2623_s7 + $0xd8] ss:$20 sps:$4 sm:$0xff]  }
  0x35   : > { %2164 = vmatprep.subr.bf16.mxu1 %v2424_v36  ;;  %v2508_v36 = vld [vmem:[%s2623_s7 + $0x1c4] ss:$20 sps:$4 sm:$0xff]  }
  0x36   : > { %2299 = vmatpush3.bf16.msra.mxu0 %v2452_v45  ;;  %v2520_v45 = vld [vmem:[%s2623_s7 + $0x1a0] ss:$20 sps:$4 sm:$0xff]  }
  0x37   : > { %1069 = vmatmul.mubr.bf16.gmra.mrb[8].mxu0 %v2422_v37  ;;  %1165 = vmatmul.mubr.bf16.gmra.mrb[8].mxu1 %v2423_v39  ;;  %v2510_v37 = vld [vmem:[%s2623_s7 + $0x100] ss:$20 sps:$4 sm:$0xff]   ;;  %v2512_v39 = vld [vmem:[%s2623_s7 + $0x128] ss:$20 sps:$4 sm:$0xff]  }
  0x38   : > { %2165 = vmatpush3.bf16.msra.mxu1 %v2426_v40  ;;  %1076 = vmatprep.mubr.bf16.mxu0 %v2429_v42  ;;  %v2513_v40 = vld [vmem:[%s2623_s7 + $0x1ec] ss:$20 sps:$4 sm:$0xff]   ;;  %v2516_v42 = vld [vmem:[%s2623_s7 + $0x1e8] ss:$20 sps:$4 sm:$0xff]  }
  0x39   : > { %2166 = vmatprep.subr.bf16.mxu1 %v2427_v41  ;;  %1172 = vmatprep.mubr.bf16.mxu1 %v2431_v43  ;;  %v2515_v41 = vld [vmem:[%s2623_s7 + $0x150] ss:$20 sps:$4 sm:$0xff]   ;;  %v2517_v43 = vld [vmem:[%s2623_s7 + $0x178] ss:$20 sps:$4 sm:$0xff]  }
  0x3a   : > { %2300 = vmatprep.subr.bf16.mxu0 %v2459_v52 }
  0x3b   : > { %2301 = vmatpush3.bf16.msra.mxu0 %v2459_v52  ;;  %v2528_v52 = vld [vmem:[%s2623_s7 + $0x264] ss:$20 sps:$4 sm:$0xff]  }
  0x3c   : > { %2167 = vmatpush3.bf16.msra.mxu1 %v2428_v44  ;;  %2302 = vmatprep.subr.bf16.mxu0 %v2472_v57  ;;  %v2518_v44 = vld [vmem:[%s2623_s7 + $0x214] ss:$20 sps:$4 sm:$0xff]  }
  0x3d   : > { %2168 = vmatprep.subr.bf16.mxu1 %v2435_v48  ;;  %v2523_v48 = vld [vmem:[%s2623_s7 + $0x23c] ss:$20 sps:$4 sm:$0xff]  }
  0x3f   : > { %1077 = vmatmul.mubr.bf16.gmra.mrb[12].mxu0 %v2433_v46  ;;  %1173 = vmatmul.mubr.bf16.gmra.mrb[12].mxu1 %v2434_v47  ;;  %v2521_v46 = vld [vmem:[%s2623_s7 + $0x210] ss:$20 sps:$4 sm:$0xff]   ;;  %v2522_v47 = vld [vmem:[%s2623_s7 + $0x1c8] ss:$20 sps:$4 sm:$0xff]  }
  0x40   : > { %2169 = vmatpush3.bf16.msra.mxu1 %v2436_v49  ;;  %1084 = vmatprep.mubr.bf16.mxu0 %v2440_v51  ;;  %v2525_v49 = vld [vmem:[%s2623_s7 + $0x1f0] ss:$20 sps:$4 sm:$0xff]   ;;  %v2527_v51 = vld [vmem:[%s2623_s7 + $0x218] ss:$20 sps:$4 sm:$0xff]  }
  0x41   : > { %2170 = vmatprep.subr.bf16.mxu1 %v2437_v50  ;;  %1213 = vmatprep.mubr.bf16.mxu1 %v2444_v53  ;;  %v2526_v50 = vld [vmem:[%s2623_s7 + $0x238] ss:$20 sps:$4 sm:$0xff]   ;;  %v2530_v53 = vld [vmem:[%s2623_s7 + $0x240] ss:$20 sps:$4 sm:$0xff]  }
  0x42   : > { %2303 = vmatpush3.bf16.msra.mxu0 %v2472_v57 }
  0x43   : > { %2304 = vmatprep.subr.bf16.mxu0 %v2479_v60 }
  0x44   : > { %2171 = vmatpush3.bf16.msra.mxu1 %v2439_v54  ;;  %v2531_v54 = vld [vmem:[%s2623_s7 + $0x260] ss:$20 sps:$4 sm:$0xff]  }
  0x46   : > { %2305 = vmatpush3.bf16.msra.mxu0 %v2479_v60 }
  0x47   : > { %1085 = vmatmul.mubr.bf16.gmra.mrb[16].mxu0 %v2445_v56  ;;  %1214 = vmatmul.mubr.bf16.vlgmr.msra.gmra.mrb[16].mxu1 %v2442_v55  ;;  %v2532_v55 = vld [vmem:[%s2623_s7 + $0x268] ss:$20 sps:$4 sm:$0xff]   ;;  %s1762_s7 = sshll.u32 %s2939_s15, 2 }
  0x48   : > { %1092 = vmatprep.mubr.bf16.mxu0 %v2446_v58  ;;  %1221 = vmatprep.mubr.bf16.mxu1 %v2448_v59  ;;  %s2869_s30 = scalar_lea.vmem %s2933_s2, %s1762_s7 }
  0x49   : > { %2306 = vmatprep.subr.bf16.mxu0 %v2492_v1 }
  0x4a   : > { %2307 = vmatpush3.bf16.msra.mxu0 %v2492_v1 }
  0x4f   : > { %1093 = vmatmul.mubr.bf16.gmra.mrb[20].mxu0 %v2450_v61  ;;  %1222 = vmatmul.mubr.bf16.gmra.mrb[20].mxu1 %v2451_v62 }
  0x50   : > { %1100 = vmatprep.mubr.bf16.mxu0 %v2453_v63  ;;  %1229 = vmatprep.mubr.bf16.mxu1 %v2455_v0 }
  0x57   : > { %1101 = vmatmul.mubr.bf16.gmra.mrb[24].mxu0 %v2457_v2  ;;  %1230 = vmatmul.mubr.bf16.gmra.mrb[24].mxu1 %v2458_v3 }
  0x58   : > { %1108 = vmatprep.mubr.bf16.mxu0 %v2460_v4  ;;  %1237 = vmatprep.mubr.bf16.mxu1 %v2462_v5 }
  0x5f   : > { %1109 = vmatmul.mubr.bf16.gmra.mrb[28].mxu0 %v2464_v6  ;;  %1238 = vmatmul.mubr.bf16.gmra.mrb[28].mxu1 %v2465_v7 }
  0x60   : > { %1116 = vmatprep.mubr.bf16.mxu0 %v2466_v8  ;;  %1245 = vmatprep.mubr.bf16.mxu1 %v2468_v9 }
  0x67   : > { %1117 = vmatmul.mubr.bf16.gmra.mrb[32].mxu0 %v2470_v10  ;;  %1246 = vmatmul.mubr.bf16.gmra.mrb[32].mxu1 %v2471_v11 }
  0x68   : > { %1124 = vmatprep.mubr.bf16.mxu0 %v2473_v12  ;;  %1253 = vmatprep.mubr.bf16.mxu1 %v2475_v13 }
  0x6f   : > { %1125 = vmatmul.mubr.bf16.gmra.mrb[36].mxu0 %v2477_v14  ;;  %1254 = vmatmul.mubr.bf16.gmra.mrb[36].mxu1 %v2478_v15 }
  0x70   : > { %1132 = vmatprep.mubr.bf16.mxu0 %v2480_v16  ;;  %1261 = vmatprep.mubr.bf16.mxu1 %v2482_v17 }
  0x77   : > { %1133 = vmatmul.mubr.bf16.gmra.mrb[40].mxu0 %v2484_v18  ;;  %1262 = vmatmul.mubr.bf16.gmra.mrb[40].mxu1 %v2485_v19 }
  0x78   : > { %1140 = vmatprep.mubr.bf16.mxu0 %v2486_v20  ;;  %1269 = vmatprep.mubr.bf16.mxu1 %v2488_v21 }
  0x7f   : > { %1141 = vmatmul.mubr.bf16.gmra.mrb[44].mxu0 %v2490_v22  ;;  %1270 = vmatmul.mubr.bf16.gmra.mrb[44].mxu1 %v2491_v23 }
  0x80   : > { %1277 = vmatprep.mubr.bf16.mxu1 %v2493_v24  ;;  %2308 = vmatprep.mubr.bf16.mxu0 %v2495_v25 }
  0x87   : > { %1278 = vmatmul.mubr.bf16.gmra.mrb[48].mxu1 %v2496_v26  ;;  %2309 = vmatmul.mubr.bf16.vlgmr.msra.gmra.mrb[48].mxu0 %v2497_v27 }
  0x88   : > { %1285 = vmatprep.mubr.bf16.mxu1 %v2498_v28  ;;  %2312 = vmatprep.mubr.bf16.mxu0 %v2500_v29 }
  0x8f   : > { %1286 = vmatmul.mubr.bf16.gmra.mrb[52].mxu1 %v2501_v30  ;;  %2313 = vmatmul.mubr.bf16.gmra.mrb[52].mxu0 %v2502_v31 }
  0x90   : > { %1293 = vmatprep.mubr.bf16.mxu1 %v2503_v32  ;;  %2316 = vmatprep.mubr.bf16.mxu0 %v2505_v33 }
  0x97   : > { %1294 = vmatmul.mubr.bf16.gmra.mrb[56].mxu1 %v2506_v34  ;;  %2317 = vmatmul.mubr.bf16.gmra.mrb[56].mxu0 %v2507_v35 }
  0x98   : > { %1301 = vmatprep.mubr.bf16.mxu1 %v2508_v36  ;;  %2320 = vmatprep.mubr.bf16.mxu0 %v2510_v37 }
  0x9f   : > { %1302 = vmatmul.mubr.bf16.gmra.mrb[60].mxu1 %v2511_v38  ;;  %2321 = vmatmul.mubr.bf16.gmra.mrb[60].mxu0 %v2512_v39 }
  0xa0   : > { %1309 = vmatprep.mubr.bf16.mxu1 %v2513_v40  ;;  %2324 = vmatprep.mubr.bf16.mxu0 %v2515_v41 }
  0xa7   : > { %1310 = vmatmul.mubr.bf16.gmra.mrb[64].mxu1 %v2516_v42  ;;  %2325 = vmatmul.mubr.bf16.gmra.mrb[64].mxu0 %v2517_v43 }
  0xa8   : > { %1317 = vmatprep.mubr.bf16.mxu1 %v2518_v44  ;;  %2328 = vmatprep.mubr.bf16.mxu0 %v2520_v45 }
  0xaf   : > { %1318 = vmatmul.mubr.bf16.gmra.mrb[68].mxu1 %v2521_v46  ;;  %2329 = vmatmul.mubr.bf16.gmra.mrb[68].mxu0 %v2522_v47 }
  0xb0   : > { %1325 = vmatprep.mubr.bf16.mxu1 %v2523_v48  ;;  %2332 = vmatprep.mubr.bf16.mxu0 %v2525_v49 }
  0xb7   : > { %1326 = vmatmul.mubr.bf16.gmra.mrb[72].mxu1 %v2526_v50  ;;  %2333 = vmatmul.mubr.bf16.gmra.mrb[72].mxu0 %v2527_v51 }
  0xb8   : > { %1333 = vmatprep.mubr.bf16.mxu1 %v2528_v52  ;;  %2336 = vmatprep.mubr.bf16.mxu0 %v2530_v53 }
  0xbf   : > { %1334 = vmatmul.mubr.bf16.gmra.mrb[76].mxu1 %v2531_v54  ;;  %2337 = vmatmul.mubr.bf16.gmra.mrb[76].mxu0 %v2532_v55 }
  0xfa   : > { %v2132_v56 = vpop.f32.mrb[0].mxu1  ;;  %v2060_v57 = vpop.f32.mrb[0].mxu0 }
  0xfb   : > { %v2133_v58 = vpop.f32.mrb[1].mxu1  ;;  %v2061_v59 = vpop.f32.mrb[1].mxu0 }
  0xfc   : > { %v2798_v60 = vadd.f32 %v2133_v58, %v2132_v56  ;;  %v2135_v61 = vpop.f32.mrb[2].mxu1  ;;  %v2062_v62 = vadd.f32 %v2061_v59, %v2060_v57  ;;  %v2063_v63 = vpop.f32.mrb[2].mxu0 }
  0xfd   : > { %v2136_v0 = vpop.f32.mrb[3].mxu1  ;;  %v2064_v1 = vpop.f32.mrb[3].mxu0 }
  0xfe   : > { %v2800_v2 = vadd.f32 %v2136_v0, %v2135_v61  ;;  %v2065_v3 = vadd.f32 %v2064_v1, %v2063_v63 }
 0x102   : > { %v2138_v4 = vpop.f32.mrb[4].mxu1  ;;  %v2066_v5 = vpop.f32.mrb[4].mxu0 }
 0x103   : > { %v2139_v6 = vpop.f32.mrb[5].mxu1  ;;  %v2067_v7 = vpop.f32.mrb[5].mxu0 }
 0x104   : > { %v2802_v8 = vadd.f32 %v2139_v6, %v2138_v4  ;;  %v2141_v9 = vpop.f32.mrb[6].mxu1  ;;  %v2068_v10 = vadd.f32 %v2067_v7, %v2066_v5  ;;  %v2069_v11 = vpop.f32.mrb[6].mxu0 }
 0x105   : > { %v2142_v12 = vpop.f32.mrb[7].mxu1  ;;  %v2070_v13 = vpop.f32.mrb[7].mxu0 }
 0x106   : > { %v2804_v14 = vadd.f32 %v2142_v12, %v2141_v9  ;;  %v2071_v15 = vadd.f32 %v2070_v13, %v2069_v11 }
 0x10a   : > { %v2144_v16 = vpop.f32.mrb[8].mxu1  ;;  %v2072_v17 = vpop.f32.mrb[8].mxu0 }
 0x10b   : > { %v2145_v18 = vpop.f32.mrb[9].mxu1  ;;  %v2073_v19 = vpop.f32.mrb[9].mxu0 }
 0x10c   : > { %v2806_v20 = vadd.f32 %v2145_v18, %v2144_v16  ;;  %v2147_v21 = vpop.f32.mrb[10].mxu1  ;;  %v2074_v22 = vadd.f32 %v2073_v19, %v2072_v17  ;;  %v2075_v23 = vpop.f32.mrb[10].mxu0 }
 0x10d   : > { %v2148_v24 = vpop.f32.mrb[11].mxu1  ;;  %v2076_v25 = vpop.f32.mrb[11].mxu0 }
 0x10e   : > { %v2808_v26 = vadd.f32 %v2148_v24, %v2147_v21  ;;  %v2077_v27 = vadd.f32 %v2076_v25, %v2075_v23 }
 0x112   : > { %v2150_v28 = vpop.f32.mrb[12].mxu1  ;;  %v2078_v29 = vpop.f32.mrb[12].mxu0 }
 0x113   : > { %v2151_v30 = vpop.f32.mrb[13].mxu1  ;;  %v2079_v31 = vpop.f32.mrb[13].mxu0 }
 0x114   : > { %v2810_v32 = vadd.f32 %v2151_v30, %v2150_v28  ;;  %v2153_v33 = vpop.f32.mrb[14].mxu1  ;;  %v2080_v34 = vadd.f32 %v2079_v31, %v2078_v29  ;;  %v2081_v35 = vpop.f32.mrb[14].mxu0 }
 0x115   : > { %v2154_v36 = vpop.f32.mrb[15].mxu1  ;;  %v2082_v37 = vpop.f32.mrb[15].mxu0 }
 0x116   : > { %v2812_v38 = vadd.f32 %v2154_v36, %v2153_v33  ;;  %v2083_v39 = vadd.f32 %v2082_v37, %v2081_v35 }
 0x11a   : > { %v2172_v40 = vpop.f32.mrb[16].mxu1  ;;  %v2084_v41 = vpop.f32.mrb[16].mxu0 }
 0x11b   : > { %v2173_v42 = vpop.f32.mrb[17].mxu1  ;;  %v2085_v43 = vpop.f32.mrb[17].mxu0 }
 0x11c   : > { %v2174_v44 = vadd.f32 %v2173_v42, %v2172_v40  ;;  %v2175_v45 = vpop.f32.mrb[18].mxu1  ;;  %v2086_v46 = vadd.f32 %v2085_v43, %v2084_v41  ;;  %v2087_v47 = vpop.f32.mrb[18].mxu0 }
 0x11d   : > { %v2176_v48 = vpop.f32.mrb[19].mxu1  ;;  %v2088_v49 = vpop.f32.mrb[19].mxu0 }
 0x11e   : > { %v2177_v50 = vadd.f32 %v2176_v48, %v2175_v45  ;;  %v2089_v51 = vadd.f32 %v2088_v49, %v2087_v47  ;;  %v2814_v52 = vadd.f32 %v2174_v44, %v2062_v62 }
 0x120   : > { %v2816_v53 = vadd.f32 %v2177_v50, %v2065_v3 }
 0x122   : > { %v2178_v54 = vpop.f32.mrb[20].mxu1  ;;  %v2090_v55 = vpop.f32.mrb[20].mxu0 }
 0x123   : > { %v2179_v56 = vpop.f32.mrb[21].mxu1  ;;  %v2091_v57 = vpop.f32.mrb[21].mxu0 }
 0x124   : > { %v2180_v58 = vadd.f32 %v2179_v56, %v2178_v54  ;;  %v2181_v59 = vpop.f32.mrb[22].mxu1  ;;  %v2092_v61 = vadd.f32 %v2091_v57, %v2090_v55  ;;  %v2093_v63 = vpop.f32.mrb[22].mxu0 }
 0x125   : > { %v2182_v0 = vpop.f32.mrb[23].mxu1  ;;  %v2094_v1 = vpop.f32.mrb[23].mxu0 }
 0x126   : > { %v2183_v4 = vadd.f32 %v2182_v0, %v2181_v59  ;;  %v2095_v5 = vadd.f32 %v2094_v1, %v2093_v63  ;;  %v2818_v6 = vadd.f32 %v2180_v58, %v2068_v10 }
 0x128   : > { %v2820_v7 = vadd.f32 %v2183_v4, %v2071_v15 }
 0x12a   : > { %v2184_v62 = vpop.f32.mrb[24].mxu1  ;;  %v2096_v9 = vpop.f32.mrb[24].mxu0 }
 0x12b   : > { %v2185_v3 = vpop.f32.mrb[25].mxu1  ;;  %v2097_v11 = vpop.f32.mrb[25].mxu0 }
 0x12c   : > { %v2186_v12 = vadd.f32 %v2185_v3, %v2184_v62  ;;  %v2187_v13 = vpop.f32.mrb[26].mxu1  ;;  %v2098_v16 = vadd.f32 %v2097_v11, %v2096_v9  ;;  %v2099_v17 = vpop.f32.mrb[26].mxu0 }
 0x12d   : > { %v2188_v18 = vpop.f32.mrb[27].mxu1  ;;  %v2100_v19 = vpop.f32.mrb[27].mxu0 }
 0x12e   : > { %v2189_v21 = vadd.f32 %v2188_v18, %v2187_v13  ;;  %v2101_v23 = vadd.f32 %v2100_v19, %v2099_v17  ;;  %v2822_v24 = vadd.f32 %v2186_v12, %v2074_v22 }
 0x130   : > { %v2824_v25 = vadd.f32 %v2189_v21, %v2077_v27 }
 0x132   : > { %v2190_v10 = vpop.f32.mrb[28].mxu1  ;;  %v2102_v28 = vpop.f32.mrb[28].mxu0 }
 0x133   : > { %v2191_v15 = vpop.f32.mrb[29].mxu1  ;;  %v2103_v29 = vpop.f32.mrb[29].mxu0 }
 0x134   : > { %v2192_v30 = vadd.f32 %v2191_v15, %v2190_v10  ;;  %v2193_v31 = vpop.f32.mrb[30].mxu1  ;;  %v2104_v33 = vadd.f32 %v2103_v29, %v2102_v28  ;;  %v2105_v35 = vpop.f32.mrb[30].mxu0 }
 0x135   : > { %v2194_v36 = vpop.f32.mrb[31].mxu1  ;;  %v2106_v37 = vpop.f32.mrb[31].mxu0 }
 0x136   : > { %v2195_v40 = vadd.f32 %v2194_v36, %v2193_v31  ;;  %v2107_v41 = vadd.f32 %v2106_v37, %v2105_v35  ;;  %v2826_v42 = vadd.f32 %v2192_v30, %v2080_v34 }
 0x138   : > { %v2828_v43 = vadd.f32 %v2195_v40, %v2083_v39 }
 0x13a   : > { %v2196_v22 = vpop.f32.mrb[32].mxu1  ;;  %v2108_v44 = vpop.f32.mrb[32].mxu0 }
 0x13b   : > { %v2197_v27 = vpop.f32.mrb[33].mxu1  ;;  %v2109_v45 = vpop.f32.mrb[33].mxu0 }
 0x13c   : > { %v2198_v47 = vadd.f32 %v2197_v27, %v2196_v22  ;;  %v2199_v48 = vpop.f32.mrb[34].mxu1  ;;  %v2830_v49 = vadd.f32 %v2109_v45, %v2108_v44  ;;  %v2111_v50 = vpop.f32.mrb[34].mxu0 }
 0x13d   : > { %v2200_v54 = vpop.f32.mrb[35].mxu1  ;;  %v2112_v55 = vpop.f32.mrb[35].mxu0 }
 0x13e   : > { %v2201_v56 = vadd.f32 %v2200_v54, %v2199_v48  ;;  %v2832_v57 = vadd.f32 %v2112_v55, %v2111_v50  ;;  %v2834_v58 = vadd.f32 %v2198_v47, %v2086_v46 }
 0x140   : > { %v2836_v34 = vadd.f32 %v2201_v56, %v2089_v51 }
 0x142   : > { %v2202_v39 = vpop.f32.mrb[36].mxu1  ;;  %v2114_v59 = vpop.f32.mrb[36].mxu0 }
 0x143   : > { %v2203_v63 = vpop.f32.mrb[37].mxu1  ;;  %v2115_v0 = vpop.f32.mrb[37].mxu0 }
 0x144   : > { %v2204_v1 = vadd.f32 %v2203_v63, %v2202_v39  ;;  %v2205_v4 = vpop.f32.mrb[38].mxu1  ;;  %v2838_v62 = vadd.f32 %v2115_v0, %v2114_v59  ;;  %v2117_v9 = vpop.f32.mrb[38].mxu0 }
 0x145   : > { %v2206_v3 = vpop.f32.mrb[39].mxu1  ;;  %v2118_v11 = vpop.f32.mrb[39].mxu0 }
 0x146   : > { %v2207_v12 = vadd.f32 %v2206_v3, %v2205_v4  ;;  %v2840_v13 = vadd.f32 %v2118_v11, %v2117_v9  ;;  %v2842_v17 = vadd.f32 %v2204_v1, %v2092_v61 }
 0x148   : > { %v2844_v46 = vadd.f32 %v2207_v12, %v2095_v5 }
 0x14a   : > { %v2208_v51 = vpop.f32.mrb[40].mxu1  ;;  %v2120_v18 = vpop.f32.mrb[40].mxu0 }
 0x14b   : > { %v2209_v19 = vpop.f32.mrb[41].mxu1  ;;  %v2121_v21 = vpop.f32.mrb[41].mxu0 }
 0x14c   : > { %v2210_v10 = vadd.f32 %v2209_v19, %v2208_v51  ;;  %v2211_v28 = vpop.f32.mrb[42].mxu1  ;;  %v2846_v15 = vadd.f32 %v2121_v21, %v2120_v18  ;;  %v2123_v29 = vpop.f32.mrb[42].mxu0 }
 0x14d   : > { %v2212_v30 = vpop.f32.mrb[43].mxu1  ;;  %v2124_v31 = vpop.f32.mrb[43].mxu0 }
 0x14e   : > { %v2213_v35 = vadd.f32 %v2212_v30, %v2211_v28  ;;  %v2848_v36 = vadd.f32 %v2124_v31, %v2123_v29  ;;  %v2850_v37 = vadd.f32 %v2210_v10, %v2098_v16 }
 0x150   : > { %v2852_v61 = vadd.f32 %v2213_v35, %v2101_v23 }
 0x152   : > { %v2214_v5 = vpop.f32.mrb[44].mxu1  ;;  %v2126_v40 = vpop.f32.mrb[44].mxu0 }
 0x153   : > { %v2215_v22 = vpop.f32.mrb[45].mxu1  ;;  %v2127_v44 = vpop.f32.mrb[45].mxu0 }
 0x154   : > { %v2216_v27 = vadd.f32 %v2215_v22, %v2214_v5  ;;  %v2217_v45 = vpop.f32.mrb[46].mxu1  ;;  %v2854_v47 = vadd.f32 %v2127_v44, %v2126_v40  ;;  %v2129_v48 = vpop.f32.mrb[46].mxu0 }
 0x155   : > { %v2218_v50 = vpop.f32.mrb[47].mxu1  ;;  %v2130_v54 = vpop.f32.mrb[47].mxu0 }
 0x156   : > { %v2219_v55 = vadd.f32 %v2218_v50, %v2217_v45  ;;  %v2856_v56 = vadd.f32 %v2130_v54, %v2129_v48  ;;  %v2858_v39 = vadd.f32 %v2216_v27, %v2104_v33 }
 0x158   : > { %v2860_v16 = vadd.f32 %v2219_v55, %v2107_v41 }
 0x15a   : > { %v2220_v23 = vpop.f32.mrb[48].mxu1  ;;  %v2310_v59 = vpop.f32.mrb[48].mxu0 }
 0x15b   : > { %v1385_v63 = vadd.f32 %v2310_v59, %v2818_v6  ;;  %v2221_v0 = vpop.f32.mrb[49].mxu1  ;;  %v1376_v1 = vpop.f32.mrb[49].mxu0 }
 0x15c   : > { %v2222_v4 = vadd.f32 %v2221_v0, %v2220_v23  ;;  %v1377_v9 = vadd.f32 %v1376_v1, %v2814_v52  ;;  %v2223_v3 = vpop.f32.mrb[50].mxu1  ;;  %v2311_v11 = vpop.f32.mrb[50].mxu0 }
 0x15d   : > { %v1388_v12 = vadd.f32 %v2311_v11, %v2820_v7  ;;  %v2224_v51 = vpop.f32.mrb[51].mxu1  ;;  %v1379_v18 = vpop.f32.mrb[51].mxu0 }
 0x15e   : > { %v2225_v6 = vadd.f32 %v2224_v51, %v2223_v3  ;;  %v1380_v33 = vadd.f32 %v1379_v18, %v2816_v53  ;;  %v2873_v41 = vadd.f32 %v2222_v4, %v2830_v49 }
 0x15f   : > { %v1957_v52 = vpack.c.bf16 %v1388_v12, %v1385_v63 }
 0x160   : > { %v1952_v19 = vpack.c.bf16 %v1380_v33, %v1377_v9  ;;  %v2876_v21 = vadd.f32 %v2225_v6, %v2832_v57 }
 0x161   : > { %2029 = vst [vmem:[%s2869_s30 + $0x8] sm:$0xff] %v1957_v52  }
 0x162   : > { %1953 = vst [vmem:[%s2869_s30] sm:$0xff] %v1952_v19   ;;  %v2226_v7 = vpop.f32.mrb[52].mxu1  ;;  %v2314_v10 = vpop.f32.mrb[52].mxu0 }
 0x163   : > { %v1401_v28 = vadd.f32 %v2314_v10, %v2826_v42  ;;  %v2227_v29 = vpop.f32.mrb[53].mxu1  ;;  %v1392_v30 = vpop.f32.mrb[53].mxu0 }
 0x164   : > { %v2228_v31 = vadd.f32 %v2227_v29, %v2226_v7  ;;  %v1393_v53 = vadd.f32 %v1392_v30, %v2822_v24  ;;  %v2229_v49 = vpop.f32.mrb[54].mxu1  ;;  %v2315_v35 = vpop.f32.mrb[54].mxu0 }
 0x165   : > { %v1404_v5 = vadd.f32 %v2315_v35, %v2828_v43  ;;  %v2230_v40 = vpop.f32.mrb[55].mxu1  ;;  %v1395_v57 = vpop.f32.mrb[55].mxu0 }
 0x166   : > { %v2231_v22 = vadd.f32 %v2230_v40, %v2229_v49  ;;  %v1396_v44 = vadd.f32 %v1395_v57, %v2824_v25  ;;  %v1288_v27 = vadd.f32 %v2228_v31, %v2838_v62 }
 0x167   : > { %v1967_v45 = vpack.c.bf16 %v1404_v5, %v1401_v28 }
 0x168   : > { %v1962_v42 = vpack.c.bf16 %v1396_v44, %v1393_v53  ;;  %v1291_v48 = vadd.f32 %v2231_v22, %v2840_v13 }
 0x169   : > { %2031 = vst [vmem:[%s2869_s30 + $0x18] sm:$0xff] %v1967_v45  }
 0x16a   : > { %2030 = vst [vmem:[%s2869_s30 + $0x10] sm:$0xff] %v1962_v42   ;;  %v2232_v50 = vpop.f32.mrb[56].mxu1  ;;  %v2318_v54 = vpop.f32.mrb[56].mxu0 }
 0x16b   : > { %v1417_v24 = vadd.f32 %v2318_v54, %v2842_v17  ;;  %v2233_v55 = vpop.f32.mrb[57].mxu1  ;;  %v1408_v43 = vpop.f32.mrb[57].mxu0 }
 0x16c   : > { %v2234_v23 = vadd.f32 %v2233_v55, %v2232_v50  ;;  %v1409_v59 = vadd.f32 %v1408_v43, %v2834_v58  ;;  %v2235_v25 = vpop.f32.mrb[58].mxu1  ;;  %v2319_v63 = vpop.f32.mrb[58].mxu0 }
 0x16d   : > { %v1420_v62 = vadd.f32 %v2319_v63, %v2844_v46  ;;  %v2236_v0 = vpop.f32.mrb[59].mxu1  ;;  %v1411_v1 = vpop.f32.mrb[59].mxu0 }
 0x16e   : > { %v2237_v13 = vadd.f32 %v2236_v0, %v2235_v25  ;;  %v1412_v4 = vadd.f32 %v1411_v1, %v2836_v34  ;;  %v1296_v9 = vadd.f32 %v2234_v23, %v2846_v15 }
 0x16f   : > { %v1977_v3 = vpack.c.bf16 %v1420_v62, %v1417_v24 }
 0x170   : > { %v1972_v17 = vpack.c.bf16 %v1412_v4, %v1409_v59  ;;  %v1299_v11 = vadd.f32 %v2237_v13, %v2848_v36 }
 0x171   : > { %2033 = vst [vmem:[%s2869_s30 + $0x28] sm:$0xff] %v1977_v3  }
 0x172   : > { %2032 = vst [vmem:[%s2869_s30 + $0x20] sm:$0xff] %v1972_v17   ;;  %v2238_v12 = vpop.f32.mrb[60].mxu1  ;;  %v2322_v51 = vpop.f32.mrb[60].mxu0 }
 0x173   : > { %v1433_v58 = vadd.f32 %v2322_v51, %v2858_v39  ;;  %v2239_v18 = vpop.f32.mrb[61].mxu1  ;;  %v1424_v46 = vpop.f32.mrb[61].mxu0 }
 0x174   : > { %v2240_v6 = vadd.f32 %v2239_v18, %v2238_v12  ;;  %v1425_v33 = vadd.f32 %v1424_v46, %v2850_v37  ;;  %v2241_v34 = vpop.f32.mrb[62].mxu1  ;;  %v2323_v52 = vpop.f32.mrb[62].mxu0 }
 0x175   : > { %v1436_v15 = vadd.f32 %v2323_v52, %v2860_v16  ;;  %v2242_v19 = vpop.f32.mrb[63].mxu1  ;;  %v1427_v7 = vpop.f32.mrb[63].mxu0 }
 0x176   : > { %v2243_v36 = vadd.f32 %v2242_v19, %v2241_v34  ;;  %v1428_v10 = vadd.f32 %v1427_v7, %v2852_v61  ;;  %v1304_v28 = vadd.f32 %v2240_v6, %v2854_v47 }
 0x177   : > { %v1987_v29 = vpack.c.bf16 %v1436_v15, %v1433_v58 }
 0x178   : > { %v1982_v39 = vpack.c.bf16 %v1428_v10, %v1425_v33  ;;  %v1307_v30 = vadd.f32 %v2243_v36, %v2856_v56 }
 0x179   : > { %2035 = vst [vmem:[%s2869_s30 + $0x38] sm:$0xff] %v1987_v29  }
 0x17a   : > { %2034 = vst [vmem:[%s2869_s30 + $0x30] sm:$0xff] %v1982_v39   ;;  %v2244_v31 = vpop.f32.mrb[64].mxu1  ;;  %v2326_v53 = vpop.f32.mrb[64].mxu0 }
 0x17b   : > { %v1449_v37 = vadd.f32 %v2326_v53, %v1288_v27  ;;  %v2245_v49 = vpop.f32.mrb[65].mxu1  ;;  %v1440_v16 = vpop.f32.mrb[65].mxu0 }
 0x17c   : > { %v2246_v35 = vadd.f32 %v2245_v49, %v2244_v31  ;;  %v1441_v5 = vadd.f32 %v1440_v16, %v2873_v41  ;;  %v2247_v40 = vpop.f32.mrb[66].mxu1  ;;  %v2327_v61 = vpop.f32.mrb[66].mxu0 }
 0x17d   : > { %v1452_v57 = vadd.f32 %v2327_v61, %v1291_v48  ;;  %v2248_v47 = vpop.f32.mrb[67].mxu1  ;;  %v1443_v22 = vpop.f32.mrb[67].mxu0 }
 0x17e   : > { %v2249_v44 = vadd.f32 %v2248_v47, %v2247_v40  ;;  %v1444_v56 = vadd.f32 %v1443_v22, %v2876_v21  ;;  %v1312_v45 = vadd.f32 %v2246_v35, %v2798_v60 }
 0x17f   : > { %v1997_v42 = vpack.c.bf16 %v1452_v57, %v1449_v37 }
 0x180   : > { %v1992_v50 = vpack.c.bf16 %v1444_v56, %v1441_v5  ;;  %v1315_v27 = vadd.f32 %v2249_v44, %v2800_v2 }
 0x181   : > { %2037 = vst [vmem:[%s2869_s30 + $0x48] sm:$0xff] %v1997_v42  }
 0x182   : > { %2036 = vst [vmem:[%s2869_s30 + $0x40] sm:$0xff] %v1992_v50   ;;  %v2250_v54 = vpop.f32.mrb[68].mxu1  ;;  %v2330_v24 = vpop.f32.mrb[68].mxu0 }
 0x183   : > { %v1465_v55 = vadd.f32 %v2330_v24, %v1304_v28  ;;  %v2251_v41 = vpop.f32.mrb[69].mxu1  ;;  %v1456_v48 = vpop.f32.mrb[69].mxu0 }
 0x184   : > { %v2252_v43 = vadd.f32 %v2251_v41, %v2250_v54  ;;  %v1457_v23 = vadd.f32 %v1456_v48, %v1296_v9  ;;  %v2253_v59 = vpop.f32.mrb[70].mxu1  ;;  %v2331_v25 = vpop.f32.mrb[70].mxu0 }
 0x185   : > { %v1468_v21 = vadd.f32 %v2331_v25, %v1307_v30  ;;  %v2254_v63 = vpop.f32.mrb[71].mxu1  ;;  %v1459_v60 = vpop.f32.mrb[71].mxu0 }
 0x186   : > { %v2255_v62 = vadd.f32 %v2254_v63, %v2253_v59  ;;  %v1460_v0 = vadd.f32 %v1459_v60, %v1299_v11  ;;  %v1320_v2 = vadd.f32 %v2252_v43, %v2802_v8 }
 0x187   : > { %v2007_v1 = vpack.c.bf16 %v1468_v21, %v1465_v55 }
 0x188   : > { %v2002_v13 = vpack.c.bf16 %v1460_v0, %v1457_v23  ;;  %v1323_v4 = vadd.f32 %v2255_v62, %v2804_v14 }
 0x189   : > { %2039 = vst [vmem:[%s2869_s30 + $0x58] sm:$0xff] %v2007_v1  }
 0x18a   : > { %2038 = vst [vmem:[%s2869_s30 + $0x50] sm:$0xff] %v2002_v13   ;;  %v2256_v3 = vpop.f32.mrb[72].mxu1  ;;  %v2334_v17 = vpop.f32.mrb[72].mxu0 }
 0x18b   : > { %v1481_v12 = vadd.f32 %v2334_v17, %v1320_v2  ;;  %v2257_v9 = vpop.f32.mrb[73].mxu1  ;;  %v1472_v51 = vpop.f32.mrb[73].mxu0 }
 0x18c   : > { %v2258_v58 = vadd.f32 %v2257_v9, %v2256_v3  ;;  %v1473_v18 = vadd.f32 %v1472_v51, %v1312_v45  ;;  %v2259_v46 = vpop.f32.mrb[74].mxu1  ;;  %v2335_v6 = vpop.f32.mrb[74].mxu0 }
 0x18d   : > { %v1484_v11 = vadd.f32 %v2335_v6, %v1323_v4  ;;  %v2260_v33 = vpop.f32.mrb[75].mxu1  ;;  %v1475_v8 = vpop.f32.mrb[75].mxu0 }
 0x18e   : > { %v2261_v34 = vadd.f32 %v2260_v33, %v2259_v46  ;;  %v1476_v52 = vadd.f32 %v1475_v8, %v1315_v27  ;;  %v1328_v14 = vadd.f32 %v2258_v58, %v2806_v20 }
 0x18f   : > { %v2017_v15 = vpack.c.bf16 %v1484_v11, %v1481_v12 }
 0x190   : > { %v2012_v19 = vpack.c.bf16 %v1476_v52, %v1473_v18  ;;  %v1331_v7 = vadd.f32 %v2261_v34, %v2808_v26 }
 0x191   : > { %2041 = vst [vmem:[%s2869_s30 + $0x68] sm:$0xff] %v2017_v15  }
 0x192   : > { %2040 = vst [vmem:[%s2869_s30 + $0x60] sm:$0xff] %v2012_v19   ;;  %v2262_v36 = vpop.f32.mrb[76].mxu1  ;;  %v2338_v10 = vpop.f32.mrb[76].mxu0 }
 0x193   : > { %v2263_v28 = vpop.f32.mrb[77].mxu1  ;;  %v1488_v29 = vpop.f32.mrb[77].mxu0 }
 0x194   : > { %v2264_v39 = vadd.f32 %v2263_v28, %v2262_v36  ;;  %v1489_v30 = vadd.f32 %v1488_v29, %v1328_v14  ;;  %v2265_v31 = vpop.f32.mrb[78].mxu1  ;;  %v2339_v53 = vpop.f32.mrb[78].mxu0 }
 0x195   : > { %v2266_v37 = vpop.f32.mrb[79].mxu1  ;;  %v1491_v49 = vpop.f32.mrb[79].mxu0 }
 0x196   : > { %v1336_v20 = vadd.f32 %v2264_v39, %v2810_v32  ;;  %v2267_v16 = vadd.f32 %v2266_v37, %v2265_v31  ;;  %v1492_v35 = vadd.f32 %v1491_v49, %v1331_v7 }
 0x198   : > { %v1497_v5 = vadd.f32 %v2338_v10, %v1336_v20  ;;  %v1339_v26 = vadd.f32 %v2267_v16, %v2812_v38  ;;  %v2022_v40 = vpack.c.bf16 %v1492_v35, %v1489_v30 }
 0x19a   : > { %v1500_v61 = vadd.f32 %v2339_v53, %v1339_v26  ;;  %2042 = vst [vmem:[%s2869_s30 + $0x70] sm:$0xff] %v2022_v40  }
 0x19c   : > { %v2027_v57 = vpack.c.bf16 %v1500_v61, %v1497_v5 }
 0x19e   : > { %2043 = vst [vmem:[%s2869_s30 + $0x78] sm:$0xff] %v2027_v57  }
 0x19f PF: > { %s12_s11 = sadd.s32 1, %s2555_s11   ;;  %s2934_s9 = smov %s2551_s10 }
 0x1a0   : > { %p9_p5 = scmp.ge.s32.totalorder %s12_s11, 4   ;;  %s2935_s10 = smov %s2937_s12 }
 0x1a2   :  { %11 = sbr.rel (!%p9_p5) target bundleno = 2 (0x2), region = 61 }

// kernel: _stylebank_core.33
= control target key start
LH: loop header
LB: loop body
LE: loop exit
PB: predicated region body
PF: predicated region fallthrough
CT: control target
= control target key end

     0   :  { %s7993_s12 = smov 0   ;;  %s7995_s13 = smov 0   ;;  %s9870_s0 = inlined_call_operand.vmem [shape: bf16[512,2688], index: 0, kind: input, shape index: {}]   ;;  %s9871_s1 = inlined_call_operand.vmem [shape: bf16[2688,128], index: 1, kind: input, shape index: {}]   ;;  %s9872_s2 = inlined_call_operand.vmem [shape: f32[1,128], index: 2, kind: input, shape index: {}]   ;;  %s9873_s3 = inlined_call_operand.vmem [shape: f32[512,128], index: 3, kind: output, shape index: {}]  }
   0x1   :  { %s7997_s14 = smov 0  }
   0x2 LB: > { %s25_s15 = sadd.s32 1, %s7967_s13  ;;  %p5539_p0 = scmp.ge.s32.totalorder %s7971_s14, 1  ;;  %s7971_s14 = sphi %s7997_s14, %s13_s14   ;;  %s7967_s13 = sphi %s7995_s13, %s9875_s13   ;;  %s7963_s12 = sphi %s7993_s12, %s9874_s12  }
   0x3   : > { %p27_p1 = scmp.ge.s32.totalorder %s25_s15, 2  ;;  %p170_p2 = scmp.lt.s32.totalorder %s7971_s14, 3 }
   0x5   : > { %s9877_s15 = smov (%p27_p1, %s25_s15), 0  ;;  %p171_p3 = pnand %p5539_p0, %p170_p2 }
   0x6   : > { %v7284_v0 = vld [vmem:[%s9871_s1 + $0x40] sm:$0xff] (!%p171_p3)   ;;  %s5540_s18 = sshll.u32 (!%p171_p3), %s7963_s12, 5  ;;  %v7286_v2 = vld [vmem:[%s9871_s1 + $0x48] sm:$0xff] (!%p171_p3)   ;;  %v7288_v4 = vld [vmem:[%s9871_s1 + $0x50] sm:$0xff] (!%p171_p3)  }
   0x7   : > { %174 = sbr.rel (%p171_p3) target bundleno = 925 (0x39d), region = 32  ;;  %v7285_v1 = vld [vmem:[%s9871_s1] sm:$0xff] (!%p171_p3)   ;;  %6051 = vmatprep.subr.bf16.mxu0 (!%p171_p3), %v7284_v0  ;;  %7243 = vmatprep.subr.bf16.mxu1 (!%p171_p3), %v7284_v0  ;;  %p206_p4 = scmp.lt.s32.totalorder (!%p171_p3), %s5540_s18, 63  ;;  %v7287_v3 = vld [vmem:[%s9871_s1 + $0x8] sm:$0xff] (!%p171_p3)   ;;  %v7289_v5 = vld [vmem:[%s9871_s1 + $0x10] sm:$0xff] (!%p171_p3)  }
   0x8   : > { %6052 = vmatpush3.bf16.msra.mxu0 (!%p171_p3), %v7285_v1  ;;  %7251 = vmatpush3.bf16.msra.mxu1 (!%p171_p3), %v7285_v1  ;;  %v7290_v6 = vld [vmem:[%s9871_s1 + $0x58] sm:$0xff] (!%p171_p3)   ;;  %v7292_v8 = vld [vmem:[%s9871_s1 + $0x60] sm:$0xff] (!%p171_p3)   ;;  %v7294_v10 = vld [vmem:[%s9871_s1 + $0x68] sm:$0xff] (!%p171_p3)  }
   0x9   : > { %6053 = vmatprep.subr.bf16.mxu0 (!%p171_p3), %v7286_v2  ;;  %7244 = vmatprep.subr.bf16.mxu1 (!%p171_p3), %v7286_v2  ;;  %v7291_v7 = vld [vmem:[%s9871_s1 + $0x18] sm:$0xff] (!%p171_p3)   ;;  %v7293_v9 = vld [vmem:[%s9871_s1 + $0x20] sm:$0xff] (!%p171_p3)   ;;  %v7295_v13 = vld [vmem:[%s9871_s1 + $0x28] sm:$0xff] (!%p171_p3)  }
   0xa   : > { %v7296_v14 = vld [vmem:[%s9871_s1 + $0x70] sm:$0xff] (!%p171_p3)   ;;  %v7298_v16 = vld [vmem:[%s9871_s1 + $0x78] sm:$0xff] (!%p171_p3)   ;;  %v7306_v18 = vld [vmem:[%s9871_s1 + $0xc0] sm:$0xff] (!%p171_p3)  }
   0xb   : > { %v7297_v15 = vld [vmem:[%s9871_s1 + $0x30] sm:$0xff] (!%p171_p3)   ;;  %v7299_v17 = vld [vmem:[%s9871_s1 + $0x38] sm:$0xff] (!%p171_p3)   ;;  %v7309_v21 = vld [vmem:[%s9871_s1 + $0x140] sm:$0xff] (!%p171_p3)  }
   0xc   : > { %6054 = vmatpush3.bf16.msra.mxu0 (!%p171_p3), %v7287_v3  ;;  %7252 = vmatpush3.bf16.msra.mxu1 (!%p171_p3), %v7287_v3  ;;  %v7307_v22 = vld [vmem:[%s9871_s1 + $0x80] sm:$0xff] (!%p171_p3)   ;;  %v7308_v23 = vld [vmem:[%s9871_s1 + $0xc8] sm:$0xff] (!%p171_p3)   ;;  %v7318_v31 = vld [vmem:[%s9871_s1 + $0xd0] sm:$0xff] (!%p171_p3)  }
   0xd   : > { %6055 = vmatprep.subr.bf16.mxu0 (!%p171_p3), %v7288_v4  ;;  %7245 = vmatprep.subr.bf16.mxu1 (!%p171_p3), %v7288_v4  ;;  %v7311_v24 = vld [vmem:[%s9871_s1 + $0x100] sm:$0xff] (!%p171_p3)   ;;  %v7310_v27 = vld [vmem:[%s9871_s1 + $0x88] sm:$0xff] (!%p171_p3)   ;;  %v7319_v32 = vld [vmem:[%s9871_s1 + $0x90] sm:$0xff] (!%p171_p3)  }
   0xe   : > { %s9879_s18 = smov (!%p206_p4, %s5540_s18), 63  ;;  %v7329_v28 = vld [vmem:[%s9871_s1 + $0x148] sm:$0xff]   ;;  %v7320_v34 = vld [vmem:[%s9871_s1 + $0xd8] sm:$0xff]   ;;  %v7328_v40 = vld [vmem:[%s9871_s1 + $0xe0] sm:$0xff]  }
   0xf   : > { %s7259_s4 = smul.u32 84, %s9879_s18  ;;  %v7331_v33 = vld [vmem:[%s9871_s1 + $0x108] sm:$0xff]   ;;  %v7321_v37 = vld [vmem:[%s9871_s1 + $0x98] sm:$0xff]   ;;  %v7330_v41 = vld [vmem:[%s9871_s1 + $0xa0] sm:$0xff]  }
  0x10   : > { %6056 = vmatpush3.bf16.msra.mxu0 %v7289_v5  ;;  %7253 = vmatpush3.bf16.msra.mxu1 %v7289_v5  ;;  %v7332_v42 = vld [vmem:[%s9871_s1 + $0xe8] sm:$0xff]   ;;  %v7343_v43 = vld [vmem:[%s9871_s1 + $0x150] sm:$0xff]   ;;  %v7342_v52 = vld [vmem:[%s9871_s1 + $0xf8] sm:$0xff]  }
  0x11   : > { %6057 = vmatprep.subr.bf16.mxu0 %v7290_v6  ;;  %7246 = vmatprep.subr.bf16.mxu1 %v7290_v6  ;;  %s8044_s11 = scalar_lea.vmem %s9870_s0, %s7259_s4  ;;  %v7345_v46 = vld [vmem:[%s9871_s1 + $0x110] sm:$0xff]   ;;  %v7333_v47 = vld [vmem:[%s9871_s1 + $0xa8] sm:$0xff]   ;;  %v7360_v55 = vld [vmem:[%s9871_s1 + $0x158] sm:$0xff]  }
  0x12   : > { %v7302_v11 = vld [vmem:[%s8044_s11 + $0x4] ss:$84 sps:$4 sm:$0xff]   ;;  %v7300_v19 = vld [vmem:[%s8044_s11] ss:$84 sps:$4 sm:$0xff]   ;;  %v7316_v29 = vld [vmem:[%s8044_s11 + $0xa8] ss:$84 sps:$4 sm:$0xff]  }
  0x13   : > { %v7305_v12 = vld [vmem:[%s8044_s11 + $0x7e4] ss:$84 sps:$4 sm:$0xff]   ;;  %3660 = vmatprep.mubr.bf16.mxu0 %v7302_v11  ;;  %v7303_v20 = vld [vmem:[%s8044_s11 + $0x7e0] ss:$84 sps:$4 sm:$0xff]   ;;  %v7317_v30 = vld [vmem:[%s8044_s11 + $0x888] ss:$84 sps:$4 sm:$0xff]  }
  0x14   : > { %6058 = vmatpush3.bf16.msra.mxu0 %v7291_v7  ;;  %7254 = vmatpush3.bf16.msra.mxu1 %v7291_v7  ;;  %v7312_v25 = vld [vmem:[%s8044_s11 + $0xac] ss:$84 sps:$4 sm:$0xff]   ;;  %v7322_v35 = vld [vmem:[%s8044_s11 + $0x154] ss:$84 sps:$4 sm:$0xff]   ;;  %v7326_v38 = vld [vmem:[%s8044_s11 + $0x150] ss:$84 sps:$4 sm:$0xff]  }
  0x15   : > { %6059 = vmatprep.subr.bf16.mxu0 %v7292_v8  ;;  %7247 = vmatprep.subr.bf16.mxu1 %v7292_v8  ;;  %v7314_v26 = vld [vmem:[%s8044_s11 + $0x88c] ss:$84 sps:$4 sm:$0xff]   ;;  %v7324_v36 = vld [vmem:[%s8044_s11 + $0x934] ss:$84 sps:$4 sm:$0xff]   ;;  %v7327_v39 = vld [vmem:[%s8044_s11 + $0x930] ss:$84 sps:$4 sm:$0xff]  }
  0x16   : > { %3756 = vmatprep.mubr.bf16.mxu1 %v7305_v12  ;;  %v7334_v44 = vld [vmem:[%s8044_s11 + $0x1fc] ss:$84 sps:$4 sm:$0xff]   ;;  %v7338_v49 = vld [vmem:[%s8044_s11 + $0x1f8] ss:$84 sps:$4 sm:$0xff]   ;;  %v7351_v59 = vld [vmem:[%s8044_s11 + $0x2a0] ss:$84 sps:$4 sm:$0xff]  }
  0x17   : > { %v7336_v45 = vld [vmem:[%s8044_s11 + $0x9dc] ss:$84 sps:$4 sm:$0xff]   ;;  %v7339_v50 = vld [vmem:[%s8044_s11 + $0x9d8] ss:$84 sps:$4 sm:$0xff]   ;;  %v7352_v60 = vld [vmem:[%s9871_s1 + $0x1c0] sm:$0xff]  }
  0x18   : > { %6060 = vmatpush3.bf16.msra.mxu0 %v7293_v9  ;;  %7255 = vmatpush3.bf16.msra.mxu1 %v7293_v9  ;;  %v7340_v48 = vld [vmem:[%s9871_s1 + $0xf0] sm:$0xff]   ;;  %v7346_v53 = vld [vmem:[%s8044_s11 + $0x2a4] ss:$84 sps:$4 sm:$0xff]   ;;  %v7350_v54 = vld [vmem:[%s8044_s11 + $0xc] ss:$84 sps:$4 sm:$0xff]  }
  0x19   : > { %6061 = vmatprep.subr.bf16.mxu0 %v7294_v10  ;;  %7248 = vmatprep.subr.bf16.mxu1 %v7294_v10  ;;  %v7341_v51 = vld [vmem:[%s9871_s1 + $0xb0] sm:$0xff]   ;;  %v7361_v56 = vld [vmem:[%s9871_s1 + $0x118] sm:$0xff]   ;;  %v7353_v61 = vld [vmem:[%s9871_s1 + $0x180] sm:$0xff]  }
  0x1a   : > { %v7344_v57 = vld [vmem:[%s9871_s1 + $0xb8] sm:$0xff]   ;;  %v7354_v62 = vld [vmem:[%s8044_s11 + $0x34c] ss:$84 sps:$4 sm:$0xff]   ;;  %v7356_v63 = vld [vmem:[%s8044_s11 + $0xb4] ss:$84 sps:$4 sm:$0xff]  }
  0x1b   : > { %v7348_v58 = vld [vmem:[%s8044_s11 + $0x8] ss:$84 sps:$4 sm:$0xff]   ;;  %v7370_v0 = vld [vmem:[%s9871_s1 + $0x160] sm:$0xff]   ;;  %v7385_v9 = vld [vmem:[%s9871_s1 + $0x1d0] sm:$0xff]  }
  0x1c   : > { %6062 = vmatpush3.bf16.msra.mxu0 %v7295_v13  ;;  %7256 = vmatpush3.bf16.msra.mxu1 %v7295_v13  ;;  %v7368_v1 = vld [vmem:[%s9871_s1 + $0x1c8] sm:$0xff]   ;;  %v7371_v2 = vld [vmem:[%s9871_s1 + $0x120] sm:$0xff]   ;;  %v7364_v7 = vld [vmem:[%s8044_s11 + $0x15c] ss:$84 sps:$4 sm:$0xff]  }
  0x1d   : > { %6063 = vmatprep.subr.bf16.mxu0 %v7296_v14  ;;  %7249 = vmatprep.subr.bf16.mxu1 %v7296_v14  ;;  %v7369_v3 = vld [vmem:[%s9871_s1 + $0x188] sm:$0xff]   ;;  %v7359_v5 = vld [vmem:[%s8044_s11 + $0xb0] ss:$84 sps:$4 sm:$0xff]  }
  0x1e   : > { %v7358_v4 = vld [vmem:[%s8044_s11 + $0x348] ss:$84 sps:$4 sm:$0xff]   ;;  %v7387_v11 = vld [vmem:[%s9871_s1 + $0x190] sm:$0xff]   ;;  %v7367_v13 = vld [vmem:[%s8044_s11 + $0x158] ss:$84 sps:$4 sm:$0xff]  }
  0x1f   : > { %v7362_v6 = vld [vmem:[%s8044_s11 + $0x3f4] ss:$84 sps:$4 sm:$0xff]   ;;  %v7366_v12 = vld [vmem:[%s8044_s11 + $0x3f0] ss:$84 sps:$4 sm:$0xff]  }
  0x20   : > { %6064 = vmatpush3.bf16.msra.mxu0 %v7297_v15  ;;  %7257 = vmatpush3.bf16.msra.mxu1 %v7297_v15  ;;  %v7384_v8 = vld [vmem:[%s9871_s1 + $0x168] sm:$0xff]   ;;  %v7372_v14 = vld [vmem:[%s8044_s11 + $0x49c] ss:$84 sps:$4 sm:$0xff]  }
  0x21   : > { %6065 = vmatprep.subr.bf16.mxu0 %v7298_v16  ;;  %7250 = vmatprep.subr.bf16.mxu1 %v7298_v16  ;;  %v7386_v10 = vld [vmem:[%s9871_s1 + $0x128] sm:$0xff]   ;;  %v7394_v15 = vld [vmem:[%s9871_s1 + $0x170] sm:$0xff]  }
  0x22   : > { %v7395_v16 = vld [vmem:[%s9871_s1 + $0x130] sm:$0xff]  }
  0x24   : > { %6066 = vmatpush3.bf16.msra.mxu0 %v7299_v17  ;;  %7258 = vmatpush3.bf16.msra.mxu1 %v7299_v17  ;;  %v7374_v17 = vld [vmem:[%s8044_s11 + $0x204] ss:$84 sps:$4 sm:$0xff]  }
  0x25   : > { %6163 = vmatprep.subr.bf16.mxu1 %v7306_v18  ;;  %6275 = vmatprep.subr.bf16.mxu0 %v7309_v21  ;;  %v7402_v18 = vld [vmem:[%s9871_s1 + $0x1d8] sm:$0xff]   ;;  %v7377_v21 = vld [vmem:[%s8044_s11 + $0x200] ss:$84 sps:$4 sm:$0xff]  }
  0x27   : > { %3661 = vmatmul.mubr.bf16.vlgmr.msra.gmra.mrb[0].mxu0 %v7300_v19  ;;  %3757 = vmatmul.mubr.bf16.vlgmr.msra.gmra.mrb[0].mxu1 %v7303_v20  ;;  %v7403_v19 = vld [vmem:[%s9871_s1 + $0x198] sm:$0xff]  }
  0x28   : > { %6164 = vmatpush3.bf16.msra.mxu1 %v7307_v22  ;;  %6276 = vmatpush3.bf16.msra.mxu0 %v7311_v24  ;;  %v7376_v20 = vld [vmem:[%s8044_s11 + $0x498] ss:$84 sps:$4 sm:$0xff]  }
  0x29   : > { %6165 = vmatprep.subr.bf16.mxu1 %v7308_v23  ;;  %3668 = vmatprep.mubr.bf16.mxu0 %v7312_v25  ;;  %v7378_v22 = vld [vmem:[%s8044_s11 + $0x544] ss:$84 sps:$4 sm:$0xff]   ;;  %v7380_v23 = vld [vmem:[%s8044_s11 + $0x2ac] ss:$84 sps:$4 sm:$0xff]  }
  0x2a   : > { %3764 = vmatprep.mubr.bf16.mxu1 %v7314_v26  ;;  %6277 = vmatprep.subr.bf16.mxu0 %v7329_v28  ;;  %v7410_v24 = vld [vmem:[%s9871_s1 + $0x178] sm:$0xff]   ;;  %v7418_v26 = vld [vmem:[%s9871_s1 + $0x1e0] sm:$0xff]  }
  0x2b   : > { %v7411_v25 = vld [vmem:[%s9871_s1 + $0x138] sm:$0xff]  }
  0x2c   : > { %6166 = vmatpush3.bf16.msra.mxu1 %v7310_v27  ;;  %6278 = vmatpush3.bf16.msra.mxu0 %v7331_v33  ;;  %v7382_v27 = vld [vmem:[%s8044_s11 + $0x540] ss:$84 sps:$4 sm:$0xff]   ;;  %v7383_v28 = vld [vmem:[%s8044_s11 + $0x2a8] ss:$84 sps:$4 sm:$0xff]  }
  0x2d   : > { %6167 = vmatprep.subr.bf16.mxu1 %v7318_v31  ;;  %6279 = vmatprep.subr.bf16.mxu0 %v7343_v43  ;;  %v7388_v31 = vld [vmem:[%s8044_s11 + $0x5ec] ss:$84 sps:$4 sm:$0xff]   ;;  %v7392_v33 = vld [vmem:[%s8044_s11 + $0x5e8] ss:$84 sps:$4 sm:$0xff]   ;;  %v7450_v43 = vld [vmem:[%s9871_s1 + $0x1f0] sm:$0xff]  }
  0x2f   : > { %3669 = vmatmul.mubr.bf16.gmra.mrb[4].mxu0 %v7316_v29  ;;  %3765 = vmatmul.mubr.bf16.gmra.mrb[4].mxu1 %v7317_v30  ;;  %v7419_v29 = vld [vmem:[%s9871_s1 + $0x1a0] sm:$0xff]  }
  0x30   : > { %6168 = vmatpush3.bf16.msra.mxu1 %v7319_v32  ;;  %3676 = vmatprep.mubr.bf16.mxu0 %v7322_v35  ;;  %v7420_v30 = vld [vmem:[%s9871_s1 + $0x240] sm:$0xff]   ;;  %v7390_v32 = vld [vmem:[%s8044_s11 + $0x354] ss:$84 sps:$4 sm:$0xff]  }
  0x31   : > { %6169 = vmatprep.subr.bf16.mxu1 %v7320_v34  ;;  %3772 = vmatprep.mubr.bf16.mxu1 %v7324_v36  ;;  %v7393_v34 = vld [vmem:[%s8044_s11 + $0x350] ss:$84 sps:$4 sm:$0xff]   ;;  %v7434_v35 = vld [vmem:[%s9871_s1 + $0x1e8] sm:$0xff]  }
  0x32   : > { %6280 = vmatpush3.bf16.msra.mxu0 %v7345_v46  ;;  %v7435_v36 = vld [vmem:[%s9871_s1 + $0x1a8] sm:$0xff]   ;;  %v7409_v46 = vld [vmem:[%s8044_s11 + $0x4a0] ss:$84 sps:$4 sm:$0xff]  }
  0x33   : > { %6281 = vmatprep.subr.bf16.mxu0 %v7360_v55  ;;  %v7424_v55 = vld [vmem:[%s8044_s11 + $0xbc] ss:$84 sps:$4 sm:$0xff]  }
  0x34   : > { %6170 = vmatpush3.bf16.msra.mxu1 %v7321_v37  ;;  %v7396_v37 = vld [vmem:[%s8044_s11 + $0x694] ss:$84 sps:$4 sm:$0xff]  }
  0x35   : > { %6171 = vmatprep.subr.bf16.mxu1 %v7328_v40  ;;  %v7401_v40 = vld [vmem:[%s8044_s11 + $0x3f8] ss:$84 sps:$4 sm:$0xff]  }
  0x36   : > { %6282 = vmatpush3.bf16.msra.mxu0 %v7361_v56  ;;  %v7436_v56 = vld [vmem:[%s9871_s1 + $0x248] sm:$0xff]  }
  0x37   : > { %3677 = vmatmul.mubr.bf16.gmra.mrb[8].mxu0 %v7326_v38  ;;  %3773 = vmatmul.mubr.bf16.gmra.mrb[8].mxu1 %v7327_v39  ;;  %v7398_v38 = vld [vmem:[%s8044_s11 + $0x3fc] ss:$84 sps:$4 sm:$0xff]  }
  0x38   : > { %6172 = vmatpush3.bf16.msra.mxu1 %v7330_v41  ;;  %3684 = vmatprep.mubr.bf16.mxu0 %v7334_v44  ;;  %v7400_v39 = vld [vmem:[%s8044_s11 + $0x690] ss:$84 sps:$4 sm:$0xff]  }
  0x39   : > { %6173 = vmatprep.subr.bf16.mxu1 %v7332_v42  ;;  %3780 = vmatprep.mubr.bf16.mxu1 %v7336_v45  ;;  %v7404_v41 = vld [vmem:[%s8044_s11 + $0x73c] ss:$84 sps:$4 sm:$0xff]   ;;  %v7406_v42 = vld [vmem:[%s8044_s11 + $0x4a4] ss:$84 sps:$4 sm:$0xff]  }
  0x3a   : > { %6283 = vmatprep.subr.bf16.mxu0 %v7370_v0  ;;  %v7451_v44 = vld [vmem:[%s9871_s1 + $0x1b0] sm:$0xff]   ;;  %v7408_v45 = vld [vmem:[%s8044_s11 + $0x738] ss:$84 sps:$4 sm:$0xff]  }
  0x3b   : > { %6284 = vmatpush3.bf16.msra.mxu0 %v7371_v2  ;;  %v7453_v0 = vld [vmem:[%s9871_s1 + $0x210] sm:$0xff]   ;;  %v7432_v2 = vld [vmem:[%s8044_s11 + $0x698] ss:$84 sps:$4 sm:$0xff]  }
  0x3c   : > { %6174 = vmatpush3.bf16.msra.mxu1 %v7333_v47  ;;  %6285 = vmatprep.subr.bf16.mxu0 %v7384_v8  ;;  %v7412_v47 = vld [vmem:[%s8044_s11 + $0x54c] ss:$84 sps:$4 sm:$0xff]  }
  0x3d   : > { %6175 = vmatprep.subr.bf16.mxu1 %v7340_v48  ;;  %v7416_v48 = vld [vmem:[%s8044_s11 + $0x14] ss:$84 sps:$4 sm:$0xff]   ;;  %v7485_v8 = vld [vmem:[%s9871_s1 + $0x220] sm:$0xff]  }
  0x3f   : > { %3685 = vmatmul.mubr.bf16.gmra.mrb[12].mxu0 %v7338_v49  ;;  %3781 = vmatmul.mubr.bf16.gmra.mrb[12].mxu1 %v7339_v50  ;;  %v7466_v49 = vld [vmem:[%s9871_s1 + $0x1f8] sm:$0xff]  }
  0x40   : > { %6176 = vmatpush3.bf16.msra.mxu1 %v7341_v51  ;;  %3692 = vmatprep.mubr.bf16.mxu0 %v7346_v53  ;;  %v7467_v50 = vld [vmem:[%s9871_s1 + $0x1b8] sm:$0xff]   ;;  %v7414_v51 = vld [vmem:[%s8044_s11 + $0x10] ss:$84 sps:$4 sm:$0xff]  }
  0x41   : > { %6177 = vmatprep.subr.bf16.mxu1 %v7342_v52  ;;  %3821 = vmatprep.mubr.bf16.mxu1 %v7350_v54  ;;  %v7417_v52 = vld [vmem:[%s8044_s11 + $0x548] ss:$84 sps:$4 sm:$0xff]   ;;  %v7421_v53 = vld [vmem:[%s9871_s1 + $0x200] sm:$0xff]  }
  0x42   : > { %6286 = vmatpush3.bf16.msra.mxu0 %v7386_v10  ;;  %v7422_v54 = vld [vmem:[%s8044_s11 + $0x5f4] ss:$84 sps:$4 sm:$0xff]  }
  0x43   : > { %6287 = vmatprep.subr.bf16.mxu0 %v7394_v15  ;;  %v7442_v10 = vld [vmem:[%s8044_s11 + $0x740] ss:$84 sps:$4 sm:$0xff]  }
  0x44   : > { %6178 = vmatpush3.bf16.msra.mxu1 %v7344_v57  ;;  %v7482_v57 = vld [vmem:[%s9871_s1 + $0x2c0] sm:$0xff]   ;;  %v7446_v15 = vld [vmem:[%s8044_s11 + $0x2b4] ss:$84 sps:$4 sm:$0xff]  }
  0x45   : > { %6387 = vmatprep.subr.bf16.mxu1 %v7352_v60  ;;  %v7426_v60 = vld [vmem:[%s8044_s11 + $0x5f0] ss:$84 sps:$4 sm:$0xff]  }
  0x46   : > { %6288 = vmatpush3.bf16.msra.mxu0 %v7395_v16  ;;  %v7517_v16 = vld [vmem:[%s9871_s1 + $0x230] sm:$0xff]  }
  0x47   : > { %3693 = vmatmul.mubr.bf16.gmra.mrb[16].mxu0 %v7351_v59  ;;  %3822 = vmatmul.mubr.bf16.vlgmr.msra.gmra.mrb[16].mxu1 %v7348_v58  ;;  %v7437_v58 = vld [vmem:[%s9871_s1 + $0x208] sm:$0xff]   ;;  %v7452_v59 = vld [vmem:[%s9871_s1 + $0x250] sm:$0xff]  }
  0x48   : > { %6388 = vmatpush3.bf16.msra.mxu1 %v7353_v61  ;;  %3700 = vmatprep.mubr.bf16.mxu0 %v7354_v62  ;;  %v7427_v61 = vld [vmem:[%s8044_s11 + $0xb8] ss:$84 sps:$4 sm:$0xff]   ;;  %v7428_v62 = vld [vmem:[%s8044_s11 + $0x69c] ss:$84 sps:$4 sm:$0xff]  }
  0x49   : > { %3829 = vmatprep.mubr.bf16.mxu1 %v7356_v63  ;;  %6389 = vmatprep.subr.bf16.mxu1 %v7368_v1  ;;  %v7430_v63 = vld [vmem:[%s8044_s11 + $0x164] ss:$84 sps:$4 sm:$0xff]  }
  0x4a   : > { %6289 = vmatprep.subr.bf16.mxu0 %v7410_v24  ;;  %v7468_v1 = vld [vmem:[%s9871_s1 + $0x258] sm:$0xff]  }
  0x4b   : > { %6290 = vmatpush3.bf16.msra.mxu0 %v7411_v25  ;;  %v7459_v24 = vld [vmem:[%s8044_s11 + $0x358] ss:$84 sps:$4 sm:$0xff]   ;;  %v7460_v25 = vld [vmem:[%s8044_s11 + $0x93c] ss:$84 sps:$4 sm:$0xff]  }
  0x4c   : > { %6390 = vmatpush3.bf16.msra.mxu1 %v7369_v3  ;;  %6499 = vmatprep.subr.bf16.mxu0 %v7420_v30  ;;  %v7469_v3 = vld [vmem:[%s9871_s1 + $0x218] sm:$0xff]  }
  0x4d   : > { %6391 = vmatprep.subr.bf16.mxu1 %v7385_v9  ;;  %v7500_v9 = vld [vmem:[%s9871_s1 + $0x268] sm:$0xff]   ;;  %v7470_v30 = vld [vmem:[%s8044_s11 + $0x9e4] ss:$84 sps:$4 sm:$0xff]  }
  0x4f   : > { %3701 = vmatmul.mubr.bf16.gmra.mrb[20].mxu0 %v7358_v4  ;;  %3830 = vmatmul.mubr.bf16.gmra.mrb[20].mxu1 %v7359_v5  ;;  %v7484_v4 = vld [vmem:[%s9871_s1 + $0x260] sm:$0xff]  }
  0x50   : > { %3708 = vmatprep.mubr.bf16.mxu0 %v7362_v6  ;;  %3837 = vmatprep.mubr.bf16.mxu1 %v7364_v7  ;;  %v7433_v5 = vld [vmem:[%s8044_s11 + $0x160] ss:$84 sps:$4 sm:$0xff]   ;;  %v7438_v6 = vld [vmem:[%s8044_s11 + $0x744] ss:$84 sps:$4 sm:$0xff]  }
  0x51   : > { %6392 = vmatpush3.bf16.msra.mxu1 %v7387_v11  ;;  %v7440_v7 = vld [vmem:[%s8044_s11 + $0x20c] ss:$84 sps:$4 sm:$0xff]   ;;  %v7443_v11 = vld [vmem:[%s8044_s11 + $0x208] ss:$84 sps:$4 sm:$0xff]  }
  0x52   : > { %6393 = vmatprep.subr.bf16.mxu1 %v7402_v18  ;;  %v7449_v18 = vld [vmem:[%s8044_s11 + $0x2b0] ss:$84 sps:$4 sm:$0xff]  }
  0x55   : > { %6394 = vmatpush3.bf16.msra.mxu1 %v7403_v19  ;;  %v7454_v19 = vld [vmem:[%s8044_s11 + $0x894] ss:$84 sps:$4 sm:$0xff]  }
  0x56   : > { %6395 = vmatprep.subr.bf16.mxu1 %v7418_v26  ;;  %v7462_v26 = vld [vmem:[%s8044_s11 + $0x404] ss:$84 sps:$4 sm:$0xff]  }
  0x57   : > { %3709 = vmatmul.mubr.bf16.gmra.mrb[24].mxu0 %v7366_v12  ;;  %3838 = vmatmul.mubr.bf16.gmra.mrb[24].mxu1 %v7367_v13  ;;  %v7501_v12 = vld [vmem:[%s9871_s1 + $0x228] sm:$0xff]   ;;  %v7516_v13 = vld [vmem:[%s9871_s1 + $0x270] sm:$0xff]  }
  0x58   : > { %3716 = vmatprep.mubr.bf16.mxu0 %v7372_v14  ;;  %3845 = vmatprep.mubr.bf16.mxu1 %v7374_v17  ;;  %v7444_v14 = vld [vmem:[%s8044_s11 + $0x7ec] ss:$84 sps:$4 sm:$0xff]   ;;  %v7448_v17 = vld [vmem:[%s8044_s11 + $0x7e8] ss:$84 sps:$4 sm:$0xff]  }
  0x59   : > { %6396 = vmatpush3.bf16.msra.mxu1 %v7419_v29  ;;  %v7465_v29 = vld [vmem:[%s8044_s11 + $0x400] ss:$84 sps:$4 sm:$0xff]  }
  0x5a   : > { %6397 = vmatprep.subr.bf16.mxu1 %v7434_v35  ;;  %v7480_v35 = vld [vmem:[%s8044_s11 + $0x1c] ss:$84 sps:$4 sm:$0xff]  }
  0x5d   : > { %6398 = vmatpush3.bf16.msra.mxu1 %v7435_v36  ;;  %v7478_v36 = vld [vmem:[%s8044_s11 + $0x18] ss:$84 sps:$4 sm:$0xff]  }
  0x5e   : > { %6399 = vmatprep.subr.bf16.mxu1 %v7450_v43  ;;  %v7514_v43 = vld [vmem:[%s9871_s1 + $0x2d0] sm:$0xff]  }
  0x5f   : > { %3717 = vmatmul.mubr.bf16.gmra.mrb[28].mxu0 %v7376_v20  ;;  %3846 = vmatmul.mubr.bf16.gmra.mrb[28].mxu1 %v7377_v21  ;;  %v7456_v20 = vld [vmem:[%s8044_s11 + $0x35c] ss:$84 sps:$4 sm:$0xff]  }
  0x60   : > { %3724 = vmatprep.mubr.bf16.mxu0 %v7378_v22  ;;  %3853 = vmatprep.mubr.bf16.mxu1 %v7380_v23  ;;  %v7532_v21 = vld [vmem:[%s9871_s1 + $0x278] sm:$0xff]   ;;  %v7458_v23 = vld [vmem:[%s8044_s11 + $0x890] ss:$84 sps:$4 sm:$0xff]  }
  0x61   : > { %6400 = vmatpush3.bf16.msra.mxu1 %v7451_v44  ;;  %v7533_v22 = vld [vmem:[%s9871_s1 + $0x238] sm:$0xff]  }
  0x62   : > { %6401 = vmatprep.subr.bf16.mxu1 %v7466_v49  ;;  %v7490_v44 = vld [vmem:[%s8044_s11 + $0x5f8] ss:$84 sps:$4 sm:$0xff]  }
  0x63   : > { %v7530_v49 = vld [vmem:[%s9871_s1 + $0x2d8] sm:$0xff]  }
  0x65   : > { %6402 = vmatpush3.bf16.msra.mxu1 %v7467_v50  ;;  %v7496_v50 = vld [vmem:[%s8044_s11 + $0x6a0] ss:$84 sps:$4 sm:$0xff]  }
  0x66   : > { %6611 = vmatprep.subr.bf16.mxu1 %v7482_v57  ;;  %v7562_v57 = vld [vmem:[%s9871_s1 + $0x2e8] sm:$0xff]  }
  0x67   : > { %3725 = vmatmul.mubr.bf16.gmra.mrb[32].mxu0 %v7382_v27  ;;  %3854 = vmatmul.mubr.bf16.gmra.mrb[32].mxu1 %v7383_v28  ;;  %v7548_v27 = vld [vmem:[%s9871_s1 + $0x340] sm:$0xff]   ;;  %v7464_v28 = vld [vmem:[%s8044_s11 + $0x938] ss:$84 sps:$4 sm:$0xff]  }
  0x68   : > { %3732 = vmatprep.mubr.bf16.mxu0 %v7388_v31  ;;  %3861 = vmatprep.mubr.bf16.mxu1 %v7390_v32  ;;  %v7472_v31 = vld [vmem:[%s8044_s11 + $0x4ac] ss:$84 sps:$4 sm:$0xff]  }
  0x69   : > { %v7474_v32 = vld [vmem:[%s8044_s11 + $0x9e0] ss:$84 sps:$4 sm:$0xff]  }
  0x6f   : > { %3733 = vmatmul.mubr.bf16.gmra.mrb[36].mxu0 %v7392_v33  ;;  %3862 = vmatmul.mubr.bf16.gmra.mrb[36].mxu1 %v7393_v34  ;;  %v7475_v33 = vld [vmem:[%s8044_s11 + $0x4a8] ss:$84 sps:$4 sm:$0xff]  }
  0x70   : > { %3740 = vmatprep.mubr.bf16.mxu0 %v7396_v37  ;;  %3869 = vmatprep.mubr.bf16.mxu1 %v7398_v38  ;;  %v7476_v34 = vld [vmem:[%s8044_s11 + $0x554] ss:$84 sps:$4 sm:$0xff]   ;;  %v7481_v37 = vld [vmem:[%s8044_s11 + $0x550] ss:$84 sps:$4 sm:$0xff]  }
  0x71   : > { %v7483_v38 = vld [vmem:[%s9871_s1 + $0x280] sm:$0xff]  }
  0x77   : > { %3741 = vmatmul.mubr.bf16.gmra.mrb[40].mxu0 %v7400_v39  ;;  %3870 = vmatmul.mubr.bf16.gmra.mrb[40].mxu1 %v7401_v40  ;;  %v7486_v39 = vld [vmem:[%s8044_s11 + $0x5fc] ss:$84 sps:$4 sm:$0xff]   ;;  %v7488_v40 = vld [vmem:[%s8044_s11 + $0xc4] ss:$84 sps:$4 sm:$0xff]  }
  0x78   : > { %3748 = vmatprep.mubr.bf16.mxu0 %v7404_v41  ;;  %3877 = vmatprep.mubr.bf16.mxu1 %v7406_v42  ;;  %v7498_v41 = vld [vmem:[%s9871_s1 + $0x2c8] sm:$0xff]  }
  0x79   : > { %v7499_v42 = vld [vmem:[%s9871_s1 + $0x288] sm:$0xff]  }
  0x7f   : > { %3749 = vmatmul.mubr.bf16.gmra.mrb[44].mxu0 %v7408_v45  ;;  %3878 = vmatmul.mubr.bf16.gmra.mrb[44].mxu1 %v7409_v46  ;;  %v7491_v45 = vld [vmem:[%s8044_s11 + $0xc0] ss:$84 sps:$4 sm:$0xff]   ;;  %v7492_v46 = vld [vmem:[%s8044_s11 + $0x6a4] ss:$84 sps:$4 sm:$0xff]  }
  0x80   : > { %3885 = vmatprep.mubr.bf16.mxu1 %v7412_v47  ;;  %3982 = vmatprep.mubr.bf16.mxu0 %v7416_v48  ;;  %v7494_v47 = vld [vmem:[%s8044_s11 + $0x16c] ss:$84 sps:$4 sm:$0xff]   ;;  %v7515_v48 = vld [vmem:[%s9871_s1 + $0x290] sm:$0xff]  }
  0x87   : > { %3886 = vmatmul.mubr.bf16.gmra.mrb[48].mxu1 %v7417_v52  ;;  %3983 = vmatmul.mubr.bf16.vlgmr.msra.gmra.mrb[48].mxu0 %v7414_v51  ;;  %v7497_v51 = vld [vmem:[%s8044_s11 + $0x168] ss:$84 sps:$4 sm:$0xff]  }
  0x88   : > { %6500 = vmatpush3.bf16.msra.mxu0 %v7421_v53  ;;  %3893 = vmatprep.mubr.bf16.mxu1 %v7422_v54  ;;  %v7531_v52 = vld [vmem:[%s9871_s1 + $0x298] sm:$0xff]   ;;  %v7546_v53 = vld [vmem:[%s9871_s1 + $0x2e0] sm:$0xff]  }
  0x89   : > { %3990 = vmatprep.mubr.bf16.mxu0 %v7424_v55  ;;  %6501 = vmatprep.subr.bf16.mxu0 %v7436_v56  ;;  %v7502_v54 = vld [vmem:[%s8044_s11 + $0x74c] ss:$84 sps:$4 sm:$0xff]   ;;  %v7504_v55 = vld [vmem:[%s8044_s11 + $0x214] ss:$84 sps:$4 sm:$0xff]  }
  0x8a   : > { %v7547_v56 = vld [vmem:[%s9871_s1 + $0x2a0] sm:$0xff]  }
  0x8c   : > { %6502 = vmatpush3.bf16.msra.mxu0 %v7437_v58  ;;  %v7506_v58 = vld [vmem:[%s8044_s11 + $0x748] ss:$84 sps:$4 sm:$0xff]  }
  0x8d   : > { %6503 = vmatprep.subr.bf16.mxu0 %v7452_v59  ;;  %v7507_v59 = vld [vmem:[%s8044_s11 + $0x210] ss:$84 sps:$4 sm:$0xff]  }
  0x8f   : > { %3894 = vmatmul.mubr.bf16.gmra.mrb[52].mxu1 %v7426_v60  ;;  %3991 = vmatmul.mubr.bf16.gmra.mrb[52].mxu0 %v7427_v61  ;;  %v7563_v60 = vld [vmem:[%s9871_s1 + $0x2a8] sm:$0xff]   ;;  %v7578_v61 = vld [vmem:[%s9871_s1 + $0x2f0] sm:$0xff]  }
  0x90   : > { %3901 = vmatprep.mubr.bf16.mxu1 %v7428_v62  ;;  %3998 = vmatprep.mubr.bf16.mxu0 %v7430_v63  ;;  %v7508_v62 = vld [vmem:[%s8044_s11 + $0x7f4] ss:$84 sps:$4 sm:$0xff]   ;;  %v7510_v63 = vld [vmem:[%s8044_s11 + $0x2bc] ss:$84 sps:$4 sm:$0xff]  }
  0x91   : > { %6504 = vmatpush3.bf16.msra.mxu0 %v7453_v0  ;;  %v7579_v0 = vld [vmem:[%s9871_s1 + $0x2b0] sm:$0xff]  }
  0x92   : > { %6505 = vmatprep.subr.bf16.mxu0 %v7468_v1  ;;  %v7594_v1 = vld [vmem:[%s9871_s1 + $0x2f8] sm:$0xff]  }
  0x95   : > { %6506 = vmatpush3.bf16.msra.mxu0 %v7469_v3  ;;  %v7610_v3 = vld [vmem:[%s9871_s1 + $0x3c0] sm:$0xff]  }
  0x96   : > { %6507 = vmatprep.subr.bf16.mxu0 %v7484_v4  ;;  %v7512_v4 = vld [vmem:[%s8044_s11 + $0x7f0] ss:$84 sps:$4 sm:$0xff]  }
  0x97   : > { %3902 = vmatmul.mubr.bf16.gmra.mrb[56].mxu1 %v7432_v2  ;;  %3999 = vmatmul.mubr.bf16.gmra.mrb[56].mxu0 %v7433_v5  ;;  %v7595_v2 = vld [vmem:[%s9871_s1 + $0x2b8] sm:$0xff]  }
  0x98   : > { %3909 = vmatprep.mubr.bf16.mxu1 %v7438_v6  ;;  %4006 = vmatprep.mubr.bf16.mxu0 %v7440_v7  ;;  %v7513_v5 = vld [vmem:[%s8044_s11 + $0x2b8] ss:$84 sps:$4 sm:$0xff]   ;;  %v7518_v6 = vld [vmem:[%s8044_s11 + $0x89c] ss:$84 sps:$4 sm:$0xff]  }
  0x99   : > { %6508 = vmatpush3.bf16.msra.mxu0 %v7485_v8  ;;  %v7520_v7 = vld [vmem:[%s8044_s11 + $0x364] ss:$84 sps:$4 sm:$0xff]  }
  0x9a   : > { %6509 = vmatprep.subr.bf16.mxu0 %v7500_v9  ;;  %v7522_v8 = vld [vmem:[%s8044_s11 + $0x898] ss:$84 sps:$4 sm:$0xff]   ;;  %v7523_v9 = vld [vmem:[%s8044_s11 + $0x360] ss:$84 sps:$4 sm:$0xff]  }
  0x9d   : > { %6510 = vmatpush3.bf16.msra.mxu0 %v7501_v12  ;;  %v7528_v12 = vld [vmem:[%s8044_s11 + $0x940] ss:$84 sps:$4 sm:$0xff]  }
  0x9e   : > { %6511 = vmatprep.subr.bf16.mxu0 %v7516_v13  ;;  %v7529_v13 = vld [vmem:[%s8044_s11 + $0x408] ss:$84 sps:$4 sm:$0xff]  }
  0x9f   : > { %3910 = vmatmul.mubr.bf16.gmra.mrb[60].mxu1 %v7442_v10  ;;  %4007 = vmatmul.mubr.bf16.gmra.mrb[60].mxu0 %v7443_v11  ;;  %v7524_v10 = vld [vmem:[%s8044_s11 + $0x944] ss:$84 sps:$4 sm:$0xff]   ;;  %v7526_v11 = vld [vmem:[%s8044_s11 + $0x40c] ss:$84 sps:$4 sm:$0xff]  }
  0xa0   : > { %3917 = vmatprep.mubr.bf16.mxu1 %v7444_v14  ;;  %4014 = vmatprep.mubr.bf16.mxu0 %v7446_v15  ;;  %v7534_v14 = vld [vmem:[%s8044_s11 + $0x9ec] ss:$84 sps:$4 sm:$0xff]   ;;  %v7536_v15 = vld [vmem:[%s8044_s11 + $0x4b4] ss:$84 sps:$4 sm:$0xff]  }
  0xa1   : > { %6512 = vmatpush3.bf16.msra.mxu0 %v7517_v16  ;;  %v7538_v16 = vld [vmem:[%s8044_s11 + $0x9e8] ss:$84 sps:$4 sm:$0xff]  }
  0xa2   : > { %6513 = vmatprep.subr.bf16.mxu0 %v7532_v21 }
  0xa5   : > { %6514 = vmatpush3.bf16.msra.mxu0 %v7533_v22 }
  0xa6   : > { %6723 = vmatprep.subr.bf16.mxu0 %v7548_v27  ;;  %v7544_v27 = vld [vmem:[%s8044_s11 + $0x24] ss:$84 sps:$4 sm:$0xff]  }
  0xa7   : > { %3918 = vmatmul.mubr.bf16.gmra.mrb[64].mxu1 %v7448_v17  ;;  %4015 = vmatmul.mubr.bf16.gmra.mrb[64].mxu0 %v7449_v18  ;;  %v7539_v17 = vld [vmem:[%s8044_s11 + $0x4b0] ss:$84 sps:$4 sm:$0xff]  }
  0xa8   : > { %3925 = vmatprep.mubr.bf16.mxu1 %v7454_v19  ;;  %4022 = vmatprep.mubr.bf16.mxu0 %v7456_v20 }
  0xaf   : > { %3926 = vmatmul.mubr.bf16.gmra.mrb[68].mxu1 %v7458_v23  ;;  %4023 = vmatmul.mubr.bf16.gmra.mrb[68].mxu0 %v7459_v24 }
  0xb0   : > { %3933 = vmatprep.mubr.bf16.mxu1 %v7460_v25  ;;  %4030 = vmatprep.mubr.bf16.mxu0 %v7462_v26  ;;  %v7540_v26 = vld [vmem:[%s8044_s11 + $0x55c] ss:$84 sps:$4 sm:$0xff]  }
  0xb7   : > { %3934 = vmatmul.mubr.bf16.gmra.mrb[72].mxu1 %v7464_v28  ;;  %4031 = vmatmul.mubr.bf16.gmra.mrb[72].mxu0 %v7465_v29 }
  0xb8   : > { %3941 = vmatprep.mubr.bf16.mxu1 %v7470_v30  ;;  %4038 = vmatprep.mubr.bf16.mxu0 %v7472_v31 }
  0xbf   : > { %3942 = vmatmul.mubr.bf16.gmra.mrb[76].mxu1 %v7474_v32  ;;  %4039 = vmatmul.mubr.bf16.gmra.mrb[76].mxu0 %v7475_v33  ;;  %v7542_v32 = vld [vmem:[%s8044_s11 + $0x20] ss:$84 sps:$4 sm:$0xff]   ;;  %v7545_v33 = vld [vmem:[%s8044_s11 + $0x558] ss:$84 sps:$4 sm:$0xff]  }
  0xc0   : > { %4046 = vmatprep.mubr.bf16.mxu0 %v7476_v34  ;;  %4143 = vmatprep.mubr.bf16.mxu1 %v7480_v35 }
  0xc7   : > { %4047 = vmatmul.mubr.bf16.gmra.mrb[80].mxu0 %v7481_v37  ;;  %4144 = vmatmul.mubr.bf16.vlgmr.msra.gmra.mrb[80].mxu1 %v7478_v36 }
  0xc8   : > { %6612 = vmatpush3.bf16.msra.mxu1 %v7483_v38  ;;  %4054 = vmatprep.mubr.bf16.mxu0 %v7486_v39 }
  0xc9   : > { %4151 = vmatprep.mubr.bf16.mxu1 %v7488_v40  ;;  %6613 = vmatprep.subr.bf16.mxu1 %v7498_v41 }
  0xcc   : > { %6614 = vmatpush3.bf16.msra.mxu1 %v7499_v42  ;;  %v7549_v42 = vld [vmem:[%s9871_s1 + $0x300] sm:$0xff]  }
  0xcd   : > { %6615 = vmatprep.subr.bf16.mxu1 %v7514_v43  ;;  %v7550_v43 = vld [vmem:[%s8044_s11 + $0x604] ss:$84 sps:$4 sm:$0xff]  }
  0xcf   : > { %4055 = vmatmul.mubr.bf16.gmra.mrb[84].mxu0 %v7490_v44  ;;  %4152 = vmatmul.mubr.bf16.gmra.mrb[84].mxu1 %v7491_v45 }
  0xd0   : > { %4062 = vmatprep.mubr.bf16.mxu0 %v7492_v46  ;;  %4159 = vmatprep.mubr.bf16.mxu1 %v7494_v47  ;;  %v7552_v46 = vld [vmem:[%s8044_s11 + $0xcc] ss:$84 sps:$4 sm:$0xff]  }
  0xd1   : > { %6616 = vmatpush3.bf16.msra.mxu1 %v7515_v48  ;;  %v7564_v47 = vld [vmem:[%s9871_s1 + $0x348] sm:$0xff]  }
  0xd2   : > { %6617 = vmatprep.subr.bf16.mxu1 %v7530_v49 }
  0xd5   : > { %6618 = vmatpush3.bf16.msra.mxu1 %v7531_v52  ;;  %v7554_v52 = vld [vmem:[%s8044_s11 + $0x600] ss:$84 sps:$4 sm:$0xff]  }
  0xd6   : > { %6619 = vmatprep.subr.bf16.mxu1 %v7546_v53  ;;  %v7555_v53 = vld [vmem:[%s8044_s11 + $0xc8] ss:$84 sps:$4 sm:$0xff]  }
  0xd7   : > { %4063 = vmatmul.mubr.bf16.gmra.mrb[88].mxu0 %v7496_v50  ;;  %4160 = vmatmul.mubr.bf16.gmra.mrb[88].mxu1 %v7497_v51  ;;  %v7565_v50 = vld [vmem:[%s9871_s1 + $0x308] sm:$0xff]   ;;  %v7580_v51 = vld [vmem:[%s9871_s1 + $0x350] sm:$0xff]  }
  0xd8   : > { %4070 = vmatprep.mubr.bf16.mxu0 %v7502_v54  ;;  %4167 = vmatprep.mubr.bf16.mxu1 %v7504_v55 }
  0xd9   : > { %6620 = vmatpush3.bf16.msra.mxu1 %v7547_v56 }
  0xda   : > { %6621 = vmatprep.subr.bf16.mxu1 %v7562_v57 }
  0xdd   : > { %6622 = vmatpush3.bf16.msra.mxu1 %v7563_v60 }
  0xde   : > { %6623 = vmatprep.subr.bf16.mxu1 %v7578_v61 }
  0xdf   : > { %4071 = vmatmul.mubr.bf16.gmra.mrb[92].mxu0 %v7506_v58  ;;  %4168 = vmatmul.mubr.bf16.gmra.mrb[92].mxu1 %v7507_v59 }
  0xe0   : > { %4078 = vmatprep.mubr.bf16.mxu0 %v7508_v62  ;;  %4175 = vmatprep.mubr.bf16.mxu1 %v7510_v63  ;;  %v7556_v62 = vld [vmem:[%s8044_s11 + $0x6ac] ss:$84 sps:$4 sm:$0xff]   ;;  %v7558_v63 = vld [vmem:[%s8044_s11 + $0x174] ss:$84 sps:$4 sm:$0xff]  }
  0xe1   : > { %6624 = vmatpush3.bf16.msra.mxu1 %v7579_v0 }
  0xe2   : > { %6625 = vmatprep.subr.bf16.mxu1 %v7594_v1 }
  0xe5   : > { %6626 = vmatpush3.bf16.msra.mxu1 %v7595_v2  ;;  %v7581_v2 = vld [vmem:[%s9871_s1 + $0x310] sm:$0xff]  }
  0xe6   : > { %6835 = vmatprep.subr.bf16.mxu1 %v7610_v3 }
  0xe7   : > { %4079 = vmatmul.mubr.bf16.gmra.mrb[96].mxu0 %v7512_v4  ;;  %4176 = vmatmul.mubr.bf16.gmra.mrb[96].mxu1 %v7513_v5  ;;  %v7596_v5 = vld [vmem:[%s9871_s1 + $0x358] sm:$0xff]  }
  0xe8   : > { %4086 = vmatprep.mubr.bf16.mxu0 %v7518_v6  ;;  %4183 = vmatprep.mubr.bf16.mxu1 %v7520_v7  ;;  %v7597_v6 = vld [vmem:[%s9871_s1 + $0x318] sm:$0xff]   ;;  %v7612_v7 = vld [vmem:[%s9871_s1 + $0x360] sm:$0xff]  }
  0xef   : > { %4087 = vmatmul.mubr.bf16.gmra.mrb[100].mxu0 %v7522_v8  ;;  %4184 = vmatmul.mubr.bf16.gmra.mrb[100].mxu1 %v7523_v9  ;;  %v7560_v8 = vld [vmem:[%s8044_s11 + $0x6a8] ss:$84 sps:$4 sm:$0xff]   ;;  %v7561_v9 = vld [vmem:[%s8044_s11 + $0x170] ss:$84 sps:$4 sm:$0xff]  }
  0xf0   : > { %4094 = vmatprep.mubr.bf16.mxu0 %v7524_v10  ;;  %4191 = vmatprep.mubr.bf16.mxu1 %v7526_v11 }
  0xf7   : > { %4095 = vmatmul.mubr.bf16.gmra.mrb[104].mxu0 %v7528_v12  ;;  %4192 = vmatmul.mubr.bf16.gmra.mrb[104].mxu1 %v7529_v13 }
  0xf8   : > { %4102 = vmatprep.mubr.bf16.mxu0 %v7534_v14  ;;  %4199 = vmatprep.mubr.bf16.mxu1 %v7536_v15 }
  0xfa   : > { %v6139_v18 = vpop.f32.mrb[0].mxu1  ;;  %v6067_v19 = vpop.f32.mrb[0].mxu0 }
  0xfb   : > { %v6140_v20 = vpop.f32.mrb[1].mxu1  ;;  %v6068_v21 = vpop.f32.mrb[1].mxu0 }
  0xfc   : > { %v8425_v22 = vadd.f32 %v6140_v20, %v6139_v18  ;;  %v6142_v23 = vpop.f32.mrb[2].mxu1  ;;  %v8427_v24 = vadd.f32 %v6068_v21, %v6067_v19  ;;  %v6070_v25 = vpop.f32.mrb[2].mxu0  ;;  %v7566_v18 = vld [vmem:[%s8044_s11 + $0x754] ss:$84 sps:$4 sm:$0xff]   ;;  %v7568_v19 = vld [vmem:[%s8044_s11 + $0x21c] ss:$84 sps:$4 sm:$0xff]  }
  0xfd   : > { %v6143_v28 = vpop.f32.mrb[3].mxu1  ;;  %v6071_v29 = vpop.f32.mrb[3].mxu0 }
  0xfe   : > { %v8431_v30 = vadd.f32 %v6143_v28, %v6142_v23  ;;  %v8433_v31 = vadd.f32 %v6071_v29, %v6070_v25  ;;  %v7613_v23 = vld [vmem:[%s9871_s1 + $0x320] sm:$0xff]   ;;  %v7628_v25 = vld [vmem:[%s9871_s1 + $0x368] sm:$0xff]   ;;  %v7644_v29 = vld [vmem:[%s9871_s1 + $0x370] sm:$0xff]  }
  0xff   : > { %4103 = vmatmul.mubr.bf16.gmra.mrb[108].mxu0 %v7538_v16  ;;  %4200 = vmatmul.mubr.bf16.gmra.mrb[108].mxu1 %v7539_v17  ;;  %v7629_v28 = vld [vmem:[%s9871_s1 + $0x328] sm:$0xff]  }
 0x100   : > { %4207 = vmatprep.mubr.bf16.mxu1 %v7540_v26  ;;  %4304 = vmatprep.mubr.bf16.mxu0 %v7544_v27 }
 0x102   : > { %v6145_v34 = vpop.f32.mrb[4].mxu1  ;;  %v6073_v35 = vpop.f32.mrb[4].mxu0 }
 0x103   : > { %v6146_v36 = vpop.f32.mrb[5].mxu1  ;;  %v6074_v37 = vpop.f32.mrb[5].mxu0 }
 0x104   : > { %v8437_v38 = vadd.f32 %v6146_v36, %v6145_v34  ;;  %v6148_v39 = vpop.f32.mrb[6].mxu1  ;;  %v8439_v40 = vadd.f32 %v6074_v37, %v6073_v35  ;;  %v6076_v41 = vpop.f32.mrb[6].mxu0  ;;  %v7571_v34 = vld [vmem:[%s8044_s11 + $0x218] ss:$84 sps:$4 sm:$0xff]  }
 0x105   : > { %v6149_v44 = vpop.f32.mrb[7].mxu1  ;;  %v6077_v45 = vpop.f32.mrb[7].mxu0 }
 0x106   : > { %v8449_v48 = vadd.f32 %v6149_v44, %v6148_v39  ;;  %v8451_v49 = vadd.f32 %v6077_v45, %v6076_v41 }
 0x107   : > { %4208 = vmatmul.mubr.bf16.gmra.mrb[112].mxu1 %v7545_v33  ;;  %4305 = vmatmul.mubr.bf16.vlgmr.msra.gmra.mrb[112].mxu0 %v7542_v32  ;;  %v8510_v32 = vld [vmem:[%s9872_s2] ss:$0 sm:$0xff]  ;;  %v7570_v33 = vld [vmem:[%s8044_s11 + $0x750] ss:$84 sps:$4 sm:$0xff]  }
 0x108   : > { %6724 = vmatpush3.bf16.msra.mxu0 %v7549_v42  ;;  %4215 = vmatprep.mubr.bf16.mxu1 %v7550_v43  ;;  %v3663_v41 = vadd.f32 %v8427_v24, %v8510_v32 }
 0x109   : > { %4312 = vmatprep.mubr.bf16.mxu0 %v7552_v46  ;;  %6725 = vmatprep.subr.bf16.mxu0 %v7564_v47  ;;  %v7572_v46 = vld [vmem:[%s8044_s11 + $0x7fc] ss:$84 sps:$4 sm:$0xff]   ;;  %v7574_v47 = vld [vmem:[%s8044_s11 + $0x2c4] ss:$84 sps:$4 sm:$0xff]  }
 0x10a   : > { %v6151_v54 = vpop.f32.mrb[8].mxu1  ;;  %v6079_v55 = vpop.f32.mrb[8].mxu0 }
 0x10b   : > { %v6152_v56 = vpop.f32.mrb[9].mxu1  ;;  %v6080_v57 = vpop.f32.mrb[9].mxu0 }
 0x10c   : > { %v8461_v58 = vadd.f32 %v6152_v56, %v6151_v54  ;;  %v6154_v59 = vpop.f32.mrb[10].mxu1  ;;  %v8463_v60 = vadd.f32 %v6080_v57, %v6079_v55  ;;  %v6082_v61 = vpop.f32.mrb[10].mxu0  ;;  %6726 = vmatpush3.bf16.msra.mxu0 %v7565_v50  ;;  %v7660_v56 = vld [vmem:[%s9871_s1 + $0x378] sm:$0xff]  }
 0x10d   : > { %v6155_v0 = vpop.f32.mrb[11].mxu1  ;;  %v6083_v1 = vpop.f32.mrb[11].mxu0  ;;  %6727 = vmatprep.subr.bf16.mxu0 %v7580_v51  ;;  %v7661_v57 = vld [vmem:[%s9871_s1 + $0x338] sm:$0xff]  }
 0x10e   : > { %v8470_v3 = vadd.f32 %v6155_v0, %v6154_v59  ;;  %v8472_v4 = vadd.f32 %v6083_v1, %v6082_v61  ;;  %v7576_v61 = vld [vmem:[%s8044_s11 + $0x7f8] ss:$84 sps:$4 sm:$0xff]  }
 0x10f   : > { %4216 = vmatmul.mubr.bf16.gmra.mrb[116].mxu1 %v7554_v52  ;;  %4313 = vmatmul.mubr.bf16.gmra.mrb[116].mxu0 %v7555_v53  ;;  %v7645_v52 = vld [vmem:[%s9871_s1 + $0x330] sm:$0xff]   ;;  %v3666_v53 = vadd.f32 %v8433_v31, %v8510_v32  ;;  %v7676_v31 = vld [vmem:[%s9871_s1 + $0x440] sm:$0xff]  }
 0x110   : > { %4223 = vmatprep.mubr.bf16.mxu1 %v7556_v62  ;;  %4320 = vmatprep.mubr.bf16.mxu0 %v7558_v63  ;;  %v7577_v62 = vld [vmem:[%s8044_s11 + $0x2c0] ss:$84 sps:$4 sm:$0xff]  }
 0x111   : > { %6728 = vmatpush3.bf16.msra.mxu0 %v7581_v2 }
 0x112   : > { %v6157_v10 = vpop.f32.mrb[12].mxu1  ;;  %v6085_v11 = vpop.f32.mrb[12].mxu0  ;;  %6729 = vmatprep.subr.bf16.mxu0 %v7596_v5  ;;  %v3671_v5 = vadd.f32 %v8439_v40, %v8510_v32 }
 0x113   : > { %v6158_v12 = vpop.f32.mrb[13].mxu1  ;;  %v6086_v13 = vpop.f32.mrb[13].mxu0 }
 0x114   : > { %v8485_v14 = vadd.f32 %v6158_v12, %v6157_v10  ;;  %v6160_v15 = vpop.f32.mrb[14].mxu1  ;;  %v8487_v16 = vadd.f32 %v6086_v13, %v6085_v11  ;;  %v6088_v17 = vpop.f32.mrb[14].mxu0  ;;  %v7582_v10 = vld [vmem:[%s8044_s11 + $0x8a4] ss:$84 sps:$4 sm:$0xff]   ;;  %v7584_v11 = vld [vmem:[%s8044_s11 + $0x36c] ss:$84 sps:$4 sm:$0xff]  }
 0x115   : > { %v6161_v20 = vpop.f32.mrb[15].mxu1  ;;  %v6089_v21 = vpop.f32.mrb[15].mxu0  ;;  %6730 = vmatpush3.bf16.msra.mxu0 %v7597_v6 }
 0x116   : > { %v8497_v26 = vadd.f32 %v6161_v20, %v6160_v15  ;;  %v8499_v27 = vadd.f32 %v6089_v21, %v6088_v17  ;;  %6731 = vmatprep.subr.bf16.mxu0 %v7612_v7  ;;  %v3674_v15 = vadd.f32 %v8451_v49, %v8510_v32  ;;  %v7586_v20 = vld [vmem:[%s8044_s11 + $0x8a0] ss:$84 sps:$4 sm:$0xff]   ;;  %v7587_v21 = vld [vmem:[%s8044_s11 + $0x368] ss:$84 sps:$4 sm:$0xff]  }
 0x117   : > { %4224 = vmatmul.mubr.bf16.gmra.mrb[120].mxu1 %v7560_v8  ;;  %4321 = vmatmul.mubr.bf16.gmra.mrb[120].mxu0 %v7561_v9 }
 0x118   : > { %4231 = vmatprep.mubr.bf16.mxu1 %v7566_v18  ;;  %4328 = vmatprep.mubr.bf16.mxu0 %v7568_v19 }
 0x119   : > { %6732 = vmatpush3.bf16.msra.mxu0 %v7613_v23 }
 0x11a   : > { %v6179_v35 = vpop.f32.mrb[16].mxu1  ;;  %v6091_v36 = vpop.f32.mrb[16].mxu0  ;;  %6733 = vmatprep.subr.bf16.mxu0 %v7628_v25 }
 0x11b   : > { %v6180_v37 = vpop.f32.mrb[17].mxu1  ;;  %v6092_v39 = vpop.f32.mrb[17].mxu0 }
 0x11c   : > { %v6181_v42 = vadd.f32 %v6180_v37, %v6179_v35  ;;  %v6182_v43 = vpop.f32.mrb[18].mxu1  ;;  %v8516_v44 = vadd.f32 %v6092_v39, %v6091_v36  ;;  %v6094_v45 = vpop.f32.mrb[18].mxu0  ;;  %v7588_v37 = vld [vmem:[%s8044_s11 + $0x94c] ss:$84 sps:$4 sm:$0xff]   ;;  %v7590_v39 = vld [vmem:[%s8044_s11 + $0x414] ss:$84 sps:$4 sm:$0xff]  }
 0x11d   : > { %v6183_v50 = vpop.f32.mrb[19].mxu1  ;;  %v6095_v51 = vpop.f32.mrb[19].mxu0  ;;  %6734 = vmatpush3.bf16.msra.mxu0 %v7629_v28 }
 0x11e   : > { %v8525_v24 = vadd.f32 %v6181_v42, %v3663_v41  ;;  %v6184_v54 = vadd.f32 %v6183_v50, %v6182_v43  ;;  %v8527_v55 = vadd.f32 %v6095_v51, %v6094_v45  ;;  %6735 = vmatprep.subr.bf16.mxu0 %v7644_v29  ;;  %v3679_v29 = vadd.f32 %v8463_v60, %v8510_v32  ;;  %v7592_v50 = vld [vmem:[%s8044_s11 + $0x948] ss:$84 sps:$4 sm:$0xff]   ;;  %v7593_v51 = vld [vmem:[%s8044_s11 + $0x410] ss:$84 sps:$4 sm:$0xff]  }
 0x11f   : > { %4232 = vmatmul.mubr.bf16.gmra.mrb[124].mxu1 %v7570_v33  ;;  %4329 = vmatmul.mubr.bf16.gmra.mrb[124].mxu0 %v7571_v34  ;;  %v3682_v43 = vadd.f32 %v8472_v4, %v8510_v32  ;;  %v3687_v4 = vadd.f32 %v8487_v16, %v8510_v32 }
 0x120   : > { %v8535_v59 = vadd.f32 %v6184_v54, %v3666_v53  ;;  %4239 = vmatprep.mubr.bf16.mxu1 %v7572_v46  ;;  %4336 = vmatprep.mubr.bf16.mxu0 %v7574_v47 }
 0x121   : > { %6736 = vmatpush3.bf16.msra.mxu0 %v7645_v52 }
 0x122   : > { %v6185_v63 = vpop.f32.mrb[20].mxu1  ;;  %v6097_v0 = vpop.f32.mrb[20].mxu0  ;;  %6737 = vmatprep.subr.bf16.mxu0 %v7660_v56 }
 0x123   : > { %v6186_v1 = vpop.f32.mrb[21].mxu1  ;;  %v6098_v2 = vpop.f32.mrb[21].mxu0 }
 0x124   : > { %v6187_v6 = vadd.f32 %v6186_v1, %v6185_v63  ;;  %v6188_v7 = vpop.f32.mrb[22].mxu1  ;;  %v8544_v8 = vadd.f32 %v6098_v2, %v6097_v0  ;;  %v6100_v9 = vpop.f32.mrb[22].mxu0  ;;  %v7598_v63 = vld [vmem:[%s8044_s11 + $0x9f4] ss:$84 sps:$4 sm:$0xff]   ;;  %v7600_v0 = vld [vmem:[%s8044_s11 + $0x4bc] ss:$84 sps:$4 sm:$0xff]  }
 0x125   : > { %v6189_v12 = vpop.f32.mrb[23].mxu1  ;;  %v6101_v13 = vpop.f32.mrb[23].mxu0  ;;  %6738 = vmatpush3.bf16.msra.mxu0 %v7661_v57 }
 0x126   : > { %v8550_v17 = vadd.f32 %v6187_v6, %v3671_v5  ;;  %v6190_v18 = vadd.f32 %v6189_v12, %v6188_v7  ;;  %v8552_v19 = vadd.f32 %v6101_v13, %v6100_v9  ;;  %6947 = vmatprep.subr.bf16.mxu0 %v7676_v31  ;;  %v3690_v5 = vadd.f32 %v8499_v27, %v8510_v32 }
 0x127   : > { %4240 = vmatmul.mubr.bf16.gmra.mrb[128].mxu1 %v7576_v61  ;;  %4337 = vmatmul.mubr.bf16.gmra.mrb[128].mxu0 %v7577_v62  ;;  %v3695_v27 = vadd.f32 %v8516_v44, %v8510_v32 }
 0x128   : > { %v8554_v40 = vadd.f32 %v6190_v18, %v3674_v15  ;;  %4247 = vmatprep.mubr.bf16.mxu1 %v7582_v10  ;;  %4344 = vmatprep.mubr.bf16.mxu0 %v7584_v11  ;;  %v7602_v10 = vld [vmem:[%s8044_s11 + $0x9f0] ss:$84 sps:$4 sm:$0xff]   ;;  %v7603_v11 = vld [vmem:[%s8044_s11 + $0x4b8] ss:$84 sps:$4 sm:$0xff]  }
 0x12a   : > { %v6191_v23 = vpop.f32.mrb[24].mxu1  ;;  %v6103_v25 = vpop.f32.mrb[24].mxu0 }
 0x12b   : > { %v6192_v28 = vpop.f32.mrb[25].mxu1  ;;  %v6104_v49 = vpop.f32.mrb[25].mxu0 }
 0x12c   : > { %v6193_v33 = vadd.f32 %v6192_v28, %v6191_v23  ;;  %v6194_v34 = vpop.f32.mrb[26].mxu1  ;;  %v8560_v35 = vadd.f32 %v6104_v49, %v6103_v25  ;;  %v6106_v36 = vpop.f32.mrb[26].mxu0  ;;  %v7604_v28 = vld [vmem:[%s8044_s11 + $0x564] ss:$84 sps:$4 sm:$0xff]   ;;  %v7608_v49 = vld [vmem:[%s8044_s11 + $0x2c] ss:$84 sps:$4 sm:$0xff]  }
 0x12d   : > { %v6195_v41 = vpop.f32.mrb[27].mxu1  ;;  %v6107_v42 = vpop.f32.mrb[27].mxu0 }
 0x12e   : > { %v8566_v45 = vadd.f32 %v6193_v33, %v3679_v29  ;;  %v6196_v46 = vadd.f32 %v6195_v41, %v6194_v34  ;;  %v8568_v47 = vadd.f32 %v6107_v42, %v6106_v36  ;;  %v3698_v34 = vadd.f32 %v8527_v55, %v8510_v32  ;;  %v7606_v41 = vld [vmem:[%s8044_s11 + $0x28] ss:$84 sps:$4 sm:$0xff]   ;;  %v7609_v42 = vld [vmem:[%s8044_s11 + $0x560] ss:$84 sps:$4 sm:$0xff]  }
 0x12f   : > { %4248 = vmatmul.mubr.bf16.gmra.mrb[132].mxu1 %v7586_v20  ;;  %4345 = vmatmul.mubr.bf16.gmra.mrb[132].mxu0 %v7587_v21  ;;  %v3703_v55 = vadd.f32 %v8544_v8, %v8510_v32  ;;  %v3706_v8 = vadd.f32 %v8552_v19, %v8510_v32  ;;  %v7642_v19 = vld [vmem:[%s9871_s1 + $0x3d0] sm:$0xff]  }
 0x130   : > { %v8570_v60 = vadd.f32 %v6196_v46, %v3682_v43  ;;  %4255 = vmatprep.mubr.bf16.mxu1 %v7588_v37  ;;  %4352 = vmatprep.mubr.bf16.mxu0 %v7590_v39 }
 0x132   : > { %v6197_v52 = vpop.f32.mrb[28].mxu1  ;;  %v6109_v53 = vpop.f32.mrb[28].mxu0 }
 0x133   : > { %v6198_v54 = vpop.f32.mrb[29].mxu1  ;;  %v6110_v56 = vpop.f32.mrb[29].mxu0 }
 0x134   : > { %v6199_v57 = vadd.f32 %v6198_v54, %v6197_v52  ;;  %v6200_v31 = vpop.f32.mrb[30].mxu1  ;;  %v8576_v61 = vadd.f32 %v6110_v56, %v6109_v53  ;;  %v6112_v62 = vpop.f32.mrb[30].mxu0 }
 0x135   : > { %v6201_v1 = vpop.f32.mrb[31].mxu1  ;;  %v6113_v2 = vpop.f32.mrb[31].mxu0 }
 0x136   : > { %v8582_v6 = vadd.f32 %v6199_v57, %v3687_v4  ;;  %v6202_v7 = vadd.f32 %v6201_v1, %v6200_v31  ;;  %v8584_v9 = vadd.f32 %v6113_v2, %v6112_v62  ;;  %v7611_v4 = vld [vmem:[%s9871_s1 + $0x380] sm:$0xff]  }
 0x137   : > { %4256 = vmatmul.mubr.bf16.gmra.mrb[136].mxu1 %v7592_v50  ;;  %4353 = vmatmul.mubr.bf16.gmra.mrb[136].mxu0 %v7593_v51  ;;  %v7614_v57 = vld [vmem:[%s8044_s11 + $0x60c] ss:$84 sps:$4 sm:$0xff]  }
 0x138   : > { %v8586_v16 = vadd.f32 %v6202_v7, %v3690_v5  ;;  %4263 = vmatprep.mubr.bf16.mxu1 %v7598_v63  ;;  %4360 = vmatprep.mubr.bf16.mxu0 %v7600_v0  ;;  %v7616_v63 = vld [vmem:[%s8044_s11 + $0xd4] ss:$84 sps:$4 sm:$0xff]  }
 0x139   : > { %v7626_v0 = vld [vmem:[%s9871_s1 + $0x3c8] sm:$0xff]  }
 0x13a   : > { %v6203_v12 = vpop.f32.mrb[32].mxu1  ;;  %v6115_v13 = vpop.f32.mrb[32].mxu0 }
 0x13b   : > { %v6204_v15 = vpop.f32.mrb[33].mxu1  ;;  %v6116_v18 = vpop.f32.mrb[33].mxu0 }
 0x13c   : > { %v6205_v20 = vadd.f32 %v6204_v15, %v6203_v12  ;;  %v6206_v21 = vpop.f32.mrb[34].mxu1  ;;  %v8592_v23 = vadd.f32 %v6116_v18, %v6115_v13  ;;  %v6118_v25 = vpop.f32.mrb[34].mxu0  ;;  %v7619_v12 = vld [vmem:[%s8044_s11 + $0xd0] ss:$84 sps:$4 sm:$0xff]  }
 0x13d   : > { %v6207_v29 = vpop.f32.mrb[35].mxu1  ;;  %v6119_v33 = vpop.f32.mrb[35].mxu0 }
 0x13e   : > { %v8598_v36 = vadd.f32 %v6205_v20, %v3695_v27  ;;  %v6208_v37 = vadd.f32 %v6207_v29, %v6206_v21  ;;  %v8600_v39 = vadd.f32 %v6119_v33, %v6118_v25  ;;  %v3711_v20 = vadd.f32 %v8560_v35, %v8510_v32  ;;  %v7620_v29 = vld [vmem:[%s8044_s11 + $0x6b4] ss:$84 sps:$4 sm:$0xff]   ;;  %v7622_v33 = vld [vmem:[%s8044_s11 + $0x17c] ss:$84 sps:$4 sm:$0xff]  }
 0x13f   : > { %4264 = vmatmul.mubr.bf16.gmra.mrb[140].mxu1 %v7602_v10  ;;  %4361 = vmatmul.mubr.bf16.gmra.mrb[140].mxu0 %v7603_v11  ;;  %v7627_v10 = vld [vmem:[%s9871_s1 + $0x388] sm:$0xff]   ;;  %v3714_v35 = vadd.f32 %v8568_v47, %v8510_v32  ;;  %v7674_v47 = vld [vmem:[%s9871_s1 + $0x3e0] sm:$0xff]  }
 0x140   : > { %v8602_v44 = vadd.f32 %v6208_v37, %v3698_v34  ;;  %4368 = vmatprep.mubr.bf16.mxu0 %v7604_v28  ;;  %4465 = vmatprep.mubr.bf16.mxu1 %v7608_v49  ;;  %v7618_v11 = vld [vmem:[%s8044_s11 + $0x608] ss:$84 sps:$4 sm:$0xff]  }
 0x142   : > { %v6209_v43 = vpop.f32.mrb[36].mxu1  ;;  %v6121_v46 = vpop.f32.mrb[36].mxu0 }
 0x143   : > { %v6210_v50 = vpop.f32.mrb[37].mxu1  ;;  %v6122_v51 = vpop.f32.mrb[37].mxu0 }
 0x144   : > { %v6211_v52 = vadd.f32 %v6210_v50, %v6209_v43  ;;  %v6212_v53 = vpop.f32.mrb[38].mxu1  ;;  %v8608_v54 = vadd.f32 %v6122_v51, %v6121_v46  ;;  %v6124_v56 = vpop.f32.mrb[38].mxu0  ;;  %v7658_v50 = vld [vmem:[%s9871_s1 + $0x3d8] sm:$0xff]  }
 0x145   : > { %v6213_v31 = vpop.f32.mrb[39].mxu1  ;;  %v6125_v62 = vpop.f32.mrb[39].mxu0  ;;  %v7659_v51 = vld [vmem:[%s9871_s1 + $0x398] sm:$0xff]  }
 0x146   : > { %v8620_v1 = vadd.f32 %v6211_v52, %v3703_v55  ;;  %v6214_v2 = vadd.f32 %v6213_v31, %v6212_v53  ;;  %v8622_v5 = vadd.f32 %v6125_v62, %v6124_v56  ;;  %v7624_v52 = vld [vmem:[%s8044_s11 + $0x6b0] ss:$84 sps:$4 sm:$0xff]   ;;  %v7625_v53 = vld [vmem:[%s8044_s11 + $0x178] ss:$84 sps:$4 sm:$0xff]   ;;  %v3719_v62 = vadd.f32 %v8576_v61, %v8510_v32 }
 0x147   : > { %4369 = vmatmul.mubr.bf16.gmra.mrb[144].mxu0 %v7609_v42  ;;  %4466 = vmatmul.mubr.bf16.vlgmr.msra.gmra.mrb[144].mxu1 %v7606_v41  ;;  %v7643_v41 = vld [vmem:[%s9871_s1 + $0x390] sm:$0xff]   ;;  %v7690_v61 = vld [vmem:[%s9871_s1 + $0x3e8] sm:$0xff]  }
 0x148   : > { %v8624_v7 = vadd.f32 %v6214_v2, %v3706_v8  ;;  %6836 = vmatpush3.bf16.msra.mxu1 %v7611_v4  ;;  %4376 = vmatprep.mubr.bf16.mxu0 %v7614_v57 }
 0x149   : > { %4473 = vmatprep.mubr.bf16.mxu1 %v7616_v63  ;;  %6837 = vmatprep.subr.bf16.mxu1 %v7626_v0 }
 0x14a   : > { %v6215_v13 = vpop.f32.mrb[40].mxu1  ;;  %v6127_v15 = vpop.f32.mrb[40].mxu0 }
 0x14b   : > { %v6216_v18 = vpop.f32.mrb[41].mxu1  ;;  %v6128_v27 = vpop.f32.mrb[41].mxu0 }
 0x14c   : > { %v6217_v21 = vadd.f32 %v6216_v18, %v6215_v13  ;;  %v6218_v25 = vpop.f32.mrb[42].mxu1  ;;  %v8636_v28 = vadd.f32 %v6128_v27, %v6127_v15  ;;  %v6130_v49 = vpop.f32.mrb[42].mxu0  ;;  %6838 = vmatpush3.bf16.msra.mxu1 %v7627_v10  ;;  %v7630_v10 = vld [vmem:[%s8044_s11 + $0x75c] ss:$84 sps:$4 sm:$0xff]   ;;  %v7675_v13 = vld [vmem:[%s9871_s1 + $0x3a0] sm:$0xff]   ;;  %v3722_v15 = vadd.f32 %v8584_v9, %v8510_v32 }
 0x14d   : > { %v6219_v34 = vpop.f32.mrb[43].mxu1  ;;  %v6131_v37 = vpop.f32.mrb[43].mxu0  ;;  %6839 = vmatprep.subr.bf16.mxu1 %v7642_v19  ;;  %v7632_v19 = vld [vmem:[%s8044_s11 + $0x224] ss:$84 sps:$4 sm:$0xff]   ;;  %v7706_v9 = vld [vmem:[%s9871_s1 + $0x3f0] sm:$0xff]  }
 0x14e   : > { %v8645_v42 = vadd.f32 %v6217_v21, %v3711_v20  ;;  %v6220_v43 = vadd.f32 %v6219_v34, %v6218_v25  ;;  %v8647_v46 = vadd.f32 %v6131_v37, %v6130_v49  ;;  %v7691_v25 = vld [vmem:[%s9871_s1 + $0x3a8] sm:$0xff]  }
 0x14f   : > { %4377 = vmatmul.mubr.bf16.gmra.mrb[148].mxu0 %v7618_v11  ;;  %4474 = vmatmul.mubr.bf16.gmra.mrb[148].mxu1 %v7619_v12  ;;  %v7634_v49 = vld [vmem:[%s8044_s11 + $0x758] ss:$84 sps:$4 sm:$0xff]  }
 0x150   : > { %v8655_v55 = vadd.f32 %v6220_v43, %v3714_v35  ;;  %4384 = vmatprep.mubr.bf16.mxu0 %v7620_v29  ;;  %4481 = vmatprep.mubr.bf16.mxu1 %v7622_v33  ;;  %v7635_v29 = vld [vmem:[%s8044_s11 + $0x220] ss:$84 sps:$4 sm:$0xff]   ;;  %v3727_v35 = vadd.f32 %v8592_v23, %v8510_v32 }
 0x151   : > { %6840 = vmatpush3.bf16.msra.mxu1 %v7643_v41 }
 0x152   : > { %v6221_v56 = vpop.f32.mrb[44].mxu1  ;;  %v6133_v4 = vpop.f32.mrb[44].mxu0  ;;  %6841 = vmatprep.subr.bf16.mxu1 %v7658_v50 }
 0x153   : > { %v6222_v57 = vpop.f32.mrb[45].mxu1  ;;  %v6134_v31 = vpop.f32.mrb[45].mxu0 }
 0x154   : > { %v6223_v63 = vadd.f32 %v6222_v57, %v6221_v56  ;;  %v6224_v0 = vpop.f32.mrb[46].mxu1  ;;  %v8664_v8 = vadd.f32 %v6134_v31, %v6133_v4  ;;  %v6136_v2 = vpop.f32.mrb[46].mxu0  ;;  %v3730_v56 = vadd.f32 %v8600_v39, %v8510_v32  ;;  %v7707_v31 = vld [vmem:[%s9871_s1 + $0x3b0] sm:$0xff]   ;;  %v7722_v39 = vld [vmem:[%s9871_s1 + $0x3f8] sm:$0xff]  }
 0x155   : > { %v6225_v11 = vpop.f32.mrb[47].mxu1  ;;  %v6137_v12 = vpop.f32.mrb[47].mxu0  ;;  %6842 = vmatpush3.bf16.msra.mxu1 %v7659_v51 }
 0x156   : > { %v8676_v18 = vadd.f32 %v6223_v63, %v3719_v62  ;;  %v6226_v27 = vadd.f32 %v6225_v11, %v6224_v0  ;;  %v8678_v20 = vadd.f32 %v6137_v12, %v6136_v2  ;;  %6843 = vmatprep.subr.bf16.mxu1 %v7674_v47  ;;  %v7723_v2 = vld [vmem:[%s9871_s1 + $0x3b8] sm:$0xff]   ;;  %v7640_v11 = vld [vmem:[%s8044_s11 + $0x800] ss:$84 sps:$4 sm:$0xff]  }
 0x157   : > { %4385 = vmatmul.mubr.bf16.gmra.mrb[152].mxu0 %v7624_v52  ;;  %4482 = vmatmul.mubr.bf16.gmra.mrb[152].mxu1 %v7625_v53  ;;  %v7636_v52 = vld [vmem:[%s8044_s11 + $0x804] ss:$84 sps:$4 sm:$0xff]   ;;  %v7638_v53 = vld [vmem:[%s8044_s11 + $0x2cc] ss:$84 sps:$4 sm:$0xff]   ;;  %v7641_v12 = vld [vmem:[%s8044_s11 + $0x2c8] ss:$84 sps:$4 sm:$0xff]  }
 0x158   : > { %v8680_v21 = vadd.f32 %v6226_v27, %v3722_v15  ;;  %4392 = vmatprep.mubr.bf16.mxu0 %v7630_v10  ;;  %4489 = vmatprep.mubr.bf16.mxu1 %v7632_v19 }
 0x159   : > { %6844 = vmatpush3.bf16.msra.mxu1 %v7675_v13 }
 0x15a   : > { %v6227_v33 = vpop.f32.mrb[48].mxu1  ;;  %v6291_v34 = vpop.f32.mrb[48].mxu0  ;;  %6845 = vmatprep.subr.bf16.mxu1 %v7690_v61 }
 0x15b   : > { %v6228_v37 = vpop.f32.mrb[49].mxu1  ;;  %v6292_v41 = vpop.f32.mrb[49].mxu0 }
 0x15c   : > { %v6229_v43 = vadd.f32 %v6228_v37, %v6227_v33  ;;  %v6293_v50 = vadd.f32 %v6292_v41, %v6291_v34  ;;  %v6230_v51 = vpop.f32.mrb[50].mxu1  ;;  %v6294_v47 = vpop.f32.mrb[50].mxu0  ;;  %v7646_v33 = vld [vmem:[%s8044_s11 + $0x8ac] ss:$84 sps:$4 sm:$0xff]   ;;  %v7648_v34 = vld [vmem:[%s8044_s11 + $0x374] ss:$84 sps:$4 sm:$0xff]   ;;  %v3738_v37 = vadd.f32 %v8622_v5, %v8510_v32 }
 0x15d   : > { %v6231_v4 = vpop.f32.mrb[51].mxu1  ;;  %v6295_v57 = vpop.f32.mrb[51].mxu0  ;;  %6846 = vmatpush3.bf16.msra.mxu1 %v7691_v25  ;;  %v3735_v25 = vadd.f32 %v8608_v54, %v8510_v32 }
 0x15e   : > { %v6232_v62 = vadd.f32 %v6231_v4, %v6230_v51  ;;  %v6296_v23 = vadd.f32 %v6295_v57, %v6294_v47  ;;  %v8699_v63 = vadd.f32 %v6229_v43, %v3727_v35  ;;  %v8702_v0 = vadd.f32 %v6293_v50, %v8525_v24  ;;  %6847 = vmatprep.subr.bf16.mxu1 %v7706_v9  ;;  %v7738_v24 = vld [vmem:[%s9871_s1 + $0x4c0] sm:$0xff]  }
 0x15f   : > { %4393 = vmatmul.mubr.bf16.gmra.mrb[156].mxu0 %v7634_v49  ;;  %4490 = vmatmul.mubr.bf16.gmra.mrb[156].mxu1 %v7635_v29 }
 0x160   : > { %4400 = vmatprep.mubr.bf16.mxu0 %v7636_v52  ;;  %4497 = vmatprep.mubr.bf16.mxu1 %v7638_v53  ;;  %v8710_v10 = vadd.f32 %v6232_v62, %v3730_v56  ;;  %v8713_v19 = vadd.f32 %v6296_v23, %v8535_v59  ;;  %v7650_v52 = vld [vmem:[%s8044_s11 + $0x8a8] ss:$84 sps:$4 sm:$0xff]   ;;  %v7651_v53 = vld [vmem:[%s8044_s11 + $0x370] ss:$84 sps:$4 sm:$0xff]  }
 0x161   : > { %6848 = vmatpush3.bf16.msra.mxu1 %v7707_v31 }
 0x162   : > { %v6233_v13 = vpop.f32.mrb[52].mxu1  ;;  %v6297_v61 = vpop.f32.mrb[52].mxu0  ;;  %6849 = vmatprep.subr.bf16.mxu1 %v7722_v39 }
 0x163   : > { %v6234_v15 = vpop.f32.mrb[53].mxu1  ;;  %v6298_v27 = vpop.f32.mrb[53].mxu0 }
 0x164   : > { %v6235_v9 = vadd.f32 %v6234_v15, %v6233_v13  ;;  %v6299_v49 = vadd.f32 %v6298_v27, %v6297_v61  ;;  %v6236_v59 = vpop.f32.mrb[54].mxu1  ;;  %v6300_v29 = vpop.f32.mrb[54].mxu0 }
 0x165   : > { %v6237_v41 = vpop.f32.mrb[55].mxu1  ;;  %v6301_v35 = vpop.f32.mrb[55].mxu0  ;;  %6850 = vmatpush3.bf16.msra.mxu1 %v7723_v2 }
 0x166   : > { %v6238_v43 = vadd.f32 %v6237_v41, %v6236_v59  ;;  %v6302_v50 = vadd.f32 %v6301_v35, %v6300_v29  ;;  %v8726_v51 = vadd.f32 %v6235_v9, %v3735_v25  ;;  %v8729_v54 = vadd.f32 %v6299_v49, %v8550_v17  ;;  %7059 = vmatprep.subr.bf16.mxu1 %v7738_v24  ;;  %v7652_v24 = vld [vmem:[%s8044_s11 + $0x954] ss:$84 sps:$4 sm:$0xff]   ;;  %v7657_v49 = vld [vmem:[%s8044_s11 + $0x418] ss:$84 sps:$4 sm:$0xff]  }
 0x167   : > { %4401 = vmatmul.mubr.bf16.gmra.mrb[160].mxu0 %v7640_v11  ;;  %4498 = vmatmul.mubr.bf16.gmra.mrb[160].mxu1 %v7641_v12  ;;  %v3743_v17 = vadd.f32 %v8636_v28, %v8510_v32  ;;  %v7654_v11 = vld [vmem:[%s8044_s11 + $0x41c] ss:$84 sps:$4 sm:$0xff]  }
 0x168   : > { %4408 = vmatprep.mubr.bf16.mxu0 %v7646_v33  ;;  %4505 = vmatprep.mubr.bf16.mxu1 %v7648_v34  ;;  %v8731_v47 = vadd.f32 %v6238_v43, %v3738_v37  ;;  %v8734_v5 = vadd.f32 %v6302_v50, %v8554_v40  ;;  %v3746_v40 = vadd.f32 %v8647_v46, %v8510_v32  ;;  %v7656_v46 = vld [vmem:[%s8044_s11 + $0x950] ss:$84 sps:$4 sm:$0xff]  }
 0x169   : > { %v7662_v50 = vld [vmem:[%s8044_s11 + $0x9fc] ss:$84 sps:$4 sm:$0xff]  }
 0x16a   : > { %v6239_v56 = vpop.f32.mrb[56].mxu1  ;;  %v6303_v4 = vpop.f32.mrb[56].mxu0 }
 0x16b   : > { %v6240_v57 = vpop.f32.mrb[57].mxu1  ;;  %v6304_v31 = vpop.f32.mrb[57].mxu0 }
 0x16c   : > { %v6241_v62 = vadd.f32 %v6240_v57, %v6239_v56  ;;  %v6305_v23 = vadd.f32 %v6304_v31, %v6303_v4  ;;  %v6242_v39 = vpop.f32.mrb[58].mxu1  ;;  %v6306_v2 = vpop.f32.mrb[58].mxu0 }
 0x16d   : > { %v6243_v12 = vpop.f32.mrb[59].mxu1  ;;  %v6307_v13 = vpop.f32.mrb[59].mxu0 }
 0x16e   : > { %v6244_v61 = vadd.f32 %v6243_v12, %v6242_v39  ;;  %v6308_v15 = vadd.f32 %v6307_v13, %v6306_v2  ;;  %v8744_v27 = vadd.f32 %v6241_v62, %v3743_v17  ;;  %v8747_v25 = vadd.f32 %v6305_v23, %v8566_v45  ;;  %v7666_v2 = vld [vmem:[%s8044_s11 + $0x9f8] ss:$84 sps:$4 sm:$0xff]  }
 0x16f   : > { %4409 = vmatmul.mubr.bf16.gmra.mrb[164].mxu0 %v7650_v52  ;;  %4506 = vmatmul.mubr.bf16.gmra.mrb[164].mxu1 %v7651_v53  ;;  %v3751_v45 = vadd.f32 %v8664_v8, %v8510_v32  ;;  %v7664_v52 = vld [vmem:[%s8044_s11 + $0x4c4] ss:$84 sps:$4 sm:$0xff]   ;;  %v3754_v53 = vadd.f32 %v8678_v20, %v8510_v32 }
 0x170   : > { %4416 = vmatprep.mubr.bf16.mxu0 %v7652_v24  ;;  %4513 = vmatprep.mubr.bf16.mxu1 %v7654_v11  ;;  %v8749_v28 = vadd.f32 %v6244_v61, %v3746_v40  ;;  %v8752_v9 = vadd.f32 %v6308_v15, %v8570_v60  ;;  %v7667_v24 = vld [vmem:[%s8044_s11 + $0x4c0] ss:$84 sps:$4 sm:$0xff]  }
 0x171   : > { %v7672_v15 = vld [vmem:[%s8044_s11 + $0x34] ss:$84 sps:$4 sm:$0xff]  }
 0x172   : > { %v6245_v59 = vpop.f32.mrb[60].mxu1  ;;  %v6309_v29 = vpop.f32.mrb[60].mxu0 }
 0x173   : > { %v6246_v33 = vpop.f32.mrb[61].mxu1  ;;  %v6310_v34 = vpop.f32.mrb[61].mxu0 }
 0x174   : > { %v6247_v37 = vadd.f32 %v6246_v33, %v6245_v59  ;;  %v6311_v41 = vadd.f32 %v6310_v34, %v6309_v29  ;;  %v6248_v35 = vpop.f32.mrb[62].mxu1  ;;  %v6312_v43 = vpop.f32.mrb[62].mxu0 }
 0x175   : > { %v6249_v60 = vpop.f32.mrb[63].mxu1  ;;  %v6313_v56 = vpop.f32.mrb[63].mxu0 }
 0x176   : > { %v6250_v4 = vadd.f32 %v6249_v60, %v6248_v35  ;;  %v6314_v57 = vadd.f32 %v6313_v56, %v6312_v43  ;;  %v8762_v31 = vadd.f32 %v6247_v37, %v3751_v45  ;;  %v8765_v17 = vadd.f32 %v6311_v41, %v8582_v6  ;;  %v8777_v6 = vld [vmem:[%s9872_s2] ss:$0 sm:$0xff] }
 0x177   : > { %4417 = vmatmul.mubr.bf16.gmra.mrb[168].mxu0 %v7656_v46  ;;  %4514 = vmatmul.mubr.bf16.gmra.mrb[168].mxu1 %v7657_v49  ;;  %v3759_v11 = vadd.f32 %v8777_v6, %v8425_v22  ;;  %v3762_v46 = vadd.f32 %v8777_v6, %v8431_v30 }
 0x178   : > { %4424 = vmatprep.mubr.bf16.mxu0 %v7662_v50  ;;  %4521 = vmatprep.mubr.bf16.mxu1 %v7664_v52  ;;  %v8767_v8 = vadd.f32 %v6250_v4, %v3754_v53  ;;  %v8770_v32 = vadd.f32 %v6314_v57, %v8586_v16  ;;  %v7668_v16 = vld [vmem:[%s8044_s11 + $0x56c] ss:$84 sps:$4 sm:$0xff]   ;;  %v7670_v50 = vld [vmem:[%s8044_s11 + $0x30] ss:$84 sps:$4 sm:$0xff]   ;;  %v7673_v52 = vld [vmem:[%s8044_s11 + $0x568] ss:$84 sps:$4 sm:$0xff]  }
 0x179   : > { %v7677_v57 = vld [vmem:[%s9871_s1 + $0x400] sm:$0xff]  }
 0x17a   : > { %v6251_v20 = vpop.f32.mrb[64].mxu1  ;;  %v6315_v62 = vpop.f32.mrb[64].mxu0 }
 0x17b   : > { %v6252_v23 = vpop.f32.mrb[65].mxu1  ;;  %v6316_v39 = vpop.f32.mrb[65].mxu0 }
 0x17c   : > { %v6253_v40 = vadd.f32 %v6252_v23, %v6251_v20  ;;  %v6317_v12 = vadd.f32 %v6316_v39, %v6315_v62  ;;  %v6254_v13 = vpop.f32.mrb[66].mxu1  ;;  %v6318_v61 = vpop.f32.mrb[66].mxu0  ;;  %v3770_v20 = vadd.f32 %v8777_v6, %v8449_v48  ;;  %v7680_v39 = vld [vmem:[%s8044_s11 + $0xdc] ss:$84 sps:$4 sm:$0xff]   ;;  %v7693_v48 = vld [vmem:[%s9871_s1 + $0x408] sm:$0xff]  }
 0x17d   : > { %v6255_v49 = vpop.f32.mrb[67].mxu1  ;;  %v6319_v59 = vpop.f32.mrb[67].mxu0 }
 0x17e   : > { %v6256_v29 = vadd.f32 %v6255_v49, %v6254_v13  ;;  %v6320_v33 = vadd.f32 %v6319_v59, %v6318_v61  ;;  %v8785_v34 = vadd.f32 %v6253_v40, %v3759_v11  ;;  %v8788_v45 = vadd.f32 %v6317_v12, %v8598_v36  ;;  %v7682_v49 = vld [vmem:[%s8044_s11 + $0x610] ss:$84 sps:$4 sm:$0xff]   ;;  %v7683_v59 = vld [vmem:[%s8044_s11 + $0xd8] ss:$84 sps:$4 sm:$0xff]  }
 0x17f   : > { %4425 = vmatmul.mubr.bf16.gmra.mrb[172].mxu0 %v7666_v2  ;;  %4522 = vmatmul.mubr.bf16.gmra.mrb[172].mxu1 %v7667_v24  ;;  %v3767_v36 = vadd.f32 %v8777_v6, %v8437_v38  ;;  %v7692_v2 = vld [vmem:[%s9871_s1 + $0x448] sm:$0xff]  }
 0x180   : > { %4529 = vmatprep.mubr.bf16.mxu1 %v7668_v16  ;;  %4626 = vmatprep.mubr.bf16.mxu0 %v7672_v15  ;;  %v8790_v22 = vadd.f32 %v6256_v29, %v3762_v46  ;;  %v8793_v30 = vadd.f32 %v6320_v33, %v8602_v44  ;;  %v7678_v44 = vld [vmem:[%s8044_s11 + $0x614] ss:$84 sps:$4 sm:$0xff]   ;;  %v3775_v29 = vadd.f32 %v8777_v6, %v8461_v58  ;;  %v7724_v58 = vld [vmem:[%s9871_s1 + $0x458] sm:$0xff]  }
 0x182   : > { %v6257_v37 = vpop.f32.mrb[68].mxu1  ;;  %v6321_v41 = vpop.f32.mrb[68].mxu0 }
 0x183   : > { %v6258_v35 = vpop.f32.mrb[69].mxu1  ;;  %v6322_v43 = vpop.f32.mrb[69].mxu0 }
 0x184   : > { %v6259_v53 = vadd.f32 %v6258_v35, %v6257_v37  ;;  %v6323_v60 = vadd.f32 %v6322_v43, %v6321_v41  ;;  %v6260_v56 = vpop.f32.mrb[70].mxu1  ;;  %v6324_v4 = vpop.f32.mrb[70].mxu0  ;;  %v7684_v35 = vld [vmem:[%s8044_s11 + $0x6bc] ss:$84 sps:$4 sm:$0xff]   ;;  %v7686_v43 = vld [vmem:[%s8044_s11 + $0x184] ss:$84 sps:$4 sm:$0xff]  }
 0x185   : > { %v6261_v62 = vpop.f32.mrb[71].mxu1  ;;  %v6325_v23 = vpop.f32.mrb[71].mxu0 }
 0x186   : > { %v6262_v38 = vadd.f32 %v6261_v62, %v6260_v56  ;;  %v6326_v24 = vadd.f32 %v6325_v23, %v6324_v4  ;;  %v8809_v11 = vadd.f32 %v6259_v53, %v3767_v36  ;;  %v8812_v40 = vadd.f32 %v6323_v60, %v8620_v1  ;;  %v7708_v1 = vld [vmem:[%s9871_s1 + $0x450] sm:$0xff]   ;;  %v7740_v23 = vld [vmem:[%s9871_s1 + $0x460] sm:$0xff]  }
 0x187   : > { %4530 = vmatmul.mubr.bf16.gmra.mrb[176].mxu1 %v7673_v52  ;;  %4627 = vmatmul.mubr.bf16.vlgmr.msra.gmra.mrb[176].mxu0 %v7670_v50  ;;  %v3778_v50 = vadd.f32 %v8777_v6, %v8470_v3  ;;  %v7709_v53 = vld [vmem:[%s9871_s1 + $0x410] sm:$0xff]  }
 0x188   : > { %6948 = vmatpush3.bf16.msra.mxu0 %v7677_v57  ;;  %4537 = vmatprep.mubr.bf16.mxu1 %v7678_v44  ;;  %v8817_v12 = vadd.f32 %v6262_v38, %v3770_v20  ;;  %v8820_v13 = vadd.f32 %v6326_v24, %v8624_v7  ;;  %v7725_v20 = vld [vmem:[%s9871_s1 + $0x418] sm:$0xff]   ;;  %v7689_v24 = vld [vmem:[%s8044_s11 + $0x180] ss:$84 sps:$4 sm:$0xff]  }
 0x189   : > { %4634 = vmatprep.mubr.bf16.mxu0 %v7680_v39  ;;  %6949 = vmatprep.subr.bf16.mxu0 %v7692_v2  ;;  %v7688_v38 = vld [vmem:[%s8044_s11 + $0x6b8] ss:$84 sps:$4 sm:$0xff]  }
 0x18a   : > { %v6263_v61 = vpop.f32.mrb[72].mxu1  ;;  %v6327_v16 = vpop.f32.mrb[72].mxu0 }
 0x18b   : > { %v6264_v15 = vpop.f32.mrb[73].mxu1  ;;  %v6328_v46 = vpop.f32.mrb[73].mxu0 }
 0x18c   : > { %v6265_v33 = vadd.f32 %v6264_v15, %v6263_v61  ;;  %v6329_v37 = vadd.f32 %v6328_v46, %v6327_v16  ;;  %v6266_v7 = vpop.f32.mrb[74].mxu1  ;;  %v6330_v41 = vpop.f32.mrb[74].mxu0  ;;  %6950 = vmatpush3.bf16.msra.mxu0 %v7693_v48  ;;  %v7694_v15 = vld [vmem:[%s8044_s11 + $0x764] ss:$84 sps:$4 sm:$0xff]   ;;  %v7696_v46 = vld [vmem:[%s8044_s11 + $0x22c] ss:$84 sps:$4 sm:$0xff]  }
 0x18d   : > { %v6267_v52 = vpop.f32.mrb[75].mxu1  ;;  %v6331_v36 = vpop.f32.mrb[75].mxu0  ;;  %6951 = vmatprep.subr.bf16.mxu0 %v7708_v1 }
 0x18e   : > { %v6268_v60 = vadd.f32 %v6267_v52, %v6266_v7  ;;  %v6332_v56 = vadd.f32 %v6331_v36, %v6330_v41  ;;  %v8839_v4 = vadd.f32 %v6265_v33, %v3775_v29  ;;  %v8842_v57 = vadd.f32 %v6329_v37, %v8645_v42  ;;  %v7741_v33 = vld [vmem:[%s9871_s1 + $0x420] sm:$0xff]   ;;  %v7772_v52 = vld [vmem:[%s9871_s1 + $0x470] sm:$0xff]  }
 0x18f   : > { %4538 = vmatmul.mubr.bf16.gmra.mrb[180].mxu1 %v7682_v49  ;;  %4635 = vmatmul.mubr.bf16.gmra.mrb[180].mxu0 %v7683_v59  ;;  %v3786_v49 = vadd.f32 %v8777_v6, %v8497_v26  ;;  %v7756_v26 = vld [vmem:[%s9871_s1 + $0x468] sm:$0xff]  }
 0x190   : > { %4545 = vmatprep.mubr.bf16.mxu1 %v7684_v35  ;;  %4642 = vmatprep.mubr.bf16.mxu0 %v7686_v43  ;;  %v8844_v3 = vadd.f32 %v6268_v60, %v3778_v50  ;;  %v8847_v44 = vadd.f32 %v6332_v56, %v8655_v55  ;;  %v3783_v55 = vadd.f32 %v8777_v6, %v8485_v14  ;;  %v7698_v60 = vld [vmem:[%s8044_s11 + $0x760] ss:$84 sps:$4 sm:$0xff]   ;;  %v7699_v56 = vld [vmem:[%s8044_s11 + $0x228] ss:$84 sps:$4 sm:$0xff]  }
 0x191   : > { %6952 = vmatpush3.bf16.msra.mxu0 %v7709_v53 }
 0x192   : > { %v6269_v62 = vpop.f32.mrb[76].mxu1  ;;  %v6333_v42 = vpop.f32.mrb[76].mxu0  ;;  %6953 = vmatprep.subr.bf16.mxu0 %v7724_v58 }
 0x193   : > { %v6270_v39 = vpop.f32.mrb[77].mxu1  ;;  %v6334_v2 = vpop.f32.mrb[77].mxu0 }
 0x194   : > { %v6271_v48 = vadd.f32 %v6270_v39, %v6269_v62  ;;  %v6335_v1 = vadd.f32 %v6334_v2, %v6333_v42  ;;  %v6272_v61 = vpop.f32.mrb[78].mxu1  ;;  %v6336_v16 = vpop.f32.mrb[78].mxu0  ;;  %v7700_v42 = vld [vmem:[%s8044_s11 + $0x80c] ss:$84 sps:$4 sm:$0xff]  }
 0x195   : > { %v6273_v59 = vpop.f32.mrb[79].mxu1  ;;  %v6337_v29 = vpop.f32.mrb[79].mxu0  ;;  %6954 = vmatpush3.bf16.msra.mxu0 %v7725_v20 }
 0x196   : > { %v6274_v37 = vadd.f32 %v6273_v59, %v6272_v61  ;;  %v6338_v7 = vadd.f32 %v6337_v29, %v6336_v16  ;;  %6955 = vmatprep.subr.bf16.mxu0 %v7740_v23  ;;  %v8866_v14 = vadd.f32 %v6271_v48, %v3783_v55  ;;  %v8869_v41 = vadd.f32 %v6335_v1, %v8676_v18  ;;  %v7757_v18 = vld [vmem:[%s9871_s1 + $0x428] sm:$0xff]   ;;  %v7788_v61 = vld [vmem:[%s9871_s1 + $0x478] sm:$0xff]   ;;  %v7705_v29 = vld [vmem:[%s8044_s11 + $0x2d0] ss:$84 sps:$4 sm:$0xff]  }
 0x197   : > { %4546 = vmatmul.mubr.bf16.gmra.mrb[184].mxu1 %v7688_v38  ;;  %4643 = vmatmul.mubr.bf16.gmra.mrb[184].mxu0 %v7689_v24  ;;  %v7702_v23 = vld [vmem:[%s8044_s11 + $0x2d4] ss:$84 sps:$4 sm:$0xff]  }
 0x198   : > { %4553 = vmatprep.mubr.bf16.mxu1 %v7694_v15  ;;  %4650 = vmatprep.mubr.bf16.mxu0 %v7696_v46  ;;  %v8874_v6 = vadd.f32 %v6274_v37, %v3786_v49  ;;  %v8877_v35 = vadd.f32 %v6338_v7, %v8680_v21  ;;  %v7773_v38 = vld [vmem:[%s9871_s1 + $0x430] sm:$0xff]   ;;  %v7704_v59 = vld [vmem:[%s8044_s11 + $0x808] ss:$84 sps:$4 sm:$0xff]  }
 0x199   : > { %6956 = vmatpush3.bf16.msra.mxu0 %v7741_v33 }
 0x19a   : > { %v6339_v43 = vpop.f32.mrb[80].mxu0  ;;  %v6403_v50 = vpop.f32.mrb[80].mxu1  ;;  %6957 = vmatprep.subr.bf16.mxu0 %v7756_v26 }
 0x19b   : > { %v6340_v36 = vpop.f32.mrb[81].mxu0  ;;  %v6404_v53 = vpop.f32.mrb[81].mxu1 }
 0x19c   : > { %v6341_v58 = vadd.f32 %v6340_v36, %v6339_v43  ;;  %v6405_v21 = vadd.f32 %v6404_v53, %v6403_v50  ;;  %v6342_v20 = vpop.f32.mrb[82].mxu0  ;;  %v6406_v62 = vpop.f32.mrb[82].mxu1  ;;  %v7712_v43 = vld [vmem:[%s8044_s11 + $0x37c] ss:$84 sps:$4 sm:$0xff]  }
 0x19d   : > { %v6343_v39 = vpop.f32.mrb[83].mxu0  ;;  %v6407_v2 = vpop.f32.mrb[83].mxu1  ;;  %6958 = vmatpush3.bf16.msra.mxu0 %v7757_v18  ;;  %v7710_v18 = vld [vmem:[%s8044_s11 + $0x8b4] ss:$84 sps:$4 sm:$0xff]  }
 0x19e   : > { %v8893_v24 = vadd.f32 %v6341_v58, %v8699_v63  ;;  %v8896_v55 = vadd.f32 %v6405_v21, %v8702_v0  ;;  %v6344_v48 = vadd.f32 %v6343_v39, %v6342_v20  ;;  %v6408_v1 = vadd.f32 %v6407_v2, %v6406_v62  ;;  %6959 = vmatprep.subr.bf16.mxu0 %v7772_v52  ;;  %v7789_v0 = vld [vmem:[%s9871_s1 + $0x438] sm:$0xff]  }
 0x19f   : > { %4554 = vmatmul.mubr.bf16.gmra.mrb[188].mxu1 %v7698_v60  ;;  %4651 = vmatmul.mubr.bf16.gmra.mrb[188].mxu0 %v7699_v56 }
 0x1a0   : > { %v8902_v16 = vadd.f32 %v6344_v48, %v8710_v10  ;;  %v8905_v63 = vadd.f32 %v6408_v1, %v8713_v19  ;;  %4561 = vmatprep.mubr.bf16.mxu1 %v7700_v42  ;;  %4658 = vmatprep.mubr.bf16.mxu0 %v7702_v23  ;;  %v8913_v10 = vld [vmem:[%s9871_s1 + $0x500] sm:$0xff]   ;;  %v7715_v23 = vld [vmem:[%s8044_s11 + $0x378] ss:$84 sps:$4 sm:$0xff]   ;;  %v7716_v1 = vld [vmem:[%s8044_s11 + $0x95c] ss:$84 sps:$4 sm:$0xff]  }
 0x1a1   : > { %6960 = vmatpush3.bf16.msra.mxu0 %v7773_v38  ;;  %v7714_v42 = vld [vmem:[%s8044_s11 + $0x8b0] ss:$84 sps:$4 sm:$0xff]  }
 0x1a2   : > { %v6345_v15 = vpop.f32.mrb[84].mxu0  ;;  %v6409_v46 = vpop.f32.mrb[84].mxu1  ;;  %6961 = vmatprep.subr.bf16.mxu0 %v7788_v61  ;;  %v7718_v61 = vld [vmem:[%s8044_s11 + $0x424] ss:$84 sps:$4 sm:$0xff]  }
 0x1a3   : > { %v6346_v49 = vpop.f32.mrb[85].mxu0  ;;  %v6410_v19 = vpop.f32.mrb[85].mxu1 }
 0x1a4   : > { %v6347_v33 = vadd.f32 %v6346_v49, %v6345_v15  ;;  %v6411_v37 = vadd.f32 %v6410_v19, %v6409_v46  ;;  %v6348_v7 = vpop.f32.mrb[86].mxu0  ;;  %v6412_v26 = vpop.f32.mrb[86].mxu1 }
 0x1a5   : > { %v6349_v50 = vpop.f32.mrb[87].mxu0  ;;  %v6413_v52 = vpop.f32.mrb[87].mxu1  ;;  %6962 = vmatpush3.bf16.msra.mxu0 %v7789_v0 }
 0x1a6   : > { %v8920_v36 = vadd.f32 %v6347_v33, %v8726_v51  ;;  %v8923_v53 = vadd.f32 %v6411_v37, %v8729_v54  ;;  %v6350_v60 = vadd.f32 %v6349_v50, %v6348_v7  ;;  %v6414_v56 = vadd.f32 %v6413_v52, %v6412_v26  ;;  %7195 = vmatprep.subr.bf16.mxu0 %v8913_v10  ;;  %v7721_v7 = vld [vmem:[%s8044_s11 + $0x420] ss:$84 sps:$4 sm:$0xff]   ;;  %v7726_v52 = vld [vmem:[%s8044_s11 + $0xa04] ss:$84 sps:$4 sm:$0xff]  }
 0x1a7   : > { %4562 = vmatmul.mubr.bf16.gmra.mrb[192].mxu1 %v7704_v59  ;;  %4659 = vmatmul.mubr.bf16.gmra.mrb[192].mxu0 %v7705_v29 }
 0x1a8   : > { %v8927_v58 = vadd.f32 %v6350_v60, %v8731_v47  ;;  %v8930_v21 = vadd.f32 %v6414_v56, %v8734_v5  ;;  %4569 = vmatprep.mubr.bf16.mxu1 %v7710_v18  ;;  %4666 = vmatprep.mubr.bf16.mxu0 %v7712_v43  ;;  %v7728_v60 = vld [vmem:[%s8044_s11 + $0x4cc] ss:$84 sps:$4 sm:$0xff]  }
 0x1aa   : > { %v6351_v51 = vpop.f32.mrb[88].mxu0  ;;  %v6415_v20 = vpop.f32.mrb[88].mxu1 }
 0x1ab   : > { %v6352_v54 = vpop.f32.mrb[89].mxu0  ;;  %v6416_v62 = vpop.f32.mrb[89].mxu1 }
 0x1ac   : > { %v6353_v39 = vadd.f32 %v6352_v54, %v6351_v51  ;;  %v6417_v2 = vadd.f32 %v6416_v62, %v6415_v20  ;;  %v6354_v38 = vpop.f32.mrb[90].mxu0  ;;  %v6418_v48 = vpop.f32.mrb[90].mxu1 }
 0x1ad   : > { %v6355_v0 = vpop.f32.mrb[91].mxu0  ;;  %v6419_v47 = vpop.f32.mrb[91].mxu1 }
 0x1ae   : > { %v8937_v5 = vadd.f32 %v6353_v39, %v8744_v27  ;;  %v8940_v15 = vadd.f32 %v6417_v2, %v8747_v25  ;;  %v6356_v46 = vadd.f32 %v6355_v0, %v6354_v38  ;;  %v6420_v49 = vadd.f32 %v6419_v47, %v6418_v48  ;;  %v7720_v25 = vld [vmem:[%s8044_s11 + $0x958] ss:$84 sps:$4 sm:$0xff]   ;;  %v7731_v38 = vld [vmem:[%s8044_s11 + $0x4c8] ss:$84 sps:$4 sm:$0xff]  }
 0x1af   : > { %4570 = vmatmul.mubr.bf16.gmra.mrb[196].mxu1 %v7714_v42  ;;  %4667 = vmatmul.mubr.bf16.gmra.mrb[196].mxu0 %v7715_v23  ;;  %v7732_v47 = vld [vmem:[%s8044_s11 + $0x574] ss:$84 sps:$4 sm:$0xff]  }
 0x1b0   : > { %v8943_v19 = vadd.f32 %v6356_v46, %v8749_v28  ;;  %v8946_v59 = vadd.f32 %v6420_v49, %v8752_v9  ;;  %4577 = vmatprep.mubr.bf16.mxu1 %v7716_v1  ;;  %4674 = vmatprep.mubr.bf16.mxu0 %v7718_v61  ;;  %v7736_v46 = vld [vmem:[%s8044_s11 + $0x3c] ss:$84 sps:$4 sm:$0xff]  }
 0x1b2   : > { %v6357_v29 = vpop.f32.mrb[92].mxu0  ;;  %v6421_v27 = vpop.f32.mrb[92].mxu1 }
 0x1b3   : > { %v6358_v33 = vpop.f32.mrb[93].mxu0  ;;  %v6422_v37 = vpop.f32.mrb[93].mxu1 }
 0x1b4   : > { %v6359_v26 = vadd.f32 %v6358_v33, %v6357_v29  ;;  %v6423_v18 = vadd.f32 %v6422_v37, %v6421_v27  ;;  %v6360_v43 = vpop.f32.mrb[94].mxu0  ;;  %v6424_v50 = vpop.f32.mrb[94].mxu1 }
 0x1b5   : > { %v6361_v56 = vpop.f32.mrb[95].mxu0  ;;  %v6425_v28 = vpop.f32.mrb[95].mxu1 }
 0x1b6   : > { %v8953_v9 = vadd.f32 %v6359_v26, %v8762_v31  ;;  %v8956_v51 = vadd.f32 %v6423_v18, %v8765_v17  ;;  %v6362_v20 = vadd.f32 %v6361_v56, %v6360_v43  ;;  %v6426_v54 = vadd.f32 %v6425_v28, %v6424_v50  ;;  %v7730_v17 = vld [vmem:[%s8044_s11 + $0xa00] ss:$84 sps:$4 sm:$0xff]   ;;  %v7737_v43 = vld [vmem:[%s8044_s11 + $0x570] ss:$84 sps:$4 sm:$0xff]  }
 0x1b7   : > { %4578 = vmatmul.mubr.bf16.gmra.mrb[200].mxu1 %v7720_v25  ;;  %4675 = vmatmul.mubr.bf16.gmra.mrb[200].mxu0 %v7721_v7  ;;  %v7742_v28 = vld [vmem:[%s8044_s11 + $0x61c] ss:$84 sps:$4 sm:$0xff]  }
 0x1b8   : > { %v8959_v62 = vadd.f32 %v6362_v20, %v8767_v8  ;;  %v8962_v42 = vadd.f32 %v6426_v54, %v8770_v32  ;;  %4585 = vmatprep.mubr.bf16.mxu1 %v7726_v52  ;;  %4682 = vmatprep.mubr.bf16.mxu0 %v7728_v60  ;;  %v7744_v54 = vld [vmem:[%s8044_s11 + $0xe4] ss:$84 sps:$4 sm:$0xff]  }
 0x1ba   : > { %v6363_v23 = vpop.f32.mrb[96].mxu0  ;;  %v6427_v31 = vpop.f32.mrb[96].mxu1 }
 0x1bb   : > { %v6364_v39 = vpop.f32.mrb[97].mxu0  ;;  %v6428_v2 = vpop.f32.mrb[97].mxu1 }
 0x1bc   : > { %v6365_v48 = vadd.f32 %v6364_v39, %v6363_v23  ;;  %v6429_v1 = vadd.f32 %v6428_v2, %v6427_v31  ;;  %v6366_v61 = vpop.f32.mrb[98].mxu0  ;;  %v6430_v0 = vpop.f32.mrb[98].mxu1  ;;  %v7754_v23 = vld [vmem:[%s9871_s1 + $0x4c8] sm:$0xff]  }
 0x1bd   : > { %v6367_v49 = vpop.f32.mrb[99].mxu0  ;;  %v6431_v8 = vpop.f32.mrb[99].mxu1 }
 0x1be   : > { %v8969_v32 = vadd.f32 %v6365_v48, %v8785_v34  ;;  %v8972_v29 = vadd.f32 %v6429_v1, %v8788_v45  ;;  %v6368_v27 = vadd.f32 %v6367_v49, %v6366_v61  ;;  %v6432_v33 = vadd.f32 %v6431_v8, %v6430_v0  ;;  %v7734_v45 = vld [vmem:[%s8044_s11 + $0x38] ss:$84 sps:$4 sm:$0xff]  }
 0x1bf   : > { %4586 = vmatmul.mubr.bf16.gmra.mrb[204].mxu1 %v7730_v17  ;;  %4683 = vmatmul.mubr.bf16.gmra.mrb[204].mxu0 %v7731_v38 }
 0x1c0   : > { %v8975_v37 = vadd.f32 %v6368_v27, %v8790_v22  ;;  %v8978_v25 = vadd.f32 %v6432_v33, %v8793_v30  ;;  %4690 = vmatprep.mubr.bf16.mxu0 %v7732_v47  ;;  %4787 = vmatprep.mubr.bf16.mxu1 %v7736_v46  ;;  %v7739_v22 = vld [vmem:[%s9871_s1 + $0x480] sm:$0xff]  }
 0x1c1   : > { %v7747_v47 = vld [vmem:[%s8044_s11 + $0xe0] ss:$84 sps:$4 sm:$0xff]   ;;  %v7748_v33 = vld [vmem:[%s8044_s11 + $0x6c4] ss:$84 sps:$4 sm:$0xff]  }
 0x1c2   : > { %v6369_v7 = vpop.f32.mrb[100].mxu0  ;;  %v6433_v34 = vpop.f32.mrb[100].mxu1 }
 0x1c3   : > { %v6370_v26 = vpop.f32.mrb[101].mxu0  ;;  %v6434_v18 = vpop.f32.mrb[101].mxu1 }
 0x1c4   : > { %v6371_v50 = vadd.f32 %v6370_v26, %v6369_v7  ;;  %v6435_v52 = vadd.f32 %v6434_v18, %v6433_v34  ;;  %v6372_v60 = vpop.f32.mrb[102].mxu0  ;;  %v6436_v56 = vpop.f32.mrb[102].mxu1  ;;  %v7750_v7 = vld [vmem:[%s8044_s11 + $0x18c] ss:$84 sps:$4 sm:$0xff]   ;;  %v7771_v18 = vld [vmem:[%s9871_s1 + $0x490] sm:$0xff]  }
 0x1c5   : > { %v6373_v30 = vpop.f32.mrb[103].mxu0  ;;  %v6437_v20 = vpop.f32.mrb[103].mxu1 }
 0x1c6   : > { %v8991_v31 = vadd.f32 %v6371_v50, %v8809_v11  ;;  %v8994_v39 = vadd.f32 %v6435_v52, %v8812_v40  ;;  %v6374_v2 = vadd.f32 %v6373_v30, %v6372_v60  ;;  %v6438_v17 = vadd.f32 %v6437_v20, %v6436_v56  ;;  %v7755_v11 = vld [vmem:[%s9871_s1 + $0x488] sm:$0xff]   ;;  %v7770_v40 = vld [vmem:[%s9871_s1 + $0x4d0] sm:$0xff]   ;;  %v7786_v60 = vld [vmem:[%s9871_s1 + $0x4d8] sm:$0xff]  }
 0x1c7   : > { %4691 = vmatmul.mubr.bf16.gmra.mrb[208].mxu0 %v7737_v43  ;;  %4788 = vmatmul.mubr.bf16.vlgmr.msra.gmra.mrb[208].mxu1 %v7734_v45 }
 0x1c8   : > { %v8997_v38 = vadd.f32 %v6374_v2, %v8817_v12  ;;  %v9000_v48 = vadd.f32 %v6438_v17, %v8820_v13  ;;  %7060 = vmatpush3.bf16.msra.mxu1 %v7739_v22  ;;  %4698 = vmatprep.mubr.bf16.mxu0 %v7742_v28  ;;  %v7746_v13 = vld [vmem:[%s8044_s11 + $0x618] ss:$84 sps:$4 sm:$0xff]  }
 0x1c9   : > { %4795 = vmatprep.mubr.bf16.mxu1 %v7744_v54  ;;  %7061 = vmatprep.subr.bf16.mxu1 %v7754_v23  ;;  %v7753_v54 = vld [vmem:[%s8044_s11 + $0x188] ss:$84 sps:$4 sm:$0xff]  }
 0x1ca   : > { %v6375_v1 = vpop.f32.mrb[104].mxu0  ;;  %v6439_v12 = vpop.f32.mrb[104].mxu1 }
 0x1cb   : > { %v6376_v61 = vpop.f32.mrb[105].mxu0  ;;  %v6440_v0 = vpop.f32.mrb[105].mxu1 }
 0x1cc   : > { %v6377_v46 = vadd.f32 %v6376_v61, %v6375_v1  ;;  %v6441_v49 = vadd.f32 %v6440_v0, %v6439_v12  ;;  %v6378_v8 = vpop.f32.mrb[106].mxu0  ;;  %v6442_v27 = vpop.f32.mrb[106].mxu1  ;;  %7062 = vmatpush3.bf16.msra.mxu1 %v7755_v11  ;;  %v7760_v1 = vld [vmem:[%s8044_s11 + $0x234] ss:$84 sps:$4 sm:$0xff]   ;;  %v7803_v0 = vld [vmem:[%s9871_s1 + $0x4a0] sm:$0xff]  }
 0x1cd   : > { %v6379_v34 = vpop.f32.mrb[107].mxu0  ;;  %v6443_v26 = vpop.f32.mrb[107].mxu1  ;;  %7063 = vmatprep.subr.bf16.mxu1 %v7770_v40  ;;  %v7758_v40 = vld [vmem:[%s8044_s11 + $0x76c] ss:$84 sps:$4 sm:$0xff]  }
 0x1ce   : > { %v9016_v45 = vadd.f32 %v6377_v46, %v8839_v4  ;;  %v9019_v43 = vadd.f32 %v6441_v49, %v8842_v57  ;;  %v6380_v50 = vadd.f32 %v6379_v34, %v6378_v8  ;;  %v6444_v52 = vadd.f32 %v6443_v26, %v6442_v27  ;;  %v7787_v4 = vld [vmem:[%s9871_s1 + $0x498] sm:$0xff]   ;;  %v7817_v8 = vld [vmem:[%s9871_s1 + $0x4e8] sm:$0xff]  }
 0x1cf   : > { %4699 = vmatmul.mubr.bf16.gmra.mrb[212].mxu0 %v7746_v13  ;;  %4796 = vmatmul.mubr.bf16.gmra.mrb[212].mxu1 %v7747_v47 }
 0x1d0   : > { %v9025_v56 = vadd.f32 %v6380_v50, %v8844_v3  ;;  %v9028_v22 = vadd.f32 %v6444_v52, %v8847_v44  ;;  %4706 = vmatprep.mubr.bf16.mxu0 %v7748_v33  ;;  %4803 = vmatprep.mubr.bf16.mxu1 %v7750_v7  ;;  %v7802_v3 = vld [vmem:[%s9871_s1 + $0x4e0] sm:$0xff]  }
 0x1d1   : > { %7064 = vmatpush3.bf16.msra.mxu1 %v7771_v18  ;;  %v7752_v44 = vld [vmem:[%s8044_s11 + $0x6c0] ss:$84 sps:$4 sm:$0xff]   ;;  %v7763_v18 = vld [vmem:[%s8044_s11 + $0x230] ss:$84 sps:$4 sm:$0xff]  }
 0x1d2   : > { %v6381_v57 = vpop.f32.mrb[108].mxu0  ;;  %v6445_v28 = vpop.f32.mrb[108].mxu1  ;;  %7065 = vmatprep.subr.bf16.mxu1 %v7786_v60 }
 0x1d3   : > { %v6382_v30 = vpop.f32.mrb[109].mxu0  ;;  %v6446_v20 = vpop.f32.mrb[109].mxu1 }
 0x1d4   : > { %v6383_v23 = vadd.f32 %v6382_v30, %v6381_v57  ;;  %v6447_v2 = vadd.f32 %v6446_v20, %v6445_v28  ;;  %v6384_v17 = vpop.f32.mrb[110].mxu0  ;;  %v6448_v11 = vpop.f32.mrb[110].mxu1  ;;  %v7764_v57 = vld [vmem:[%s8044_s11 + $0x814] ss:$84 sps:$4 sm:$0xff]   ;;  %v7766_v28 = vld [vmem:[%s8044_s11 + $0x2dc] ss:$84 sps:$4 sm:$0xff]  }
 0x1d5   : > { %v6385_v12 = vpop.f32.mrb[111].mxu0  ;;  %v6449_v61 = vpop.f32.mrb[111].mxu1  ;;  %7066 = vmatpush3.bf16.msra.mxu1 %v7787_v4  ;;  %v7833_v20 = vld [vmem:[%s9871_s1 + $0x4b0] sm:$0xff]  }
 0x1d6   : > { %v9044_v13 = vadd.f32 %v6383_v23, %v8866_v14  ;;  %v9047_v47 = vadd.f32 %v6447_v2, %v8869_v41  ;;  %v6386_v46 = vadd.f32 %v6385_v12, %v6384_v17  ;;  %v6450_v49 = vadd.f32 %v6449_v61, %v6448_v11  ;;  %7067 = vmatprep.subr.bf16.mxu1 %v7802_v3  ;;  %v7818_v41 = vld [vmem:[%s9871_s1 + $0x4a8] sm:$0xff]   ;;  %v7847_v17 = vld [vmem:[%s9871_s1 + $0x4f8] sm:$0xff]  }
 0x1d7   : > { %4707 = vmatmul.mubr.bf16.gmra.mrb[216].mxu0 %v7752_v44  ;;  %4804 = vmatmul.mubr.bf16.gmra.mrb[216].mxu1 %v7753_v54 }
 0x1d8   : > { %v9053_v27 = vadd.f32 %v6386_v46, %v8874_v6  ;;  %v9056_v14 = vadd.f32 %v6450_v49, %v8877_v35  ;;  %4714 = vmatprep.mubr.bf16.mxu0 %v7758_v40  ;;  %4811 = vmatprep.mubr.bf16.mxu1 %v7760_v1  ;;  %v7832_v6 = vld [vmem:[%s9871_s1 + $0x4f0] sm:$0xff]   ;;  %v7762_v35 = vld [vmem:[%s8044_s11 + $0x768] ss:$84 sps:$4 sm:$0xff]  }
 0x1d9   : > { %7068 = vmatpush3.bf16.msra.mxu1 %v7803_v0  ;;  %v7768_v0 = vld [vmem:[%s8044_s11 + $0x810] ss:$84 sps:$4 sm:$0xff]  }
 0x1da   : > { %v6451_v33 = vpop.f32.mrb[112].mxu1  ;;  %v6515_v7 = vpop.f32.mrb[112].mxu0  ;;  %7069 = vmatprep.subr.bf16.mxu1 %v7817_v8 }
 0x1db   : > { %v6452_v34 = vpop.f32.mrb[113].mxu1  ;;  %v6516_v26 = vpop.f32.mrb[113].mxu0 }
 0x1dc   : > { %v6453_v50 = vadd.f32 %v6452_v34, %v6451_v33  ;;  %v6517_v52 = vadd.f32 %v6516_v26, %v6515_v7  ;;  %v6454_v60 = vpop.f32.mrb[114].mxu1  ;;  %v6518_v4 = vpop.f32.mrb[114].mxu0  ;;  %v7776_v33 = vld [vmem:[%s8044_s11 + $0x384] ss:$84 sps:$4 sm:$0xff]  }
 0x1dd   : > { %v6455_v3 = vpop.f32.mrb[115].mxu1  ;;  %v6519_v30 = vpop.f32.mrb[115].mxu0  ;;  %7070 = vmatpush3.bf16.msra.mxu1 %v7818_v41  ;;  %v7774_v41 = vld [vmem:[%s8044_s11 + $0x8bc] ss:$84 sps:$4 sm:$0xff]  }
 0x1de   : > { %v9072_v44 = vadd.f32 %v6453_v50, %v8893_v24  ;;  %v9075_v54 = vadd.f32 %v6517_v52, %v8896_v55  ;;  %v6456_v23 = vadd.f32 %v6455_v3, %v6454_v60  ;;  %v6520_v2 = vadd.f32 %v6519_v30, %v6518_v4  ;;  %7071 = vmatprep.subr.bf16.mxu1 %v7832_v6  ;;  %v7848_v55 = vld [vmem:[%s9871_s1 + $0x4b8] sm:$0xff]  }
 0x1df   : > { %4715 = vmatmul.mubr.bf16.gmra.mrb[220].mxu0 %v7762_v35  ;;  %4812 = vmatmul.mubr.bf16.gmra.mrb[220].mxu1 %v7763_v18 }
 0x1e0   : > { %v9081_v11 = vadd.f32 %v6456_v23, %v8902_v16  ;;  %v9084_v24 = vadd.f32 %v6520_v2, %v8905_v63  ;;  %4722 = vmatprep.mubr.bf16.mxu0 %v7764_v57  ;;  %4819 = vmatprep.mubr.bf16.mxu1 %v7766_v28  ;;  %v7769_v16 = vld [vmem:[%s8044_s11 + $0x2d8] ss:$84 sps:$4 sm:$0xff]   ;;  %v7779_v28 = vld [vmem:[%s8044_s11 + $0x380] ss:$84 sps:$4 sm:$0xff]  }
 0x1e1   : > { %7072 = vmatpush3.bf16.msra.mxu1 %v7833_v20  ;;  %v7780_v2 = vld [vmem:[%s8044_s11 + $0x964] ss:$84 sps:$4 sm:$0xff]  }
 0x1e2   : > { %v6457_v40 = vpop.f32.mrb[116].mxu1  ;;  %v6521_v1 = vpop.f32.mrb[116].mxu0  ;;  %7073 = vmatprep.subr.bf16.mxu1 %v7847_v17  ;;  %v7782_v17 = vld [vmem:[%s8044_s11 + $0x42c] ss:$84 sps:$4 sm:$0xff]  }
 0x1e3   : > { %v6458_v12 = vpop.f32.mrb[117].mxu1  ;;  %v6522_v61 = vpop.f32.mrb[117].mxu0 }
 0x1e4   : > { %v6459_v46 = vadd.f32 %v6458_v12, %v6457_v40  ;;  %v6523_v49 = vadd.f32 %v6522_v61, %v6521_v1  ;;  %v6460_v63 = vpop.f32.mrb[118].mxu1  ;;  %v6524_v8 = vpop.f32.mrb[118].mxu0 }
 0x1e5   : > { %v6461_v7 = vpop.f32.mrb[119].mxu1  ;;  %v6525_v6 = vpop.f32.mrb[119].mxu0  ;;  %7074 = vmatpush3.bf16.msra.mxu1 %v7848_v55 }
 0x1e6   : > { %v9094_v34 = vadd.f32 %v6459_v46, %v8920_v36  ;;  %v9097_v26 = vadd.f32 %v6523_v49, %v8923_v53  ;;  %v6462_v35 = vadd.f32 %v6461_v7, %v6460_v63  ;;  %v6526_v18 = vadd.f32 %v6525_v6, %v6524_v8  ;;  %v7778_v53 = vld [vmem:[%s8044_s11 + $0x8b8] ss:$84 sps:$4 sm:$0xff]   ;;  %v7785_v63 = vld [vmem:[%s8044_s11 + $0x428] ss:$84 sps:$4 sm:$0xff]  }
 0x1e7   : > { %4723 = vmatmul.mubr.bf16.gmra.mrb[224].mxu0 %v7768_v0  ;;  %4820 = vmatmul.mubr.bf16.gmra.mrb[224].mxu1 %v7769_v16  ;;  %v7790_v6 = vld [vmem:[%s8044_s11 + $0xa0c] ss:$84 sps:$4 sm:$0xff]  }
 0x1e8   : > { %v9100_v50 = vadd.f32 %v6462_v35, %v8927_v58  ;;  %v9103_v52 = vadd.f32 %v6526_v18, %v8930_v21  ;;  %4730 = vmatprep.mubr.bf16.mxu0 %v7774_v41  ;;  %4827 = vmatprep.mubr.bf16.mxu1 %v7776_v33  ;;  %v7792_v35 = vld [vmem:[%s8044_s11 + $0x4d4] ss:$84 sps:$4 sm:$0xff]  }
 0x1ea   : > { %v6463_v60 = vpop.f32.mrb[120].mxu1  ;;  %v6527_v36 = vpop.f32.mrb[120].mxu0 }
 0x1eb   : > { %v6464_v4 = vpop.f32.mrb[121].mxu1  ;;  %v6528_v57 = vpop.f32.mrb[121].mxu0 }
 0x1ec   : > { %v6465_v3 = vadd.f32 %v6464_v4, %v6463_v60  ;;  %v6529_v30 = vadd.f32 %v6528_v57, %v6527_v36  ;;  %v6466_v20 = vpop.f32.mrb[122].mxu1  ;;  %v6530_v23 = vpop.f32.mrb[122].mxu0 }
 0x1ed   : > { %v6467_v55 = vpop.f32.mrb[123].mxu1  ;;  %v6531_v58 = vpop.f32.mrb[123].mxu0 }
 0x1ee   : > { %v9110_v21 = vadd.f32 %v6465_v3, %v8937_v5  ;;  %v9113_v40 = vadd.f32 %v6529_v30, %v8940_v15  ;;  %v6468_v1 = vadd.f32 %v6467_v55, %v6466_v20  ;;  %v6532_v12 = vadd.f32 %v6531_v58, %v6530_v23  ;;  %v7784_v15 = vld [vmem:[%s8044_s11 + $0x960] ss:$84 sps:$4 sm:$0xff]   ;;  %v7795_v20 = vld [vmem:[%s8044_s11 + $0x4d0] ss:$84 sps:$4 sm:$0xff]  }
 0x1ef   : > { %4731 = vmatmul.mubr.bf16.gmra.mrb[228].mxu0 %v7778_v53  ;;  %4828 = vmatmul.mubr.bf16.gmra.mrb[228].mxu1 %v7779_v28  ;;  %v7796_v58 = vld [vmem:[%s8044_s11 + $0x57c] ss:$84 sps:$4 sm:$0xff]  }
 0x1f0   : > { %v9116_v61 = vadd.f32 %v6468_v1, %v8943_v19  ;;  %v9119_v0 = vadd.f32 %v6532_v12, %v8946_v59  ;;  %4738 = vmatprep.mubr.bf16.mxu0 %v7780_v2  ;;  %4835 = vmatprep.mubr.bf16.mxu1 %v7782_v17  ;;  %v7800_v1 = vld [vmem:[%s8044_s11 + $0x44] ss:$84 sps:$4 sm:$0xff]  }
 0x1f2   : > { %v6469_v16 = vpop.f32.mrb[124].mxu1  ;;  %v6533_v5 = vpop.f32.mrb[124].mxu0 }
 0x1f3   : > { %v6470_v46 = vpop.f32.mrb[125].mxu1  ;;  %v6534_v49 = vpop.f32.mrb[125].mxu0 }
 0x1f4   : > { %v6471_v8 = vadd.f32 %v6470_v46, %v6469_v16  ;;  %v6535_v41 = vadd.f32 %v6534_v49, %v6533_v5  ;;  %v6472_v33 = vpop.f32.mrb[126].mxu1  ;;  %v6536_v7 = vpop.f32.mrb[126].mxu0 }
 0x1f5   : > { %v6473_v18 = vpop.f32.mrb[127].mxu1  ;;  %v6537_v19 = vpop.f32.mrb[127].mxu0 }
 0x1f6   : > { %v9126_v59 = vadd.f32 %v6471_v8, %v8953_v9  ;;  %v9129_v60 = vadd.f32 %v6535_v41, %v8956_v51  ;;  %v6474_v36 = vadd.f32 %v6473_v18, %v6472_v33  ;;  %v6538_v4 = vadd.f32 %v6537_v19, %v6536_v7  ;;  %v7794_v51 = vld [vmem:[%s8044_s11 + $0xa08] ss:$84 sps:$4 sm:$0xff]   ;;  %v7801_v33 = vld [vmem:[%s8044_s11 + $0x578] ss:$84 sps:$4 sm:$0xff]  }
 0x1f7   : > { %4739 = vmatmul.mubr.bf16.gmra.mrb[232].mxu0 %v7784_v15  ;;  %4836 = vmatmul.mubr.bf16.gmra.mrb[232].mxu1 %v7785_v63  ;;  %v7805_v19 = vld [vmem:[%s8044_s11 + $0x624] ss:$84 sps:$4 sm:$0xff]  }
 0x1f8   : > { %v9132_v57 = vadd.f32 %v6474_v36, %v8959_v62  ;;  %v9135_v53 = vadd.f32 %v6538_v4, %v8962_v42  ;;  %4746 = vmatprep.mubr.bf16.mxu0 %v7790_v6  ;;  %4843 = vmatprep.mubr.bf16.mxu1 %v7792_v35  ;;  %v7807_v4 = vld [vmem:[%s8044_s11 + $0xec] ss:$84 sps:$4 sm:$0xff]  }
 0x1fa   : > { %v6475_v28 = vpop.f32.mrb[128].mxu1  ;;  %v6539_v9 = vpop.f32.mrb[128].mxu0 }
 0x1fb   : > { %v6476_v3 = vpop.f32.mrb[129].mxu1  ;;  %v6540_v30 = vpop.f32.mrb[129].mxu0 }
 0x1fc   : > { %v6477_v23 = vadd.f32 %v6476_v3, %v6475_v28  ;;  %v6541_v2 = vadd.f32 %v6540_v30, %v6539_v9  ;;  %v6478_v17 = vpop.f32.mrb[130].mxu1  ;;  %v6542_v55 = vpop.f32.mrb[130].mxu0 }
 0x1fd   : > { %v6479_v12 = vpop.f32.mrb[131].mxu1  ;;  %v6543_v62 = vpop.f32.mrb[131].mxu0 }
 0x1fe   : > { %v9142_v42 = vadd.f32 %v6477_v23, %v8969_v32  ;;  %v9145_v16 = vadd.f32 %v6541_v2, %v8972_v29  ;;  %v6480_v5 = vadd.f32 %v6479_v12, %v6478_v17  ;;  %v6544_v46 = vadd.f32 %v6543_v62, %v6542_v55  ;;  %v7798_v29 = vld [vmem:[%s8044_s11 + $0x40] ss:$84 sps:$4 sm:$0xff]   ;;  %v7810_v55 = vld [vmem:[%s8044_s11 + $0xe8] ss:$84 sps:$4 sm:$0xff]  }
 0x1ff   : > { %4747 = vmatmul.mubr.bf16.gmra.mrb[236].mxu0 %v7794_v51  ;;  %4844 = vmatmul.mubr.bf16.gmra.mrb[236].mxu1 %v7795_v20  ;;  %v7811_v62 = vld [vmem:[%s8044_s11 + $0x6cc] ss:$84 sps:$4 sm:$0xff]  }
 0x200   : > { %v9148_v49 = vadd.f32 %v6480_v5, %v8975_v37  ;;  %v9151_v15 = vadd.f32 %v6544_v46, %v8978_v25  ;;  %4851 = vmatprep.mubr.bf16.mxu1 %v7796_v58  ;;  %4948 = vmatprep.mubr.bf16.mxu0 %v7800_v1  ;;  %v7819_v25 = vld [vmem:[%s9871_s1 + $0x508] sm:$0xff]  }
 0x202   : > { %v6481_v63 = vpop.f32.mrb[132].mxu1  ;;  %v6545_v32 = vpop.f32.mrb[132].mxu0 }
 0x203   : > { %v6482_v8 = vpop.f32.mrb[133].mxu1  ;;  %v6546_v41 = vpop.f32.mrb[133].mxu0 }
 0x204   : > { %v6483_v7 = vadd.f32 %v6482_v8, %v6481_v63  ;;  %v6547_v6 = vadd.f32 %v6546_v41, %v6545_v32  ;;  %v6484_v35 = vpop.f32.mrb[134].mxu1  ;;  %v6548_v18 = vpop.f32.mrb[134].mxu0 }
 0x205   : > { %v6485_v36 = vpop.f32.mrb[135].mxu1  ;;  %v6549_v37 = vpop.f32.mrb[135].mxu0 }
 0x206   : > { %v9161_v28 = vadd.f32 %v6483_v7, %v8991_v31  ;;  %v9164_v9 = vadd.f32 %v6547_v6, %v8994_v39  ;;  %v6486_v3 = vadd.f32 %v6485_v36, %v6484_v35  ;;  %v6550_v30 = vadd.f32 %v6549_v37, %v6548_v18  ;;  %v7834_v31 = vld [vmem:[%s9871_s1 + $0x510] sm:$0xff]   ;;  %v7862_v6 = vld [vmem:[%s9871_s1 + $0x520] sm:$0xff]  }
 0x207   : > { %4852 = vmatmul.mubr.bf16.gmra.mrb[240].mxu1 %v7801_v33  ;;  %4949 = vmatmul.mubr.bf16.vlgmr.msra.gmra.mrb[240].mxu0 %v7798_v29  ;;  %v7849_v29 = vld [vmem:[%s9871_s1 + $0x518] sm:$0xff]  }
 0x208   : > { %v9167_v51 = vadd.f32 %v6486_v3, %v8997_v38  ;;  %v9170_v20 = vadd.f32 %v6550_v30, %v9000_v48  ;;  %7196 = vmatpush3.bf16.msra.mxu0 %v8913_v10  ;;  %4859 = vmatprep.mubr.bf16.mxu1 %v7805_v19  ;;  %v7809_v38 = vld [vmem:[%s8044_s11 + $0x620] ss:$84 sps:$4 sm:$0xff]   ;;  %v7815_v19 = vld [vmem:[%s8044_s11 + $0x6c8] ss:$84 sps:$4 sm:$0xff]  }
 0x209   : > { %4956 = vmatprep.mubr.bf16.mxu0 %v7807_v4  ;;  %7197 = vmatprep.subr.bf16.mxu0 %v7819_v25  ;;  %v7813_v10 = vld [vmem:[%s8044_s11 + $0x194] ss:$84 sps:$4 sm:$0xff]   ;;  %v7822_v3 = vld [vmem:[%s8044_s11 + $0x23c] ss:$84 sps:$4 sm:$0xff]  }
 0x20a   : > { %v6487_v39 = vpop.f32.mrb[136].mxu1  ;;  %v6551_v23 = vpop.f32.mrb[136].mxu0 }
 0x20b   : > { %v6488_v2 = vpop.f32.mrb[137].mxu1  ;;  %v6552_v17 = vpop.f32.mrb[137].mxu0 }
 0x20c   : > { %v6489_v58 = vadd.f32 %v6488_v2, %v6487_v39  ;;  %v6553_v48 = vadd.f32 %v6552_v17, %v6551_v23  ;;  %v6490_v1 = vpop.f32.mrb[138].mxu1  ;;  %v6554_v12 = vpop.f32.mrb[138].mxu0  ;;  %7198 = vmatpush3.bf16.msra.mxu0 %v7819_v25  ;;  %v7820_v25 = vld [vmem:[%s8044_s11 + $0x774] ss:$84 sps:$4 sm:$0xff]  }
 0x20d   : > { %v6491_v5 = vpop.f32.mrb[139].mxu1  ;;  %v6555_v46 = vpop.f32.mrb[139].mxu0  ;;  %7199 = vmatprep.subr.bf16.mxu0 %v7834_v31 }
 0x20e   : > { %v9181_v63 = vadd.f32 %v6489_v58, %v9016_v45  ;;  %v9184_v32 = vadd.f32 %v6553_v48, %v9019_v43  ;;  %v6492_v8 = vadd.f32 %v6491_v5, %v6490_v1  ;;  %v6556_v41 = vadd.f32 %v6555_v46, %v6554_v12  ;;  %v7888_v48 = vld [vmem:[%s9871_s1 + $0x530] sm:$0xff]  }
 0x20f   : > { %4860 = vmatmul.mubr.bf16.gmra.mrb[244].mxu1 %v7809_v38  ;;  %4957 = vmatmul.mubr.bf16.gmra.mrb[244].mxu0 %v7810_v55  ;;  %v7875_v38 = vld [vmem:[%s9871_s1 + $0x528] sm:$0xff]  }
 0x210   : > { %v9190_v33 = vadd.f32 %v6492_v8, %v9025_v56  ;;  %v9193_v7 = vadd.f32 %v6556_v41, %v9028_v22  ;;  %4867 = vmatprep.mubr.bf16.mxu1 %v7811_v62  ;;  %4964 = vmatprep.mubr.bf16.mxu0 %v7813_v10  ;;  %v7816_v56 = vld [vmem:[%s8044_s11 + $0x190] ss:$84 sps:$4 sm:$0xff]  }
 0x211   : > { %7200 = vmatpush3.bf16.msra.mxu0 %v7834_v31  ;;  %v7824_v62 = vld [vmem:[%s8044_s11 + $0x770] ss:$84 sps:$4 sm:$0xff]  }
 0x212   : > { %v6493_v45 = vpop.f32.mrb[140].mxu1  ;;  %v6557_v43 = vpop.f32.mrb[140].mxu0  ;;  %7201 = vmatprep.subr.bf16.mxu0 %v7849_v29  ;;  %v7828_v8 = vld [vmem:[%s8044_s11 + $0x81c] ss:$84 sps:$4 sm:$0xff]   ;;  %v7831_v41 = vld [vmem:[%s8044_s11 + $0x2e4] ss:$84 sps:$4 sm:$0xff]  }
 0x213   : > { %v6494_v35 = vpop.f32.mrb[141].mxu1  ;;  %v6558_v18 = vpop.f32.mrb[141].mxu0 }
 0x214   : > { %v6495_v36 = vadd.f32 %v6494_v35, %v6493_v45  ;;  %v6559_v37 = vadd.f32 %v6558_v18, %v6557_v43  ;;  %v6496_v22 = vpop.f32.mrb[142].mxu1  ;;  %v6560_v4 = vpop.f32.mrb[142].mxu0 }
 0x215   : > { %v6497_v30 = vpop.f32.mrb[143].mxu1  ;;  %v6561_v39 = vpop.f32.mrb[143].mxu0  ;;  %7202 = vmatpush3.bf16.msra.mxu0 %v7849_v29 }
 0x216   : > { %v9203_v31 = vadd.f32 %v6495_v36, %v9044_v13  ;;  %v9206_v23 = vadd.f32 %v6559_v37, %v9047_v47  ;;  %v6498_v2 = vadd.f32 %v6497_v30, %v6496_v22  ;;  %v6562_v17 = vadd.f32 %v6561_v39, %v6560_v4  ;;  %7203 = vmatprep.subr.bf16.mxu0 %v7862_v6  ;;  %v7826_v4 = vld [vmem:[%s8044_s11 + $0x818] ss:$84 sps:$4 sm:$0xff]  }
 0x217   : > { %4868 = vmatmul.mubr.bf16.gmra.mrb[248].mxu1 %v7815_v19  ;;  %4965 = vmatmul.mubr.bf16.gmra.mrb[248].mxu0 %v7816_v56  ;;  %v7901_v19 = vld [vmem:[%s9871_s1 + $0x538] sm:$0xff]  }
 0x218   : > { %v9212_v55 = vadd.f32 %v6498_v2, %v9053_v27  ;;  %v9215_v13 = vadd.f32 %v6562_v17, %v9056_v14  ;;  %4875 = vmatprep.mubr.bf16.mxu1 %v7820_v25  ;;  %4972 = vmatprep.mubr.bf16.mxu0 %v7822_v3  ;;  %v7825_v27 = vld [vmem:[%s8044_s11 + $0x238] ss:$84 sps:$4 sm:$0xff]   ;;  %v7829_v25 = vld [vmem:[%s8044_s11 + $0x2e0] ss:$84 sps:$4 sm:$0xff]  }
 0x219   : > { %7204 = vmatpush3.bf16.msra.mxu0 %v7862_v6  ;;  %v7837_v2 = vld [vmem:[%s8044_s11 + $0x8c4] ss:$84 sps:$4 sm:$0xff]   ;;  %v7840_v17 = vld [vmem:[%s8044_s11 + $0x38c] ss:$84 sps:$4 sm:$0xff]  }
 0x21a   : > { %v6563_v47 = vpop.f32.mrb[144].mxu0  ;;  %v6627_v58 = vpop.f32.mrb[144].mxu1  ;;  %7205 = vmatprep.subr.bf16.mxu0 %v7875_v38 }
 0x21b   : > { %v6564_v1 = vpop.f32.mrb[145].mxu0  ;;  %v6628_v12 = vpop.f32.mrb[145].mxu1 }
 0x21c   : > { %v6565_v10 = vadd.f32 %v6564_v1, %v6563_v47  ;;  %v6629_v5 = vadd.f32 %v6628_v12, %v6627_v58  ;;  %v6566_v14 = vpop.f32.mrb[146].mxu0  ;;  %v6630_v46 = vpop.f32.mrb[146].mxu1 }
 0x21d   : > { %v6567_v29 = vpop.f32.mrb[147].mxu0  ;;  %v6631_v45 = vpop.f32.mrb[147].mxu1  ;;  %7206 = vmatpush3.bf16.msra.mxu0 %v7875_v38 }
 0x21e   : > { %v9225_v43 = vadd.f32 %v6565_v10, %v9072_v44  ;;  %v9228_v6 = vadd.f32 %v6629_v5, %v9075_v54  ;;  %v6568_v35 = vadd.f32 %v6567_v29, %v6566_v14  ;;  %v6632_v18 = vadd.f32 %v6631_v45, %v6630_v46  ;;  %7207 = vmatprep.subr.bf16.mxu0 %v7888_v48  ;;  %v7838_v14 = vld [vmem:[%s8044_s11 + $0x388] ss:$84 sps:$4 sm:$0xff]   ;;  %v7843_v45 = vld [vmem:[%s8044_s11 + $0x96c] ss:$84 sps:$4 sm:$0xff]  }
 0x21f   : > { %4876 = vmatmul.mubr.bf16.gmra.mrb[252].mxu1 %v7824_v62  ;;  %4973 = vmatmul.mubr.bf16.gmra.mrb[252].mxu0 %v7825_v27 }
 0x220   : > { %v9234_v56 = vadd.f32 %v6568_v35, %v9081_v11  ;;  %v9237_v44 = vadd.f32 %v6632_v18, %v9084_v24  ;;  %4883 = vmatprep.mubr.bf16.mxu1 %v7828_v8  ;;  %4980 = vmatprep.mubr.bf16.mxu0 %v7831_v41  ;;  %v7846_v35 = vld [vmem:[%s8044_s11 + $0x434] ss:$84 sps:$4 sm:$0xff]  }
 0x221   : > { %7208 = vmatpush3.bf16.msra.mxu0 %v7888_v48 }
 0x222   : > { %v6569_v54 = vpop.f32.mrb[148].mxu0  ;;  %v6633_v36 = vpop.f32.mrb[148].mxu1  ;;  %7209 = vmatprep.subr.bf16.mxu0 %v7901_v19 }
 0x223   : > { %v6570_v37 = vpop.f32.mrb[149].mxu0  ;;  %v6634_v22 = vpop.f32.mrb[149].mxu1 }
 0x224   : > { %v6571_v3 = vadd.f32 %v6570_v37, %v6569_v54  ;;  %v6635_v30 = vadd.f32 %v6634_v22, %v6633_v36  ;;  %v6572_v39 = vpop.f32.mrb[150].mxu0  ;;  %v6636_v11 = vpop.f32.mrb[150].mxu1 }
 0x225   : > { %v6573_v38 = vpop.f32.mrb[151].mxu0  ;;  %v6637_v24 = vpop.f32.mrb[151].mxu1  ;;  %7210 = vmatpush3.bf16.msra.mxu0 %v7901_v19 }
 0x226   : > { %v9244_v47 = vadd.f32 %v6571_v3, %v9094_v34  ;;  %v9247_v58 = vadd.f32 %v6635_v30, %v9097_v26  ;;  %v6574_v48 = vadd.f32 %v6573_v38, %v6572_v39  ;;  %v6638_v1 = vadd.f32 %v6637_v24, %v6636_v11  ;;  %v7835_v26 = vld [vmem:[%s8044_s11 + $0x8c0] ss:$84 sps:$4 sm:$0xff]   ;;  %v7844_v30 = vld [vmem:[%s8044_s11 + $0x430] ss:$84 sps:$4 sm:$0xff]  }
 0x227   : > { %4884 = vmatmul.mubr.bf16.gmra.mrb[0].mxu1 %v7826_v4  ;;  %4981 = vmatmul.mubr.bf16.gmra.mrb[0].mxu0 %v7829_v25  ;;  %v7852_v38 = vld [vmem:[%s8044_s11 + $0xa14] ss:$84 sps:$4 sm:$0xff]   ;;  %v7855_v24 = vld [vmem:[%s8044_s11 + $0x4dc] ss:$84 sps:$4 sm:$0xff]  }
 0x228   : > { %v9250_v12 = vadd.f32 %v6574_v48, %v9100_v50  ;;  %v9253_v62 = vadd.f32 %v6638_v1, %v9103_v52  ;;  %4891 = vmatprep.mubr.bf16.mxu1 %v7837_v2  ;;  %4988 = vmatprep.mubr.bf16.mxu0 %v7840_v17 }
 0x22a   : > { %v6575_v27 = vpop.f32.mrb[152].mxu0  ;;  %v6639_v34 = vpop.f32.mrb[152].mxu1 }
 0x22b   : > { %v6576_v10 = vpop.f32.mrb[153].mxu0  ;;  %v6640_v5 = vpop.f32.mrb[153].mxu1 }
 0x22c   : > { %v6577_v46 = vadd.f32 %v6576_v10, %v6575_v27  ;;  %v6641_v8 = vadd.f32 %v6640_v5, %v6639_v34  ;;  %v6578_v41 = vpop.f32.mrb[154].mxu0  ;;  %v6642_v29 = vpop.f32.mrb[154].mxu1 }
 0x22d   : > { %v6579_v18 = vpop.f32.mrb[155].mxu0  ;;  %v6643_v50 = vpop.f32.mrb[155].mxu1 }
 0x22e   : > { %v9260_v52 = vadd.f32 %v6577_v46, %v9110_v21  ;;  %v9263_v19 = vadd.f32 %v6641_v8, %v9113_v40  ;;  %v6580_v54 = vadd.f32 %v6579_v18, %v6578_v41  ;;  %v6644_v36 = vadd.f32 %v6643_v50, %v6642_v29  ;;  %v7841_v40 = vld [vmem:[%s8044_s11 + $0x968] ss:$84 sps:$4 sm:$0xff]   ;;  %v7853_v8 = vld [vmem:[%s8044_s11 + $0x4d8] ss:$84 sps:$4 sm:$0xff]  }
 0x22f   : > { %4892 = vmatmul.mubr.bf16.gmra.mrb[4].mxu1 %v7835_v26  ;;  %4989 = vmatmul.mubr.bf16.gmra.mrb[4].mxu0 %v7838_v14  ;;  %v7858_v18 = vld [vmem:[%s8044_s11 + $0x584] ss:$84 sps:$4 sm:$0xff]   ;;  %v7861_v50 = vld [vmem:[%s8044_s11 + $0x4c] ss:$84 sps:$4 sm:$0xff]  }
 0x230   : > { %v9266_v37 = vadd.f32 %v6580_v54, %v9116_v61  ;;  %v9269_v22 = vadd.f32 %v6644_v36, %v9119_v0  ;;  %4899 = vmatprep.mubr.bf16.mxu1 %v7843_v45  ;;  %4996 = vmatprep.mubr.bf16.mxu0 %v7846_v35 }
 0x232   : > { %v6581_v4 = vpop.f32.mrb[156].mxu0  ;;  %v6645_v21 = vpop.f32.mrb[156].mxu1 }
 0x233   : > { %v6582_v25 = vpop.f32.mrb[157].mxu0  ;;  %v6646_v3 = vpop.f32.mrb[157].mxu1 }
 0x234   : > { %v6583_v39 = vadd.f32 %v6582_v25, %v6581_v4  ;;  %v6647_v11 = vadd.f32 %v6646_v3, %v6645_v21  ;;  %v6584_v2 = vpop.f32.mrb[158].mxu0  ;;  %v6648_v17 = vpop.f32.mrb[158].mxu1 }
 0x235   : > { %v6585_v48 = vpop.f32.mrb[159].mxu0  ;;  %v6649_v61 = vpop.f32.mrb[159].mxu1 }
 0x236   : > { %v9276_v0 = vadd.f32 %v6583_v39, %v9126_v59  ;;  %v9279_v1 = vadd.f32 %v6647_v11, %v9129_v60  ;;  %v6586_v27 = vadd.f32 %v6585_v48, %v6584_v2  ;;  %v6650_v34 = vadd.f32 %v6649_v61, %v6648_v17  ;;  %v7850_v60 = vld [vmem:[%s8044_s11 + $0xa10] ss:$84 sps:$4 sm:$0xff]   ;;  %v7859_v11 = vld [vmem:[%s8044_s11 + $0x48] ss:$84 sps:$4 sm:$0xff]   ;;  %v7865_v48 = vld [vmem:[%s8044_s11 + $0x62c] ss:$84 sps:$4 sm:$0xff]  }
 0x237   : > { %4900 = vmatmul.mubr.bf16.gmra.mrb[8].mxu1 %v7841_v40  ;;  %4997 = vmatmul.mubr.bf16.gmra.mrb[8].mxu0 %v7844_v30  ;;  %v7868_v61 = vld [vmem:[%s8044_s11 + $0xf4] ss:$84 sps:$4 sm:$0xff]  }
 0x238   : > { %v9282_v10 = vadd.f32 %v6586_v27, %v9132_v57  ;;  %v9285_v5 = vadd.f32 %v6650_v34, %v9135_v53  ;;  %4907 = vmatprep.mubr.bf16.mxu1 %v7852_v38  ;;  %5004 = vmatprep.mubr.bf16.mxu0 %v7855_v24 }
 0x23a   : > { %v6587_v26 = vpop.f32.mrb[160].mxu0  ;;  %v6651_v59 = vpop.f32.mrb[160].mxu1 }
 0x23b   : > { %v6588_v14 = vpop.f32.mrb[161].mxu0  ;;  %v6652_v46 = vpop.f32.mrb[161].mxu1 }
 0x23c   : > { %v6589_v41 = vadd.f32 %v6588_v14, %v6587_v26  ;;  %v6653_v29 = vadd.f32 %v6652_v46, %v6651_v59  ;;  %v6590_v45 = vpop.f32.mrb[162].mxu0  ;;  %v6654_v35 = vpop.f32.mrb[162].mxu1 }
 0x23d   : > { %v6591_v54 = vpop.f32.mrb[163].mxu0  ;;  %v6655_v57 = vpop.f32.mrb[163].mxu1 }
 0x23e   : > { %v9292_v53 = vadd.f32 %v6589_v41, %v9142_v42  ;;  %v9295_v36 = vadd.f32 %v6653_v29, %v9145_v16  ;;  %v6592_v4 = vadd.f32 %v6591_v54, %v6590_v45  ;;  %v6656_v21 = vadd.f32 %v6655_v57, %v6654_v35  ;;  %v7856_v16 = vld [vmem:[%s8044_s11 + $0x580] ss:$84 sps:$4 sm:$0xff]   ;;  %v7866_v29 = vld [vmem:[%s8044_s11 + $0xf0] ss:$84 sps:$4 sm:$0xff]  }
 0x23f   : > { %4908 = vmatmul.mubr.bf16.gmra.mrb[12].mxu1 %v7850_v60  ;;  %5005 = vmatmul.mubr.bf16.gmra.mrb[12].mxu0 %v7853_v8  ;;  %v7871_v54 = vld [vmem:[%s8044_s11 + $0x6d4] ss:$84 sps:$4 sm:$0xff]   ;;  %v7874_v57 = vld [vmem:[%s8044_s11 + $0x19c] ss:$84 sps:$4 sm:$0xff]  }
 0x240   : > { %v9298_v25 = vadd.f32 %v6592_v4, %v9148_v49  ;;  %v9301_v3 = vadd.f32 %v6656_v21, %v9151_v15  ;;  %5012 = vmatprep.mubr.bf16.mxu0 %v7858_v18  ;;  %5109 = vmatprep.mubr.bf16.mxu1 %v7861_v50 }
 0x242   : > { %v6593_v40 = vpop.f32.mrb[164].mxu0  ;;  %v6657_v42 = vpop.f32.mrb[164].mxu1 }
 0x243   : > { %v6594_v30 = vpop.f32.mrb[165].mxu0  ;;  %v6658_v39 = vpop.f32.mrb[165].mxu1 }
 0x244   : > { %v6595_v2 = vadd.f32 %v6594_v30, %v6593_v40  ;;  %v6659_v17 = vadd.f32 %v6658_v39, %v6657_v42  ;;  %v6596_v38 = vpop.f32.mrb[166].mxu0  ;;  %v6660_v24 = vpop.f32.mrb[166].mxu1 }
 0x245   : > { %v6597_v27 = vpop.f32.mrb[167].mxu0  ;;  %v6661_v49 = vpop.f32.mrb[167].mxu1 }
 0x246   : > { %v9308_v15 = vadd.f32 %v6595_v2, %v9161_v28  ;;  %v9311_v34 = vadd.f32 %v6659_v17, %v9164_v9  ;;  %v6598_v26 = vadd.f32 %v6597_v27, %v6596_v38  ;;  %v6662_v59 = vadd.f32 %v6661_v49, %v6660_v24  ;;  %v7863_v9 = vld [vmem:[%s8044_s11 + $0x628] ss:$84 sps:$4 sm:$0xff]   ;;  %v7872_v17 = vld [vmem:[%s8044_s11 + $0x198] ss:$84 sps:$4 sm:$0xff]  }
 0x247   : > { %5013 = vmatmul.mubr.bf16.gmra.mrb[16].mxu0 %v7856_v16  ;;  %5110 = vmatmul.mubr.bf16.vlgmr.msra.gmra.mrb[16].mxu1 %v7859_v11  ;;  %v7878_v27 = vld [vmem:[%s8044_s11 + $0x77c] ss:$84 sps:$4 sm:$0xff]   ;;  %v7881_v49 = vld [vmem:[%s8044_s11 + $0x244] ss:$84 sps:$4 sm:$0xff]  }
 0x248   : > { %v9314_v14 = vadd.f32 %v6598_v26, %v9167_v51  ;;  %v9317_v46 = vadd.f32 %v6662_v59, %v9170_v20  ;;  %5020 = vmatprep.mubr.bf16.mxu0 %v7865_v48  ;;  %5117 = vmatprep.mubr.bf16.mxu1 %v7868_v61 }
 0x24a   : > { %v6599_v60 = vpop.f32.mrb[168].mxu0  ;;  %v6663_v28 = vpop.f32.mrb[168].mxu1 }
 0x24b   : > { %v6600_v8 = vpop.f32.mrb[169].mxu0  ;;  %v6664_v41 = vpop.f32.mrb[169].mxu1 }
 0x24c   : > { %v6601_v45 = vadd.f32 %v6600_v8, %v6599_v60  ;;  %v6665_v35 = vadd.f32 %v6664_v41, %v6663_v28  ;;  %v6602_v18 = vpop.f32.mrb[170].mxu0  ;;  %v6666_v50 = vpop.f32.mrb[170].mxu1 }
 0x24d   : > { %v6603_v4 = vpop.f32.mrb[171].mxu0  ;;  %v6667_v51 = vpop.f32.mrb[171].mxu1 }
 0x24e   : > { %v9324_v20 = vadd.f32 %v6601_v45, %v9181_v63  ;;  %v9327_v21 = vadd.f32 %v6665_v35, %v9184_v32  ;;  %v6604_v40 = vadd.f32 %v6603_v4, %v6602_v18  ;;  %v6668_v42 = vadd.f32 %v6667_v51, %v6666_v50  ;;  %v7869_v32 = vld [vmem:[%s8044_s11 + $0x6d0] ss:$84 sps:$4 sm:$0xff]   ;;  %v7879_v35 = vld [vmem:[%s8044_s11 + $0x240] ss:$84 sps:$4 sm:$0xff]  }
 0x24f   : > { %5021 = vmatmul.mubr.bf16.gmra.mrb[20].mxu0 %v7863_v9  ;;  %5118 = vmatmul.mubr.bf16.gmra.mrb[20].mxu1 %v7866_v29  ;;  %v7884_v4 = vld [vmem:[%s8044_s11 + $0x824] ss:$84 sps:$4 sm:$0xff]   ;;  %v7887_v51 = vld [vmem:[%s8044_s11 + $0x2ec] ss:$84 sps:$4 sm:$0xff]  }
 0x250   : > { %v9330_v30 = vadd.f32 %v6604_v40, %v9190_v33  ;;  %v9333_v39 = vadd.f32 %v6668_v42, %v9193_v7  ;;  %5028 = vmatprep.mubr.bf16.mxu0 %v7871_v54  ;;  %5125 = vmatprep.mubr.bf16.mxu1 %v7874_v57 }
 0x252   : > { %v6605_v16 = vpop.f32.mrb[172].mxu0  ;;  %v6669_v63 = vpop.f32.mrb[172].mxu1 }
 0x253   : > { %v6606_v11 = vpop.f32.mrb[173].mxu0  ;;  %v6670_v2 = vpop.f32.mrb[173].mxu1 }
 0x254   : > { %v6607_v38 = vadd.f32 %v6606_v11, %v6605_v16  ;;  %v6671_v24 = vadd.f32 %v6670_v2, %v6669_v63  ;;  %v6608_v48 = vpop.f32.mrb[174].mxu0  ;;  %v6672_v61 = vpop.f32.mrb[174].mxu1 }
 0x255   : > { %v6609_v26 = vpop.f32.mrb[175].mxu0  ;;  %v6673_v33 = vpop.f32.mrb[175].mxu1 }
 0x256   : > { %v9340_v7 = vadd.f32 %v6607_v38, %v9203_v31  ;;  %v9343_v59 = vadd.f32 %v6671_v24, %v9206_v23  ;;  %v6610_v60 = vadd.f32 %v6609_v26, %v6608_v48  ;;  %v6674_v28 = vadd.f32 %v6673_v33, %v6672_v61  ;;  %v7876_v23 = vld [vmem:[%s8044_s11 + $0x778] ss:$84 sps:$4 sm:$0xff]   ;;  %v7885_v24 = vld [vmem:[%s8044_s11 + $0x2e8] ss:$84 sps:$4 sm:$0xff]  }
 0x257   : > { %5029 = vmatmul.mubr.bf16.gmra.mrb[24].mxu0 %v7869_v32  ;;  %5126 = vmatmul.mubr.bf16.gmra.mrb[24].mxu1 %v7872_v17  ;;  %v7891_v26 = vld [vmem:[%s8044_s11 + $0x8cc] ss:$84 sps:$4 sm:$0xff]   ;;  %v7894_v33 = vld [vmem:[%s8044_s11 + $0x394] ss:$84 sps:$4 sm:$0xff]  }
 0x258   : > { %v9346_v8 = vadd.f32 %v6610_v60, %v9212_v55  ;;  %v9349_v41 = vadd.f32 %v6674_v28, %v9215_v13  ;;  %5036 = vmatprep.mubr.bf16.mxu0 %v7878_v27  ;;  %5133 = vmatprep.mubr.bf16.mxu1 %v7881_v49 }
 0x25a   : > { %v6675_v9 = vpop.f32.mrb[176].mxu1  ;;  %v6739_v31 = vpop.f32.mrb[176].mxu0 }
 0x25b   : > { %v6676_v29 = vpop.f32.mrb[177].mxu1  ;;  %v6740_v45 = vpop.f32.mrb[177].mxu0 }
 0x25c   : > { %v6677_v18 = vadd.f32 %v6676_v29, %v6675_v9  ;;  %v6741_v50 = vadd.f32 %v6740_v45, %v6739_v31  ;;  %v6678_v54 = vpop.f32.mrb[178].mxu1  ;;  %v6742_v57 = vpop.f32.mrb[178].mxu0 }
 0x25d   : > { %v6679_v40 = vpop.f32.mrb[179].mxu1  ;;  %v6743_v55 = vpop.f32.mrb[179].mxu0 }
 0x25e   : > { %v9356_v13 = vadd.f32 %v6677_v18, %v9225_v43  ;;  %v9359_v42 = vadd.f32 %v6741_v50, %v9228_v6  ;;  %v6680_v16 = vadd.f32 %v6679_v40, %v6678_v54  ;;  %v6744_v63 = vadd.f32 %v6743_v55, %v6742_v57  ;;  %v7882_v6 = vld [vmem:[%s8044_s11 + $0x820] ss:$84 sps:$4 sm:$0xff]   ;;  %v7892_v50 = vld [vmem:[%s8044_s11 + $0x390] ss:$84 sps:$4 sm:$0xff]  }
 0x25f   : > { %5037 = vmatmul.mubr.bf16.gmra.mrb[28].mxu0 %v7876_v23  ;;  %5134 = vmatmul.mubr.bf16.gmra.mrb[28].mxu1 %v7879_v35  ;;  %v7897_v40 = vld [vmem:[%s8044_s11 + $0x974] ss:$84 sps:$4 sm:$0xff]   ;;  %v7900_v55 = vld [vmem:[%s8044_s11 + $0x43c] ss:$84 sps:$4 sm:$0xff]  }
 0x260   : > { %v9362_v11 = vadd.f32 %v6680_v16, %v9234_v56  ;;  %v9365_v2 = vadd.f32 %v6744_v63, %v9237_v44  ;;  %5044 = vmatprep.mubr.bf16.mxu0 %v7884_v4  ;;  %5141 = vmatprep.mubr.bf16.mxu1 %v7887_v51 }
 0x262   : > { %v6681_v32 = vpop.f32.mrb[180].mxu1  ;;  %v6745_v43 = vpop.f32.mrb[180].mxu0 }
 0x263   : > { %v6682_v17 = vpop.f32.mrb[181].mxu1  ;;  %v6746_v38 = vpop.f32.mrb[181].mxu0 }
 0x264   : > { %v6683_v48 = vadd.f32 %v6682_v17, %v6681_v32  ;;  %v6747_v61 = vadd.f32 %v6746_v38, %v6745_v43  ;;  %v6684_v27 = vpop.f32.mrb[182].mxu1  ;;  %v6748_v49 = vpop.f32.mrb[182].mxu0 }
 0x265   : > { %v6685_v60 = vpop.f32.mrb[183].mxu1  ;;  %v6749_v56 = vpop.f32.mrb[183].mxu0 }
 0x266   : > { %v9372_v44 = vadd.f32 %v6683_v48, %v9244_v47  ;;  %v9375_v28 = vadd.f32 %v6747_v61, %v9247_v58  ;;  %v6686_v9 = vadd.f32 %v6685_v60, %v6684_v27  ;;  %v6750_v31 = vadd.f32 %v6749_v56, %v6748_v49  ;;  %v7889_v58 = vld [vmem:[%s8044_s11 + $0x8c8] ss:$84 sps:$4 sm:$0xff]   ;;  %v7898_v61 = vld [vmem:[%s8044_s11 + $0x438] ss:$84 sps:$4 sm:$0xff]  }
 0x267   : > { %5045 = vmatmul.mubr.bf16.gmra.mrb[32].mxu0 %v7882_v6  ;;  %5142 = vmatmul.mubr.bf16.gmra.mrb[32].mxu1 %v7885_v24  ;;  %v7904_v60 = vld [vmem:[%s8044_s11 + $0xa1c] ss:$84 sps:$4 sm:$0xff]   ;;  %v7907_v56 = vld [vmem:[%s8044_s11 + $0x4e4] ss:$84 sps:$4 sm:$0xff]  }
 0x268   : > { %v9378_v29 = vadd.f32 %v6686_v9, %v9250_v12  ;;  %v9381_v45 = vadd.f32 %v6750_v31, %v9253_v62  ;;  %5052 = vmatprep.mubr.bf16.mxu0 %v7891_v26  ;;  %5149 = vmatprep.mubr.bf16.mxu1 %v7894_v33 }
 0x26a   : > { %v6687_v23 = vpop.f32.mrb[184].mxu1  ;;  %v6751_v47 = vpop.f32.mrb[184].mxu0 }
 0x26b   : > { %v6688_v35 = vpop.f32.mrb[185].mxu1  ;;  %v6752_v18 = vpop.f32.mrb[185].mxu0 }
 0x26c   : > { %v6689_v54 = vadd.f32 %v6688_v35, %v6687_v23  ;;  %v6753_v57 = vadd.f32 %v6752_v18, %v6751_v47  ;;  %v6690_v4 = vpop.f32.mrb[186].mxu1  ;;  %v6754_v51 = vpop.f32.mrb[186].mxu0 }
 0x26d   : > { %v6691_v16 = vpop.f32.mrb[187].mxu1  ;;  %v6755_v12 = vpop.f32.mrb[187].mxu0 }
 0x26e   : > { %v9388_v62 = vadd.f32 %v6689_v54, %v9260_v52  ;;  %v9391_v63 = vadd.f32 %v6753_v57, %v9263_v19  ;;  %v6692_v32 = vadd.f32 %v6691_v16, %v6690_v4  ;;  %v6756_v43 = vadd.f32 %v6755_v12, %v6754_v51  ;;  %v7895_v19 = vld [vmem:[%s8044_s11 + $0x970] ss:$84 sps:$4 sm:$0xff]   ;;  %v7905_v57 = vld [vmem:[%s8044_s11 + $0x4e0] ss:$84 sps:$4 sm:$0xff]  }
 0x26f   : > { %5053 = vmatmul.mubr.bf16.gmra.mrb[36].mxu0 %v7889_v58  ;;  %5150 = vmatmul.mubr.bf16.gmra.mrb[36].mxu1 %v7892_v50  ;;  %v7910_v16 = vld [vmem:[%s8044_s11 + $0x58c] ss:$84 sps:$4 sm:$0xff]   ;;  %v7911_v12 = vld [vmem:[%s8044_s11 + $0x50] ss:$84 sps:$4 sm:$0xff]  }
 0x270   : > { %v9394_v17 = vadd.f32 %v6692_v32, %v9266_v37  ;;  %v9397_v38 = vadd.f32 %v6756_v43, %v9269_v22  ;;  %5060 = vmatprep.mubr.bf16.mxu0 %v7897_v40  ;;  %5157 = vmatprep.mubr.bf16.mxu1 %v7900_v55 }
 0x272   : > { %v6693_v6 = vpop.f32.mrb[188].mxu1  ;;  %v6757_v52 = vpop.f32.mrb[188].mxu0 }
 0x273   : > { %v6694_v24 = vpop.f32.mrb[189].mxu1  ;;  %v6758_v48 = vpop.f32.mrb[189].mxu0 }
 0x274   : > { %v6695_v27 = vadd.f32 %v6694_v24, %v6693_v6  ;;  %v6759_v49 = vadd.f32 %v6758_v48, %v6757_v52  ;;  %v6696_v26 = vpop.f32.mrb[190].mxu1  ;;  %v6760_v33 = vpop.f32.mrb[190].mxu0 }
 0x275   : > { %v6697_v9 = vpop.f32.mrb[191].mxu1  ;;  %v6761_v37 = vpop.f32.mrb[191].mxu0 }
 0x276   : > { %v9404_v22 = vadd.f32 %v6695_v27, %v9276_v0  ;;  %v9407_v31 = vadd.f32 %v6759_v49, %v9279_v1  ;;  %v6698_v23 = vadd.f32 %v6697_v9, %v6696_v26  ;;  %v6762_v47 = vadd.f32 %v6761_v37, %v6760_v33  ;;  %v7902_v1 = vld [vmem:[%s8044_s11 + $0xa18] ss:$84 sps:$4 sm:$0xff]   ;;  %v7915_v9 = vld [vmem:[%s8044_s11 + $0x634] ss:$84 sps:$4 sm:$0xff]  }
 0x277   : > { %5061 = vmatmul.mubr.bf16.gmra.mrb[40].mxu0 %v7895_v19  ;;  %5158 = vmatmul.mubr.bf16.gmra.mrb[40].mxu1 %v7898_v61  ;;  %v7912_v49 = vld [vmem:[%s8044_s11 + $0xf8] ss:$84 sps:$4 sm:$0xff]   ;;  %v7916_v37 = vld [vmem:[%s8044_s11 + $0x1a0] ss:$84 sps:$4 sm:$0xff]  }
 0x278   : > { %v9410_v35 = vadd.f32 %v6698_v23, %v9282_v10  ;;  %v9413_v18 = vadd.f32 %v6762_v47, %v9285_v5  ;;  %5068 = vmatprep.mubr.bf16.mxu0 %v7904_v60  ;;  %5165 = vmatprep.mubr.bf16.mxu1 %v7907_v56 }
 0x27a   : > { %v6699_v58 = vpop.f32.mrb[192].mxu1  ;;  %v6763_v0 = vpop.f32.mrb[192].mxu0 }
 0x27b   : > { %v6700_v50 = vpop.f32.mrb[193].mxu1  ;;  %v6764_v54 = vpop.f32.mrb[193].mxu0 }
 0x27c   : > { %v6701_v4 = vadd.f32 %v6700_v50, %v6699_v58  ;;  %v6765_v51 = vadd.f32 %v6764_v54, %v6763_v0  ;;  %v6702_v40 = vpop.f32.mrb[194].mxu1  ;;  %v6766_v55 = vpop.f32.mrb[194].mxu0 }
 0x27d   : > { %v6703_v32 = vpop.f32.mrb[195].mxu1  ;;  %v6767_v10 = vpop.f32.mrb[195].mxu0 }
 0x27e   : > { %v9420_v5 = vadd.f32 %v6701_v4, %v9292_v53  ;;  %v9423_v43 = vadd.f32 %v6765_v51, %v9295_v36  ;;  %v6704_v6 = vadd.f32 %v6703_v32, %v6702_v40  ;;  %v6768_v52 = vadd.f32 %v6767_v10, %v6766_v55  ;;  %v7908_v36 = vld [vmem:[%s8044_s11 + $0x588] ss:$84 sps:$4 sm:$0xff]   ;;  %v7921_v10 = vld [vmem:[%s8044_s11 + $0x2f0] ss:$84 sps:$4 sm:$0xff]  }
 0x27f   : > { %5069 = vmatmul.mubr.bf16.gmra.mrb[44].mxu0 %v7902_v1  ;;  %5166 = vmatmul.mubr.bf16.gmra.mrb[44].mxu1 %v7905_v57  ;;  %v7917_v51 = vld [vmem:[%s8044_s11 + $0x248] ss:$84 sps:$4 sm:$0xff]  }
 0x280   : > { %v9426_v24 = vadd.f32 %v6704_v6, %v9298_v25  ;;  %v9429_v48 = vadd.f32 %v6768_v52, %v9301_v3  ;;  %5173 = vmatprep.mubr.bf16.mxu1 %v7910_v16  ;;  %7211 = vmatprep.mubr.bf16.mxu0 %v7911_v12  ;;  %v7920_v32 = vld [vmem:[%s8044_s11 + $0x6dc] ss:$84 sps:$4 sm:$0xff]  }
 0x282   : > { %v6705_v19 = vpop.f32.mrb[196].mxu1  ;;  %v6769_v53 = vpop.f32.mrb[196].mxu0 }
 0x283   : > { %v6706_v61 = vpop.f32.mrb[197].mxu1  ;;  %v6770_v27 = vpop.f32.mrb[197].mxu0 }
 0x284   : > { %v6707_v26 = vadd.f32 %v6706_v61, %v6705_v19  ;;  %v6771_v33 = vadd.f32 %v6770_v27, %v6769_v53  ;;  %v6708_v60 = vpop.f32.mrb[198].mxu1  ;;  %v6772_v56 = vpop.f32.mrb[198].mxu0 }
 0x285   : > { %v6709_v23 = vpop.f32.mrb[199].mxu1  ;;  %v6773_v25 = vpop.f32.mrb[199].mxu0 }
 0x286   : > { %v9436_v3 = vadd.f32 %v6707_v26, %v9308_v15  ;;  %v9439_v47 = vadd.f32 %v6771_v33, %v9311_v34  ;;  %v6710_v58 = vadd.f32 %v6709_v23, %v6708_v60  ;;  %v6774_v0 = vadd.f32 %v6773_v25, %v6772_v56  ;;  %v7913_v34 = vld [vmem:[%s8044_s11 + $0x630] ss:$84 sps:$4 sm:$0xff]   ;;  %v7922_v33 = vld [vmem:[%s8044_s11 + $0x398] ss:$84 sps:$4 sm:$0xff]   ;;  %v7926_v25 = vld [vmem:[%s8044_s11 + $0x440] ss:$84 sps:$4 sm:$0xff]  }
 0x287   : > { %5174 = vmatmul.mubr.bf16.gmra.mrb[48].mxu1 %v7908_v36  ;;  %7212 = vmatmul.mubr.bf16.vlgmr.msra.gmra.mrb[48].mxu0 %v7912_v49  ;;  %v7925_v23 = vld [vmem:[%s8044_s11 + $0x784] ss:$84 sps:$4 sm:$0xff]  }
 0x288   : > { %v9442_v50 = vadd.f32 %v6710_v58, %v9314_v14  ;;  %v9445_v54 = vadd.f32 %v6774_v0, %v9317_v46  ;;  %5181 = vmatprep.mubr.bf16.mxu1 %v7915_v9  ;;  %7215 = vmatprep.mubr.bf16.mxu0 %v7916_v37 }
 0x28a   : > { %v6711_v1 = vpop.f32.mrb[200].mxu1  ;;  %v6775_v15 = vpop.f32.mrb[200].mxu0 }
 0x28b   : > { %v6712_v57 = vpop.f32.mrb[201].mxu1  ;;  %v6776_v4 = vpop.f32.mrb[201].mxu0 }
 0x28c   : > { %v6713_v40 = vadd.f32 %v6712_v57, %v6711_v1  ;;  %v6777_v55 = vadd.f32 %v6776_v4, %v6775_v15  ;;  %v6714_v16 = vpop.f32.mrb[202].mxu1  ;;  %v6778_v12 = vpop.f32.mrb[202].mxu0 }
 0x28d   : > { %v6715_v6 = vpop.f32.mrb[203].mxu1  ;;  %v6779_v14 = vpop.f32.mrb[203].mxu0 }
 0x28e   : > { %v9452_v46 = vadd.f32 %v6713_v40, %v9324_v20  ;;  %v9455_v52 = vadd.f32 %v6777_v55, %v9327_v21  ;;  %v6716_v19 = vadd.f32 %v6715_v6, %v6714_v16  ;;  %v6780_v53 = vadd.f32 %v6779_v14, %v6778_v12  ;;  %v7918_v21 = vld [vmem:[%s8044_s11 + $0x6d8] ss:$84 sps:$4 sm:$0xff]   ;;  %v7927_v55 = vld [vmem:[%s8044_s11 + $0x4e8] ss:$84 sps:$4 sm:$0xff]   ;;  %v7931_v14 = vld [vmem:[%s8044_s11 + $0x590] ss:$84 sps:$4 sm:$0xff]  }
 0x28f   : > { %5182 = vmatmul.mubr.bf16.gmra.mrb[52].mxu1 %v7913_v34  ;;  %7216 = vmatmul.mubr.bf16.gmra.mrb[52].mxu0 %v7917_v51  ;;  %v7930_v6 = vld [vmem:[%s8044_s11 + $0x82c] ss:$84 sps:$4 sm:$0xff]  }
 0x290   : > { %v9458_v61 = vadd.f32 %v6716_v19, %v9330_v30  ;;  %v9461_v27 = vadd.f32 %v6780_v53, %v9333_v39  ;;  %5189 = vmatprep.mubr.bf16.mxu1 %v7920_v32  ;;  %7219 = vmatprep.mubr.bf16.mxu0 %v7921_v10 }
 0x292   : > { %v6717_v36 = vpop.f32.mrb[204].mxu1  ;;  %v6781_v20 = vpop.f32.mrb[204].mxu0 }
 0x293   : > { %v6718_v49 = vpop.f32.mrb[205].mxu1  ;;  %v6782_v26 = vpop.f32.mrb[205].mxu0 }
 0x294   : > { %v6719_v60 = vadd.f32 %v6718_v49, %v6717_v36  ;;  %v6783_v56 = vadd.f32 %v6782_v26, %v6781_v20  ;;  %v6720_v9 = vpop.f32.mrb[206].mxu1  ;;  %v6784_v37 = vpop.f32.mrb[206].mxu0 }
 0x295   : > { %v6721_v58 = vpop.f32.mrb[207].mxu1  ;;  %v6785_v30 = vpop.f32.mrb[207].mxu0 }
 0x296   : > { %v9468_v39 = vadd.f32 %v6719_v60, %v9340_v7  ;;  %v9471_v0 = vadd.f32 %v6783_v56, %v9343_v59  ;;  %v6722_v1 = vadd.f32 %v6721_v58, %v6720_v9  ;;  %v6786_v15 = vadd.f32 %v6785_v30, %v6784_v37  ;;  %v7923_v59 = vld [vmem:[%s8044_s11 + $0x780] ss:$84 sps:$4 sm:$0xff]   ;;  %v7932_v56 = vld [vmem:[%s8044_s11 + $0x638] ss:$84 sps:$4 sm:$0xff]  }
 0x297   : > { %5190 = vmatmul.mubr.bf16.gmra.mrb[56].mxu1 %v7918_v21  ;;  %7220 = vmatmul.mubr.bf16.gmra.mrb[56].mxu0 %v7922_v33  ;;  %v7935_v58 = vld [vmem:[%s8044_s11 + $0x8d4] ss:$84 sps:$4 sm:$0xff]  }
 0x298   : > { %v9474_v57 = vadd.f32 %v6722_v1, %v9346_v8  ;;  %v9477_v4 = vadd.f32 %v6786_v15, %v9349_v41  ;;  %5197 = vmatprep.mubr.bf16.mxu1 %v7925_v23  ;;  %7223 = vmatprep.mubr.bf16.mxu0 %v7926_v25  ;;  %v7936_v30 = vld [vmem:[%s8044_s11 + $0x6e0] ss:$84 sps:$4 sm:$0xff]  }
 0x29a   : > { %v6787_v34 = vpop.f32.mrb[208].mxu0  ;;  %v6851_v7 = vpop.f32.mrb[208].mxu1 }
 0x29b   : > { %v6788_v51 = vpop.f32.mrb[209].mxu0  ;;  %v6852_v40 = vpop.f32.mrb[209].mxu1 }
 0x29c   : > { %v6789_v16 = vadd.f32 %v6788_v51, %v6787_v34  ;;  %v6853_v12 = vadd.f32 %v6852_v40, %v6851_v7  ;;  %v6790_v32 = vpop.f32.mrb[210].mxu0  ;;  %v6854_v10 = vpop.f32.mrb[210].mxu1 }
 0x29d   : > { %v6791_v19 = vpop.f32.mrb[211].mxu0  ;;  %v6855_v8 = vpop.f32.mrb[211].mxu1 }
 0x29e   : > { %v9484_v41 = vadd.f32 %v6789_v16, %v9356_v13  ;;  %v9487_v53 = vadd.f32 %v6853_v12, %v9359_v42  ;;  %v6792_v36 = vadd.f32 %v6791_v19, %v6790_v32  ;;  %v6856_v20 = vadd.f32 %v6855_v8, %v6854_v10  ;;  %v7928_v42 = vld [vmem:[%s8044_s11 + $0x828] ss:$84 sps:$4 sm:$0xff]   ;;  %v7941_v8 = vld [vmem:[%s8044_s11 + $0x830] ss:$84 sps:$4 sm:$0xff]  }
 0x29f   : > { %5198 = vmatmul.mubr.bf16.gmra.mrb[60].mxu1 %v7923_v59  ;;  %7224 = vmatmul.mubr.bf16.gmra.mrb[60].mxu0 %v7927_v55  ;;  %v7937_v12 = vld [vmem:[%s8044_s11 + $0x788] ss:$84 sps:$4 sm:$0xff]  }
 0x2a0   : > { %v9490_v49 = vadd.f32 %v6792_v36, %v9362_v11  ;;  %v9493_v26 = vadd.f32 %v6856_v20, %v9365_v2  ;;  %5205 = vmatprep.mubr.bf16.mxu1 %v7930_v6  ;;  %7227 = vmatprep.mubr.bf16.mxu0 %v7931_v14  ;;  %v7940_v19 = vld [vmem:[%s8044_s11 + $0x97c] ss:$84 sps:$4 sm:$0xff]  }
 0x2a2   : > { %v6793_v21 = vpop.f32.mrb[212].mxu0  ;;  %v6857_v13 = vpop.f32.mrb[212].mxu1 }
 0x2a3   : > { %v6794_v33 = vpop.f32.mrb[213].mxu0  ;;  %v6858_v60 = vpop.f32.mrb[213].mxu1 }
 0x2a4   : > { %v6795_v9 = vadd.f32 %v6794_v33, %v6793_v21  ;;  %v6859_v37 = vadd.f32 %v6858_v60, %v6857_v13  ;;  %v6796_v23 = vpop.f32.mrb[214].mxu0  ;;  %v6860_v25 = vpop.f32.mrb[214].mxu1 }
 0x2a5   : > { %v6797_v1 = vpop.f32.mrb[215].mxu0  ;;  %v6861_v11 = vpop.f32.mrb[215].mxu1 }
 0x2a6   : > { %v9500_v2 = vadd.f32 %v6795_v9, %v9372_v44  ;;  %v9503_v15 = vadd.f32 %v6859_v37, %v9375_v28  ;;  %v6798_v34 = vadd.f32 %v6797_v1, %v6796_v23  ;;  %v6862_v7 = vadd.f32 %v6861_v11, %v6860_v25  ;;  %v7933_v28 = vld [vmem:[%s8044_s11 + $0x8d0] ss:$84 sps:$4 sm:$0xff]   ;;  %v7942_v37 = vld [vmem:[%s8044_s11 + $0x8d8] ss:$84 sps:$4 sm:$0xff]   ;;  %v7946_v11 = vld [vmem:[%s8044_s11 + $0x980] ss:$84 sps:$4 sm:$0xff]  }
 0x2a7   : > { %5206 = vmatmul.mubr.bf16.gmra.mrb[64].mxu1 %v7928_v42  ;;  %7228 = vmatmul.mubr.bf16.gmra.mrb[64].mxu0 %v7932_v56  ;;  %v7945_v1 = vld [vmem:[%s8044_s11 + $0xa24] ss:$84 sps:$4 sm:$0xff]  }
 0x2a8   : > { %v9506_v51 = vadd.f32 %v6798_v34, %v9378_v29  ;;  %v9509_v40 = vadd.f32 %v6862_v7, %v9381_v45  ;;  %5213 = vmatprep.mubr.bf16.mxu1 %v7935_v58  ;;  %7231 = vmatprep.mubr.bf16.mxu0 %v7936_v30 }
 0x2aa   : > { %v6799_v59 = vpop.f32.mrb[216].mxu0  ;;  %v6863_v44 = vpop.f32.mrb[216].mxu1 }
 0x2ab   : > { %v6800_v55 = vpop.f32.mrb[217].mxu0  ;;  %v6864_v16 = vpop.f32.mrb[217].mxu1 }
 0x2ac   : > { %v6801_v32 = vadd.f32 %v6800_v55, %v6799_v59  ;;  %v6865_v10 = vadd.f32 %v6864_v16, %v6863_v44  ;;  %v6802_v6 = vpop.f32.mrb[218].mxu0  ;;  %v6866_v14 = vpop.f32.mrb[218].mxu1 }
 0x2ad   : > { %v6803_v36 = vpop.f32.mrb[219].mxu0  ;;  %v6867_v29 = vpop.f32.mrb[219].mxu1 }
 0x2ae   : > { %v9516_v45 = vadd.f32 %v6801_v32, %v9388_v62  ;;  %v9519_v20 = vadd.f32 %v6865_v10, %v9391_v63  ;;  %v6804_v21 = vadd.f32 %v6803_v36, %v6802_v6  ;;  %v6868_v13 = vadd.f32 %v6867_v29, %v6866_v14  ;;  %v7938_v63 = vld [vmem:[%s8044_s11 + $0x978] ss:$84 sps:$4 sm:$0xff]   ;;  %v7943_v10 = vld [vmem:[%s8044_s11 + $0xa20] ss:$84 sps:$4 sm:$0xff]   ;;  %v7947_v6 = vld [vmem:[%s8044_s11 + $0xa28] ss:$84 sps:$4 sm:$0xff]  }
 0x2af   : > { %5214 = vmatmul.mubr.bf16.gmra.mrb[68].mxu1 %v7933_v28  ;;  %7232 = vmatmul.mubr.bf16.gmra.mrb[68].mxu0 %v7937_v12  ;;  %s5543_s11 = sshll.u32 %s9879_s18, 3 }
 0x2b0   : > { %v9522_v33 = vadd.f32 %v6804_v21, %v9394_v17  ;;  %v9525_v60 = vadd.f32 %v6868_v13, %v9397_v38  ;;  %5221 = vmatprep.mubr.bf16.mxu1 %v7940_v19  ;;  %7235 = vmatprep.mubr.bf16.mxu0 %v7941_v8  ;;  %s9789_s5 = scalar_lea.vmem %s9873_s3, %s5543_s11 }
 0x2b2   : > { %v6805_v42 = vpop.f32.mrb[220].mxu0  ;;  %v6869_v62 = vpop.f32.mrb[220].mxu1 }
 0x2b3   : > { %v6806_v56 = vpop.f32.mrb[221].mxu0  ;;  %v6870_v9 = vpop.f32.mrb[221].mxu1 }
 0x2b4   : > { %v6807_v23 = vadd.f32 %v6806_v56, %v6805_v42  ;;  %v6871_v25 = vadd.f32 %v6870_v9, %v6869_v62  ;;  %v6808_v58 = vpop.f32.mrb[222].mxu0  ;;  %v6872_v30 = vpop.f32.mrb[222].mxu1 }
 0x2b5   : > { %v6809_v34 = vpop.f32.mrb[223].mxu0  ;;  %v6873_v17 = vpop.f32.mrb[223].mxu1 }
 0x2b6   : > { %v9532_v38 = vadd.f32 %v6807_v23, %v9404_v22  ;;  %v9535_v7 = vadd.f32 %v6871_v25, %v9407_v31  ;;  %v6810_v59 = vadd.f32 %v6809_v34, %v6808_v58  ;;  %v6874_v44 = vadd.f32 %v6873_v17, %v6872_v30 }
 0x2b7   : > { %5222 = vmatmul.mubr.bf16.gmra.mrb[72].mxu1 %v7938_v63  ;;  %7236 = vmatmul.mubr.bf16.gmra.mrb[72].mxu0 %v7942_v37 }
 0x2b8   : > { %v9538_v55 = vadd.f32 %v6810_v59, %v9410_v35  ;;  %v9541_v16 = vadd.f32 %v6874_v44, %v9413_v18  ;;  %5229 = vmatprep.mubr.bf16.mxu1 %v7945_v1  ;;  %7239 = vmatprep.mubr.bf16.mxu0 %v7946_v11 }
 0x2ba   : > { %v6811_v28 = vpop.f32.mrb[224].mxu0  ;;  %v6875_v12 = vpop.f32.mrb[224].mxu1 }
 0x2bb   : > { %v6812_v32 = vpop.f32.mrb[225].mxu0  ;;  %v6876_v22 = vpop.f32.mrb[225].mxu1 }
 0x2bc   : > { %v6813_v31 = vadd.f32 %v6812_v32, %v6811_v28  ;;  %v6877_v14 = vadd.f32 %v6876_v22, %v6875_v12  ;;  %v6814_v19 = vpop.f32.mrb[226].mxu0  ;;  %v6878_v8 = vpop.f32.mrb[226].mxu1 }
 0x2bd   : > { %v6815_v36 = vpop.f32.mrb[227].mxu0  ;;  %v6879_v29 = vpop.f32.mrb[227].mxu1 }
 0x2be   : > { %v9546_v35 = vadd.f32 %v6813_v31, %v9420_v5  ;;  %v9549_v18 = vadd.f32 %v6877_v14, %v9423_v43  ;;  %v6816_v21 = vadd.f32 %v6815_v36, %v6814_v19  ;;  %v6880_v13 = vadd.f32 %v6879_v29, %v6878_v8 }
 0x2bf   : > { %5230 = vmatmul.mubr.bf16.gmra.mrb[76].mxu1 %v7943_v10  ;;  %7240 = vmatmul.mubr.bf16.gmra.mrb[76].mxu0 %v7947_v6 }
 0x2c0   : > { %v9552_v42 = vadd.f32 %v6816_v21, %v9426_v24  ;;  %v9555_v62 = vadd.f32 %v6880_v13, %v9429_v48 }
 0x2c2   : > { %v6817_v56 = vpop.f32.mrb[228].mxu0  ;;  %v6881_v9 = vpop.f32.mrb[228].mxu1 }
 0x2c3   : > { %v6818_v63 = vpop.f32.mrb[229].mxu0  ;;  %v6882_v37 = vpop.f32.mrb[229].mxu1 }
 0x2c4   : > { %v6819_v23 = vadd.f32 %v6818_v63, %v6817_v56  ;;  %v6883_v5 = vadd.f32 %v6882_v37, %v6881_v9  ;;  %v6820_v25 = vpop.f32.mrb[230].mxu0  ;;  %v6884_v58 = vpop.f32.mrb[230].mxu1 }
 0x2c5   : > { %v6821_v43 = vpop.f32.mrb[231].mxu0  ;;  %v6885_v30 = vpop.f32.mrb[231].mxu1 }
 0x2c6   : > { %v9558_v1 = vadd.f32 %v6819_v23, %v9436_v3  ;;  %v9561_v11 = vadd.f32 %v6883_v5, %v9439_v47  ;;  %v6822_v24 = vadd.f32 %v6821_v43, %v6820_v25  ;;  %v6886_v34 = vadd.f32 %v6885_v30, %v6884_v58 }
 0x2c8   : > { %v9564_v48 = vadd.f32 %v6822_v24, %v9442_v50  ;;  %v9567_v17 = vadd.f32 %v6886_v34, %v9445_v54 }
 0x2ca   : > { %v6823_v59 = vpop.f32.mrb[232].mxu0  ;;  %v6887_v44 = vpop.f32.mrb[232].mxu1 }
 0x2cb   : > { %v6824_v28 = vpop.f32.mrb[233].mxu0  ;;  %v6888_v12 = vpop.f32.mrb[233].mxu1 }
 0x2cc   : > { %v6825_v32 = vadd.f32 %v6824_v28, %v6823_v59  ;;  %v6889_v22 = vadd.f32 %v6888_v12, %v6887_v44  ;;  %v6826_v10 = vpop.f32.mrb[234].mxu0  ;;  %v6890_v3 = vpop.f32.mrb[234].mxu1 }
 0x2cd   : > { %v6827_v6 = vpop.f32.mrb[235].mxu0  ;;  %v6891_v31 = vpop.f32.mrb[235].mxu1 }
 0x2ce   : > { %v9570_v47 = vadd.f32 %v6825_v32, %v9452_v46  ;;  %v9573_v14 = vadd.f32 %v6889_v22, %v9455_v52  ;;  %v6828_v50 = vadd.f32 %v6827_v6, %v6826_v10  ;;  %v6892_v19 = vadd.f32 %v6891_v31, %v6890_v3 }
 0x2d0   : > { %v9576_v54 = vadd.f32 %v6828_v50, %v9458_v61  ;;  %v9579_v8 = vadd.f32 %v6892_v19, %v9461_v27 }
 0x2d2   : > { %v6829_v36 = vpop.f32.mrb[236].mxu0  ;;  %v6893_v29 = vpop.f32.mrb[236].mxu1 }
 0x2d3   : > { %v6830_v21 = vpop.f32.mrb[237].mxu0  ;;  %v6894_v13 = vpop.f32.mrb[237].mxu1 }
 0x2d4   : > { %v6831_v56 = vadd.f32 %v6830_v21, %v6829_v36  ;;  %v6895_v9 = vadd.f32 %v6894_v13, %v6893_v29  ;;  %v6832_v63 = vpop.f32.mrb[238].mxu0  ;;  %v6896_v46 = vpop.f32.mrb[238].mxu1 }
 0x2d5   : > { %v6833_v37 = vpop.f32.mrb[239].mxu0  ;;  %v6897_v23 = vpop.f32.mrb[239].mxu1 }
 0x2d6   : > { %v9582_v52 = vadd.f32 %v6831_v56, %v9468_v39  ;;  %v9585_v5 = vadd.f32 %v6895_v9, %v9471_v0  ;;  %v6834_v61 = vadd.f32 %v6833_v37, %v6832_v63  ;;  %v6898_v25 = vadd.f32 %v6897_v23, %v6896_v46 }
 0x2d8   : > { %v9588_v27 = vadd.f32 %v6834_v61, %v9474_v57  ;;  %v9591_v58 = vadd.f32 %v6898_v25, %v9477_v4 }
 0x2da   : > { %v6899_v43 = vpop.f32.mrb[240].mxu1  ;;  %v6963_v30 = vpop.f32.mrb[240].mxu0 }
 0x2db   : > { %v6900_v24 = vpop.f32.mrb[241].mxu1  ;;  %v6964_v34 = vpop.f32.mrb[241].mxu0 }
 0x2dc   : > { %v6901_v59 = vadd.f32 %v6900_v24, %v6899_v43  ;;  %v6965_v44 = vadd.f32 %v6964_v34, %v6963_v30  ;;  %v6902_v28 = vpop.f32.mrb[242].mxu1  ;;  %v6966_v39 = vpop.f32.mrb[242].mxu0 }
 0x2dd   : > { %v6903_v12 = vpop.f32.mrb[243].mxu1  ;;  %v6967_v32 = vpop.f32.mrb[243].mxu0 }
 0x2de   : > { %v9594_v0 = vadd.f32 %v6901_v59, %v9484_v41  ;;  %v9597_v22 = vadd.f32 %v6965_v44, %v9487_v53  ;;  %v6904_v57 = vadd.f32 %v6903_v12, %v6902_v28  ;;  %v6968_v10 = vadd.f32 %v6967_v32, %v6966_v39 }
 0x2e0   : > { %v9600_v4 = vadd.f32 %v6904_v57, %v9490_v49  ;;  %v9603_v3 = vadd.f32 %v6968_v10, %v9493_v26 }
 0x2e2   : > { %v6905_v6 = vpop.f32.mrb[244].mxu1  ;;  %v6969_v31 = vpop.f32.mrb[244].mxu0 }
 0x2e3   : > { %v6906_v50 = vpop.f32.mrb[245].mxu1  ;;  %v6970_v19 = vpop.f32.mrb[245].mxu0 }
 0x2e4   : > { %v6907_v36 = vadd.f32 %v6906_v50, %v6905_v6  ;;  %v6971_v29 = vadd.f32 %v6970_v19, %v6969_v31  ;;  %v6908_v21 = vpop.f32.mrb[246].mxu1  ;;  %v6972_v41 = vpop.f32.mrb[246].mxu0 }
 0x2e5   : > { %v6909_v13 = vpop.f32.mrb[247].mxu1  ;;  %v6973_v56 = vpop.f32.mrb[247].mxu0 }
 0x2e6   : > { %v9606_v53 = vadd.f32 %v6907_v36, %v9500_v2  ;;  %v9609_v9 = vadd.f32 %v6971_v29, %v9503_v15  ;;  %v6910_v49 = vadd.f32 %v6909_v13, %v6908_v21  ;;  %v6974_v63 = vadd.f32 %v6973_v56, %v6972_v41 }
 0x2e8   : > { %v9612_v26 = vadd.f32 %v6910_v49, %v9506_v51  ;;  %v9615_v46 = vadd.f32 %v6974_v63, %v9509_v40 }
 0x2ea   : > { %v6911_v37 = vpop.f32.mrb[248].mxu1  ;;  %v6975_v23 = vpop.f32.mrb[248].mxu0 }
 0x2eb   : > { %v6912_v61 = vpop.f32.mrb[249].mxu1  ;;  %v6976_v25 = vpop.f32.mrb[249].mxu0 }
 0x2ec   : > { %v6913_v43 = vadd.f32 %v6912_v61, %v6911_v37  ;;  %v6977_v30 = vadd.f32 %v6976_v25, %v6975_v23  ;;  %v6914_v24 = vpop.f32.mrb[250].mxu1  ;;  %v6978_v2 = vpop.f32.mrb[250].mxu0 }
 0x2ed   : > { %v6915_v34 = vpop.f32.mrb[251].mxu1  ;;  %v6979_v59 = vpop.f32.mrb[251].mxu0 }
 0x2ee   : > { %v9618_v15 = vadd.f32 %v6913_v43, %v9516_v45  ;;  %v9621_v44 = vadd.f32 %v6977_v30, %v9519_v20  ;;  %v6916_v51 = vadd.f32 %v6915_v34, %v6914_v24  ;;  %v6980_v28 = vadd.f32 %v6979_v59, %v6978_v2 }
 0x2f0   : > { %v9624_v40 = vadd.f32 %v6916_v51, %v9522_v33  ;;  %v9627_v39 = vadd.f32 %v6980_v28, %v9525_v60 }
 0x2f2   : > { %v6917_v12 = vpop.f32.mrb[252].mxu1  ;;  %v6981_v32 = vpop.f32.mrb[252].mxu0 }
 0x2f3   : > { %v6918_v57 = vpop.f32.mrb[253].mxu1  ;;  %v6982_v10 = vpop.f32.mrb[253].mxu0 }
 0x2f4   : > { %v6919_v6 = vadd.f32 %v6918_v57, %v6917_v12  ;;  %v6983_v31 = vadd.f32 %v6982_v10, %v6981_v32  ;;  %v6920_v50 = vpop.f32.mrb[254].mxu1  ;;  %v6984_v45 = vpop.f32.mrb[254].mxu0 }
 0x2f5   : > { %v6921_v19 = vpop.f32.mrb[255].mxu1  ;;  %v6985_v36 = vpop.f32.mrb[255].mxu0 }
 0x2f6   : > { %v9630_v20 = vadd.f32 %v6919_v6, %v9532_v38  ;;  %v9633_v29 = vadd.f32 %v6983_v31, %v9535_v7  ;;  %v6922_v33 = vadd.f32 %v6921_v19, %v6920_v50  ;;  %v6986_v21 = vadd.f32 %v6985_v36, %v6984_v45 }
 0x2f8   : > { %v9636_v60 = vadd.f32 %v6922_v33, %v9538_v55  ;;  %v9639_v41 = vadd.f32 %v6986_v21, %v9541_v16 }
 0x2fa   : > { %v6923_v13 = vpop.f32.mrb[0].mxu1  ;;  %v6987_v56 = vpop.f32.mrb[0].mxu0 }
 0x2fb   : > { %v6924_v49 = vpop.f32.mrb[1].mxu1  ;;  %v6988_v63 = vpop.f32.mrb[1].mxu0 }
 0x2fc   : > { %v6925_v37 = vadd.f32 %v6924_v49, %v6923_v13  ;;  %v6989_v23 = vadd.f32 %v6988_v63, %v6987_v56  ;;  %v6926_v61 = vpop.f32.mrb[2].mxu1  ;;  %v6990_v38 = vpop.f32.mrb[2].mxu0 }
 0x2fd   : > { %v6927_v25 = vpop.f32.mrb[3].mxu1  ;;  %v6991_v43 = vpop.f32.mrb[3].mxu0 }
 0x2fe   : > { %v9642_v7 = vadd.f32 %v6925_v37, %v9546_v35  ;;  %v9645_v30 = vadd.f32 %v6989_v23, %v9549_v18  ;;  %v6928_v55 = vadd.f32 %v6927_v25, %v6926_v61  ;;  %v6992_v24 = vadd.f32 %v6991_v43, %v6990_v38 }
 0x300   : > { %v9648_v16 = vadd.f32 %v6928_v55, %v9552_v42  ;;  %v9651_v2 = vadd.f32 %v6992_v24, %v9555_v62 }
 0x302   : > { %v6929_v34 = vpop.f32.mrb[4].mxu1  ;;  %v6993_v59 = vpop.f32.mrb[4].mxu0 }
 0x303   : > { %v6930_v51 = vpop.f32.mrb[5].mxu1  ;;  %v6994_v28 = vpop.f32.mrb[5].mxu0 }
 0x304   : > { %v6931_v12 = vadd.f32 %v6930_v51, %v6929_v34  ;;  %v6995_v32 = vadd.f32 %v6994_v28, %v6993_v59  ;;  %v6932_v57 = vpop.f32.mrb[6].mxu1  ;;  %v6996_v35 = vpop.f32.mrb[6].mxu0 }
 0x305   : > { %v6933_v10 = vpop.f32.mrb[7].mxu1  ;;  %v6997_v6 = vpop.f32.mrb[7].mxu0 }
 0x306   : > { %v9654_v18 = vadd.f32 %v6931_v12, %v9558_v1  ;;  %v9657_v31 = vadd.f32 %v6995_v32, %v9561_v11  ;;  %v6934_v42 = vadd.f32 %v6933_v10, %v6932_v57  ;;  %v6998_v50 = vadd.f32 %v6997_v6, %v6996_v35 }
 0x308   : > { %v9660_v62 = vadd.f32 %v6934_v42, %v9564_v48  ;;  %v9663_v45 = vadd.f32 %v6998_v50, %v9567_v17 }
 0x30a   : > { %v6935_v19 = vpop.f32.mrb[8].mxu1  ;;  %v6999_v36 = vpop.f32.mrb[8].mxu0 }
 0x30b   : > { %v6936_v33 = vpop.f32.mrb[9].mxu1  ;;  %v7000_v21 = vpop.f32.mrb[9].mxu0 }
 0x30c   : > { %v6937_v13 = vadd.f32 %v6936_v33, %v6935_v19  ;;  %v7001_v56 = vadd.f32 %v7000_v21, %v6999_v36  ;;  %v6938_v49 = vpop.f32.mrb[10].mxu1  ;;  %v7002_v1 = vpop.f32.mrb[10].mxu0 }
 0x30d   : > { %v6939_v63 = vpop.f32.mrb[11].mxu1  ;;  %v7003_v37 = vpop.f32.mrb[11].mxu0 }
 0x30e   : > { %v9666_v11 = vadd.f32 %v6937_v13, %v9570_v47  ;;  %v9669_v23 = vadd.f32 %v7001_v56, %v9573_v14  ;;  %v6940_v48 = vadd.f32 %v6939_v63, %v6938_v49  ;;  %v7004_v61 = vadd.f32 %v7003_v37, %v7002_v1 }
 0x310   : > { %v9672_v17 = vadd.f32 %v6940_v48, %v9576_v54  ;;  %v9675_v38 = vadd.f32 %v7004_v61, %v9579_v8 }
 0x312   : > { %v6941_v25 = vpop.f32.mrb[12].mxu1  ;;  %v7005_v43 = vpop.f32.mrb[12].mxu0 }
 0x313   : > { %v6942_v55 = vpop.f32.mrb[13].mxu1  ;;  %v7006_v24 = vpop.f32.mrb[13].mxu0 }
 0x314   : > { %v6943_v34 = vadd.f32 %v6942_v55, %v6941_v25  ;;  %v7007_v59 = vadd.f32 %v7006_v24, %v7005_v43  ;;  %v6944_v51 = vpop.f32.mrb[14].mxu1  ;;  %v7008_v47 = vpop.f32.mrb[14].mxu0 }
 0x315   : > { %v6945_v28 = vpop.f32.mrb[15].mxu1  ;;  %v7009_v12 = vpop.f32.mrb[15].mxu0 }
 0x316   : > { %v9678_v14 = vadd.f32 %v6943_v34, %v9582_v52  ;;  %v9681_v32 = vadd.f32 %v7007_v59, %v9585_v5  ;;  %v6946_v54 = vadd.f32 %v6945_v28, %v6944_v51  ;;  %v7010_v57 = vadd.f32 %v7009_v12, %v7008_v47 }
 0x318   : > { %v9684_v8 = vadd.f32 %v6946_v54, %v9588_v27  ;;  %v9687_v35 = vadd.f32 %v7010_v57, %v9591_v58 }
 0x31a   : > { %v7011_v10 = vpop.f32.mrb[16].mxu0  ;;  %v7075_v6 = vpop.f32.mrb[16].mxu1 }
 0x31b   : > { %v7012_v42 = vpop.f32.mrb[17].mxu0  ;;  %v7076_v50 = vpop.f32.mrb[17].mxu1 }
 0x31c   : > { %v7013_v19 = vadd.f32 %v7012_v42, %v7011_v10  ;;  %v7077_v36 = vadd.f32 %v7076_v50, %v7075_v6  ;;  %v7014_v33 = vpop.f32.mrb[18].mxu0  ;;  %v7078_v52 = vpop.f32.mrb[18].mxu1 }
 0x31d   : > { %v7015_v21 = vpop.f32.mrb[19].mxu0  ;;  %v7079_v13 = vpop.f32.mrb[19].mxu1 }
 0x31e   : > { %v9690_v5 = vadd.f32 %v7013_v19, %v9594_v0  ;;  %v7016_v56 = vadd.f32 %v7015_v21, %v7014_v33  ;;  %v7080_v49 = vadd.f32 %v7079_v13, %v7078_v52  ;;  %v9693_v27 = vadd.f32 %v7077_v36, %v9597_v22 }
 0x320   : > { %v9696_v58 = vadd.f32 %v7016_v56, %v9600_v4  ;;  %v9699_v1 = vadd.f32 %v7080_v49, %v9603_v3 }
 0x322   : > { %v7017_v63 = vpop.f32.mrb[20].mxu0  ;;  %v7081_v37 = vpop.f32.mrb[20].mxu1 }
 0x323   : > { %v7018_v48 = vpop.f32.mrb[21].mxu0  ;;  %v7082_v61 = vpop.f32.mrb[21].mxu1 }
 0x324   : > { %v7019_v25 = vadd.f32 %v7018_v48, %v7017_v63  ;;  %v7083_v43 = vadd.f32 %v7082_v61, %v7081_v37  ;;  %v7020_v55 = vpop.f32.mrb[22].mxu0  ;;  %v7084_v0 = vpop.f32.mrb[22].mxu1 }
 0x325   : > { %v7021_v24 = vpop.f32.mrb[23].mxu0  ;;  %v7085_v34 = vpop.f32.mrb[23].mxu1 }
 0x326   : > { %v9702_v59 = vadd.f32 %v7019_v25, %v9606_v53  ;;  %v7022_v22 = vadd.f32 %v7021_v24, %v7020_v55  ;;  %v7086_v51 = vadd.f32 %v7085_v34, %v7084_v0  ;;  %v9705_v4 = vadd.f32 %v7083_v43, %v9609_v9 }
 0x328   : > { %v9708_v3 = vadd.f32 %v7022_v22, %v9612_v26  ;;  %v9711_v47 = vadd.f32 %v7086_v51, %v9615_v46 }
 0x32a   : > { %v7023_v28 = vpop.f32.mrb[24].mxu0  ;;  %v7087_v12 = vpop.f32.mrb[24].mxu1 }
 0x32b   : > { %v7024_v54 = vpop.f32.mrb[25].mxu0  ;;  %v7088_v57 = vpop.f32.mrb[25].mxu1 }
 0x32c   : > { %v7025_v10 = vadd.f32 %v7024_v54, %v7023_v28  ;;  %v7089_v6 = vadd.f32 %v7088_v57, %v7087_v12  ;;  %v7026_v42 = vpop.f32.mrb[26].mxu0  ;;  %v7090_v53 = vpop.f32.mrb[26].mxu1 }
 0x32d   : > { %v7027_v50 = vpop.f32.mrb[27].mxu0  ;;  %v7091_v19 = vpop.f32.mrb[27].mxu1 }
 0x32e   : > { %v9714_v36 = vadd.f32 %v7025_v10, %v9618_v15  ;;  %v7028_v9 = vadd.f32 %v7027_v50, %v7026_v42  ;;  %v7092_v33 = vadd.f32 %v7091_v19, %v7090_v53  ;;  %v9717_v26 = vadd.f32 %v7089_v6, %v9621_v44 }
 0x330   : > { %v9720_v46 = vadd.f32 %v7028_v9, %v9624_v40  ;;  %v9723_v52 = vadd.f32 %v7092_v33, %v9627_v39 }
 0x332   : > { %v7029_v21 = vpop.f32.mrb[28].mxu0  ;;  %v7093_v13 = vpop.f32.mrb[28].mxu1 }
 0x333   : > { %v7030_v56 = vpop.f32.mrb[29].mxu0  ;;  %v7094_v49 = vpop.f32.mrb[29].mxu1 }
 0x334   : > { %v7031_v63 = vadd.f32 %v7030_v56, %v7029_v21  ;;  %v7095_v37 = vadd.f32 %v7094_v49, %v7093_v13  ;;  %v7032_v48 = vpop.f32.mrb[30].mxu0  ;;  %v7096_v15 = vpop.f32.mrb[30].mxu1 }
 0x335   : > { %v7033_v61 = vpop.f32.mrb[31].mxu0  ;;  %v7097_v25 = vpop.f32.mrb[31].mxu1 }
 0x336   : > { %v9726_v43 = vadd.f32 %v7031_v63, %v9630_v20  ;;  %v7034_v44 = vadd.f32 %v7033_v61, %v7032_v48  ;;  %v7098_v55 = vadd.f32 %v7097_v25, %v7096_v15  ;;  %v9729_v40 = vadd.f32 %v7095_v37, %v9633_v29 }
 0x338   : > { %v9732_v39 = vadd.f32 %v7034_v44, %v9636_v60  ;;  %v9735_v0 = vadd.f32 %v7098_v55, %v9639_v41 }
 0x33a   : > { %v7035_v24 = vpop.f32.mrb[32].mxu0  ;;  %v7099_v34 = vpop.f32.mrb[32].mxu1 }
 0x33b   : > { %v7036_v22 = vpop.f32.mrb[33].mxu0  ;;  %v7100_v51 = vpop.f32.mrb[33].mxu1 }
 0x33c   : > { %v7037_v28 = vadd.f32 %v7036_v22, %v7035_v24  ;;  %v7101_v12 = vadd.f32 %v7100_v51, %v7099_v34  ;;  %v7038_v54 = vpop.f32.mrb[34].mxu0  ;;  %v7102_v20 = vpop.f32.mrb[34].mxu1 }
 0x33d   : > { %v7039_v57 = vpop.f32.mrb[35].mxu0  ;;  %v7103_v10 = vpop.f32.mrb[35].mxu1 }
 0x33e   : > { %v9738_v6 = vadd.f32 %v7037_v28, %v9642_v7  ;;  %v7040_v29 = vadd.f32 %v7039_v57, %v7038_v54  ;;  %v7104_v42 = vadd.f32 %v7103_v10, %v7102_v20  ;;  %v9741_v60 = vadd.f32 %v7101_v12, %v9645_v30 }
 0x340   : > { %v9744_v41 = vadd.f32 %v7040_v29, %v9648_v16  ;;  %v9747_v53 = vadd.f32 %v7104_v42, %v9651_v2 }
 0x342   : > { %v7041_v50 = vpop.f32.mrb[36].mxu0  ;;  %v7105_v19 = vpop.f32.mrb[36].mxu1 }
 0x343   : > { %v7042_v9 = vpop.f32.mrb[37].mxu0  ;;  %v7106_v33 = vpop.f32.mrb[37].mxu1 }
 0x344   : > { %v7043_v21 = vadd.f32 %v7042_v9, %v7041_v50  ;;  %v7107_v13 = vadd.f32 %v7106_v33, %v7105_v19  ;;  %v7044_v56 = vpop.f32.mrb[38].mxu0  ;;  %v7108_v7 = vpop.f32.mrb[38].mxu1 }
 0x345   : > { %v7045_v49 = vpop.f32.mrb[39].mxu0  ;;  %v7109_v63 = vpop.f32.mrb[39].mxu1 }
 0x346   : > { %v9750_v37 = vadd.f32 %v7043_v21, %v9654_v18  ;;  %v7046_v30 = vadd.f32 %v7045_v49, %v7044_v56  ;;  %v7110_v48 = vadd.f32 %v7109_v63, %v7108_v7  ;;  %v9753_v16 = vadd.f32 %v7107_v13, %v9657_v31 }
 0x348   : > { %v9756_v2 = vadd.f32 %v7046_v30, %v9660_v62  ;;  %v9759_v15 = vadd.f32 %v7110_v48, %v9663_v45 }
 0x34a   : > { %v7047_v61 = vpop.f32.mrb[40].mxu0  ;;  %v7111_v25 = vpop.f32.mrb[40].mxu1 }
 0x34b   : > { %v7048_v44 = vpop.f32.mrb[41].mxu0  ;;  %v7112_v55 = vpop.f32.mrb[41].mxu1 }
 0x34c   : > { %v7049_v24 = vadd.f32 %v7048_v44, %v7047_v61  ;;  %v7113_v34 = vadd.f32 %v7112_v55, %v7111_v25  ;;  %v7050_v22 = vpop.f32.mrb[42].mxu0  ;;  %v7114_v18 = vpop.f32.mrb[42].mxu1 }
 0x34d   : > { %v7051_v51 = vpop.f32.mrb[43].mxu0  ;;  %v7115_v28 = vpop.f32.mrb[43].mxu1 }
 0x34e   : > { %v9762_v12 = vadd.f32 %v7049_v24, %v9666_v11  ;;  %v7052_v31 = vadd.f32 %v7051_v51, %v7050_v22  ;;  %v7116_v54 = vadd.f32 %v7115_v28, %v7114_v18  ;;  %v9765_v62 = vadd.f32 %v7113_v34, %v9669_v23 }
 0x350   : > { %v9768_v45 = vadd.f32 %v7052_v31, %v9672_v17  ;;  %v9771_v20 = vadd.f32 %v7116_v54, %v9675_v38 }
 0x352   : > { %v7053_v57 = vpop.f32.mrb[44].mxu0  ;;  %v7117_v10 = vpop.f32.mrb[44].mxu1 }
 0x353   : > { %v7054_v29 = vpop.f32.mrb[45].mxu0  ;;  %v7118_v42 = vpop.f32.mrb[45].mxu1 }
 0x354   : > { %v7055_v50 = vadd.f32 %v7054_v29, %v7053_v57  ;;  %v7119_v19 = vadd.f32 %v7118_v42, %v7117_v10  ;;  %v7056_v11 = vpop.f32.mrb[46].mxu0  ;;  %v7120_v9 = vpop.f32.mrb[46].mxu1 }
 0x355   : > { %v7057_v33 = vpop.f32.mrb[47].mxu0  ;;  %v7121_v21 = vpop.f32.mrb[47].mxu1 }
 0x356   : > { %v9774_v23 = vadd.f32 %v7055_v50, %v9678_v14  ;;  %v7058_v13 = vadd.f32 %v7057_v33, %v7056_v11  ;;  %v7122_v17 = vadd.f32 %v7121_v21, %v7120_v9  ;;  %v9777_v56 = vadd.f32 %v7119_v19, %v9681_v32 }
 0x358   : > { %v9781_v38 = vadd.f32 %v7058_v13, %v9684_v8  ;;  %v9784_v7 = vadd.f32 %v7122_v17, %v9687_v35 }
 0x35a   : > { %v7123_v49 = vpop.f32.mrb[48].mxu1  ;;  %v7213_v14 = vpop.f32.mrb[48].mxu0 }
 0x35b   : > { %v5281_v32 = vadd.f32 %v7213_v14, %v9705_v4  ;;  %v7124_v63 = vpop.f32.mrb[49].mxu1  ;;  %v5272_v30 = vpop.f32.mrb[49].mxu0 }
 0x35c   : > { %v7125_v8 = vadd.f32 %v7124_v63, %v7123_v49  ;;  %v5273_v48 = vadd.f32 %v5272_v30, %v9693_v27  ;;  %v7126_v35 = vpop.f32.mrb[50].mxu1  ;;  %v7214_v61 = vpop.f32.mrb[50].mxu0 }
 0x35d   : > { %5401 = vst [vmem:[%s9789_s5 + $0x10] sm:$0xff] %v5281_v32  ;;  %v5284_v25 = vadd.f32 %v7214_v61, %v9711_v47  ;;  %v7127_v44 = vpop.f32.mrb[51].mxu1  ;;  %v5275_v55 = vpop.f32.mrb[51].mxu0 }
 0x35e   : > { %5399 = vst [vmem:[%s9789_s5] sm:$0xff] %v5273_v48  ;;  %v7128_v24 = vadd.f32 %v7127_v44, %v7126_v35  ;;  %v5276_v34 = vadd.f32 %v5275_v55, %v9699_v1  ;;  %v9798_v4 = vadd.f32 %v7125_v8, %v9690_v5 }
 0x35f   : > { %5402 = vst [vmem:[%s9789_s5 + $0x18] sm:$0xff] %v5284_v25 }
 0x360   : > { %5400 = vst [vmem:[%s9789_s5 + $0x8] sm:$0xff] %v5276_v34  ;;  %v9803_v27 = vadd.f32 %v7128_v24, %v9696_v58 }
 0x362   : > { %v7129_v22 = vpop.f32.mrb[52].mxu1  ;;  %v7217_v18 = vpop.f32.mrb[52].mxu0 }
 0x363   : > { %v5297_v47 = vadd.f32 %v7217_v18, %v9729_v40  ;;  %v7130_v51 = vpop.f32.mrb[53].mxu1  ;;  %v5288_v28 = vpop.f32.mrb[53].mxu0 }
 0x364   : > { %v7131_v31 = vadd.f32 %v7130_v51, %v7129_v22  ;;  %v5289_v1 = vadd.f32 %v5288_v28, %v9717_v26  ;;  %v7132_v54 = vpop.f32.mrb[54].mxu1  ;;  %v7218_v5 = vpop.f32.mrb[54].mxu0 }
 0x365   : > { %5405 = vst [vmem:[%s9789_s5 + $0x30] sm:$0xff] %v5297_v47  ;;  %v5300_v57 = vadd.f32 %v7218_v5, %v9735_v0  ;;  %v7133_v10 = vpop.f32.mrb[55].mxu1  ;;  %v5291_v29 = vpop.f32.mrb[55].mxu0 }
 0x366   : > { %5403 = vst [vmem:[%s9789_s5 + $0x20] sm:$0xff] %v5289_v1  ;;  %v7134_v58 = vadd.f32 %v7133_v10, %v7132_v54  ;;  %v5292_v42 = vadd.f32 %v5291_v29, %v9723_v52  ;;  %v5184_v40 = vadd.f32 %v7131_v31, %v9702_v59 }
 0x367   : > { %5406 = vst [vmem:[%s9789_s5 + $0x38] sm:$0xff] %v5300_v57 }
 0x368   : > { %5404 = vst [vmem:[%s9789_s5 + $0x28] sm:$0xff] %v5292_v42  ;;  %v5187_v50 = vadd.f32 %v7134_v58, %v9708_v3 }
 0x36a   : > { %v7135_v26 = vpop.f32.mrb[56].mxu1  ;;  %v7221_v19 = vpop.f32.mrb[56].mxu0 }
 0x36b   : > { %v5313_v11 = vadd.f32 %v7221_v19, %v9753_v16  ;;  %v7136_v0 = vpop.f32.mrb[57].mxu1  ;;  %v5304_v9 = vpop.f32.mrb[57].mxu0 }
 0x36c   : > { %v7137_v33 = vadd.f32 %v7136_v0, %v7135_v26  ;;  %v5305_v21 = vadd.f32 %v5304_v9, %v9741_v60  ;;  %v7138_v13 = vpop.f32.mrb[58].mxu1  ;;  %v7222_v52 = vpop.f32.mrb[58].mxu0 }
 0x36d   : > { %5409 = vst [vmem:[%s9789_s5 + $0x50] sm:$0xff] %v5313_v11  ;;  %v5316_v59 = vadd.f32 %v7222_v52, %v9759_v15  ;;  %v7139_v17 = vpop.f32.mrb[59].mxu1  ;;  %v5307_v49 = vpop.f32.mrb[59].mxu0 }
 0x36e   : > { %5407 = vst [vmem:[%s9789_s5 + $0x40] sm:$0xff] %v5305_v21  ;;  %v7140_v3 = vadd.f32 %v7139_v17, %v7138_v13  ;;  %v5308_v14 = vadd.f32 %v5307_v49, %v9747_v53  ;;  %v5192_v16 = vadd.f32 %v7137_v33, %v9714_v36 }
 0x36f   : > { %5410 = vst [vmem:[%s9789_s5 + $0x58] sm:$0xff] %v5316_v59 }
 0x370   : > { %5408 = vst [vmem:[%s9789_s5 + $0x48] sm:$0xff] %v5308_v14  ;;  %v5195_v32 = vadd.f32 %v7140_v3, %v9720_v46 }
 0x372   : > { %v7141_v60 = vpop.f32.mrb[60].mxu1  ;;  %v7225_v63 = vpop.f32.mrb[60].mxu0 }
 0x373   : > { %v5329_v30 = vadd.f32 %v7225_v63, %v9777_v56  ;;  %v7142_v15 = vpop.f32.mrb[61].mxu1  ;;  %v5320_v8 = vpop.f32.mrb[61].mxu0 }
 0x374   : > { %v7143_v48 = vadd.f32 %v7142_v15, %v7141_v60  ;;  %v5321_v35 = vadd.f32 %v5320_v8, %v9765_v62  ;;  %v7144_v61 = vpop.f32.mrb[62].mxu1  ;;  %v7226_v53 = vpop.f32.mrb[62].mxu0 }
 0x375   : > { %5413 = vst [vmem:[%s9789_s5 + $0x70] sm:$0xff] %v5329_v30  ;;  %v5332_v36 = vadd.f32 %v7226_v53, %v9784_v7  ;;  %v7145_v25 = vpop.f32.mrb[63].mxu1  ;;  %v5323_v44 = vpop.f32.mrb[63].mxu0 }
 0x376   : > { %5411 = vst [vmem:[%s9789_s5 + $0x60] sm:$0xff] %v5321_v35  ;;  %v7146_v46 = vadd.f32 %v7145_v25, %v7144_v61  ;;  %v5324_v55 = vadd.f32 %v5323_v44, %v9771_v20  ;;  %v5200_v56 = vadd.f32 %v7143_v48, %v9726_v43 }
 0x377   : > { %5414 = vst [vmem:[%s9789_s5 + $0x78] sm:$0xff] %v5332_v36 }
 0x378   : > { %5412 = vst [vmem:[%s9789_s5 + $0x68] sm:$0xff] %v5324_v55  ;;  %v5203_v24 = vadd.f32 %v7146_v46, %v9732_v39 }
 0x37a   : > { %v7147_v62 = vpop.f32.mrb[64].mxu1  ;;  %v7229_v34 = vpop.f32.mrb[64].mxu0 }
 0x37b   : > { %v5345_v22 = vadd.f32 %v7229_v34, %v5184_v40  ;;  %v7148_v7 = vpop.f32.mrb[65].mxu1  ;;  %v5336_v18 = vpop.f32.mrb[65].mxu0 }
 0x37c   : > { %v7149_v47 = vadd.f32 %v7148_v7, %v7147_v62  ;;  %v5337_v51 = vadd.f32 %v5336_v18, %v9798_v4  ;;  %v7150_v28 = vpop.f32.mrb[66].mxu1  ;;  %v7230_v31 = vpop.f32.mrb[66].mxu0 }
 0x37d   : > { %5417 = vst [vmem:[%s9789_s5 + $0x90] sm:$0xff] %v5345_v22  ;;  %v5348_v20 = vadd.f32 %v7230_v31, %v5187_v50  ;;  %v7151_v43 = vpop.f32.mrb[67].mxu1  ;;  %v5339_v1 = vpop.f32.mrb[67].mxu0 }
 0x37e   : > { %5415 = vst [vmem:[%s9789_s5 + $0x80] sm:$0xff] %v5337_v51  ;;  %v7152_v54 = vadd.f32 %v7151_v43, %v7150_v28  ;;  %v5340_v39 = vadd.f32 %v5339_v1, %v9803_v27  ;;  %v5208_v5 = vadd.f32 %v7149_v47, %v9738_v6 }
 0x37f   : > { %5418 = vst [vmem:[%s9789_s5 + $0x98] sm:$0xff] %v5348_v20 }
 0x380   : > { %5416 = vst [vmem:[%s9789_s5 + $0x88] sm:$0xff] %v5340_v39  ;;  %v5211_v57 = vadd.f32 %v7152_v54, %v9744_v41 }
 0x382   : > { %v7153_v10 = vpop.f32.mrb[68].mxu1  ;;  %v7233_v4 = vpop.f32.mrb[68].mxu0 }
 0x383   : > { %v5361_v29 = vadd.f32 %v7233_v4, %v5200_v56  ;;  %v7154_v58 = vpop.f32.mrb[69].mxu1  ;;  %v5352_v42 = vpop.f32.mrb[69].mxu0 }
 0x384   : > { %v7155_v40 = vadd.f32 %v7154_v58, %v7153_v10  ;;  %v5353_v50 = vadd.f32 %v5352_v42, %v5192_v16  ;;  %v7156_v26 = vpop.f32.mrb[70].mxu1  ;;  %v7234_v19 = vpop.f32.mrb[70].mxu0 }
 0x385   : > { %5421 = vst [vmem:[%s9789_s5 + $0xb0] sm:$0xff] %v5361_v29  ;;  %v5364_v27 = vadd.f32 %v7234_v19, %v5203_v24  ;;  %v7157_v11 = vpop.f32.mrb[71].mxu1  ;;  %v5355_v6 = vpop.f32.mrb[71].mxu0 }
 0x386   : > { %5419 = vst [vmem:[%s9789_s5 + $0xa0] sm:$0xff] %v5353_v50  ;;  %v7158_v0 = vadd.f32 %v7157_v11, %v7156_v26  ;;  %v5356_v9 = vadd.f32 %v5355_v6, %v5195_v32  ;;  %v5216_v41 = vadd.f32 %v7155_v40, %v9750_v37 }
 0x387   : > { %5422 = vst [vmem:[%s9789_s5 + $0xb8] sm:$0xff] %v5364_v27 }
 0x388   : > { %5420 = vst [vmem:[%s9789_s5 + $0xa8] sm:$0xff] %v5356_v9  ;;  %v5219_v33 = vadd.f32 %v7158_v0, %v9756_v2 }
 0x38a   : > { %v7159_v21 = vpop.f32.mrb[72].mxu1  ;;  %v7237_v13 = vpop.f32.mrb[72].mxu0 }
 0x38b   : > { %v5377_v52 = vadd.f32 %v7237_v13, %v5216_v41  ;;  %v7160_v59 = vpop.f32.mrb[73].mxu1  ;;  %v5368_v17 = vpop.f32.mrb[73].mxu0 }
 0x38c   : > { %v7161_v49 = vadd.f32 %v7160_v59, %v7159_v21  ;;  %v5369_v3 = vadd.f32 %v5368_v17, %v5208_v5  ;;  %v7162_v14 = vpop.f32.mrb[74].mxu1  ;;  %v7238_v16 = vpop.f32.mrb[74].mxu0 }
 0x38d   : > { %5425 = vst [vmem:[%s9789_s5 + $0xd0] sm:$0xff] %v5377_v52  ;;  %v5380_v32 = vadd.f32 %v7238_v16, %v5219_v33  ;;  %v7163_v60 = vpop.f32.mrb[75].mxu1  ;;  %v5371_v37 = vpop.f32.mrb[75].mxu0 }
 0x38e   : > { %5423 = vst [vmem:[%s9789_s5 + $0xc0] sm:$0xff] %v5369_v3  ;;  %v7164_v63 = vadd.f32 %v7163_v60, %v7162_v14  ;;  %v5372_v30 = vadd.f32 %v5371_v37, %v5211_v57  ;;  %v5224_v2 = vadd.f32 %v7161_v49, %v9762_v12 }
 0x38f   : > { %5426 = vst [vmem:[%s9789_s5 + $0xd8] sm:$0xff] %v5380_v32 }
 0x390   : > { %5424 = vst [vmem:[%s9789_s5 + $0xc8] sm:$0xff] %v5372_v30  ;;  %v5227_v15 = vadd.f32 %v7164_v63, %v9768_v45 }
 0x392   : > { %v7165_v8 = vpop.f32.mrb[76].mxu1  ;;  %v7241_v48 = vpop.f32.mrb[76].mxu0 }
 0x393   : > { %v7166_v35 = vpop.f32.mrb[77].mxu1  ;;  %v5384_v61 = vpop.f32.mrb[77].mxu0 }
 0x394   : > { %v7167_v53 = vadd.f32 %v7166_v35, %v7165_v8  ;;  %v5385_v36 = vadd.f32 %v5384_v61, %v5224_v2  ;;  %v7168_v25 = vpop.f32.mrb[78].mxu1  ;;  %v7242_v44 = vpop.f32.mrb[78].mxu0 }
 0x395   : > { %v7169_v46 = vpop.f32.mrb[79].mxu1  ;;  %v5387_v55 = vpop.f32.mrb[79].mxu0 }
 0x396   : > { %v5232_v56 = vadd.f32 %v7167_v53, %v9774_v23  ;;  %5427 = vst [vmem:[%s9789_s5 + $0xe0] sm:$0xff] %v5385_v36  ;;  %v7170_v12 = vadd.f32 %v7169_v46, %v7168_v25  ;;  %v5388_v24 = vadd.f32 %v5387_v55, %v5227_v15 }
 0x398   : > { %v5393_v62 = vadd.f32 %v7241_v48, %v5232_v56  ;;  %v5235_v45 = vadd.f32 %v7170_v12, %v9781_v38  ;;  %5428 = vst [vmem:[%s9789_s5 + $0xe8] sm:$0xff] %v5388_v24 }
 0x39a   : > { %5429 = vst [vmem:[%s9789_s5 + $0xf0] sm:$0xff] %v5393_v62  ;;  %v5396_v34 = vadd.f32 %v7242_v44, %v5235_v45 }
 0x39c   : > { %5430 = vst [vmem:[%s9789_s5 + $0xf8] sm:$0xff] %v5396_v34 }
 0x39d PF: > { %s13_s14 = sadd.s32 1, %s7971_s14   ;;  %s9874_s12 = smov %s7967_s13 }
 0x39e   : > { %p10_p5 = scmp.ge.s32.totalorder %s13_s14, 4   ;;  %s9875_s13 = smov %s9877_s15 }
 0x3a0   :  { %12 = sbr.rel (!%p10_p5) target bundleno = 2 (0x2), region = 68 }

</bundles_post_ra>
